<compile_context>
chip_gen: v7x
topology: tpu7x:2x2x1
jax: 0.10.0
libtpu: 0.0.40
codegen_flags: <defaults>
</compile_context>

<pallas_src>
import functools

import jax
import jax.numpy as jnp
from jax.experimental import pallas as pl
from jax.experimental.pallas import tpu as pltpu

_EPS = 1e-5  # nn.BatchNorm2d default eps


def _round_up(x, m):
    return (x + m - 1) // m * m


def _vmem_limit_bytes():
    """Derive a scoped-VMEM request from the device (<= 32 MiB, v7x-safe)."""
    default = 32 * 1024 * 1024
    try:
        fn = getattr(pltpu, "get_tpu_info", None)
        if fn is None:
            return default
        cap = getattr(fn(), "vmem_capacity_bytes", None)
        if not cap:
            return default
        return int(min(cap // 2, default))
    except Exception:
        return default


_VMEM_LIMIT = _vmem_limit_bytes()


# ----------------------------------------------------------------------------
# Pallas kernel 1: tiled (x @ w + b) with bf16 MXU inputs, f32 accumulation,
# optional pre-BN activation, optional per-tile channel sum / sumsq stats.
# ----------------------------------------------------------------------------
def _matmul_kernel(x_ref, w_ref, b_ref, *rest,
                   act, compute_stats, m_valid, tm, needs_mask):
    if compute_stats:
        y_ref, stats_ref, acc_ref = rest
    else:
        y_ref, acc_ref = rest
        stats_ref = None

    k = pl.program_id(1)

    @pl.when(k == 0)
    def _():
        acc_ref[...] = jnp.zeros_like(acc_ref)

    acc_ref[...] += jnp.dot(x_ref[...], w_ref[...],
                            preferred_element_type=jnp.float32)

    @pl.when(k == pl.num_programs(1) - 1)
    def _():
        # b_ref block is (1, Np) (broadcast bias) or (tm, Np) (per-row addend,
        # used by the fusion layer to carry the per-image global contribution).
        y = acc_ref[...] + b_ref[...]
        if act == "relu":
            y = jnp.maximum(y, 0.0)
        elif act == "tanh":
            y = jnp.tanh(y)
        y_ref[...] = y
        if compute_stats:
            if needs_mask:
                rows = (jax.lax.broadcasted_iota(jnp.int32, y.shape, 0)
                        + pl.program_id(0) * tm)
                y = jnp.where(rows < m_valid, y, 0.0)
            s = jnp.sum(y, axis=0, keepdims=True)            # (1, Np)
            ss = jnp.sum(y * y, axis=0, keepdims=True)       # (1, Np)
            pad = jnp.zeros((6, y.shape[1]), jnp.float32)
            stats_ref[...] = jnp.concatenate([s, ss, pad], axis=0)  # (8, Np)


# ----------------------------------------------------------------------------
# Pallas kernel 2: per-channel affine epilogue (BatchNorm normalize) + ReLU.
# ----------------------------------------------------------------------------
def _affine_kernel(y_ref, scale_ref, shift_ref, o_ref, *, relu):
    o = y_ref[...] * scale_ref[...] + shift_ref[...]
    if relu:
        o = jnp.maximum(o, 0.0)
    o_ref[...] = o


# ----------------------------------------------------------------------------
# Kernel wrappers
# ----------------------------------------------------------------------------
def matmul_bias_act(x, w, b, *, act="none", compute_stats=False):
    """Tiled y = x @ w + b on the MXU (bf16 inputs, f32 accumulation).

    x: (M, K); w: (K, Cout); b: (1, Cout) broadcast bias or (M, Cout) addend.
    Returns (y_padded (Mp, Np) f32, stats or None, meta dict).
    """
    M, K = x.shape
    Cout = w.shape[1]

    Np = _round_up(Cout, 128)                 # lane-dense output stores
    tm = 256 if M >= 256 else _round_up(M, 8)
    Mp = _round_up(M, tm)
    m_tiles = Mp // tm
    Kp = _round_up(K, 128)
    if Kp > 1024:
        tk = 512
        Kp = _round_up(K, 512)
    else:
        tk = Kp
    k_tiles = Kp // tk

    xp = jnp.zeros((Mp, Kp), jnp.bfloat16).at[:M, :K].set(x.astype(jnp.bfloat16))
    wp = jnp.zeros((Kp, Np), jnp.bfloat16).at[:K, :Cout].set(w.astype(jnp.bfloat16))

    if b.shape[0] == 1:
        bp = jnp.zeros((1, Np), jnp.float32).at[:, :Cout].set(b.astype(jnp.float32))
        b_spec = pl.BlockSpec((1, Np), lambda m, k: (0, 0))
    else:
        bp = jnp.zeros((Mp, Np), jnp.float32).at[:M, :Cout].set(b.astype(jnp.float32))
        b_spec = pl.BlockSpec((tm, Np), lambda m, k: (m, 0))

    y_spec = pl.BlockSpec((tm, Np), lambda m, k: (m, 0))
    if compute_stats:
        out_shape = (jax.ShapeDtypeStruct((Mp, Np), jnp.float32),
                     jax.ShapeDtypeStruct((8 * m_tiles, Np), jnp.float32))
        out_specs = (y_spec, pl.BlockSpec((8, Np), lambda m, k: (m, 0)))
    else:
        out_shape = jax.ShapeDtypeStruct((Mp, Np), jnp.float32)
        out_specs = y_spec

    kernel = functools.partial(
        _matmul_kernel, act=act, compute_stats=compute_stats,
        m_valid=M, tm=tm, needs_mask=(Mp != M))

    res = pl.pallas_call(
        kernel,
        out_shape=out_shape,
        grid=(m_tiles, k_tiles),
        in_specs=[pl.BlockSpec((tm, tk), lambda m, k: (m, k)),
                  pl.BlockSpec((tk, Np), lambda m, k: (k, 0)),
                  b_spec],
        out_specs=out_specs,
        scratch_shapes=[pltpu.VMEM((tm, Np), jnp.float32)],
        compiler_params=pltpu.CompilerParams(
            dimension_semantics=("parallel", "arbitrary"),
            vmem_limit_bytes=_VMEM_LIMIT),
    )(xp, wp, bp)

    if compute_stats:
        y, stats = res
    else:
        y, stats = res, None
    meta = dict(M=M, Cout=Cout, Mp=Mp, Np=Np, tm=tm, m_tiles=m_tiles)
    return y, stats, meta


def affine_act(y, scale, shift, *, relu, tm, Mp, Np):
    m_tiles = Mp // tm
    return pl.pallas_call(
        functools.partial(_affine_kernel, relu=relu),
        out_shape=jax.ShapeDtypeStruct((Mp, Np), jnp.float32),
        grid=(m_tiles,),
        in_specs=[pl.BlockSpec((tm, Np), lambda m: (m, 0)),
                  pl.BlockSpec((1, Np), lambda m: (0, 0)),
                  pl.BlockSpec((1, Np), lambda m: (0, 0))],
        out_specs=pl.BlockSpec((tm, Np), lambda m: (m, 0)),
        compiler_params=pltpu.CompilerParams(
            dimension_semantics=("parallel",),
            vmem_limit_bytes=_VMEM_LIMIT),
    )(y, scale, shift)


# ----------------------------------------------------------------------------
# Plain-JAX glue: im2col, nearest resize, nearest upsample
# ----------------------------------------------------------------------------
def im2col(x_nhwc, ksize, stride, padding):
    N, H, W, C = x_nhwc.shape
    xp = jnp.pad(x_nhwc, ((0, 0), (padding, padding), (padding, padding), (0, 0)))
    Ho = (H + 2 * padding - ksize) // stride + 1
    Wo = (W + 2 * padding - ksize) // stride + 1
    cols = []
    for dy in range(ksize):
        for dx in range(ksize):
            cols.append(
                xp[:, dy:dy + stride * Ho:stride, dx:dx + stride * Wo:stride, :]
            )
    patches = jnp.concatenate(cols, axis=-1)  # (N, Ho, Wo, k*k*C), order (kh,kw,Cin)
    return patches.reshape(N * Ho * Wo, ksize * ksize * C), (N, Ho, Wo)


def nearest_resize(x_nhwc, out_h, out_w):
    # matches F.interpolate(mode='nearest'): src = floor(dst * in/out)
    N, H, W, C = x_nhwc.shape
    hi = jnp.floor(jnp.arange(out_h) * (H / out_h)).astype(jnp.int32)
    wi = jnp.floor(jnp.arange(out_w) * (W / out_w)).astype(jnp.int32)
    return x_nhwc[:, hi][:, :, wi]


def upsample2(x_nhwc):
    # nn.Upsample(scale_factor=2), default mode='nearest'
    # TODO(synk): fold the x2 nearest upsample into the next conv's index_map.
    return jnp.repeat(jnp.repeat(x_nhwc, 2, axis=1), 2, axis=2)


# ----------------------------------------------------------------------------
# Layer wrappers
# ----------------------------------------------------------------------------
def conv_block(x_nhwc, params, ksize, stride, padding, mode, bias_rows=None):
    """Conv2d + (BatchNorm/ReLU/Tanh) variants via the two-pass Pallas kernels."""
    w, b, gamma, beta = params
    Cout = w.shape[1]
    patches, (N, Ho, Wo) = im2col(x_nhwc.astype(jnp.bfloat16), ksize, stride, padding)
    M = N * Ho * Wo
    bias = b if bias_rows is None else bias_rows

    if mode == "conv_tanh":                    # last decoder conv + Tanh (one pass)
        y, _, meta = matmul_bias_act(patches, w, bias, act="tanh",
                                     compute_stats=False)
    else:
        # conv_bn_relu: Conv -> BN -> ReLU ; conv_relu_bn: Conv -> ReLU -> BN
        pre_act = "relu" if mode == "conv_relu_bn" else "none"
        y, stats, meta = matmul_bias_act(patches, w, bias, act=pre_act,
                                         compute_stats=True)
        Np, tm, Mp = meta["Np"], meta["tm"], meta["Mp"]
        # training-mode BatchNorm2d statistics over the full N*H*W extent
        tot = stats.reshape(meta["m_tiles"], 8, Np).sum(axis=0)   # (8, Np)
        mean = tot[0] / M
        var = jnp.maximum(tot[1] / M - mean * mean, 0.0)          # biased variance
        g = jnp.zeros((Np,), jnp.float32).at[:Cout].set(gamma[0])
        bt = jnp.zeros((Np,), jnp.float32).at[:Cout].set(beta[0])
        scale = g * jax.lax.rsqrt(var + _EPS)
        shift = bt - mean * scale
        y = affine_act(y, scale.reshape(1, Np), shift.reshape(1, Np),
                       relu=(mode == "conv_bn_relu"), tm=tm, Mp=Mp, Np=Np)

    return y[:M, :Cout].reshape(N, Ho, Wo, Cout)


def feature_extractor_stub(img299_nhwc, params):
    # TODO(synk): stands in for inceptionresnetv2(num_classes=1001); keeps the
    # (N, 1001) global-feature interface but not the reference backbone numerics.
    w, b = params
    pooled = jnp.mean(img299_nhwc, axis=(1, 2))            # (N, 3)
    y, _, _ = matmul_bias_act(pooled, w, b, act="none", compute_stats=False)
    return y[:pooled.shape[0], :w.shape[1]]                # (N, 1001)


def fusion_forward(encoded_nhwc, global_feat, params):
    """FusionLayerNorm: Conv1x1(concat[local, global]) -> ReLU -> BatchNorm.

    The global half of the 1x1 conv is identical for every pixel, so it is
    computed once per image and folded into a per-pixel bias for the local
    256->256 matmul (no (N,H,W,1001) broadcast, no 1257-channel concat).
    """
    w, b, gamma, beta = params                  # w: (256 + 1001, 256)
    N, H, W, Cl = encoded_nhwc.shape
    Cout = w.shape[1]
    w_local, w_global = w[:Cl], w[Cl:]

    zero_b = jnp.zeros((1, Cout), jnp.float32)
    g_part, _, _ = matmul_bias_act(global_feat, w_global, zero_b,
                                   act="none", compute_stats=False)
    g_part = g_part[:N, :Cout]                              # (N, Cout)

    bias_rows = g_part + b.astype(jnp.float32)              # (N, Cout)
    bias_rows = jnp.broadcast_to(
        bias_rows[:, None, :], (N, H * W, Cout)).reshape(N * H * W, Cout)

    return conv_block(encoded_nhwc, (w_local, b, gamma, beta), 1, 1, 0,
                      "conv_relu_bn", bias_rows=bias_rows)


# ----------------------------------------------------------------------------
# Parameter init (deterministic, synthetic)
# ----------------------------------------------------------------------------
def init_conv(key, cin, cout, k):
    kw, kb = jax.random.split(key)
    fan_in = cin * k * k
    # PyTorch layout (Cout, Cin, kh, kw) -> matmul layout (kh*kw*Cin, Cout)
    w = jax.random.normal(kw, (cout, cin, k, k), jnp.float32) / jnp.sqrt(fan_in)
    w_mat = jnp.transpose(w, (2, 3, 1, 0)).reshape(k * k * cin, cout)
    b = jax.random.normal(kb, (1, cout), jnp.float32) * 0.01
    gamma = jnp.ones((1, cout), jnp.float32)   # BN default weight init
    beta = jnp.zeros((1, cout), jnp.float32)   # BN default bias init
    return (w_mat, b, gamma, beta)


ENC_CFG = [(1, 64, 2), (64, 128, 1), (128, 128, 2), (128, 256, 1),
           (256, 256, 2), (256, 512, 1), (512, 512, 1), (512, 256, 1)]
DEC_CFG = [(256, 128), (128, 64), (64, 64), (64, 32), (32, 2)]


def init_params(key, depth_before_fusion=1257, depth_after_fusion=256):
    keys = iter(jax.random.split(key, 32))
    params = {}
    params["enc"] = [init_conv(next(keys), cin, cout, 3) for cin, cout, _ in ENC_CFG]
    params["fusion"] = init_conv(next(keys), depth_before_fusion, depth_after_fusion, 1)
    params["dec"] = [init_conv(next(keys), cin, cout, 3) for cin, cout in DEC_CFG]
    kfe = next(keys)
    params["fe"] = (
        jax.random.normal(kfe, (3, 1001), jnp.float32) * 0.1,
        jnp.zeros((1, 1001), jnp.float32),
    )
    return params


# ----------------------------------------------------------------------------
# Full forward (use_224=False, to_rgb=False defaults)
# ----------------------------------------------------------------------------
def deep_koalarization_norm_forward(image_nchw, params):
    x = jnp.transpose(image_nchw, (0, 2, 3, 1)).astype(jnp.float32)  # NHWC, C=1

    # img_299 = interpolate(image, (299,299)).expand(-1, 3, -1, -1)
    img_299 = nearest_resize(x, 299, 299)
    img_299 = jnp.broadcast_to(img_299, img_299.shape[:3] + (3,))
    global_feat = feature_extractor_stub(img_299, params["fe"])      # (N, 1001)

    # encoder (img_224 == image since use_224=False)
    h = x
    for p, (_, _, stride) in zip(params["enc"], ENC_CFG):
        h = conv_block(h, p, 3, stride, 1, "conv_bn_relu")

    # fusion (Conv1x1 -> ReLU -> BatchNorm)
    fused = fusion_forward(h, global_feat, params["fusion"])

    # decoder
    d = conv_block(fused, params["dec"][0], 3, 1, 1, "conv_bn_relu")
    d = upsample2(d)
    d = conv_block(d, params["dec"][1], 3, 1, 1, "conv_bn_relu")
    d = conv_block(d, params["dec"][2], 3, 1, 1, "conv_bn_relu")
    d = upsample2(d)
    d = conv_block(d, params["dec"][3], 3, 1, 1, "conv_bn_relu")
    d = conv_block(d, params["dec"][4], 3, 1, 1, "conv_tanh")
    d = upsample2(d)

    return jnp.transpose(d, (0, 3, 1, 2))  # back to NCHW, (N, 2, H, W)


if __name__ == "__main__":
    key = jax.random.PRNGKey(0)
    k_img, k_par = jax.random.split(key)

    # small shapes: batch=2, 1-channel "L" image, 16x16 spatial
    image = jax.random.normal(k_img, (2, 1, 16, 16), jnp.float32)
    params = init_params(k_par)

    forward = jax.jit(deep_koalarization_norm_forward)
    out = jax.block_until_ready(forward(image, params))

    assert out.shape == (2, 2, 16, 16), out.shape
    assert bool(jnp.all(jnp.isfinite(out)))
    print("KERNEL_OK")
</pallas_src>

<mosaic_0001>
module attributes {stable_mosaic.version = 11 : i64} {
  func.func @_matmul_kernel(%arg0: i32, %arg1: i32, %arg2: memref<128x128xbf16, #tpu.memory_space<vmem>>, %arg3: memref<128x128xbf16, #tpu.memory_space<vmem>>, %arg4: memref<1x128xf32, #tpu.memory_space<vmem>>, %arg5: memref<128x128xf32, #tpu.memory_space<vmem>>, %arg6: memref<8x128xf32, #tpu.memory_space<vmem>>, %arg7: memref<128x128xf32, #tpu.memory_space<vmem>>) attributes {dimension_semantics = [#tpu.dimension_semantics<parallel>, #tpu.dimension_semantics<arbitrary>], iteration_bounds = array<i64: 1, 1>, scalar_prefetch = 0 : i64, scratch_operands = 1 : i64, tpu.core_type = #tpu.core_type<tc>, window_params = [{transform_indices = @transform_0, window_bounds = array<i64: 128, 128>}, {transform_indices = @transform_1, window_bounds = array<i64: 128, 128>}, {pipeline_mode = #tpu.pipeline_mode<synchronous>, transform_indices = @transform_2, window_bounds = array<i64: 1, 128>}, {transform_indices = @transform_3, window_bounds = array<i64: 128, 128>}, {transform_indices = @transform_4, window_bounds = array<i64: 8, 128>}]} {
    %c0_i32 = arith.constant 0 : i32
    %0 = arith.cmpi eq, %arg1, %c0_i32 : i32
    %1 = arith.extui %0 : i1 to i32
    %c0_i32_0 = arith.constant 0 : i32
    %2 = arith.cmpi ne, %1, %c0_i32_0 : i32
    scf.if %2 {
      %cst_10 = arith.constant 0.000000e+00 : f32
      %12 = vector.broadcast %cst_10 : f32 to vector<128x128xf32>
      %c0_11 = arith.constant 0 : index
      %c0_12 = arith.constant 0 : index
      %13 = vector.load %arg7[%c0_11, %c0_12] : memref<128x128xf32, #tpu.memory_space<vmem>>, vector<128x128xf32>
      tpu.vector_store %arg7[%c0_11, %c0_12], %12 {strides = array<i32>} : memref<128x128xf32, #tpu.memory_space<vmem>>, vector<128x128xf32>,
    } else {
    }
    %c0 = arith.constant 0 : index
    %c0_1 = arith.constant 0 : index
    %3 = vector.load %arg7[%c0, %c0_1] : memref<128x128xf32, #tpu.memory_space<vmem>>, vector<128x128xf32>
    %c0_2 = arith.constant 0 : index
    %c0_3 = arith.constant 0 : index
    %4 = vector.load %arg2[%c0_2, %c0_3] : memref<128x128xbf16, #tpu.memory_space<vmem>>, vector<128x128xbf16>
    %c0_4 = arith.constant 0 : index
    %c0_5 = arith.constant 0 : index
    %5 = vector.load %arg3[%c0_4, %c0_5] : memref<128x128xbf16, #tpu.memory_space<vmem>>, vector<128x128xbf16>
    %cst = arith.constant dense<0.000000e+00> : vector<128x128xf32>
    %6 = tpu.matmul %4, %5, %cst {dimension_numbers = #tpu.dot_dimension_numbers<[1], [0], [0], [1], [0, 0, 1, 1], [], []>} : vector<128x128xbf16>, vector<128x128xbf16>, vector<128x128xf32> -> vector<128x128xf32>
    %7 = arith.addf %3, %6 : vector<128x128xf32>
    %c0_6 = arith.constant 0 : index
    %c0_7 = arith.constant 0 : index
    %8 = vector.load %arg7[%c0_6, %c0_7] : memref<128x128xf32, #tpu.memory_space<vmem>>, vector<128x128xf32>
    tpu.vector_store %arg7[%c0_6, %c0_7], %7 {strides = array<i32>} : memref<128x128xf32, #tpu.memory_space<vmem>>, vector<128x128xf32>,
    %c0_i32_8 = arith.constant 0 : i32
    %9 = arith.cmpi eq, %arg1, %c0_i32_8 : i32
    %10 = arith.extui %9 : i1 to i32
    %c0_i32_9 = arith.constant 0 : i32
    %11 = arith.cmpi ne, %10, %c0_i32_9 : i32
    scf.if %11 {
      %c0_10 = arith.constant 0 : index
      %c0_11 = arith.constant 0 : index
      %12 = vector.load %arg7[%c0_10, %c0_11] : memref<128x128xf32, #tpu.memory_space<vmem>>, vector<128x128xf32>
      %c0_12 = arith.constant 0 : index
      %c0_13 = arith.constant 0 : index
      %13 = vector.load %arg4[%c0_12, %c0_13] : memref<1x128xf32, #tpu.memory_space<vmem>>, vector<1x128xf32>
      %14 = vector.broadcast %13 : vector<1x128xf32> to vector<128x128xf32>
      %15 = arith.addf %12, %14 : vector<128x128xf32>
      %c0_14 = arith.constant 0 : index
      %c0_15 = arith.constant 0 : index
      %16 = vector.load %arg5[%c0_14, %c0_15] : memref<128x128xf32, #tpu.memory_space<vmem>>, vector<128x128xf32>
      tpu.vector_store %arg5[%c0_14, %c0_15], %15 {strides = array<i32>} : memref<128x128xf32, #tpu.memory_space<vmem>>, vector<128x128xf32>,
      %cst_16 = arith.constant dense<0.000000e+00> : vector<128xf32>
      %17 = vector.multi_reduction <add>, %15, %cst_16 [0] : vector<128x128xf32> to vector<128xf32>
      %18 = vector.shape_cast %17 : vector<128xf32> to vector<1x128xf32>
      %19 = arith.mulf %15, %15 : vector<128x128xf32>
      %cst_17 = arith.constant dense<0.000000e+00> : vector<128xf32>
      %20 = vector.multi_reduction <add>, %19, %cst_17 [0] : vector<128x128xf32> to vector<128xf32>
      %21 = vector.shape_cast %20 : vector<128xf32> to vector<1x128xf32>
      %cst_18 = arith.constant 0.000000e+00 : f32
      %22 = vector.broadcast %cst_18 : f32 to vector<6x128xf32>
      %23 = tpu.concatenate %18, %21, %22 in 0 : vector<1x128xf32>, vector<1x128xf32>, vector<6x128xf32> -> vector<8x128xf32>
      %c0_19 = arith.constant 0 : index
      %c0_20 = arith.constant 0 : index
      %24 = vector.load %arg6[%c0_19, %c0_20] : memref<8x128xf32, #tpu.memory_space<vmem>>, vector<8x128xf32>
      tpu.vector_store %arg6[%c0_19, %c0_20], %23 {strides = array<i32>} : memref<8x128xf32, #tpu.memory_space<vmem>>, vector<8x128xf32>,
    } else {
    }
    return
  }
  func.func @transform_0(%arg0: i32, %arg1: i32) -> (i32, i32) {
    %c0_i32 = arith.constant 0 : i32
    return %arg0, %arg1 : i32, i32
  }
  func.func @transform_1(%arg0: i32, %arg1: i32) -> (i32, i32) {
    %c0_i32 = arith.constant 0 : i32
    %c0_i32_0 = arith.constant 0 : i32
    return %arg1, %c0_i32 : i32, i32
  }
  func.func @transform_2(%arg0: i32, %arg1: i32) -> (i32, i32) {
    %c0_i32 = arith.constant 0 : i32
    %c0_i32_0 = arith.constant 0 : i32
    %c0_i32_1 = arith.constant 0 : i32
    return %c0_i32, %c0_i32_0 : i32, i32
  }
  func.func @transform_3(%arg0: i32, %arg1: i32) -> (i32, i32) {
    %c0_i32 = arith.constant 0 : i32
    %c0_i32_0 = arith.constant 0 : i32
    return %arg0, %c0_i32 : i32, i32
  }
  func.func @transform_4(%arg0: i32, %arg1: i32) -> (i32, i32) {
    %c0_i32 = arith.constant 0 : i32
    %c0_i32_0 = arith.constant 0 : i32
    return %arg0, %c0_i32 : i32, i32
  }
}

module attributes {stable_mosaic.version = 11 : i64} {
  func.func @_affine_kernel(%arg0: i32, %arg1: memref<128x128xf32, #tpu.memory_space<vmem>>, %arg2: memref<1x128xf32, #tpu.memory_space<vmem>>, %arg3: memref<1x128xf32, #tpu.memory_space<vmem>>, %arg4: memref<128x128xf32, #tpu.memory_space<vmem>>) attributes {dimension_semantics = [#tpu.dimension_semantics<parallel>], iteration_bounds = array<i64: 1>, scalar_prefetch = 0 : i64, scratch_operands = 0 : i64, tpu.core_type = #tpu.core_type<tc>, window_params = [{transform_indices = @transform_0, window_bounds = array<i64: 128, 128>}, {pipeline_mode = #tpu.pipeline_mode<synchronous>, transform_indices = @transform_1, window_bounds = array<i64: 1, 128>}, {pipeline_mode = #tpu.pipeline_mode<synchronous>, transform_indices = @transform_2, window_bounds = array<i64: 1, 128>}, {transform_indices = @transform_3, window_bounds = array<i64: 128, 128>}]} {
    %c0 = arith.constant 0 : index
    %c0_0 = arith.constant 0 : index
    %0 = vector.load %arg1[%c0, %c0_0] : memref<128x128xf32, #tpu.memory_space<vmem>>, vector<128x128xf32>
    %c0_1 = arith.constant 0 : index
    %c0_2 = arith.constant 0 : index
    %1 = vector.load %arg2[%c0_1, %c0_2] : memref<1x128xf32, #tpu.memory_space<vmem>>, vector<1x128xf32>
    %2 = vector.broadcast %1 : vector<1x128xf32> to vector<128x128xf32>
    %3 = arith.mulf %0, %2 : vector<128x128xf32>
    %c0_3 = arith.constant 0 : index
    %c0_4 = arith.constant 0 : index
    %4 = vector.load %arg3[%c0_3, %c0_4] : memref<1x128xf32, #tpu.memory_space<vmem>>, vector<1x128xf32>
    %5 = vector.broadcast %4 : vector<1x128xf32> to vector<128x128xf32>
    %6 = arith.addf %3, %5 : vector<128x128xf32>
    %cst = arith.constant 0.000000e+00 : f32
    %7 = vector.broadcast %cst : f32 to vector<128x128xf32>
    %8 = arith.maximumf %6, %7 : vector<128x128xf32>
    %c0_5 = arith.constant 0 : index
    %c0_6 = arith.constant 0 : index
    %9 = vector.load %arg4[%c0_5, %c0_6] : memref<128x128xf32, #tpu.memory_space<vmem>>, vector<128x128xf32>
    tpu.vector_store %arg4[%c0_5, %c0_6], %8 {strides = array<i32>} : memref<128x128xf32, #tpu.memory_space<vmem>>, vector<128x128xf32>,
    return
  }
  func.func @transform_0(%arg0: i32) -> (i32, i32) {
    %c0_i32 = arith.constant 0 : i32
    %c0_i32_0 = arith.constant 0 : i32
    return %arg0, %c0_i32 : i32, i32
  }
  func.func @transform_1(%arg0: i32) -> (i32, i32) {
    %c0_i32 = arith.constant 0 : i32
    %c0_i32_0 = arith.constant 0 : i32
    %c0_i32_1 = arith.constant 0 : i32
    return %c0_i32, %c0_i32_0 : i32, i32
  }
  func.func @transform_2(%arg0: i32) -> (i32, i32) {
    %c0_i32 = arith.constant 0 : i32
    %c0_i32_0 = arith.constant 0 : i32
    %c0_i32_1 = arith.constant 0 : i32
    return %c0_i32, %c0_i32_0 : i32, i32
  }
  func.func @transform_3(%arg0: i32) -> (i32, i32) {
    %c0_i32 = arith.constant 0 : i32
    %c0_i32_0 = arith.constant 0 : i32
    return %arg0, %c0_i32 : i32, i32
  }
}

module attributes {stable_mosaic.version = 11 : i64} {
  func.func @_matmul_kernel(%arg0: i32, %arg1: i32, %arg2: memref<128x640xbf16, #tpu.memory_space<vmem>>, %arg3: memref<640x128xbf16, #tpu.memory_space<vmem>>, %arg4: memref<1x128xf32, #tpu.memory_space<vmem>>, %arg5: memref<128x128xf32, #tpu.memory_space<vmem>>, %arg6: memref<8x128xf32, #tpu.memory_space<vmem>>, %arg7: memref<128x128xf32, #tpu.memory_space<vmem>>) attributes {dimension_semantics = [#tpu.dimension_semantics<parallel>, #tpu.dimension_semantics<arbitrary>], iteration_bounds = array<i64: 1, 1>, scalar_prefetch = 0 : i64, scratch_operands = 1 : i64, tpu.core_type = #tpu.core_type<tc>, window_params = [{transform_indices = @transform_0, window_bounds = array<i64: 128, 640>}, {transform_indices = @transform_1, window_bounds = array<i64: 640, 128>}, {pipeline_mode = #tpu.pipeline_mode<synchronous>, transform_indices = @transform_2, window_bounds = array<i64: 1, 128>}, {transform_indices = @transform_3, window_bounds = array<i64: 128, 128>}, {transform_indices = @transform_4, window_bounds = array<i64: 8, 128>}]} {
    %c0_i32 = arith.constant 0 : i32
    %0 = arith.cmpi eq, %arg1, %c0_i32 : i32
    %1 = arith.extui %0 : i1 to i32
    %c0_i32_0 = arith.constant 0 : i32
    %2 = arith.cmpi ne, %1, %c0_i32_0 : i32
    scf.if %2 {
      %cst_10 = arith.constant 0.000000e+00 : f32
      %12 = vector.broadcast %cst_10 : f32 to vector<128x128xf32>
      %c0_11 = arith.constant 0 : index
      %c0_12 = arith.constant 0 : index
      %13 = vector.load %arg7[%c0_11, %c0_12] : memref<128x128xf32, #tpu.memory_space<vmem>>, vector<128x128xf32>
      tpu.vector_store %arg7[%c0_11, %c0_12], %12 {strides = array<i32>} : memref<128x128xf32, #tpu.memory_space<vmem>>, vector<128x128xf32>,
    } else {
    }
    %c0 = arith.constant 0 : index
    %c0_1 = arith.constant 0 : index
    %3 = vector.load %arg7[%c0, %c0_1] : memref<128x128xf32, #tpu.memory_space<vmem>>, vector<128x128xf32>
    %c0_2 = arith.constant 0 : index
    %c0_3 = arith.constant 0 : index
    %4 = vector.load %arg2[%c0_2, %c0_3] : memref<128x640xbf16, #tpu.memory_space<vmem>>, vector<128x640xbf16>
    %c0_4 = arith.constant 0 : index
    %c0_5 = arith.constant 0 : index
    %5 = vector.load %arg3[%c0_4, %c0_5] : memref<640x128xbf16, #tpu.memory_space<vmem>>, vector<640x128xbf16>
    %cst = arith.constant dense<0.000000e+00> : vector<128x128xf32>
    %6 = tpu.matmul %4, %5, %cst {dimension_numbers = #tpu.dot_dimension_numbers<[1], [0], [0], [1], [0, 0, 1, 1], [], []>} : vector<128x640xbf16>, vector<640x128xbf16>, vector<128x128xf32> -> vector<128x128xf32>
    %7 = arith.addf %3, %6 : vector<128x128xf32>
    %c0_6 = arith.constant 0 : index
    %c0_7 = arith.constant 0 : index
    %8 = vector.load %arg7[%c0_6, %c0_7] : memref<128x128xf32, #tpu.memory_space<vmem>>, vector<128x128xf32>
    tpu.vector_store %arg7[%c0_6, %c0_7], %7 {strides = array<i32>} : memref<128x128xf32, #tpu.memory_space<vmem>>, vector<128x128xf32>,
    %c0_i32_8 = arith.constant 0 : i32
    %9 = arith.cmpi eq, %arg1, %c0_i32_8 : i32
    %10 = arith.extui %9 : i1 to i32
    %c0_i32_9 = arith.constant 0 : i32
    %11 = arith.cmpi ne, %10, %c0_i32_9 : i32
    scf.if %11 {
      %c0_10 = arith.constant 0 : index
      %c0_11 = arith.constant 0 : index
      %12 = vector.load %arg7[%c0_10, %c0_11] : memref<128x128xf32, #tpu.memory_space<vmem>>, vector<128x128xf32>
      %c0_12 = arith.constant 0 : index
      %c0_13 = arith.constant 0 : index
      %13 = vector.load %arg4[%c0_12, %c0_13] : memref<1x128xf32, #tpu.memory_space<vmem>>, vector<1x128xf32>
      %14 = vector.broadcast %13 : vector<1x128xf32> to vector<128x128xf32>
      %15 = arith.addf %12, %14 : vector<128x128xf32>
      %c0_14 = arith.constant 0 : index
      %c0_15 = arith.constant 0 : index
      %16 = vector.load %arg5[%c0_14, %c0_15] : memref<128x128xf32, #tpu.memory_space<vmem>>, vector<128x128xf32>
      tpu.vector_store %arg5[%c0_14, %c0_15], %15 {strides = array<i32>} : memref<128x128xf32, #tpu.memory_space<vmem>>, vector<128x128xf32>,
      %cst_16 = arith.constant dense<0.000000e+00> : vector<128xf32>
      %17 = vector.multi_reduction <add>, %15, %cst_16 [0] : vector<128x128xf32> to vector<128xf32>
      %18 = vector.shape_cast %17 : vector<128xf32> to vector<1x128xf32>
      %19 = arith.mulf %15, %15 : vector<128x128xf32>
      %cst_17 = arith.constant dense<0.000000e+00> : vector<128xf32>
      %20 = vector.multi_reduction <add>, %19, %cst_17 [0] : vector<128x128xf32> to vector<128xf32>
      %21 = vector.shape_cast %20 : vector<128xf32> to vector<1x128xf32>
      %cst_18 = arith.constant 0.000000e+00 : f32
      %22 = vector.broadcast %cst_18 : f32 to vector<6x128xf32>
      %23 = tpu.concatenate %18, %21, %22 in 0 : vector<1x128xf32>, vector<1x128xf32>, vector<6x128xf32> -> vector<8x128xf32>
      %c0_19 = arith.constant 0 : index
      %c0_20 = arith.constant 0 : index
      %24 = vector.load %arg6[%c0_19, %c0_20] : memref<8x128xf32, #tpu.memory_space<vmem>>, vector<8x128xf32>
      tpu.vector_store %arg6[%c0_19, %c0_20], %23 {strides = array<i32>} : memref<8x128xf32, #tpu.memory_space<vmem>>, vector<8x128xf32>,
    } else {
    }
    return
  }
  func.func @transform_0(%arg0: i32, %arg1: i32) -> (i32, i32) {
    %c0_i32 = arith.constant 0 : i32
    return %arg0, %arg1 : i32, i32
  }
  func.func @transform_1(%arg0: i32, %arg1: i32) -> (i32, i32) {
    %c0_i32 = arith.constant 0 : i32
    %c0_i32_0 = arith.constant 0 : i32
    return %arg1, %c0_i32 : i32, i32
  }
  func.func @transform_2(%arg0: i32, %arg1: i32) -> (i32, i32) {
    %c0_i32 = arith.constant 0 : i32
    %c0_i32_0 = arith.constant 0 : i32
    %c0_i32_1 = arith.constant 0 : i32
    return %c0_i32, %c0_i32_0 : i32, i32
  }
  func.func @transform_3(%arg0: i32, %arg1: i32) -> (i32, i32) {
    %c0_i32 = arith.constant 0 : i32
    %c0_i32_0 = arith.constant 0 : i32
    return %arg0, %c0_i32 : i32, i32
  }
  func.func @transform_4(%arg0: i32, %arg1: i32) -> (i32, i32) {
    %c0_i32 = arith.constant 0 : i32
    %c0_i32_0 = arith.constant 0 : i32
    return %arg0, %c0_i32 : i32, i32
  }
}

module attributes {stable_mosaic.version = 11 : i64} {
  func.func @_matmul_kernel(%arg0: i32, %arg1: i32, %arg2: memref<32x512xbf16, #tpu.memory_space<vmem>>, %arg3: memref<512x128xbf16, #tpu.memory_space<vmem>>, %arg4: memref<1x128xf32, #tpu.memory_space<vmem>>, %arg5: memref<32x128xf32, #tpu.memory_space<vmem>>, %arg6: memref<8x128xf32, #tpu.memory_space<vmem>>, %arg7: memref<32x128xf32, #tpu.memory_space<vmem>>) attributes {dimension_semantics = [#tpu.dimension_semantics<parallel>, #tpu.dimension_semantics<arbitrary>], iteration_bounds = array<i64: 1, 3>, scalar_prefetch = 0 : i64, scratch_operands = 1 : i64, tpu.core_type = #tpu.core_type<tc>, window_params = [{transform_indices = @transform_0, window_bounds = array<i64: 32, 512>}, {transform_indices = @transform_1, window_bounds = array<i64: 512, 128>}, {pipeline_mode = #tpu.pipeline_mode<synchronous>, transform_indices = @transform_2, window_bounds = array<i64: 1, 128>}, {transform_indices = @transform_3, window_bounds = array<i64: 32, 128>}, {transform_indices = @transform_4, window_bounds = array<i64: 8, 128>}]} {
    %c0_i32 = arith.constant 0 : i32
    %0 = arith.cmpi eq, %arg1, %c0_i32 : i32
    %1 = arith.extui %0 : i1 to i32
    %c0_i32_0 = arith.constant 0 : i32
    %2 = arith.cmpi ne, %1, %c0_i32_0 : i32
    scf.if %2 {
      %cst_9 = arith.constant 0.000000e+00 : f32
      %12 = vector.broadcast %cst_9 : f32 to vector<32x128xf32>
      %c0_10 = arith.constant 0 : index
      %c0_11 = arith.constant 0 : index
      %13 = vector.load %arg7[%c0_10, %c0_11] : memref<32x128xf32, #tpu.memory_space<vmem>>, vector<32x128xf32>
      tpu.vector_store %arg7[%c0_10, %c0_11], %12 {strides = array<i32>} : memref<32x128xf32, #tpu.memory_space<vmem>>, vector<32x128xf32>,
    } else {
    }
    %c0 = arith.constant 0 : index
    %c0_1 = arith.constant 0 : index
    %3 = vector.load %arg7[%c0, %c0_1] : memref<32x128xf32, #tpu.memory_space<vmem>>, vector<32x128xf32>
    %c0_2 = arith.constant 0 : index
    %c0_3 = arith.constant 0 : index
    %4 = vector.load %arg2[%c0_2, %c0_3] : memref<32x512xbf16, #tpu.memory_space<vmem>>, vector<32x512xbf16>
    %c0_4 = arith.constant 0 : index
    %c0_5 = arith.constant 0 : index
    %5 = vector.load %arg3[%c0_4, %c0_5] : memref<512x128xbf16, #tpu.memory_space<vmem>>, vector<512x128xbf16>
    %cst = arith.constant dense<0.000000e+00> : vector<32x128xf32>
    %6 = tpu.matmul %4, %5, %cst {dimension_numbers = #tpu.dot_dimension_numbers<[1], [0], [0], [1], [0, 0, 1, 1], [], []>} : vector<32x512xbf16>, vector<512x128xbf16>, vector<32x128xf32> -> vector<32x128xf32>
    %7 = arith.addf %3, %6 : vector<32x128xf32>
    %c0_6 = arith.constant 0 : index
    %c0_7 = arith.constant 0 : index
    %8 = vector.load %arg7[%c0_6, %c0_7] : memref<32x128xf32, #tpu.memory_space<vmem>>, vector<32x128xf32>
    tpu.vector_store %arg7[%c0_6, %c0_7], %7 {strides = array<i32>} : memref<32x128xf32, #tpu.memory_space<vmem>>, vector<32x128xf32>,
    %c2_i32 = arith.constant 2 : i32
    %9 = arith.cmpi eq, %arg1, %c2_i32 : i32
    %10 = arith.extui %9 : i1 to i32
    %c0_i32_8 = arith.constant 0 : i32
    %11 = arith.cmpi ne, %10, %c0_i32_8 : i32
    scf.if %11 {
      %c0_9 = arith.constant 0 : index
      %c0_10 = arith.constant 0 : index
      %12 = vector.load %arg7[%c0_9, %c0_10] : memref<32x128xf32, #tpu.memory_space<vmem>>, vector<32x128xf32>
      %c0_11 = arith.constant 0 : index
      %c0_12 = arith.constant 0 : index
      %13 = vector.load %arg4[%c0_11, %c0_12] : memref<1x128xf32, #tpu.memory_space<vmem>>, vector<1x128xf32>
      %14 = vector.broadcast %13 : vector<1x128xf32> to vector<32x128xf32>
      %15 = arith.addf %12, %14 : vector<32x128xf32>
      %c0_13 = arith.constant 0 : index
      %c0_14 = arith.constant 0 : index
      %16 = vector.load %arg5[%c0_13, %c0_14] : memref<32x128xf32, #tpu.memory_space<vmem>>, vector<32x128xf32>
      tpu.vector_store %arg5[%c0_13, %c0_14], %15 {strides = array<i32>} : memref<32x128xf32, #tpu.memory_space<vmem>>, vector<32x128xf32>,
      %cst_15 = arith.constant dense<0.000000e+00> : vector<128xf32>
      %17 = vector.multi_reduction <add>, %15, %cst_15 [0] : vector<32x128xf32> to vector<128xf32>
      %18 = vector.shape_cast %17 : vector<128xf32> to vector<1x128xf32>
      %19 = arith.mulf %15, %15 : vector<32x128xf32>
      %cst_16 = arith.constant dense<0.000000e+00> : vector<128xf32>
      %20 = vector.multi_reduction <add>, %19, %cst_16 [0] : vector<32x128xf32> to vector<128xf32>
      %21 = vector.shape_cast %20 : vector<128xf32> to vector<1x128xf32>
      %cst_17 = arith.constant 0.000000e+00 : f32
      %22 = vector.broadcast %cst_17 : f32 to vector<6x128xf32>
      %23 = tpu.concatenate %18, %21, %22 in 0 : vector<1x128xf32>, vector<1x128xf32>, vector<6x128xf32> -> vector<8x128xf32>
      %c0_18 = arith.constant 0 : index
      %c0_19 = arith.constant 0 : index
      %24 = vector.load %arg6[%c0_18, %c0_19] : memref<8x128xf32, #tpu.memory_space<vmem>>, vector<8x128xf32>
      tpu.vector_store %arg6[%c0_18, %c0_19], %23 {strides = array<i32>} : memref<8x128xf32, #tpu.memory_space<vmem>>, vector<8x128xf32>,
    } else {
    }
    return
  }
  func.func @transform_0(%arg0: i32, %arg1: i32) -> (i32, i32) {
    %c0_i32 = arith.constant 0 : i32
    return %arg0, %arg1 : i32, i32
  }
  func.func @transform_1(%arg0: i32, %arg1: i32) -> (i32, i32) {
    %c0_i32 = arith.constant 0 : i32
    %c0_i32_0 = arith.constant 0 : i32
    return %arg1, %c0_i32 : i32, i32
  }
  func.func @transform_2(%arg0: i32, %arg1: i32) -> (i32, i32) {
    %c0_i32 = arith.constant 0 : i32
    %c0_i32_0 = arith.constant 0 : i32
    %c0_i32_1 = arith.constant 0 : i32
    return %c0_i32, %c0_i32_0 : i32, i32
  }
  func.func @transform_3(%arg0: i32, %arg1: i32) -> (i32, i32) {
    %c0_i32 = arith.constant 0 : i32
    %c0_i32_0 = arith.constant 0 : i32
    return %arg0, %c0_i32 : i32, i32
  }
  func.func @transform_4(%arg0: i32, %arg1: i32) -> (i32, i32) {
    %c0_i32 = arith.constant 0 : i32
    %c0_i32_0 = arith.constant 0 : i32
    return %arg0, %c0_i32 : i32, i32
  }
}

module attributes {stable_mosaic.version = 11 : i64} {
  func.func @_affine_kernel(%arg0: i32, %arg1: memref<32x128xf32, #tpu.memory_space<vmem>>, %arg2: memref<1x128xf32, #tpu.memory_space<vmem>>, %arg3: memref<1x128xf32, #tpu.memory_space<vmem>>, %arg4: memref<32x128xf32, #tpu.memory_space<vmem>>) attributes {dimension_semantics = [#tpu.dimension_semantics<parallel>], iteration_bounds = array<i64: 1>, scalar_prefetch = 0 : i64, scratch_operands = 0 : i64, tpu.core_type = #tpu.core_type<tc>, window_params = [{transform_indices = @transform_0, window_bounds = array<i64: 32, 128>}, {pipeline_mode = #tpu.pipeline_mode<synchronous>, transform_indices = @transform_1, window_bounds = array<i64: 1, 128>}, {pipeline_mode = #tpu.pipeline_mode<synchronous>, transform_indices = @transform_2, window_bounds = array<i64: 1, 128>}, {transform_indices = @transform_3, window_bounds = array<i64: 32, 128>}]} {
    %c0 = arith.constant 0 : index
    %c0_0 = arith.constant 0 : index
    %0 = vector.load %arg1[%c0, %c0_0] : memref<32x128xf32, #tpu.memory_space<vmem>>, vector<32x128xf32>
    %c0_1 = arith.constant 0 : index
    %c0_2 = arith.constant 0 : index
    %1 = vector.load %arg2[%c0_1, %c0_2] : memref<1x128xf32, #tpu.memory_space<vmem>>, vector<1x128xf32>
    %2 = vector.broadcast %1 : vector<1x128xf32> to vector<32x128xf32>
    %3 = arith.mulf %0, %2 : vector<32x128xf32>
    %c0_3 = arith.constant 0 : index
    %c0_4 = arith.constant 0 : index
    %4 = vector.load %arg3[%c0_3, %c0_4] : memref<1x128xf32, #tpu.memory_space<vmem>>, vector<1x128xf32>
    %5 = vector.broadcast %4 : vector<1x128xf32> to vector<32x128xf32>
    %6 = arith.addf %3, %5 : vector<32x128xf32>
    %cst = arith.constant 0.000000e+00 : f32
    %7 = vector.broadcast %cst : f32 to vector<32x128xf32>
    %8 = arith.maximumf %6, %7 : vector<32x128xf32>
    %c0_5 = arith.constant 0 : index
    %c0_6 = arith.constant 0 : index
    %9 = vector.load %arg4[%c0_5, %c0_6] : memref<32x128xf32, #tpu.memory_space<vmem>>, vector<32x128xf32>
    tpu.vector_store %arg4[%c0_5, %c0_6], %8 {strides = array<i32>} : memref<32x128xf32, #tpu.memory_space<vmem>>, vector<32x128xf32>,
    return
  }
  func.func @transform_0(%arg0: i32) -> (i32, i32) {
    %c0_i32 = arith.constant 0 : i32
    %c0_i32_0 = arith.constant 0 : i32
    return %arg0, %c0_i32 : i32, i32
  }
  func.func @transform_1(%arg0: i32) -> (i32, i32) {
    %c0_i32 = arith.constant 0 : i32
    %c0_i32_0 = arith.constant 0 : i32
    %c0_i32_1 = arith.constant 0 : i32
    return %c0_i32, %c0_i32_0 : i32, i32
  }
  func.func @transform_2(%arg0: i32) -> (i32, i32) {
    %c0_i32 = arith.constant 0 : i32
    %c0_i32_0 = arith.constant 0 : i32
    %c0_i32_1 = arith.constant 0 : i32
    return %c0_i32, %c0_i32_0 : i32, i32
  }
  func.func @transform_3(%arg0: i32) -> (i32, i32) {
    %c0_i32 = arith.constant 0 : i32
    %c0_i32_0 = arith.constant 0 : i32
    return %arg0, %c0_i32 : i32, i32
  }
}

module attributes {stable_mosaic.version = 11 : i64} {
  func.func @_matmul_kernel(%arg0: i32, %arg1: i32, %arg2: memref<32x512xbf16, #tpu.memory_space<vmem>>, %arg3: memref<512x256xbf16, #tpu.memory_space<vmem>>, %arg4: memref<1x256xf32, #tpu.memory_space<vmem>>, %arg5: memref<32x256xf32, #tpu.memory_space<vmem>>, %arg6: memref<8x256xf32, #tpu.memory_space<vmem>>, %arg7: memref<32x256xf32, #tpu.memory_space<vmem>>) attributes {dimension_semantics = [#tpu.dimension_semantics<parallel>, #tpu.dimension_semantics<arbitrary>], iteration_bounds = array<i64: 1, 3>, scalar_prefetch = 0 : i64, scratch_operands = 1 : i64, tpu.core_type = #tpu.core_type<tc>, window_params = [{transform_indices = @transform_0, window_bounds = array<i64: 32, 512>}, {transform_indices = @transform_1, window_bounds = array<i64: 512, 256>}, {pipeline_mode = #tpu.pipeline_mode<synchronous>, transform_indices = @transform_2, window_bounds = array<i64: 1, 256>}, {transform_indices = @transform_3, window_bounds = array<i64: 32, 256>}, {transform_indices = @transform_4, window_bounds = array<i64: 8, 256>}]} {
    %c0_i32 = arith.constant 0 : i32
    %0 = arith.cmpi eq, %arg1, %c0_i32 : i32
    %1 = arith.extui %0 : i1 to i32
    %c0_i32_0 = arith.constant 0 : i32
    %2 = arith.cmpi ne, %1, %c0_i32_0 : i32
    scf.if %2 {
      %cst_9 = arith.constant 0.000000e+00 : f32
      %12 = vector.broadcast %cst_9 : f32 to vector<32x256xf32>
      %c0_10 = arith.constant 0 : index
      %c0_11 = arith.constant 0 : index
      %13 = vector.load %arg7[%c0_10, %c0_11] : memref<32x256xf32, #tpu.memory_space<vmem>>, vector<32x256xf32>
      tpu.vector_store %arg7[%c0_10, %c0_11], %12 {strides = array<i32>} : memref<32x256xf32, #tpu.memory_space<vmem>>, vector<32x256xf32>,
    } else {
    }
    %c0 = arith.constant 0 : index
    %c0_1 = arith.constant 0 : index
    %3 = vector.load %arg7[%c0, %c0_1] : memref<32x256xf32, #tpu.memory_space<vmem>>, vector<32x256xf32>
    %c0_2 = arith.constant 0 : index
    %c0_3 = arith.constant 0 : index
    %4 = vector.load %arg2[%c0_2, %c0_3] : memref<32x512xbf16, #tpu.memory_space<vmem>>, vector<32x512xbf16>
    %c0_4 = arith.constant 0 : index
    %c0_5 = arith.constant 0 : index
    %5 = vector.load %arg3[%c0_4, %c0_5] : memref<512x256xbf16, #tpu.memory_space<vmem>>, vector<512x256xbf16>
    %cst = arith.constant dense<0.000000e+00> : vector<32x256xf32>
    %6 = tpu.matmul %4, %5, %cst {dimension_numbers = #tpu.dot_dimension_numbers<[1], [0], [0], [1], [0, 0, 1, 1], [], []>} : vector<32x512xbf16>, vector<512x256xbf16>, vector<32x256xf32> -> vector<32x256xf32>
    %7 = arith.addf %3, %6 : vector<32x256xf32>
    %c0_6 = arith.constant 0 : index
    %c0_7 = arith.constant 0 : index
    %8 = vector.load %arg7[%c0_6, %c0_7] : memref<32x256xf32, #tpu.memory_space<vmem>>, vector<32x256xf32>
    tpu.vector_store %arg7[%c0_6, %c0_7], %7 {strides = array<i32>} : memref<32x256xf32, #tpu.memory_space<vmem>>, vector<32x256xf32>,
    %c2_i32 = arith.constant 2 : i32
    %9 = arith.cmpi eq, %arg1, %c2_i32 : i32
    %10 = arith.extui %9 : i1 to i32
    %c0_i32_8 = arith.constant 0 : i32
    %11 = arith.cmpi ne, %10, %c0_i32_8 : i32
    scf.if %11 {
      %c0_9 = arith.constant 0 : index
      %c0_10 = arith.constant 0 : index
      %12 = vector.load %arg7[%c0_9, %c0_10] : memref<32x256xf32, #tpu.memory_space<vmem>>, vector<32x256xf32>
      %c0_11 = arith.constant 0 : index
      %c0_12 = arith.constant 0 : index
      %13 = vector.load %arg4[%c0_11, %c0_12] : memref<1x256xf32, #tpu.memory_space<vmem>>, vector<1x256xf32>
      %14 = vector.broadcast %13 : vector<1x256xf32> to vector<32x256xf32>
      %15 = arith.addf %12, %14 : vector<32x256xf32>
      %c0_13 = arith.constant 0 : index
      %c0_14 = arith.constant 0 : index
      %16 = vector.load %arg5[%c0_13, %c0_14] : memref<32x256xf32, #tpu.memory_space<vmem>>, vector<32x256xf32>
      tpu.vector_store %arg5[%c0_13, %c0_14], %15 {strides = array<i32>} : memref<32x256xf32, #tpu.memory_space<vmem>>, vector<32x256xf32>,
      %cst_15 = arith.constant dense<0.000000e+00> : vector<256xf32>
      %17 = vector.multi_reduction <add>, %15, %cst_15 [0] : vector<32x256xf32> to vector<256xf32>
      %18 = vector.shape_cast %17 : vector<256xf32> to vector<1x256xf32>
      %19 = arith.mulf %15, %15 : vector<32x256xf32>
      %cst_16 = arith.constant dense<0.000000e+00> : vector<256xf32>
      %20 = vector.multi_reduction <add>, %19, %cst_16 [0] : vector<32x256xf32> to vector<256xf32>
      %21 = vector.shape_cast %20 : vector<256xf32> to vector<1x256xf32>
      %cst_17 = arith.constant 0.000000e+00 : f32
      %22 = vector.broadcast %cst_17 : f32 to vector<6x256xf32>
      %23 = tpu.concatenate %18, %21, %22 in 0 : vector<1x256xf32>, vector<1x256xf32>, vector<6x256xf32> -> vector<8x256xf32>
      %c0_18 = arith.constant 0 : index
      %c0_19 = arith.constant 0 : index
      %24 = vector.load %arg6[%c0_18, %c0_19] : memref<8x256xf32, #tpu.memory_space<vmem>>, vector<8x256xf32>
      tpu.vector_store %arg6[%c0_18, %c0_19], %23 {strides = array<i32>} : memref<8x256xf32, #tpu.memory_space<vmem>>, vector<8x256xf32>,
    } else {
    }
    return
  }
  func.func @transform_0(%arg0: i32, %arg1: i32) -> (i32, i32) {
    %c0_i32 = arith.constant 0 : i32
    return %arg0, %arg1 : i32, i32
  }
  func.func @transform_1(%arg0: i32, %arg1: i32) -> (i32, i32) {
    %c0_i32 = arith.constant 0 : i32
    %c0_i32_0 = arith.constant 0 : i32
    return %arg1, %c0_i32 : i32, i32
  }
  func.func @transform_2(%arg0: i32, %arg1: i32) -> (i32, i32) {
    %c0_i32 = arith.constant 0 : i32
    %c0_i32_0 = arith.constant 0 : i32
    %c0_i32_1 = arith.constant 0 : i32
    return %c0_i32, %c0_i32_0 : i32, i32
  }
  func.func @transform_3(%arg0: i32, %arg1: i32) -> (i32, i32) {
    %c0_i32 = arith.constant 0 : i32
    %c0_i32_0 = arith.constant 0 : i32
    return %arg0, %c0_i32 : i32, i32
  }
  func.func @transform_4(%arg0: i32, %arg1: i32) -> (i32, i32) {
    %c0_i32 = arith.constant 0 : i32
    %c0_i32_0 = arith.constant 0 : i32
    return %arg0, %c0_i32 : i32, i32
  }
}

module attributes {stable_mosaic.version = 11 : i64} {
  func.func @_affine_kernel(%arg0: i32, %arg1: memref<32x256xf32, #tpu.memory_space<vmem>>, %arg2: memref<1x256xf32, #tpu.memory_space<vmem>>, %arg3: memref<1x256xf32, #tpu.memory_space<vmem>>, %arg4: memref<32x256xf32, #tpu.memory_space<vmem>>) attributes {dimension_semantics = [#tpu.dimension_semantics<parallel>], iteration_bounds = array<i64: 1>, scalar_prefetch = 0 : i64, scratch_operands = 0 : i64, tpu.core_type = #tpu.core_type<tc>, window_params = [{transform_indices = @transform_0, window_bounds = array<i64: 32, 256>}, {pipeline_mode = #tpu.pipeline_mode<synchronous>, transform_indices = @transform_1, window_bounds = array<i64: 1, 256>}, {pipeline_mode = #tpu.pipeline_mode<synchronous>, transform_indices = @transform_2, window_bounds = array<i64: 1, 256>}, {transform_indices = @transform_3, window_bounds = array<i64: 32, 256>}]} {
    %c0 = arith.constant 0 : index
    %c0_0 = arith.constant 0 : index
    %0 = vector.load %arg1[%c0, %c0_0] : memref<32x256xf32, #tpu.memory_space<vmem>>, vector<32x256xf32>
    %c0_1 = arith.constant 0 : index
    %c0_2 = arith.constant 0 : index
    %1 = vector.load %arg2[%c0_1, %c0_2] : memref<1x256xf32, #tpu.memory_space<vmem>>, vector<1x256xf32>
    %2 = vector.broadcast %1 : vector<1x256xf32> to vector<32x256xf32>
    %3 = arith.mulf %0, %2 : vector<32x256xf32>
    %c0_3 = arith.constant 0 : index
    %c0_4 = arith.constant 0 : index
    %4 = vector.load %arg3[%c0_3, %c0_4] : memref<1x256xf32, #tpu.memory_space<vmem>>, vector<1x256xf32>
    %5 = vector.broadcast %4 : vector<1x256xf32> to vector<32x256xf32>
    %6 = arith.addf %3, %5 : vector<32x256xf32>
    %cst = arith.constant 0.000000e+00 : f32
    %7 = vector.broadcast %cst : f32 to vector<32x256xf32>
    %8 = arith.maximumf %6, %7 : vector<32x256xf32>
    %c0_5 = arith.constant 0 : index
    %c0_6 = arith.constant 0 : index
    %9 = vector.load %arg4[%c0_5, %c0_6] : memref<32x256xf32, #tpu.memory_space<vmem>>, vector<32x256xf32>
    tpu.vector_store %arg4[%c0_5, %c0_6], %8 {strides = array<i32>} : memref<32x256xf32, #tpu.memory_space<vmem>>, vector<32x256xf32>,
    return
  }
  func.func @transform_0(%arg0: i32) -> (i32, i32) {
    %c0_i32 = arith.constant 0 : i32
    %c0_i32_0 = arith.constant 0 : i32
    return %arg0, %c0_i32 : i32, i32
  }
  func.func @transform_1(%arg0: i32) -> (i32, i32) {
    %c0_i32 = arith.constant 0 : i32
    %c0_i32_0 = arith.constant 0 : i32
    %c0_i32_1 = arith.constant 0 : i32
    return %c0_i32, %c0_i32_0 : i32, i32
  }
  func.func @transform_2(%arg0: i32) -> (i32, i32) {
    %c0_i32 = arith.constant 0 : i32
    %c0_i32_0 = arith.constant 0 : i32
    %c0_i32_1 = arith.constant 0 : i32
    return %c0_i32, %c0_i32_0 : i32, i32
  }
  func.func @transform_3(%arg0: i32) -> (i32, i32) {
    %c0_i32 = arith.constant 0 : i32
    %c0_i32_0 = arith.constant 0 : i32
    return %arg0, %c0_i32 : i32, i32
  }
}

module attributes {stable_mosaic.version = 11 : i64} {
  func.func @_matmul_kernel(%arg0: i32, %arg1: i32, %arg2: memref<8x512xbf16, #tpu.memory_space<vmem>>, %arg3: memref<512x256xbf16, #tpu.memory_space<vmem>>, %arg4: memref<1x256xf32, #tpu.memory_space<vmem>>, %arg5: memref<8x256xf32, #tpu.memory_space<vmem>>, %arg6: memref<8x256xf32, #tpu.memory_space<vmem>>, %arg7: memref<8x256xf32, #tpu.memory_space<vmem>>) attributes {dimension_semantics = [#tpu.dimension_semantics<parallel>, #tpu.dimension_semantics<arbitrary>], iteration_bounds = array<i64: 1, 5>, scalar_prefetch = 0 : i64, scratch_operands = 1 : i64, tpu.core_type = #tpu.core_type<tc>, window_params = [{transform_indices = @transform_0, window_bounds = array<i64: 8, 512>}, {transform_indices = @transform_1, window_bounds = array<i64: 512, 256>}, {pipeline_mode = #tpu.pipeline_mode<synchronous>, transform_indices = @transform_2, window_bounds = array<i64: 1, 256>}, {transform_indices = @transform_3, window_bounds = array<i64: 8, 256>}, {transform_indices = @transform_4, window_bounds = array<i64: 8, 256>}]} {
    %c0_i32 = arith.constant 0 : i32
    %0 = arith.cmpi eq, %arg1, %c0_i32 : i32
    %1 = arith.extui %0 : i1 to i32
    %c0_i32_0 = arith.constant 0 : i32
    %2 = arith.cmpi ne, %1, %c0_i32_0 : i32
    scf.if %2 {
      %cst_9 = arith.constant 0.000000e+00 : f32
      %12 = vector.broadcast %cst_9 : f32 to vector<8x256xf32>
      %c0_10 = arith.constant 0 : index
      %c0_11 = arith.constant 0 : index
      %13 = vector.load %arg7[%c0_10, %c0_11] : memref<8x256xf32, #tpu.memory_space<vmem>>, vector<8x256xf32>
      tpu.vector_store %arg7[%c0_10, %c0_11], %12 {strides = array<i32>} : memref<8x256xf32, #tpu.memory_space<vmem>>, vector<8x256xf32>,
    } else {
    }
    %c0 = arith.constant 0 : index
    %c0_1 = arith.constant 0 : index
    %3 = vector.load %arg7[%c0, %c0_1] : memref<8x256xf32, #tpu.memory_space<vmem>>, vector<8x256xf32>
    %c0_2 = arith.constant 0 : index
    %c0_3 = arith.constant 0 : index
    %4 = vector.load %arg2[%c0_2, %c0_3] : memref<8x512xbf16, #tpu.memory_space<vmem>>, vector<8x512xbf16>
    %c0_4 = arith.constant 0 : index
    %c0_5 = arith.constant 0 : index
    %5 = vector.load %arg3[%c0_4, %c0_5] : memref<512x256xbf16, #tpu.memory_space<vmem>>, vector<512x256xbf16>
    %cst = arith.constant dense<0.000000e+00> : vector<8x256xf32>
    %6 = tpu.matmul %4, %5, %cst {dimension_numbers = #tpu.dot_dimension_numbers<[1], [0], [0], [1], [0, 0, 1, 1], [], []>} : vector<8x512xbf16>, vector<512x256xbf16>, vector<8x256xf32> -> vector<8x256xf32>
    %7 = arith.addf %3, %6 : vector<8x256xf32>
    %c0_6 = arith.constant 0 : index
    %c0_7 = arith.constant 0 : index
    %8 = vector.load %arg7[%c0_6, %c0_7] : memref<8x256xf32, #tpu.memory_space<vmem>>, vector<8x256xf32>
    tpu.vector_store %arg7[%c0_6, %c0_7], %7 {strides = array<i32>} : memref<8x256xf32, #tpu.memory_space<vmem>>, vector<8x256xf32>,
    %c4_i32 = arith.constant 4 : i32
    %9 = arith.cmpi eq, %arg1, %c4_i32 : i32
    %10 = arith.extui %9 : i1 to i32
    %c0_i32_8 = arith.constant 0 : i32
    %11 = arith.cmpi ne, %10, %c0_i32_8 : i32
    scf.if %11 {
      %c0_9 = arith.constant 0 : index
      %c0_10 = arith.constant 0 : index
      %12 = vector.load %arg7[%c0_9, %c0_10] : memref<8x256xf32, #tpu.memory_space<vmem>>, vector<8x256xf32>
      %c0_11 = arith.constant 0 : index
      %c0_12 = arith.constant 0 : index
      %13 = vector.load %arg4[%c0_11, %c0_12] : memref<1x256xf32, #tpu.memory_space<vmem>>, vector<1x256xf32>
      %14 = vector.broadcast %13 : vector<1x256xf32> to vector<8x256xf32>
      %15 = arith.addf %12, %14 : vector<8x256xf32>
      %c0_13 = arith.constant 0 : index
      %c0_14 = arith.constant 0 : index
      %16 = vector.load %arg5[%c0_13, %c0_14] : memref<8x256xf32, #tpu.memory_space<vmem>>, vector<8x256xf32>
      tpu.vector_store %arg5[%c0_13, %c0_14], %15 {strides = array<i32>} : memref<8x256xf32, #tpu.memory_space<vmem>>, vector<8x256xf32>,
      %cst_15 = arith.constant dense<0.000000e+00> : vector<256xf32>
      %17 = vector.multi_reduction <add>, %15, %cst_15 [0] : vector<8x256xf32> to vector<256xf32>
      %18 = vector.shape_cast %17 : vector<256xf32> to vector<1x256xf32>
      %19 = arith.mulf %15, %15 : vector<8x256xf32>
      %cst_16 = arith.constant dense<0.000000e+00> : vector<256xf32>
      %20 = vector.multi_reduction <add>, %19, %cst_16 [0] : vector<8x256xf32> to vector<256xf32>
      %21 = vector.shape_cast %20 : vector<256xf32> to vector<1x256xf32>
      %cst_17 = arith.constant 0.000000e+00 : f32
      %22 = vector.broadcast %cst_17 : f32 to vector<6x256xf32>
      %23 = tpu.concatenate %18, %21, %22 in 0 : vector<1x256xf32>, vector<1x256xf32>, vector<6x256xf32> -> vector<8x256xf32>
      %c0_18 = arith.constant 0 : index
      %c0_19 = arith.constant 0 : index
      %24 = vector.load %arg6[%c0_18, %c0_19] : memref<8x256xf32, #tpu.memory_space<vmem>>, vector<8x256xf32>
      tpu.vector_store %arg6[%c0_18, %c0_19], %23 {strides = array<i32>} : memref<8x256xf32, #tpu.memory_space<vmem>>, vector<8x256xf32>,
    } else {
    }
    return
  }
  func.func @transform_0(%arg0: i32, %arg1: i32) -> (i32, i32) {
    %c0_i32 = arith.constant 0 : i32
    return %arg0, %arg1 : i32, i32
  }
  func.func @transform_1(%arg0: i32, %arg1: i32) -> (i32, i32) {
    %c0_i32 = arith.constant 0 : i32
    %c0_i32_0 = arith.constant 0 : i32
    return %arg1, %c0_i32 : i32, i32
  }
  func.func @transform_2(%arg0: i32, %arg1: i32) -> (i32, i32) {
    %c0_i32 = arith.constant 0 : i32
    %c0_i32_0 = arith.constant 0 : i32
    %c0_i32_1 = arith.constant 0 : i32
    return %c0_i32, %c0_i32_0 : i32, i32
  }
  func.func @transform_3(%arg0: i32, %arg1: i32) -> (i32, i32) {
    %c0_i32 = arith.constant 0 : i32
    %c0_i32_0 = arith.constant 0 : i32
    return %arg0, %c0_i32 : i32, i32
  }
  func.func @transform_4(%arg0: i32, %arg1: i32) -> (i32, i32) {
    %c0_i32 = arith.constant 0 : i32
    %c0_i32_0 = arith.constant 0 : i32
    return %arg0, %c0_i32 : i32, i32
  }
}

module attributes {stable_mosaic.version = 11 : i64} {
  func.func @_affine_kernel(%arg0: i32, %arg1: memref<8x256xf32, #tpu.memory_space<vmem>>, %arg2: memref<1x256xf32, #tpu.memory_space<vmem>>, %arg3: memref<1x256xf32, #tpu.memory_space<vmem>>, %arg4: memref<8x256xf32, #tpu.memory_space<vmem>>) attributes {dimension_semantics = [#tpu.dimension_semantics<parallel>], iteration_bounds = array<i64: 1>, scalar_prefetch = 0 : i64, scratch_operands = 0 : i64, tpu.core_type = #tpu.core_type<tc>, window_params = [{transform_indices = @transform_0, window_bounds = array<i64: 8, 256>}, {pipeline_mode = #tpu.pipeline_mode<synchronous>, transform_indices = @transform_1, window_bounds = array<i64: 1, 256>}, {pipeline_mode = #tpu.pipeline_mode<synchronous>, transform_indices = @transform_2, window_bounds = array<i64: 1, 256>}, {transform_indices = @transform_3, window_bounds = array<i64: 8, 256>}]} {
    %c0 = arith.constant 0 : index
    %c0_0 = arith.constant 0 : index
    %0 = vector.load %arg1[%c0, %c0_0] : memref<8x256xf32, #tpu.memory_space<vmem>>, vector<8x256xf32>
    %c0_1 = arith.constant 0 : index
    %c0_2 = arith.constant 0 : index
    %1 = vector.load %arg2[%c0_1, %c0_2] : memref<1x256xf32, #tpu.memory_space<vmem>>, vector<1x256xf32>
    %2 = vector.broadcast %1 : vector<1x256xf32> to vector<8x256xf32>
    %3 = arith.mulf %0, %2 : vector<8x256xf32>
    %c0_3 = arith.constant 0 : index
    %c0_4 = arith.constant 0 : index
    %4 = vector.load %arg3[%c0_3, %c0_4] : memref<1x256xf32, #tpu.memory_space<vmem>>, vector<1x256xf32>
    %5 = vector.broadcast %4 : vector<1x256xf32> to vector<8x256xf32>
    %6 = arith.addf %3, %5 : vector<8x256xf32>
    %cst = arith.constant 0.000000e+00 : f32
    %7 = vector.broadcast %cst : f32 to vector<8x256xf32>
    %8 = arith.maximumf %6, %7 : vector<8x256xf32>
    %c0_5 = arith.constant 0 : index
    %c0_6 = arith.constant 0 : index
    %9 = vector.load %arg4[%c0_5, %c0_6] : memref<8x256xf32, #tpu.memory_space<vmem>>, vector<8x256xf32>
    tpu.vector_store %arg4[%c0_5, %c0_6], %8 {strides = array<i32>} : memref<8x256xf32, #tpu.memory_space<vmem>>, vector<8x256xf32>,
    return
  }
  func.func @transform_0(%arg0: i32) -> (i32, i32) {
    %c0_i32 = arith.constant 0 : i32
    %c0_i32_0 = arith.constant 0 : i32
    return %arg0, %c0_i32 : i32, i32
  }
  func.func @transform_1(%arg0: i32) -> (i32, i32) {
    %c0_i32 = arith.constant 0 : i32
    %c0_i32_0 = arith.constant 0 : i32
    %c0_i32_1 = arith.constant 0 : i32
    return %c0_i32, %c0_i32_0 : i32, i32
  }
  func.func @transform_2(%arg0: i32) -> (i32, i32) {
    %c0_i32 = arith.constant 0 : i32
    %c0_i32_0 = arith.constant 0 : i32
    %c0_i32_1 = arith.constant 0 : i32
    return %c0_i32, %c0_i32_0 : i32, i32
  }
  func.func @transform_3(%arg0: i32) -> (i32, i32) {
    %c0_i32 = arith.constant 0 : i32
    %c0_i32_0 = arith.constant 0 : i32
    return %arg0, %c0_i32 : i32, i32
  }
}

module attributes {stable_mosaic.version = 11 : i64} {
  func.func @_matmul_kernel(%arg0: i32, %arg1: i32, %arg2: memref<8x512xbf16, #tpu.memory_space<vmem>>, %arg3: memref<512x512xbf16, #tpu.memory_space<vmem>>, %arg4: memref<1x512xf32, #tpu.memory_space<vmem>>, %arg5: memref<8x512xf32, #tpu.memory_space<vmem>>, %arg6: memref<8x512xf32, #tpu.memory_space<vmem>>, %arg7: memref<8x512xf32, #tpu.memory_space<vmem>>) attributes {dimension_semantics = [#tpu.dimension_semantics<parallel>, #tpu.dimension_semantics<arbitrary>], iteration_bounds = array<i64: 1, 5>, scalar_prefetch = 0 : i64, scratch_operands = 1 : i64, tpu.core_type = #tpu.core_type<tc>, window_params = [{transform_indices = @transform_0, window_bounds = array<i64: 8, 512>}, {transform_indices = @transform_1, window_bounds = array<i64: 512, 512>}, {pipeline_mode = #tpu.pipeline_mode<synchronous>, transform_indices = @transform_2, window_bounds = array<i64: 1, 512>}, {transform_indices = @transform_3, window_bounds = array<i64: 8, 512>}, {transform_indices = @transform_4, window_bounds = array<i64: 8, 512>}]} {
    %c0_i32 = arith.constant 0 : i32
    %0 = arith.cmpi eq, %arg1, %c0_i32 : i32
    %1 = arith.extui %0 : i1 to i32
    %c0_i32_0 = arith.constant 0 : i32
    %2 = arith.cmpi ne, %1, %c0_i32_0 : i32
    scf.if %2 {
      %cst_9 = arith.constant 0.000000e+00 : f32
      %12 = vector.broadcast %cst_9 : f32 to vector<8x512xf32>
      %c0_10 = arith.constant 0 : index
      %c0_11 = arith.constant 0 : index
      %13 = vector.load %arg7[%c0_10, %c0_11] : memref<8x512xf32, #tpu.memory_space<vmem>>, vector<8x512xf32>
      tpu.vector_store %arg7[%c0_10, %c0_11], %12 {strides = array<i32>} : memref<8x512xf32, #tpu.memory_space<vmem>>, vector<8x512xf32>,
    } else {
    }
    %c0 = arith.constant 0 : index
    %c0_1 = arith.constant 0 : index
    %3 = vector.load %arg7[%c0, %c0_1] : memref<8x512xf32, #tpu.memory_space<vmem>>, vector<8x512xf32>
    %c0_2 = arith.constant 0 : index
    %c0_3 = arith.constant 0 : index
    %4 = vector.load %arg2[%c0_2, %c0_3] : memref<8x512xbf16, #tpu.memory_space<vmem>>, vector<8x512xbf16>
    %c0_4 = arith.constant 0 : index
    %c0_5 = arith.constant 0 : index
    %5 = vector.load %arg3[%c0_4, %c0_5] : memref<512x512xbf16, #tpu.memory_space<vmem>>, vector<512x512xbf16>
    %cst = arith.constant dense<0.000000e+00> : vector<8x512xf32>
    %6 = tpu.matmul %4, %5, %cst {dimension_numbers = #tpu.dot_dimension_numbers<[1], [0], [0], [1], [0, 0, 1, 1], [], []>} : vector<8x512xbf16>, vector<512x512xbf16>, vector<8x512xf32> -> vector<8x512xf32>
    %7 = arith.addf %3, %6 : vector<8x512xf32>
    %c0_6 = arith.constant 0 : index
    %c0_7 = arith.constant 0 : index
    %8 = vector.load %arg7[%c0_6, %c0_7] : memref<8x512xf32, #tpu.memory_space<vmem>>, vector<8x512xf32>
    tpu.vector_store %arg7[%c0_6, %c0_7], %7 {strides = array<i32>} : memref<8x512xf32, #tpu.memory_space<vmem>>, vector<8x512xf32>,
    %c4_i32 = arith.constant 4 : i32
    %9 = arith.cmpi eq, %arg1, %c4_i32 : i32
    %10 = arith.extui %9 : i1 to i32
    %c0_i32_8 = arith.constant 0 : i32
    %11 = arith.cmpi ne, %10, %c0_i32_8 : i32
    scf.if %11 {
      %c0_9 = arith.constant 0 : index
      %c0_10 = arith.constant 0 : index
      %12 = vector.load %arg7[%c0_9, %c0_10] : memref<8x512xf32, #tpu.memory_space<vmem>>, vector<8x512xf32>
      %c0_11 = arith.constant 0 : index
      %c0_12 = arith.constant 0 : index
      %13 = vector.load %arg4[%c0_11, %c0_12] : memref<1x512xf32, #tpu.memory_space<vmem>>, vector<1x512xf32>
      %14 = vector.broadcast %13 : vector<1x512xf32> to vector<8x512xf32>
      %15 = arith.addf %12, %14 : vector<8x512xf32>
      %c0_13 = arith.constant 0 : index
      %c0_14 = arith.constant 0 : index
      %16 = vector.load %arg5[%c0_13, %c0_14] : memref<8x512xf32, #tpu.memory_space<vmem>>, vector<8x512xf32>
      tpu.vector_store %arg5[%c0_13, %c0_14], %15 {strides = array<i32>} : memref<8x512xf32, #tpu.memory_space<vmem>>, vector<8x512xf32>,
      %cst_15 = arith.constant dense<0.000000e+00> : vector<512xf32>
      %17 = vector.multi_reduction <add>, %15, %cst_15 [0] : vector<8x512xf32> to vector<512xf32>
      %18 = vector.shape_cast %17 : vector<512xf32> to vector<1x512xf32>
      %19 = arith.mulf %15, %15 : vector<8x512xf32>
      %cst_16 = arith.constant dense<0.000000e+00> : vector<512xf32>
      %20 = vector.multi_reduction <add>, %19, %cst_16 [0] : vector<8x512xf32> to vector<512xf32>
      %21 = vector.shape_cast %20 : vector<512xf32> to vector<1x512xf32>
      %cst_17 = arith.constant 0.000000e+00 : f32
      %22 = vector.broadcast %cst_17 : f32 to vector<6x512xf32>
      %23 = tpu.concatenate %18, %21, %22 in 0 : vector<1x512xf32>, vector<1x512xf32>, vector<6x512xf32> -> vector<8x512xf32>
      %c0_18 = arith.constant 0 : index
      %c0_19 = arith.constant 0 : index
      %24 = vector.load %arg6[%c0_18, %c0_19] : memref<8x512xf32, #tpu.memory_space<vmem>>, vector<8x512xf32>
      tpu.vector_store %arg6[%c0_18, %c0_19], %23 {strides = array<i32>} : memref<8x512xf32, #tpu.memory_space<vmem>>, vector<8x512xf32>,
    } else {
    }
    return
  }
  func.func @transform_0(%arg0: i32, %arg1: i32) -> (i32, i32) {
    %c0_i32 = arith.constant 0 : i32
    return %arg0, %arg1 : i32, i32
  }
  func.func @transform_1(%arg0: i32, %arg1: i32) -> (i32, i32) {
    %c0_i32 = arith.constant 0 : i32
    %c0_i32_0 = arith.constant 0 : i32
    return %arg1, %c0_i32 : i32, i32
  }
  func.func @transform_2(%arg0: i32, %arg1: i32) -> (i32, i32) {
    %c0_i32 = arith.constant 0 : i32
    %c0_i32_0 = arith.constant 0 : i32
    %c0_i32_1 = arith.constant 0 : i32
    return %c0_i32, %c0_i32_0 : i32, i32
  }
  func.func @transform_3(%arg0: i32, %arg1: i32) -> (i32, i32) {
    %c0_i32 = arith.constant 0 : i32
    %c0_i32_0 = arith.constant 0 : i32
    return %arg0, %c0_i32 : i32, i32
  }
  func.func @transform_4(%arg0: i32, %arg1: i32) -> (i32, i32) {
    %c0_i32 = arith.constant 0 : i32
    %c0_i32_0 = arith.constant 0 : i32
    return %arg0, %c0_i32 : i32, i32
  }
}

module attributes {stable_mosaic.version = 11 : i64} {
  func.func @_affine_kernel(%arg0: i32, %arg1: memref<8x512xf32, #tpu.memory_space<vmem>>, %arg2: memref<1x512xf32, #tpu.memory_space<vmem>>, %arg3: memref<1x512xf32, #tpu.memory_space<vmem>>, %arg4: memref<8x512xf32, #tpu.memory_space<vmem>>) attributes {dimension_semantics = [#tpu.dimension_semantics<parallel>], iteration_bounds = array<i64: 1>, scalar_prefetch = 0 : i64, scratch_operands = 0 : i64, tpu.core_type = #tpu.core_type<tc>, window_params = [{transform_indices = @transform_0, window_bounds = array<i64: 8, 512>}, {pipeline_mode = #tpu.pipeline_mode<synchronous>, transform_indices = @transform_1, window_bounds = array<i64: 1, 512>}, {pipeline_mode = #tpu.pipeline_mode<synchronous>, transform_indices = @transform_2, window_bounds = array<i64: 1, 512>}, {transform_indices = @transform_3, window_bounds = array<i64: 8, 512>}]} {
    %c0 = arith.constant 0 : index
    %c0_0 = arith.constant 0 : index
    %0 = vector.load %arg1[%c0, %c0_0] : memref<8x512xf32, #tpu.memory_space<vmem>>, vector<8x512xf32>
    %c0_1 = arith.constant 0 : index
    %c0_2 = arith.constant 0 : index
    %1 = vector.load %arg2[%c0_1, %c0_2] : memref<1x512xf32, #tpu.memory_space<vmem>>, vector<1x512xf32>
    %2 = vector.broadcast %1 : vector<1x512xf32> to vector<8x512xf32>
    %3 = arith.mulf %0, %2 : vector<8x512xf32>
    %c0_3 = arith.constant 0 : index
    %c0_4 = arith.constant 0 : index
    %4 = vector.load %arg3[%c0_3, %c0_4] : memref<1x512xf32, #tpu.memory_space<vmem>>, vector<1x512xf32>
    %5 = vector.broadcast %4 : vector<1x512xf32> to vector<8x512xf32>
    %6 = arith.addf %3, %5 : vector<8x512xf32>
    %cst = arith.constant 0.000000e+00 : f32
    %7 = vector.broadcast %cst : f32 to vector<8x512xf32>
    %8 = arith.maximumf %6, %7 : vector<8x512xf32>
    %c0_5 = arith.constant 0 : index
    %c0_6 = arith.constant 0 : index
    %9 = vector.load %arg4[%c0_5, %c0_6] : memref<8x512xf32, #tpu.memory_space<vmem>>, vector<8x512xf32>
    tpu.vector_store %arg4[%c0_5, %c0_6], %8 {strides = array<i32>} : memref<8x512xf32, #tpu.memory_space<vmem>>, vector<8x512xf32>,
    return
  }
  func.func @transform_0(%arg0: i32) -> (i32, i32) {
    %c0_i32 = arith.constant 0 : i32
    %c0_i32_0 = arith.constant 0 : i32
    return %arg0, %c0_i32 : i32, i32
  }
  func.func @transform_1(%arg0: i32) -> (i32, i32) {
    %c0_i32 = arith.constant 0 : i32
    %c0_i32_0 = arith.constant 0 : i32
    %c0_i32_1 = arith.constant 0 : i32
    return %c0_i32, %c0_i32_0 : i32, i32
  }
  func.func @transform_2(%arg0: i32) -> (i32, i32) {
    %c0_i32 = arith.constant 0 : i32
    %c0_i32_0 = arith.constant 0 : i32
    %c0_i32_1 = arith.constant 0 : i32
    return %c0_i32, %c0_i32_0 : i32, i32
  }
  func.func @transform_3(%arg0: i32) -> (i32, i32) {
    %c0_i32 = arith.constant 0 : i32
    %c0_i32_0 = arith.constant 0 : i32
    return %arg0, %c0_i32 : i32, i32
  }
}

module attributes {stable_mosaic.version = 11 : i64} {
  func.func @_matmul_kernel(%arg0: i32, %arg1: i32, %arg2: memref<8x512xbf16, #tpu.memory_space<vmem>>, %arg3: memref<512x512xbf16, #tpu.memory_space<vmem>>, %arg4: memref<1x512xf32, #tpu.memory_space<vmem>>, %arg5: memref<8x512xf32, #tpu.memory_space<vmem>>, %arg6: memref<8x512xf32, #tpu.memory_space<vmem>>, %arg7: memref<8x512xf32, #tpu.memory_space<vmem>>) attributes {dimension_semantics = [#tpu.dimension_semantics<parallel>, #tpu.dimension_semantics<arbitrary>], iteration_bounds = array<i64: 1, 9>, scalar_prefetch = 0 : i64, scratch_operands = 1 : i64, tpu.core_type = #tpu.core_type<tc>, window_params = [{transform_indices = @transform_0, window_bounds = array<i64: 8, 512>}, {transform_indices = @transform_1, window_bounds = array<i64: 512, 512>}, {pipeline_mode = #tpu.pipeline_mode<synchronous>, transform_indices = @transform_2, window_bounds = array<i64: 1, 512>}, {transform_indices = @transform_3, window_bounds = array<i64: 8, 512>}, {transform_indices = @transform_4, window_bounds = array<i64: 8, 512>}]} {
    %c0_i32 = arith.constant 0 : i32
    %0 = arith.cmpi eq, %arg1, %c0_i32 : i32
    %1 = arith.extui %0 : i1 to i32
    %c0_i32_0 = arith.constant 0 : i32
    %2 = arith.cmpi ne, %1, %c0_i32_0 : i32
    scf.if %2 {
      %cst_9 = arith.constant 0.000000e+00 : f32
      %12 = vector.broadcast %cst_9 : f32 to vector<8x512xf32>
      %c0_10 = arith.constant 0 : index
      %c0_11 = arith.constant 0 : index
      %13 = vector.load %arg7[%c0_10, %c0_11] : memref<8x512xf32, #tpu.memory_space<vmem>>, vector<8x512xf32>
      tpu.vector_store %arg7[%c0_10, %c0_11], %12 {strides = array<i32>} : memref<8x512xf32, #tpu.memory_space<vmem>>, vector<8x512xf32>,
    } else {
    }
    %c0 = arith.constant 0 : index
    %c0_1 = arith.constant 0 : index
    %3 = vector.load %arg7[%c0, %c0_1] : memref<8x512xf32, #tpu.memory_space<vmem>>, vector<8x512xf32>
    %c0_2 = arith.constant 0 : index
    %c0_3 = arith.constant 0 : index
    %4 = vector.load %arg2[%c0_2, %c0_3] : memref<8x512xbf16, #tpu.memory_space<vmem>>, vector<8x512xbf16>
    %c0_4 = arith.constant 0 : index
    %c0_5 = arith.constant 0 : index
    %5 = vector.load %arg3[%c0_4, %c0_5] : memref<512x512xbf16, #tpu.memory_space<vmem>>, vector<512x512xbf16>
    %cst = arith.constant dense<0.000000e+00> : vector<8x512xf32>
    %6 = tpu.matmul %4, %5, %cst {dimension_numbers = #tpu.dot_dimension_numbers<[1], [0], [0], [1], [0, 0, 1, 1], [], []>} : vector<8x512xbf16>, vector<512x512xbf16>, vector<8x512xf32> -> vector<8x512xf32>
    %7 = arith.addf %3, %6 : vector<8x512xf32>
    %c0_6 = arith.constant 0 : index
    %c0_7 = arith.constant 0 : index
    %8 = vector.load %arg7[%c0_6, %c0_7] : memref<8x512xf32, #tpu.memory_space<vmem>>, vector<8x512xf32>
    tpu.vector_store %arg7[%c0_6, %c0_7], %7 {strides = array<i32>} : memref<8x512xf32, #tpu.memory_space<vmem>>, vector<8x512xf32>,
    %c8_i32 = arith.constant 8 : i32
    %9 = arith.cmpi eq, %arg1, %c8_i32 : i32
    %10 = arith.extui %9 : i1 to i32
    %c0_i32_8 = arith.constant 0 : i32
    %11 = arith.cmpi ne, %10, %c0_i32_8 : i32
    scf.if %11 {
      %c0_9 = arith.constant 0 : index
      %c0_10 = arith.constant 0 : index
      %12 = vector.load %arg7[%c0_9, %c0_10] : memref<8x512xf32, #tpu.memory_space<vmem>>, vector<8x512xf32>
      %c0_11 = arith.constant 0 : index
      %c0_12 = arith.constant 0 : index
      %13 = vector.load %arg4[%c0_11, %c0_12] : memref<1x512xf32, #tpu.memory_space<vmem>>, vector<1x512xf32>
      %14 = vector.broadcast %13 : vector<1x512xf32> to vector<8x512xf32>
      %15 = arith.addf %12, %14 : vector<8x512xf32>
      %c0_13 = arith.constant 0 : index
      %c0_14 = arith.constant 0 : index
      %16 = vector.load %arg5[%c0_13, %c0_14] : memref<8x512xf32, #tpu.memory_space<vmem>>, vector<8x512xf32>
      tpu.vector_store %arg5[%c0_13, %c0_14], %15 {strides = array<i32>} : memref<8x512xf32, #tpu.memory_space<vmem>>, vector<8x512xf32>,
      %cst_15 = arith.constant dense<0.000000e+00> : vector<512xf32>
      %17 = vector.multi_reduction <add>, %15, %cst_15 [0] : vector<8x512xf32> to vector<512xf32>
      %18 = vector.shape_cast %17 : vector<512xf32> to vector<1x512xf32>
      %19 = arith.mulf %15, %15 : vector<8x512xf32>
      %cst_16 = arith.constant dense<0.000000e+00> : vector<512xf32>
      %20 = vector.multi_reduction <add>, %19, %cst_16 [0] : vector<8x512xf32> to vector<512xf32>
      %21 = vector.shape_cast %20 : vector<512xf32> to vector<1x512xf32>
      %cst_17 = arith.constant 0.000000e+00 : f32
      %22 = vector.broadcast %cst_17 : f32 to vector<6x512xf32>
      %23 = tpu.concatenate %18, %21, %22 in 0 : vector<1x512xf32>, vector<1x512xf32>, vector<6x512xf32> -> vector<8x512xf32>
      %c0_18 = arith.constant 0 : index
      %c0_19 = arith.constant 0 : index
      %24 = vector.load %arg6[%c0_18, %c0_19] : memref<8x512xf32, #tpu.memory_space<vmem>>, vector<8x512xf32>
      tpu.vector_store %arg6[%c0_18, %c0_19], %23 {strides = array<i32>} : memref<8x512xf32, #tpu.memory_space<vmem>>, vector<8x512xf32>,
    } else {
    }
    return
  }
  func.func @transform_0(%arg0: i32, %arg1: i32) -> (i32, i32) {
    %c0_i32 = arith.constant 0 : i32
    return %arg0, %arg1 : i32, i32
  }
  func.func @transform_1(%arg0: i32, %arg1: i32) -> (i32, i32) {
    %c0_i32 = arith.constant 0 : i32
    %c0_i32_0 = arith.constant 0 : i32
    return %arg1, %c0_i32 : i32, i32
  }
  func.func @transform_2(%arg0: i32, %arg1: i32) -> (i32, i32) {
    %c0_i32 = arith.constant 0 : i32
    %c0_i32_0 = arith.constant 0 : i32
    %c0_i32_1 = arith.constant 0 : i32
    return %c0_i32, %c0_i32_0 : i32, i32
  }
  func.func @transform_3(%arg0: i32, %arg1: i32) -> (i32, i32) {
    %c0_i32 = arith.constant 0 : i32
    %c0_i32_0 = arith.constant 0 : i32
    return %arg0, %c0_i32 : i32, i32
  }
  func.func @transform_4(%arg0: i32, %arg1: i32) -> (i32, i32) {
    %c0_i32 = arith.constant 0 : i32
    %c0_i32_0 = arith.constant 0 : i32
    return %arg0, %c0_i32 : i32, i32
  }
}

module attributes {stable_mosaic.version = 11 : i64} {
  func.func @_matmul_kernel(%arg0: i32, %arg1: i32, %arg2: memref<8x512xbf16, #tpu.memory_space<vmem>>, %arg3: memref<512x256xbf16, #tpu.memory_space<vmem>>, %arg4: memref<1x256xf32, #tpu.memory_space<vmem>>, %arg5: memref<8x256xf32, #tpu.memory_space<vmem>>, %arg6: memref<8x256xf32, #tpu.memory_space<vmem>>, %arg7: memref<8x256xf32, #tpu.memory_space<vmem>>) attributes {dimension_semantics = [#tpu.dimension_semantics<parallel>, #tpu.dimension_semantics<arbitrary>], iteration_bounds = array<i64: 1, 9>, scalar_prefetch = 0 : i64, scratch_operands = 1 : i64, tpu.core_type = #tpu.core_type<tc>, window_params = [{transform_indices = @transform_0, window_bounds = array<i64: 8, 512>}, {transform_indices = @transform_1, window_bounds = array<i64: 512, 256>}, {pipeline_mode = #tpu.pipeline_mode<synchronous>, transform_indices = @transform_2, window_bounds = array<i64: 1, 256>}, {transform_indices = @transform_3, window_bounds = array<i64: 8, 256>}, {transform_indices = @transform_4, window_bounds = array<i64: 8, 256>}]} {
    %c0_i32 = arith.constant 0 : i32
    %0 = arith.cmpi eq, %arg1, %c0_i32 : i32
    %1 = arith.extui %0 : i1 to i32
    %c0_i32_0 = arith.constant 0 : i32
    %2 = arith.cmpi ne, %1, %c0_i32_0 : i32
    scf.if %2 {
      %cst_9 = arith.constant 0.000000e+00 : f32
      %12 = vector.broadcast %cst_9 : f32 to vector<8x256xf32>
      %c0_10 = arith.constant 0 : index
      %c0_11 = arith.constant 0 : index
      %13 = vector.load %arg7[%c0_10, %c0_11] : memref<8x256xf32, #tpu.memory_space<vmem>>, vector<8x256xf32>
      tpu.vector_store %arg7[%c0_10, %c0_11], %12 {strides = array<i32>} : memref<8x256xf32, #tpu.memory_space<vmem>>, vector<8x256xf32>,
    } else {
    }
    %c0 = arith.constant 0 : index
    %c0_1 = arith.constant 0 : index
    %3 = vector.load %arg7[%c0, %c0_1] : memref<8x256xf32, #tpu.memory_space<vmem>>, vector<8x256xf32>
    %c0_2 = arith.constant 0 : index
    %c0_3 = arith.constant 0 : index
    %4 = vector.load %arg2[%c0_2, %c0_3] : memref<8x512xbf16, #tpu.memory_space<vmem>>, vector<8x512xbf16>
    %c0_4 = arith.constant 0 : index
    %c0_5 = arith.constant 0 : index
    %5 = vector.load %arg3[%c0_4, %c0_5] : memref<512x256xbf16, #tpu.memory_space<vmem>>, vector<512x256xbf16>
    %cst = arith.constant dense<0.000000e+00> : vector<8x256xf32>
    %6 = tpu.matmul %4, %5, %cst {dimension_numbers = #tpu.dot_dimension_numbers<[1], [0], [0], [1], [0, 0, 1, 1], [], []>} : vector<8x512xbf16>, vector<512x256xbf16>, vector<8x256xf32> -> vector<8x256xf32>
    %7 = arith.addf %3, %6 : vector<8x256xf32>
    %c0_6 = arith.constant 0 : index
    %c0_7 = arith.constant 0 : index
    %8 = vector.load %arg7[%c0_6, %c0_7] : memref<8x256xf32, #tpu.memory_space<vmem>>, vector<8x256xf32>
    tpu.vector_store %arg7[%c0_6, %c0_7], %7 {strides = array<i32>} : memref<8x256xf32, #tpu.memory_space<vmem>>, vector<8x256xf32>,
    %c8_i32 = arith.constant 8 : i32
    %9 = arith.cmpi eq, %arg1, %c8_i32 : i32
    %10 = arith.extui %9 : i1 to i32
    %c0_i32_8 = arith.constant 0 : i32
    %11 = arith.cmpi ne, %10, %c0_i32_8 : i32
    scf.if %11 {
      %c0_9 = arith.constant 0 : index
      %c0_10 = arith.constant 0 : index
      %12 = vector.load %arg7[%c0_9, %c0_10] : memref<8x256xf32, #tpu.memory_space<vmem>>, vector<8x256xf32>
      %c0_11 = arith.constant 0 : index
      %c0_12 = arith.constant 0 : index
      %13 = vector.load %arg4[%c0_11, %c0_12] : memref<1x256xf32, #tpu.memory_space<vmem>>, vector<1x256xf32>
      %14 = vector.broadcast %13 : vector<1x256xf32> to vector<8x256xf32>
      %15 = arith.addf %12, %14 : vector<8x256xf32>
      %c0_13 = arith.constant 0 : index
      %c0_14 = arith.constant 0 : index
      %16 = vector.load %arg5[%c0_13, %c0_14] : memref<8x256xf32, #tpu.memory_space<vmem>>, vector<8x256xf32>
      tpu.vector_store %arg5[%c0_13, %c0_14], %15 {strides = array<i32>} : memref<8x256xf32, #tpu.memory_space<vmem>>, vector<8x256xf32>,
      %cst_15 = arith.constant dense<0.000000e+00> : vector<256xf32>
      %17 = vector.multi_reduction <add>, %15, %cst_15 [0] : vector<8x256xf32> to vector<256xf32>
      %18 = vector.shape_cast %17 : vector<256xf32> to vector<1x256xf32>
      %19 = arith.mulf %15, %15 : vector<8x256xf32>
      %cst_16 = arith.constant dense<0.000000e+00> : vector<256xf32>
      %20 = vector.multi_reduction <add>, %19, %cst_16 [0] : vector<8x256xf32> to vector<256xf32>
      %21 = vector.shape_cast %20 : vector<256xf32> to vector<1x256xf32>
      %cst_17 = arith.constant 0.000000e+00 : f32
      %22 = vector.broadcast %cst_17 : f32 to vector<6x256xf32>
      %23 = tpu.concatenate %18, %21, %22 in 0 : vector<1x256xf32>, vector<1x256xf32>, vector<6x256xf32> -> vector<8x256xf32>
      %c0_18 = arith.constant 0 : index
      %c0_19 = arith.constant 0 : index
      %24 = vector.load %arg6[%c0_18, %c0_19] : memref<8x256xf32, #tpu.memory_space<vmem>>, vector<8x256xf32>
      tpu.vector_store %arg6[%c0_18, %c0_19], %23 {strides = array<i32>} : memref<8x256xf32, #tpu.memory_space<vmem>>, vector<8x256xf32>,
    } else {
    }
    return
  }
  func.func @transform_0(%arg0: i32, %arg1: i32) -> (i32, i32) {
    %c0_i32 = arith.constant 0 : i32
    return %arg0, %arg1 : i32, i32
  }
  func.func @transform_1(%arg0: i32, %arg1: i32) -> (i32, i32) {
    %c0_i32 = arith.constant 0 : i32
    %c0_i32_0 = arith.constant 0 : i32
    return %arg1, %c0_i32 : i32, i32
  }
  func.func @transform_2(%arg0: i32, %arg1: i32) -> (i32, i32) {
    %c0_i32 = arith.constant 0 : i32
    %c0_i32_0 = arith.constant 0 : i32
    %c0_i32_1 = arith.constant 0 : i32
    return %c0_i32, %c0_i32_0 : i32, i32
  }
  func.func @transform_3(%arg0: i32, %arg1: i32) -> (i32, i32) {
    %c0_i32 = arith.constant 0 : i32
    %c0_i32_0 = arith.constant 0 : i32
    return %arg0, %c0_i32 : i32, i32
  }
  func.func @transform_4(%arg0: i32, %arg1: i32) -> (i32, i32) {
    %c0_i32 = arith.constant 0 : i32
    %c0_i32_0 = arith.constant 0 : i32
    return %arg0, %c0_i32 : i32, i32
  }
}

module attributes {stable_mosaic.version = 11 : i64} {
  func.func @_matmul_kernel(%arg0: i32, %arg1: i32, %arg2: memref<8x128xbf16, #tpu.memory_space<vmem>>, %arg3: memref<128x1024xbf16, #tpu.memory_space<vmem>>, %arg4: memref<1x1024xf32, #tpu.memory_space<vmem>>, %arg5: memref<8x1024xf32, #tpu.memory_space<vmem>>, %arg6: memref<8x1024xf32, #tpu.memory_space<vmem>>) attributes {dimension_semantics = [#tpu.dimension_semantics<parallel>, #tpu.dimension_semantics<arbitrary>], iteration_bounds = array<i64: 1, 1>, scalar_prefetch = 0 : i64, scratch_operands = 1 : i64, tpu.core_type = #tpu.core_type<tc>, window_params = [{transform_indices = @transform_0, window_bounds = array<i64: 8, 128>}, {transform_indices = @transform_1, window_bounds = array<i64: 128, 1024>}, {pipeline_mode = #tpu.pipeline_mode<synchronous>, transform_indices = @transform_2, window_bounds = array<i64: 1, 1024>}, {transform_indices = @transform_3, window_bounds = array<i64: 8, 1024>}]} {
    %c0_i32 = arith.constant 0 : i32
    %0 = arith.cmpi eq, %arg1, %c0_i32 : i32
    %1 = arith.extui %0 : i1 to i32
    %c0_i32_0 = arith.constant 0 : i32
    %2 = arith.cmpi ne, %1, %c0_i32_0 : i32
    scf.if %2 {
      %cst_10 = arith.constant 0.000000e+00 : f32
      %12 = vector.broadcast %cst_10 : f32 to vector<8x1024xf32>
      %c0_11 = arith.constant 0 : index
      %c0_12 = arith.constant 0 : index
      %13 = vector.load %arg6[%c0_11, %c0_12] : memref<8x1024xf32, #tpu.memory_space<vmem>>, vector<8x1024xf32>
      tpu.vector_store %arg6[%c0_11, %c0_12], %12 {strides = array<i32>} : memref<8x1024xf32, #tpu.memory_space<vmem>>, vector<8x1024xf32>,
    } else {
    }
    %c0 = arith.constant 0 : index
    %c0_1 = arith.constant 0 : index
    %3 = vector.load %arg6[%c0, %c0_1] : memref<8x1024xf32, #tpu.memory_space<vmem>>, vector<8x1024xf32>
    %c0_2 = arith.constant 0 : index
    %c0_3 = arith.constant 0 : index
    %4 = vector.load %arg2[%c0_2, %c0_3] : memref<8x128xbf16, #tpu.memory_space<vmem>>, vector<8x128xbf16>
    %c0_4 = arith.constant 0 : index
    %c0_5 = arith.constant 0 : index
    %5 = vector.load %arg3[%c0_4, %c0_5] : memref<128x1024xbf16, #tpu.memory_space<vmem>>, vector<128x1024xbf16>
    %cst = arith.constant dense<0.000000e+00> : vector<8x1024xf32>
    %6 = tpu.matmul %4, %5, %cst {dimension_numbers = #tpu.dot_dimension_numbers<[1], [0], [0], [1], [0, 0, 1, 1], [], []>} : vector<8x128xbf16>, vector<128x1024xbf16>, vector<8x1024xf32> -> vector<8x1024xf32>
    %7 = arith.addf %3, %6 : vector<8x1024xf32>
    %c0_6 = arith.constant 0 : index
    %c0_7 = arith.constant 0 : index
    %8 = vector.load %arg6[%c0_6, %c0_7] : memref<8x1024xf32, #tpu.memory_space<vmem>>, vector<8x1024xf32>
    tpu.vector_store %arg6[%c0_6, %c0_7], %7 {strides = array<i32>} : memref<8x1024xf32, #tpu.memory_space<vmem>>, vector<8x1024xf32>,
    %c0_i32_8 = arith.constant 0 : i32
    %9 = arith.cmpi eq, %arg1, %c0_i32_8 : i32
    %10 = arith.extui %9 : i1 to i32
    %c0_i32_9 = arith.constant 0 : i32
    %11 = arith.cmpi ne, %10, %c0_i32_9 : i32
    scf.if %11 {
      %c0_10 = arith.constant 0 : index
      %c0_11 = arith.constant 0 : index
      %12 = vector.load %arg6[%c0_10, %c0_11] : memref<8x1024xf32, #tpu.memory_space<vmem>>, vector<8x1024xf32>
      %c0_12 = arith.constant 0 : index
      %c0_13 = arith.constant 0 : index
      %13 = vector.load %arg4[%c0_12, %c0_13] : memref<1x1024xf32, #tpu.memory_space<vmem>>, vector<1x1024xf32>
      %14 = vector.broadcast %13 : vector<1x1024xf32> to vector<8x1024xf32>
      %15 = arith.addf %12, %14 : vector<8x1024xf32>
      %c0_14 = arith.constant 0 : index
      %c0_15 = arith.constant 0 : index
      %16 = vector.load %arg5[%c0_14, %c0_15] : memref<8x1024xf32, #tpu.memory_space<vmem>>, vector<8x1024xf32>
      tpu.vector_store %arg5[%c0_14, %c0_15], %15 {strides = array<i32>} : memref<8x1024xf32, #tpu.memory_space<vmem>>, vector<8x1024xf32>,
    } else {
    }
    return
  }
  func.func @transform_0(%arg0: i32, %arg1: i32) -> (i32, i32) {
    %c0_i32 = arith.constant 0 : i32
    return %arg0, %arg1 : i32, i32
  }
  func.func @transform_1(%arg0: i32, %arg1: i32) -> (i32, i32) {
    %c0_i32 = arith.constant 0 : i32
    %c0_i32_0 = arith.constant 0 : i32
    return %arg1, %c0_i32 : i32, i32
  }
  func.func @transform_2(%arg0: i32, %arg1: i32) -> (i32, i32) {
    %c0_i32 = arith.constant 0 : i32
    %c0_i32_0 = arith.constant 0 : i32
    %c0_i32_1 = arith.constant 0 : i32
    return %c0_i32, %c0_i32_0 : i32, i32
  }
  func.func @transform_3(%arg0: i32, %arg1: i32) -> (i32, i32) {
    %c0_i32 = arith.constant 0 : i32
    %c0_i32_0 = arith.constant 0 : i32
    return %arg0, %c0_i32 : i32, i32
  }
}

module attributes {stable_mosaic.version = 11 : i64} {
  func.func @_matmul_kernel(%arg0: i32, %arg1: i32, %arg2: memref<8x1024xbf16, #tpu.memory_space<vmem>>, %arg3: memref<1024x256xbf16, #tpu.memory_space<vmem>>, %arg4: memref<1x256xf32, #tpu.memory_space<vmem>>, %arg5: memref<8x256xf32, #tpu.memory_space<vmem>>, %arg6: memref<8x256xf32, #tpu.memory_space<vmem>>) attributes {dimension_semantics = [#tpu.dimension_semantics<parallel>, #tpu.dimension_semantics<arbitrary>], iteration_bounds = array<i64: 1, 1>, scalar_prefetch = 0 : i64, scratch_operands = 1 : i64, tpu.core_type = #tpu.core_type<tc>, window_params = [{transform_indices = @transform_0, window_bounds = array<i64: 8, 1024>}, {transform_indices = @transform_1, window_bounds = array<i64: 1024, 256>}, {pipeline_mode = #tpu.pipeline_mode<synchronous>, transform_indices = @transform_2, window_bounds = array<i64: 1, 256>}, {transform_indices = @transform_3, window_bounds = array<i64: 8, 256>}]} {
    %c0_i32 = arith.constant 0 : i32
    %0 = arith.cmpi eq, %arg1, %c0_i32 : i32
    %1 = arith.extui %0 : i1 to i32
    %c0_i32_0 = arith.constant 0 : i32
    %2 = arith.cmpi ne, %1, %c0_i32_0 : i32
    scf.if %2 {
      %cst_10 = arith.constant 0.000000e+00 : f32
      %12 = vector.broadcast %cst_10 : f32 to vector<8x256xf32>
      %c0_11 = arith.constant 0 : index
      %c0_12 = arith.constant 0 : index
      %13 = vector.load %arg6[%c0_11, %c0_12] : memref<8x256xf32, #tpu.memory_space<vmem>>, vector<8x256xf32>
      tpu.vector_store %arg6[%c0_11, %c0_12], %12 {strides = array<i32>} : memref<8x256xf32, #tpu.memory_space<vmem>>, vector<8x256xf32>,
    } else {
    }
    %c0 = arith.constant 0 : index
    %c0_1 = arith.constant 0 : index
    %3 = vector.load %arg6[%c0, %c0_1] : memref<8x256xf32, #tpu.memory_space<vmem>>, vector<8x256xf32>
    %c0_2 = arith.constant 0 : index
    %c0_3 = arith.constant 0 : index
    %4 = vector.load %arg2[%c0_2, %c0_3] : memref<8x1024xbf16, #tpu.memory_space<vmem>>, vector<8x1024xbf16>
    %c0_4 = arith.constant 0 : index
    %c0_5 = arith.constant 0 : index
    %5 = vector.load %arg3[%c0_4, %c0_5] : memref<1024x256xbf16, #tpu.memory_space<vmem>>, vector<1024x256xbf16>
    %cst = arith.constant dense<0.000000e+00> : vector<8x256xf32>
    %6 = tpu.matmul %4, %5, %cst {dimension_numbers = #tpu.dot_dimension_numbers<[1], [0], [0], [1], [0, 0, 1, 1], [], []>} : vector<8x1024xbf16>, vector<1024x256xbf16>, vector<8x256xf32> -> vector<8x256xf32>
    %7 = arith.addf %3, %6 : vector<8x256xf32>
    %c0_6 = arith.constant 0 : index
    %c0_7 = arith.constant 0 : index
    %8 = vector.load %arg6[%c0_6, %c0_7] : memref<8x256xf32, #tpu.memory_space<vmem>>, vector<8x256xf32>
    tpu.vector_store %arg6[%c0_6, %c0_7], %7 {strides = array<i32>} : memref<8x256xf32, #tpu.memory_space<vmem>>, vector<8x256xf32>,
    %c0_i32_8 = arith.constant 0 : i32
    %9 = arith.cmpi eq, %arg1, %c0_i32_8 : i32
    %10 = arith.extui %9 : i1 to i32
    %c0_i32_9 = arith.constant 0 : i32
    %11 = arith.cmpi ne, %10, %c0_i32_9 : i32
    scf.if %11 {
      %c0_10 = arith.constant 0 : index
      %c0_11 = arith.constant 0 : index
      %12 = vector.load %arg6[%c0_10, %c0_11] : memref<8x256xf32, #tpu.memory_space<vmem>>, vector<8x256xf32>
      %c0_12 = arith.constant 0 : index
      %c0_13 = arith.constant 0 : index
      %13 = vector.load %arg4[%c0_12, %c0_13] : memref<1x256xf32, #tpu.memory_space<vmem>>, vector<1x256xf32>
      %14 = vector.broadcast %13 : vector<1x256xf32> to vector<8x256xf32>
      %15 = arith.addf %12, %14 : vector<8x256xf32>
      %c0_14 = arith.constant 0 : index
      %c0_15 = arith.constant 0 : index
      %16 = vector.load %arg5[%c0_14, %c0_15] : memref<8x256xf32, #tpu.memory_space<vmem>>, vector<8x256xf32>
      tpu.vector_store %arg5[%c0_14, %c0_15], %15 {strides = array<i32>} : memref<8x256xf32, #tpu.memory_space<vmem>>, vector<8x256xf32>,
    } else {
    }
    return
  }
  func.func @transform_0(%arg0: i32, %arg1: i32) -> (i32, i32) {
    %c0_i32 = arith.constant 0 : i32
    return %arg0, %arg1 : i32, i32
  }
  func.func @transform_1(%arg0: i32, %arg1: i32) -> (i32, i32) {
    %c0_i32 = arith.constant 0 : i32
    %c0_i32_0 = arith.constant 0 : i32
    return %arg1, %c0_i32 : i32, i32
  }
  func.func @transform_2(%arg0: i32, %arg1: i32) -> (i32, i32) {
    %c0_i32 = arith.constant 0 : i32
    %c0_i32_0 = arith.constant 0 : i32
    %c0_i32_1 = arith.constant 0 : i32
    return %c0_i32, %c0_i32_0 : i32, i32
  }
  func.func @transform_3(%arg0: i32, %arg1: i32) -> (i32, i32) {
    %c0_i32 = arith.constant 0 : i32
    %c0_i32_0 = arith.constant 0 : i32
    return %arg0, %c0_i32 : i32, i32
  }
}

module attributes {stable_mosaic.version = 11 : i64} {
  func.func @_affine_kernel(%arg0: i32, %arg1: memref<8x256xf32, #tpu.memory_space<vmem>>, %arg2: memref<1x256xf32, #tpu.memory_space<vmem>>, %arg3: memref<1x256xf32, #tpu.memory_space<vmem>>, %arg4: memref<8x256xf32, #tpu.memory_space<vmem>>) attributes {dimension_semantics = [#tpu.dimension_semantics<parallel>], iteration_bounds = array<i64: 1>, scalar_prefetch = 0 : i64, scratch_operands = 0 : i64, tpu.core_type = #tpu.core_type<tc>, window_params = [{transform_indices = @transform_0, window_bounds = array<i64: 8, 256>}, {pipeline_mode = #tpu.pipeline_mode<synchronous>, transform_indices = @transform_1, window_bounds = array<i64: 1, 256>}, {pipeline_mode = #tpu.pipeline_mode<synchronous>, transform_indices = @transform_2, window_bounds = array<i64: 1, 256>}, {transform_indices = @transform_3, window_bounds = array<i64: 8, 256>}]} {
    %c0 = arith.constant 0 : index
    %c0_0 = arith.constant 0 : index
    %0 = vector.load %arg1[%c0, %c0_0] : memref<8x256xf32, #tpu.memory_space<vmem>>, vector<8x256xf32>
    %c0_1 = arith.constant 0 : index
    %c0_2 = arith.constant 0 : index
    %1 = vector.load %arg2[%c0_1, %c0_2] : memref<1x256xf32, #tpu.memory_space<vmem>>, vector<1x256xf32>
    %2 = vector.broadcast %1 : vector<1x256xf32> to vector<8x256xf32>
    %3 = arith.mulf %0, %2 : vector<8x256xf32>
    %c0_3 = arith.constant 0 : index
    %c0_4 = arith.constant 0 : index
    %4 = vector.load %arg3[%c0_3, %c0_4] : memref<1x256xf32, #tpu.memory_space<vmem>>, vector<1x256xf32>
    %5 = vector.broadcast %4 : vector<1x256xf32> to vector<8x256xf32>
    %6 = arith.addf %3, %5 : vector<8x256xf32>
    %c0_5 = arith.constant 0 : index
    %c0_6 = arith.constant 0 : index
    %7 = vector.load %arg4[%c0_5, %c0_6] : memref<8x256xf32, #tpu.memory_space<vmem>>, vector<8x256xf32>
    tpu.vector_store %arg4[%c0_5, %c0_6], %6 {strides = array<i32>} : memref<8x256xf32, #tpu.memory_space<vmem>>, vector<8x256xf32>,
    return
  }
  func.func @transform_0(%arg0: i32) -> (i32, i32) {
    %c0_i32 = arith.constant 0 : i32
    %c0_i32_0 = arith.constant 0 : i32
    return %arg0, %c0_i32 : i32, i32
  }
  func.func @transform_1(%arg0: i32) -> (i32, i32) {
    %c0_i32 = arith.constant 0 : i32
    %c0_i32_0 = arith.constant 0 : i32
    %c0_i32_1 = arith.constant 0 : i32
    return %c0_i32, %c0_i32_0 : i32, i32
  }
  func.func @transform_2(%arg0: i32) -> (i32, i32) {
    %c0_i32 = arith.constant 0 : i32
    %c0_i32_0 = arith.constant 0 : i32
    %c0_i32_1 = arith.constant 0 : i32
    return %c0_i32, %c0_i32_0 : i32, i32
  }
  func.func @transform_3(%arg0: i32) -> (i32, i32) {
    %c0_i32 = arith.constant 0 : i32
    %c0_i32_0 = arith.constant 0 : i32
    return %arg0, %c0_i32 : i32, i32
  }
}

module attributes {stable_mosaic.version = 11 : i64} {
  func.func @_matmul_kernel(%arg0: i32, %arg1: i32, %arg2: memref<8x256xbf16, #tpu.memory_space<vmem>>, %arg3: memref<256x256xbf16, #tpu.memory_space<vmem>>, %arg4: memref<8x256xf32, #tpu.memory_space<vmem>>, %arg5: memref<8x256xf32, #tpu.memory_space<vmem>>, %arg6: memref<8x256xf32, #tpu.memory_space<vmem>>, %arg7: memref<8x256xf32, #tpu.memory_space<vmem>>) attributes {dimension_semantics = [#tpu.dimension_semantics<parallel>, #tpu.dimension_semantics<arbitrary>], iteration_bounds = array<i64: 1, 1>, scalar_prefetch = 0 : i64, scratch_operands = 1 : i64, tpu.core_type = #tpu.core_type<tc>, window_params = [{transform_indices = @transform_0, window_bounds = array<i64: 8, 256>}, {transform_indices = @transform_1, window_bounds = array<i64: 256, 256>}, {transform_indices = @transform_2, window_bounds = array<i64: 8, 256>}, {transform_indices = @transform_3, window_bounds = array<i64: 8, 256>}, {transform_indices = @transform_4, window_bounds = array<i64: 8, 256>}]} {
    %c0_i32 = arith.constant 0 : i32
    %0 = arith.cmpi eq, %arg1, %c0_i32 : i32
    %1 = arith.extui %0 : i1 to i32
    %c0_i32_0 = arith.constant 0 : i32
    %2 = arith.cmpi ne, %1, %c0_i32_0 : i32
    scf.if %2 {
      %cst_10 = arith.constant 0.000000e+00 : f32
      %12 = vector.broadcast %cst_10 : f32 to vector<8x256xf32>
      %c0_11 = arith.constant 0 : index
      %c0_12 = arith.constant 0 : index
      %13 = vector.load %arg7[%c0_11, %c0_12] : memref<8x256xf32, #tpu.memory_space<vmem>>, vector<8x256xf32>
      tpu.vector_store %arg7[%c0_11, %c0_12], %12 {strides = array<i32>} : memref<8x256xf32, #tpu.memory_space<vmem>>, vector<8x256xf32>,
    } else {
    }
    %c0 = arith.constant 0 : index
    %c0_1 = arith.constant 0 : index
    %3 = vector.load %arg7[%c0, %c0_1] : memref<8x256xf32, #tpu.memory_space<vmem>>, vector<8x256xf32>
    %c0_2 = arith.constant 0 : index
    %c0_3 = arith.constant 0 : index
    %4 = vector.load %arg2[%c0_2, %c0_3] : memref<8x256xbf16, #tpu.memory_space<vmem>>, vector<8x256xbf16>
    %c0_4 = arith.constant 0 : index
    %c0_5 = arith.constant 0 : index
    %5 = vector.load %arg3[%c0_4, %c0_5] : memref<256x256xbf16, #tpu.memory_space<vmem>>, vector<256x256xbf16>
    %cst = arith.constant dense<0.000000e+00> : vector<8x256xf32>
    %6 = tpu.matmul %4, %5, %cst {dimension_numbers = #tpu.dot_dimension_numbers<[1], [0], [0], [1], [0, 0, 1, 1], [], []>} : vector<8x256xbf16>, vector<256x256xbf16>, vector<8x256xf32> -> vector<8x256xf32>
    %7 = arith.addf %3, %6 : vector<8x256xf32>
    %c0_6 = arith.constant 0 : index
    %c0_7 = arith.constant 0 : index
    %8 = vector.load %arg7[%c0_6, %c0_7] : memref<8x256xf32, #tpu.memory_space<vmem>>, vector<8x256xf32>
    tpu.vector_store %arg7[%c0_6, %c0_7], %7 {strides = array<i32>} : memref<8x256xf32, #tpu.memory_space<vmem>>, vector<8x256xf32>,
    %c0_i32_8 = arith.constant 0 : i32
    %9 = arith.cmpi eq, %arg1, %c0_i32_8 : i32
    %10 = arith.extui %9 : i1 to i32
    %c0_i32_9 = arith.constant 0 : i32
    %11 = arith.cmpi ne, %10, %c0_i32_9 : i32
    scf.if %11 {
      %c0_10 = arith.constant 0 : index
      %c0_11 = arith.constant 0 : index
      %12 = vector.load %arg7[%c0_10, %c0_11] : memref<8x256xf32, #tpu.memory_space<vmem>>, vector<8x256xf32>
      %c0_12 = arith.constant 0 : index
      %c0_13 = arith.constant 0 : index
      %13 = vector.load %arg4[%c0_12, %c0_13] : memref<8x256xf32, #tpu.memory_space<vmem>>, vector<8x256xf32>
      %14 = arith.addf %12, %13 : vector<8x256xf32>
      %cst_14 = arith.constant 0.000000e+00 : f32
      %15 = vector.broadcast %cst_14 : f32 to vector<8x256xf32>
      %16 = arith.maximumf %14, %15 : vector<8x256xf32>
      %c0_15 = arith.constant 0 : index
      %c0_16 = arith.constant 0 : index
      %17 = vector.load %arg5[%c0_15, %c0_16] : memref<8x256xf32, #tpu.memory_space<vmem>>, vector<8x256xf32>
      tpu.vector_store %arg5[%c0_15, %c0_16], %16 {strides = array<i32>} : memref<8x256xf32, #tpu.memory_space<vmem>>, vector<8x256xf32>,
      %cst_17 = arith.constant dense<0.000000e+00> : vector<256xf32>
      %18 = vector.multi_reduction <add>, %16, %cst_17 [0] : vector<8x256xf32> to vector<256xf32>
      %19 = vector.shape_cast %18 : vector<256xf32> to vector<1x256xf32>
      %20 = arith.mulf %16, %16 : vector<8x256xf32>
      %cst_18 = arith.constant dense<0.000000e+00> : vector<256xf32>
      %21 = vector.multi_reduction <add>, %20, %cst_18 [0] : vector<8x256xf32> to vector<256xf32>
      %22 = vector.shape_cast %21 : vector<256xf32> to vector<1x256xf32>
      %cst_19 = arith.constant 0.000000e+00 : f32
      %23 = vector.broadcast %cst_19 : f32 to vector<6x256xf32>
      %24 = tpu.concatenate %19, %22, %23 in 0 : vector<1x256xf32>, vector<1x256xf32>, vector<6x256xf32> -> vector<8x256xf32>
      %c0_20 = arith.constant 0 : index
      %c0_21 = arith.constant 0 : index
      %25 = vector.load %arg6[%c0_20, %c0_21] : memref<8x256xf32, #tpu.memory_space<vmem>>, vector<8x256xf32>
      tpu.vector_store %arg6[%c0_20, %c0_21], %24 {strides = array<i32>} : memref<8x256xf32, #tpu.memory_space<vmem>>, vector<8x256xf32>,
    } else {
    }
    return
  }
  func.func @transform_0(%arg0: i32, %arg1: i32) -> (i32, i32) {
    %c0_i32 = arith.constant 0 : i32
    return %arg0, %arg1 : i32, i32
  }
  func.func @transform_1(%arg0: i32, %arg1: i32) -> (i32, i32) {
    %c0_i32 = arith.constant 0 : i32
    %c0_i32_0 = arith.constant 0 : i32
    return %arg1, %c0_i32 : i32, i32
  }
  func.func @transform_2(%arg0: i32, %arg1: i32) -> (i32, i32) {
    %c0_i32 = arith.constant 0 : i32
    %c0_i32_0 = arith.constant 0 : i32
    return %arg0, %c0_i32 : i32, i32
  }
  func.func @transform_3(%arg0: i32, %arg1: i32) -> (i32, i32) {
    %c0_i32 = arith.constant 0 : i32
    %c0_i32_0 = arith.constant 0 : i32
    return %arg0, %c0_i32 : i32, i32
  }
  func.func @transform_4(%arg0: i32, %arg1: i32) -> (i32, i32) {
    %c0_i32 = arith.constant 0 : i32
    %c0_i32_0 = arith.constant 0 : i32
    return %arg0, %c0_i32 : i32, i32
  }
}

module attributes {stable_mosaic.version = 11 : i64} {
  func.func @_matmul_kernel(%arg0: i32, %arg1: i32, %arg2: memref<8x512xbf16, #tpu.memory_space<vmem>>, %arg3: memref<512x128xbf16, #tpu.memory_space<vmem>>, %arg4: memref<1x128xf32, #tpu.memory_space<vmem>>, %arg5: memref<8x128xf32, #tpu.memory_space<vmem>>, %arg6: memref<8x128xf32, #tpu.memory_space<vmem>>, %arg7: memref<8x128xf32, #tpu.memory_space<vmem>>) attributes {dimension_semantics = [#tpu.dimension_semantics<parallel>, #tpu.dimension_semantics<arbitrary>], iteration_bounds = array<i64: 1, 5>, scalar_prefetch = 0 : i64, scratch_operands = 1 : i64, tpu.core_type = #tpu.core_type<tc>, window_params = [{transform_indices = @transform_0, window_bounds = array<i64: 8, 512>}, {transform_indices = @transform_1, window_bounds = array<i64: 512, 128>}, {pipeline_mode = #tpu.pipeline_mode<synchronous>, transform_indices = @transform_2, window_bounds = array<i64: 1, 128>}, {transform_indices = @transform_3, window_bounds = array<i64: 8, 128>}, {transform_indices = @transform_4, window_bounds = array<i64: 8, 128>}]} {
    %c0_i32 = arith.constant 0 : i32
    %0 = arith.cmpi eq, %arg1, %c0_i32 : i32
    %1 = arith.extui %0 : i1 to i32
    %c0_i32_0 = arith.constant 0 : i32
    %2 = arith.cmpi ne, %1, %c0_i32_0 : i32
    scf.if %2 {
      %cst_9 = arith.constant 0.000000e+00 : f32
      %12 = vector.broadcast %cst_9 : f32 to vector<8x128xf32>
      %c0_10 = arith.constant 0 : index
      %c0_11 = arith.constant 0 : index
      %13 = vector.load %arg7[%c0_10, %c0_11] : memref<8x128xf32, #tpu.memory_space<vmem>>, vector<8x128xf32>
      tpu.vector_store %arg7[%c0_10, %c0_11], %12 {strides = array<i32>} : memref<8x128xf32, #tpu.memory_space<vmem>>, vector<8x128xf32>,
    } else {
    }
    %c0 = arith.constant 0 : index
    %c0_1 = arith.constant 0 : index
    %3 = vector.load %arg7[%c0, %c0_1] : memref<8x128xf32, #tpu.memory_space<vmem>>, vector<8x128xf32>
    %c0_2 = arith.constant 0 : index
    %c0_3 = arith.constant 0 : index
    %4 = vector.load %arg2[%c0_2, %c0_3] : memref<8x512xbf16, #tpu.memory_space<vmem>>, vector<8x512xbf16>
    %c0_4 = arith.constant 0 : index
    %c0_5 = arith.constant 0 : index
    %5 = vector.load %arg3[%c0_4, %c0_5] : memref<512x128xbf16, #tpu.memory_space<vmem>>, vector<512x128xbf16>
    %cst = arith.constant dense<0.000000e+00> : vector<8x128xf32>
    %6 = tpu.matmul %4, %5, %cst {dimension_numbers = #tpu.dot_dimension_numbers<[1], [0], [0], [1], [0, 0, 1, 1], [], []>} : vector<8x512xbf16>, vector<512x128xbf16>, vector<8x128xf32> -> vector<8x128xf32>
    %7 = arith.addf %3, %6 : vector<8x128xf32>
    %c0_6 = arith.constant 0 : index
    %c0_7 = arith.constant 0 : index
    %8 = vector.load %arg7[%c0_6, %c0_7] : memref<8x128xf32, #tpu.memory_space<vmem>>, vector<8x128xf32>
    tpu.vector_store %arg7[%c0_6, %c0_7], %7 {strides = array<i32>} : memref<8x128xf32, #tpu.memory_space<vmem>>, vector<8x128xf32>,
    %c4_i32 = arith.constant 4 : i32
    %9 = arith.cmpi eq, %arg1, %c4_i32 : i32
    %10 = arith.extui %9 : i1 to i32
    %c0_i32_8 = arith.constant 0 : i32
    %11 = arith.cmpi ne, %10, %c0_i32_8 : i32
    scf.if %11 {
      %c0_9 = arith.constant 0 : index
      %c0_10 = arith.constant 0 : index
      %12 = vector.load %arg7[%c0_9, %c0_10] : memref<8x128xf32, #tpu.memory_space<vmem>>, vector<8x128xf32>
      %c0_11 = arith.constant 0 : index
      %c0_12 = arith.constant 0 : index
      %13 = vector.load %arg4[%c0_11, %c0_12] : memref<1x128xf32, #tpu.memory_space<vmem>>, vector<1x128xf32>
      %14 = vector.broadcast %13 : vector<1x128xf32> to vector<8x128xf32>
      %15 = arith.addf %12, %14 : vector<8x128xf32>
      %c0_13 = arith.constant 0 : index
      %c0_14 = arith.constant 0 : index
      %16 = vector.load %arg5[%c0_13, %c0_14] : memref<8x128xf32, #tpu.memory_space<vmem>>, vector<8x128xf32>
      tpu.vector_store %arg5[%c0_13, %c0_14], %15 {strides = array<i32>} : memref<8x128xf32, #tpu.memory_space<vmem>>, vector<8x128xf32>,
      %cst_15 = arith.constant dense<0.000000e+00> : vector<128xf32>
      %17 = vector.multi_reduction <add>, %15, %cst_15 [0] : vector<8x128xf32> to vector<128xf32>
      %18 = vector.shape_cast %17 : vector<128xf32> to vector<1x128xf32>
      %19 = arith.mulf %15, %15 : vector<8x128xf32>
      %cst_16 = arith.constant dense<0.000000e+00> : vector<128xf32>
      %20 = vector.multi_reduction <add>, %19, %cst_16 [0] : vector<8x128xf32> to vector<128xf32>
      %21 = vector.shape_cast %20 : vector<128xf32> to vector<1x128xf32>
      %cst_17 = arith.constant 0.000000e+00 : f32
      %22 = vector.broadcast %cst_17 : f32 to vector<6x128xf32>
      %23 = tpu.concatenate %18, %21, %22 in 0 : vector<1x128xf32>, vector<1x128xf32>, vector<6x128xf32> -> vector<8x128xf32>
      %c0_18 = arith.constant 0 : index
      %c0_19 = arith.constant 0 : index
      %24 = vector.load %arg6[%c0_18, %c0_19] : memref<8x128xf32, #tpu.memory_space<vmem>>, vector<8x128xf32>
      tpu.vector_store %arg6[%c0_18, %c0_19], %23 {strides = array<i32>} : memref<8x128xf32, #tpu.memory_space<vmem>>, vector<8x128xf32>,
    } else {
    }
    return
  }
  func.func @transform_0(%arg0: i32, %arg1: i32) -> (i32, i32) {
    %c0_i32 = arith.constant 0 : i32
    return %arg0, %arg1 : i32, i32
  }
  func.func @transform_1(%arg0: i32, %arg1: i32) -> (i32, i32) {
    %c0_i32 = arith.constant 0 : i32
    %c0_i32_0 = arith.constant 0 : i32
    return %arg1, %c0_i32 : i32, i32
  }
  func.func @transform_2(%arg0: i32, %arg1: i32) -> (i32, i32) {
    %c0_i32 = arith.constant 0 : i32
    %c0_i32_0 = arith.constant 0 : i32
    %c0_i32_1 = arith.constant 0 : i32
    return %c0_i32, %c0_i32_0 : i32, i32
  }
  func.func @transform_3(%arg0: i32, %arg1: i32) -> (i32, i32) {
    %c0_i32 = arith.constant 0 : i32
    %c0_i32_0 = arith.constant 0 : i32
    return %arg0, %c0_i32 : i32, i32
  }
  func.func @transform_4(%arg0: i32, %arg1: i32) -> (i32, i32) {
    %c0_i32 = arith.constant 0 : i32
    %c0_i32_0 = arith.constant 0 : i32
    return %arg0, %c0_i32 : i32, i32
  }
}

module attributes {stable_mosaic.version = 11 : i64} {
  func.func @_affine_kernel(%arg0: i32, %arg1: memref<8x128xf32, #tpu.memory_space<vmem>>, %arg2: memref<1x128xf32, #tpu.memory_space<vmem>>, %arg3: memref<1x128xf32, #tpu.memory_space<vmem>>, %arg4: memref<8x128xf32, #tpu.memory_space<vmem>>) attributes {dimension_semantics = [#tpu.dimension_semantics<parallel>], iteration_bounds = array<i64: 1>, scalar_prefetch = 0 : i64, scratch_operands = 0 : i64, tpu.core_type = #tpu.core_type<tc>, window_params = [{transform_indices = @transform_0, window_bounds = array<i64: 8, 128>}, {pipeline_mode = #tpu.pipeline_mode<synchronous>, transform_indices = @transform_1, window_bounds = array<i64: 1, 128>}, {pipeline_mode = #tpu.pipeline_mode<synchronous>, transform_indices = @transform_2, window_bounds = array<i64: 1, 128>}, {transform_indices = @transform_3, window_bounds = array<i64: 8, 128>}]} {
    %c0 = arith.constant 0 : index
    %c0_0 = arith.constant 0 : index
    %0 = vector.load %arg1[%c0, %c0_0] : memref<8x128xf32, #tpu.memory_space<vmem>>, vector<8x128xf32>
    %c0_1 = arith.constant 0 : index
    %c0_2 = arith.constant 0 : index
    %1 = vector.load %arg2[%c0_1, %c0_2] : memref<1x128xf32, #tpu.memory_space<vmem>>, vector<1x128xf32>
    %2 = vector.broadcast %1 : vector<1x128xf32> to vector<8x128xf32>
    %3 = arith.mulf %0, %2 : vector<8x128xf32>
    %c0_3 = arith.constant 0 : index
    %c0_4 = arith.constant 0 : index
    %4 = vector.load %arg3[%c0_3, %c0_4] : memref<1x128xf32, #tpu.memory_space<vmem>>, vector<1x128xf32>
    %5 = vector.broadcast %4 : vector<1x128xf32> to vector<8x128xf32>
    %6 = arith.addf %3, %5 : vector<8x128xf32>
    %cst = arith.constant 0.000000e+00 : f32
    %7 = vector.broadcast %cst : f32 to vector<8x128xf32>
    %8 = arith.maximumf %6, %7 : vector<8x128xf32>
    %c0_5 = arith.constant 0 : index
    %c0_6 = arith.constant 0 : index
    %9 = vector.load %arg4[%c0_5, %c0_6] : memref<8x128xf32, #tpu.memory_space<vmem>>, vector<8x128xf32>
    tpu.vector_store %arg4[%c0_5, %c0_6], %8 {strides = array<i32>} : memref<8x128xf32, #tpu.memory_space<vmem>>, vector<8x128xf32>,
    return
  }
  func.func @transform_0(%arg0: i32) -> (i32, i32) {
    %c0_i32 = arith.constant 0 : i32
    %c0_i32_0 = arith.constant 0 : i32
    return %arg0, %c0_i32 : i32, i32
  }
  func.func @transform_1(%arg0: i32) -> (i32, i32) {
    %c0_i32 = arith.constant 0 : i32
    %c0_i32_0 = arith.constant 0 : i32
    %c0_i32_1 = arith.constant 0 : i32
    return %c0_i32, %c0_i32_0 : i32, i32
  }
  func.func @transform_2(%arg0: i32) -> (i32, i32) {
    %c0_i32 = arith.constant 0 : i32
    %c0_i32_0 = arith.constant 0 : i32
    %c0_i32_1 = arith.constant 0 : i32
    return %c0_i32, %c0_i32_0 : i32, i32
  }
  func.func @transform_3(%arg0: i32) -> (i32, i32) {
    %c0_i32 = arith.constant 0 : i32
    %c0_i32_0 = arith.constant 0 : i32
    return %arg0, %c0_i32 : i32, i32
  }
}

module attributes {stable_mosaic.version = 11 : i64} {
  func.func @_matmul_kernel(%arg0: i32, %arg1: i32, %arg2: memref<32x640xbf16, #tpu.memory_space<vmem>>, %arg3: memref<640x128xbf16, #tpu.memory_space<vmem>>, %arg4: memref<1x128xf32, #tpu.memory_space<vmem>>, %arg5: memref<32x128xf32, #tpu.memory_space<vmem>>, %arg6: memref<8x128xf32, #tpu.memory_space<vmem>>, %arg7: memref<32x128xf32, #tpu.memory_space<vmem>>) attributes {dimension_semantics = [#tpu.dimension_semantics<parallel>, #tpu.dimension_semantics<arbitrary>], iteration_bounds = array<i64: 1, 1>, scalar_prefetch = 0 : i64, scratch_operands = 1 : i64, tpu.core_type = #tpu.core_type<tc>, window_params = [{transform_indices = @transform_0, window_bounds = array<i64: 32, 640>}, {transform_indices = @transform_1, window_bounds = array<i64: 640, 128>}, {pipeline_mode = #tpu.pipeline_mode<synchronous>, transform_indices = @transform_2, window_bounds = array<i64: 1, 128>}, {transform_indices = @transform_3, window_bounds = array<i64: 32, 128>}, {transform_indices = @transform_4, window_bounds = array<i64: 8, 128>}]} {
    %c0_i32 = arith.constant 0 : i32
    %0 = arith.cmpi eq, %arg1, %c0_i32 : i32
    %1 = arith.extui %0 : i1 to i32
    %c0_i32_0 = arith.constant 0 : i32
    %2 = arith.cmpi ne, %1, %c0_i32_0 : i32
    scf.if %2 {
      %cst_10 = arith.constant 0.000000e+00 : f32
      %12 = vector.broadcast %cst_10 : f32 to vector<32x128xf32>
      %c0_11 = arith.constant 0 : index
      %c0_12 = arith.constant 0 : index
      %13 = vector.load %arg7[%c0_11, %c0_12] : memref<32x128xf32, #tpu.memory_space<vmem>>, vector<32x128xf32>
      tpu.vector_store %arg7[%c0_11, %c0_12], %12 {strides = array<i32>} : memref<32x128xf32, #tpu.memory_space<vmem>>, vector<32x128xf32>,
    } else {
    }
    %c0 = arith.constant 0 : index
    %c0_1 = arith.constant 0 : index
    %3 = vector.load %arg7[%c0, %c0_1] : memref<32x128xf32, #tpu.memory_space<vmem>>, vector<32x128xf32>
    %c0_2 = arith.constant 0 : index
    %c0_3 = arith.constant 0 : index
    %4 = vector.load %arg2[%c0_2, %c0_3] : memref<32x640xbf16, #tpu.memory_space<vmem>>, vector<32x640xbf16>
    %c0_4 = arith.constant 0 : index
    %c0_5 = arith.constant 0 : index
    %5 = vector.load %arg3[%c0_4, %c0_5] : memref<640x128xbf16, #tpu.memory_space<vmem>>, vector<640x128xbf16>
    %cst = arith.constant dense<0.000000e+00> : vector<32x128xf32>
    %6 = tpu.matmul %4, %5, %cst {dimension_numbers = #tpu.dot_dimension_numbers<[1], [0], [0], [1], [0, 0, 1, 1], [], []>} : vector<32x640xbf16>, vector<640x128xbf16>, vector<32x128xf32> -> vector<32x128xf32>
    %7 = arith.addf %3, %6 : vector<32x128xf32>
    %c0_6 = arith.constant 0 : index
    %c0_7 = arith.constant 0 : index
    %8 = vector.load %arg7[%c0_6, %c0_7] : memref<32x128xf32, #tpu.memory_space<vmem>>, vector<32x128xf32>
    tpu.vector_store %arg7[%c0_6, %c0_7], %7 {strides = array<i32>} : memref<32x128xf32, #tpu.memory_space<vmem>>, vector<32x128xf32>,
    %c0_i32_8 = arith.constant 0 : i32
    %9 = arith.cmpi eq, %arg1, %c0_i32_8 : i32
    %10 = arith.extui %9 : i1 to i32
    %c0_i32_9 = arith.constant 0 : i32
    %11 = arith.cmpi ne, %10, %c0_i32_9 : i32
    scf.if %11 {
      %c0_10 = arith.constant 0 : index
      %c0_11 = arith.constant 0 : index
      %12 = vector.load %arg7[%c0_10, %c0_11] : memref<32x128xf32, #tpu.memory_space<vmem>>, vector<32x128xf32>
      %c0_12 = arith.constant 0 : index
      %c0_13 = arith.constant 0 : index
      %13 = vector.load %arg4[%c0_12, %c0_13] : memref<1x128xf32, #tpu.memory_space<vmem>>, vector<1x128xf32>
      %14 = vector.broadcast %13 : vector<1x128xf32> to vector<32x128xf32>
      %15 = arith.addf %12, %14 : vector<32x128xf32>
      %c0_14 = arith.constant 0 : index
      %c0_15 = arith.constant 0 : index
      %16 = vector.load %arg5[%c0_14, %c0_15] : memref<32x128xf32, #tpu.memory_space<vmem>>, vector<32x128xf32>
      tpu.vector_store %arg5[%c0_14, %c0_15], %15 {strides = array<i32>} : memref<32x128xf32, #tpu.memory_space<vmem>>, vector<32x128xf32>,
      %cst_16 = arith.constant dense<0.000000e+00> : vector<128xf32>
      %17 = vector.multi_reduction <add>, %15, %cst_16 [0] : vector<32x128xf32> to vector<128xf32>
      %18 = vector.shape_cast %17 : vector<128xf32> to vector<1x128xf32>
      %19 = arith.mulf %15, %15 : vector<32x128xf32>
      %cst_17 = arith.constant dense<0.000000e+00> : vector<128xf32>
      %20 = vector.multi_reduction <add>, %19, %cst_17 [0] : vector<32x128xf32> to vector<128xf32>
      %21 = vector.shape_cast %20 : vector<128xf32> to vector<1x128xf32>
      %cst_18 = arith.constant 0.000000e+00 : f32
      %22 = vector.broadcast %cst_18 : f32 to vector<6x128xf32>
      %23 = tpu.concatenate %18, %21, %22 in 0 : vector<1x128xf32>, vector<1x128xf32>, vector<6x128xf32> -> vector<8x128xf32>
      %c0_19 = arith.constant 0 : index
      %c0_20 = arith.constant 0 : index
      %24 = vector.load %arg6[%c0_19, %c0_20] : memref<8x128xf32, #tpu.memory_space<vmem>>, vector<8x128xf32>
      tpu.vector_store %arg6[%c0_19, %c0_20], %23 {strides = array<i32>} : memref<8x128xf32, #tpu.memory_space<vmem>>, vector<8x128xf32>,
    } else {
    }
    return
  }
  func.func @transform_0(%arg0: i32, %arg1: i32) -> (i32, i32) {
    %c0_i32 = arith.constant 0 : i32
    return %arg0, %arg1 : i32, i32
  }
  func.func @transform_1(%arg0: i32, %arg1: i32) -> (i32, i32) {
    %c0_i32 = arith.constant 0 : i32
    %c0_i32_0 = arith.constant 0 : i32
    return %arg1, %c0_i32 : i32, i32
  }
  func.func @transform_2(%arg0: i32, %arg1: i32) -> (i32, i32) {
    %c0_i32 = arith.constant 0 : i32
    %c0_i32_0 = arith.constant 0 : i32
    %c0_i32_1 = arith.constant 0 : i32
    return %c0_i32, %c0_i32_0 : i32, i32
  }
  func.func @transform_3(%arg0: i32, %arg1: i32) -> (i32, i32) {
    %c0_i32 = arith.constant 0 : i32
    %c0_i32_0 = arith.constant 0 : i32
    return %arg0, %c0_i32 : i32, i32
  }
  func.func @transform_4(%arg0: i32, %arg1: i32) -> (i32, i32) {
    %c0_i32 = arith.constant 0 : i32
    %c0_i32_0 = arith.constant 0 : i32
    return %arg0, %c0_i32 : i32, i32
  }
}

module attributes {stable_mosaic.version = 11 : i64} {
  func.func @_matmul_kernel(%arg0: i32, %arg1: i32, %arg2: memref<128x384xbf16, #tpu.memory_space<vmem>>, %arg3: memref<384x128xbf16, #tpu.memory_space<vmem>>, %arg4: memref<1x128xf32, #tpu.memory_space<vmem>>, %arg5: memref<128x128xf32, #tpu.memory_space<vmem>>, %arg6: memref<128x128xf32, #tpu.memory_space<vmem>>) attributes {dimension_semantics = [#tpu.dimension_semantics<parallel>, #tpu.dimension_semantics<arbitrary>], iteration_bounds = array<i64: 1, 1>, scalar_prefetch = 0 : i64, scratch_operands = 1 : i64, tpu.core_type = #tpu.core_type<tc>, window_params = [{transform_indices = @transform_0, window_bounds = array<i64: 128, 384>}, {transform_indices = @transform_1, window_bounds = array<i64: 384, 128>}, {pipeline_mode = #tpu.pipeline_mode<synchronous>, transform_indices = @transform_2, window_bounds = array<i64: 1, 128>}, {transform_indices = @transform_3, window_bounds = array<i64: 128, 128>}]} {
    %c0_i32 = arith.constant 0 : i32
    %0 = arith.cmpi eq, %arg1, %c0_i32 : i32
    %1 = arith.extui %0 : i1 to i32
    %c0_i32_0 = arith.constant 0 : i32
    %2 = arith.cmpi ne, %1, %c0_i32_0 : i32
    scf.if %2 {
      %cst_10 = arith.constant 0.000000e+00 : f32
      %12 = vector.broadcast %cst_10 : f32 to vector<128x128xf32>
      %c0_11 = arith.constant 0 : index
      %c0_12 = arith.constant 0 : index
      %13 = vector.load %arg6[%c0_11, %c0_12] : memref<128x128xf32, #tpu.memory_space<vmem>>, vector<128x128xf32>
      tpu.vector_store %arg6[%c0_11, %c0_12], %12 {strides = array<i32>} : memref<128x128xf32, #tpu.memory_space<vmem>>, vector<128x128xf32>,
    } else {
    }
    %c0 = arith.constant 0 : index
    %c0_1 = arith.constant 0 : index
    %3 = vector.load %arg6[%c0, %c0_1] : memref<128x128xf32, #tpu.memory_space<vmem>>, vector<128x128xf32>
    %c0_2 = arith.constant 0 : index
    %c0_3 = arith.constant 0 : index
    %4 = vector.load %arg2[%c0_2, %c0_3] : memref<128x384xbf16, #tpu.memory_space<vmem>>, vector<128x384xbf16>
    %c0_4 = arith.constant 0 : index
    %c0_5 = arith.constant 0 : index
    %5 = vector.load %arg3[%c0_4, %c0_5] : memref<384x128xbf16, #tpu.memory_space<vmem>>, vector<384x128xbf16>
    %cst = arith.constant dense<0.000000e+00> : vector<128x128xf32>
    %6 = tpu.matmul %4, %5, %cst {dimension_numbers = #tpu.dot_dimension_numbers<[1], [0], [0], [1], [0, 0, 1, 1], [], []>} : vector<128x384xbf16>, vector<384x128xbf16>, vector<128x128xf32> -> vector<128x128xf32>
    %7 = arith.addf %3, %6 : vector<128x128xf32>
    %c0_6 = arith.constant 0 : index
    %c0_7 = arith.constant 0 : index
    %8 = vector.load %arg6[%c0_6, %c0_7] : memref<128x128xf32, #tpu.memory_space<vmem>>, vector<128x128xf32>
    tpu.vector_store %arg6[%c0_6, %c0_7], %7 {strides = array<i32>} : memref<128x128xf32, #tpu.memory_space<vmem>>, vector<128x128xf32>,
    %c0_i32_8 = arith.constant 0 : i32
    %9 = arith.cmpi eq, %arg1, %c0_i32_8 : i32
    %10 = arith.extui %9 : i1 to i32
    %c0_i32_9 = arith.constant 0 : i32
    %11 = arith.cmpi ne, %10, %c0_i32_9 : i32
    scf.if %11 {
      %c0_10 = arith.constant 0 : index
      %c0_11 = arith.constant 0 : index
      %12 = vector.load %arg6[%c0_10, %c0_11] : memref<128x128xf32, #tpu.memory_space<vmem>>, vector<128x128xf32>
      %c0_12 = arith.constant 0 : index
      %c0_13 = arith.constant 0 : index
      %13 = vector.load %arg4[%c0_12, %c0_13] : memref<1x128xf32, #tpu.memory_space<vmem>>, vector<1x128xf32>
      %14 = vector.broadcast %13 : vector<1x128xf32> to vector<128x128xf32>
      %15 = arith.addf %12, %14 : vector<128x128xf32>
      %16 = math.tanh %15 : vector<128x128xf32>
      %c0_14 = arith.constant 0 : index
      %c0_15 = arith.constant 0 : index
      %17 = vector.load %arg5[%c0_14, %c0_15] : memref<128x128xf32, #tpu.memory_space<vmem>>, vector<128x128xf32>
      tpu.vector_store %arg5[%c0_14, %c0_15], %16 {strides = array<i32>} : memref<128x128xf32, #tpu.memory_space<vmem>>, vector<128x128xf32>,
    } else {
    }
    return
  }
  func.func @transform_0(%arg0: i32, %arg1: i32) -> (i32, i32) {
    %c0_i32 = arith.constant 0 : i32
    return %arg0, %arg1 : i32, i32
  }
  func.func @transform_1(%arg0: i32, %arg1: i32) -> (i32, i32) {
    %c0_i32 = arith.constant 0 : i32
    %c0_i32_0 = arith.constant 0 : i32
    return %arg1, %c0_i32 : i32, i32
  }
  func.func @transform_2(%arg0: i32, %arg1: i32) -> (i32, i32) {
    %c0_i32 = arith.constant 0 : i32
    %c0_i32_0 = arith.constant 0 : i32
    %c0_i32_1 = arith.constant 0 : i32
    return %c0_i32, %c0_i32_0 : i32, i32
  }
  func.func @transform_3(%arg0: i32, %arg1: i32) -> (i32, i32) {
    %c0_i32 = arith.constant 0 : i32
    %c0_i32_0 = arith.constant 0 : i32
    return %arg0, %c0_i32 : i32, i32
  }
}

</mosaic_0001>

<bundles_post_ra>
// kernel: deep_koalarization_norm_forward.31
= control target key start
LH: loop header
LB: loop body
LE: loop exit
PB: predicated region body
PF: predicated region fallthrough
CT: control target
= control target key end

     0   :  { %s254_s0 = inlined_call_operand.vmem [shape: f32[128,128], index: 0, kind: input, shape index: {}]   ;;  %s255_s1 = inlined_call_operand.vmem [shape: f32[1,128], index: 1, kind: input, shape index: {}]   ;;  %s256_s2 = inlined_call_operand.vmem [shape: f32[1,128], index: 2, kind: input, shape index: {}]   ;;  %s257_s3 = inlined_call_operand.vmem [shape: f32[128,128], index: 3, kind: output, shape index: {}]  }
   0x1   :  { %v14_v0 = vld [vmem:[%s254_s0] sm:$0xff]  ;;  %v15_v4 = vld [vmem:[%s254_s0 + $0x8] sm:$0xff]  ;;  %v16_v5 = vld [vmem:[%s254_s0 + $0x10] sm:$0xff] }
   0x2   :  { %v112_v1 = vld [vmem:[%s255_s1] ss:$0 sm:$0xff]  ;;  %v17_v6 = vld [vmem:[%s254_s0 + $0x18] sm:$0xff]  ;;  %v19_v11 = vld [vmem:[%s254_s0 + $0x28] sm:$0xff] }
   0x3   :  { %v143_v2 = vld [vmem:[%s256_s2] ss:$0 sm:$0xff]  ;;  %v37_v3 = vmul.f32 %v112_v1, %v14_v0  ;;  %v38_v7 = vmul.f32 %v112_v1, %v15_v4  ;;  %v39_v8 = vmul.f32 %v112_v1, %v16_v5  ;;  %v40_v9 = vmul.f32 %v112_v1, %v17_v6  ;;  %v20_v12 = vld [vmem:[%s254_s0 + $0x30] sm:$0xff]  ;;  %v21_v17 = vld [vmem:[%s254_s0 + $0x38] sm:$0xff] }
   0x4   :  { %v18_v10 = vld [vmem:[%s254_s0 + $0x20] sm:$0xff]  ;;  %v42_v15 = vmul.f32 %v112_v1, %v19_v11  ;;  %v43_v16 = vmul.f32 %v112_v1, %v20_v12  ;;  %v44_v21 = vmul.f32 %v112_v1, %v21_v17  ;;  %v23_v27 = vld [vmem:[%s254_s0 + $0x48] sm:$0xff]  ;;  %v24_v28 = vld [vmem:[%s254_s0 + $0x50] sm:$0xff] }
   0x5   :  { %v60_v13 = vadd.f32 %v143_v2, %v37_v3  ;;  %v41_v14 = vmul.f32 %v112_v1, %v18_v10  ;;  %v61_v18 = vadd.f32 %v143_v2, %v38_v7  ;;  %v62_v19 = vadd.f32 %v143_v2, %v39_v8  ;;  %v22_v22 = vld [vmem:[%s254_s0 + $0x40] sm:$0xff]  ;;  %v25_v29 = vld [vmem:[%s254_s0 + $0x58] sm:$0xff]  ;;  %v27_v35 = vld [vmem:[%s254_s0 + $0x68] sm:$0xff] }
   0x6   :  { %v63_v20 = vadd.f32 %v143_v2, %v40_v9  ;;  %v65_v25 = vadd.f32 %v143_v2, %v42_v15  ;;  %v66_v26 = vadd.f32 %v143_v2, %v43_v16  ;;  %v67_v33 = vadd.f32 %v143_v2, %v44_v21  ;;  %v26_v34 = vld [vmem:[%s254_s0 + $0x60] sm:$0xff]  ;;  %v28_v36 = vld [vmem:[%s254_s0 + $0x70] sm:$0xff]  ;;  %v29_v41 = vld [vmem:[%s254_s0 + $0x78] sm:$0xff] }
   0x7   :  { %v76_v23 = vmax.f32 %v60_v13, 0.0  ;;  %v64_v24 = vadd.f32 %v143_v2, %v41_v14  ;;  %v77_v30 = vmax.f32 %v61_v18, 0.0  ;;  %v78_v31 = vmax.f32 %v62_v19, 0.0 }
   0x8   :  { %v79_v32 = vmax.f32 %v63_v20, 0.0  ;;  %v81_v38 = vmax.f32 %v65_v25, 0.0  ;;  %v82_v39 = vmax.f32 %v66_v26, 0.0  ;;  %v45_v40 = vmul.f32 %v112_v1, %v22_v22 }
   0x9   :  { %92 = vst [vmem:[%s257_s3] sm:$0xff] %v76_v23  ;;  %v80_v37 = vmax.f32 %v64_v24, 0.0  ;;  %93 = vst [vmem:[%s257_s3 + $0x8] sm:$0xff] %v77_v30  ;;  %v83_v42 = vmax.f32 %v67_v33, 0.0  ;;  %v46_v43 = vmul.f32 %v112_v1, %v23_v27  ;;  %v47_v44 = vmul.f32 %v112_v1, %v24_v28 }
   0xa   :  { %94 = vst [vmem:[%s257_s3 + $0x10] sm:$0xff] %v78_v31  ;;  %95 = vst [vmem:[%s257_s3 + $0x18] sm:$0xff] %v79_v32  ;;  %v48_v45 = vmul.f32 %v112_v1, %v25_v29  ;;  %v68_v46 = vadd.f32 %v143_v2, %v45_v40  ;;  %v49_v47 = vmul.f32 %v112_v1, %v26_v34 }
   0xb   :  { %96 = vst [vmem:[%s257_s3 + $0x20] sm:$0xff] %v80_v37  ;;  %97 = vst [vmem:[%s257_s3 + $0x28] sm:$0xff] %v81_v38  ;;  %v50_v48 = vmul.f32 %v112_v1, %v27_v35  ;;  %v51_v49 = vmul.f32 %v112_v1, %v28_v36  ;;  %v69_v50 = vadd.f32 %v143_v2, %v46_v43 }
   0xc   :  { %98 = vst [vmem:[%s257_s3 + $0x30] sm:$0xff] %v82_v39  ;;  %99 = vst [vmem:[%s257_s3 + $0x38] sm:$0xff] %v83_v42  ;;  %v70_v51 = vadd.f32 %v143_v2, %v47_v44  ;;  %v71_v52 = vadd.f32 %v143_v2, %v48_v45  ;;  %v52_v53 = vmul.f32 %v112_v1, %v29_v41  ;;  %v84_v54 = vmax.f32 %v68_v46, 0.0 }
   0xd   :  { %v72_v55 = vadd.f32 %v143_v2, %v49_v47  ;;  %v73_v56 = vadd.f32 %v143_v2, %v50_v48  ;;  %v74_v57 = vadd.f32 %v143_v2, %v51_v49  ;;  %v85_v58 = vmax.f32 %v69_v50, 0.0 }
   0xe   :  { %v86_v59 = vmax.f32 %v70_v51, 0.0  ;;  %v87_v60 = vmax.f32 %v71_v52, 0.0  ;;  %v75_v61 = vadd.f32 %v143_v2, %v52_v53  ;;  %100 = vst [vmem:[%s257_s3 + $0x40] sm:$0xff] %v84_v54 }
   0xf   :  { %v88_v62 = vmax.f32 %v72_v55, 0.0  ;;  %v89_v63 = vmax.f32 %v73_v56, 0.0  ;;  %v90_v0 = vmax.f32 %v74_v57, 0.0  ;;  %101 = vst [vmem:[%s257_s3 + $0x48] sm:$0xff] %v85_v58 }
  0x10   :  { %102 = vst [vmem:[%s257_s3 + $0x50] sm:$0xff] %v86_v59  ;;  %103 = vst [vmem:[%s257_s3 + $0x58] sm:$0xff] %v87_v60  ;;  %v91_v1 = vmax.f32 %v75_v61, 0.0 }
  0x11   :  { %104 = vst [vmem:[%s257_s3 + $0x60] sm:$0xff] %v88_v62  ;;  %105 = vst [vmem:[%s257_s3 + $0x68] sm:$0xff] %v89_v63 }
  0x12   :  { %106 = vst [vmem:[%s257_s3 + $0x70] sm:$0xff] %v90_v0  ;;  %107 = vst [vmem:[%s257_s3 + $0x78] sm:$0xff] %v91_v1 }

// kernel: deep_koalarization_norm_forward.30
= control target key start
LH: loop header
LB: loop body
LE: loop exit
PB: predicated region body
PF: predicated region fallthrough
CT: control target
= control target key end

     0   :  { %vm426_vm0 = vcmask 1040384   ;;  %vm428_vm1 = vcmask 1041408   ;;  %s675_s1 = inlined_call_operand.vmem [shape: bf16[128,128], index: 1, kind: input, shape index: {}]   ;;  %s676_s0 = inlined_call_operand.vmem [shape: bf16[128,128], index: 0, kind: input, shape index: {}]   ;;  %s677_s2 = inlined_call_operand.vmem [shape: f32[1,128], index: 2, kind: input, shape index: {}]   ;;  %s678_s3 = inlined_call_operand.vmem [shape: f32[128,128], index: 3, kind: output, shape index: {0}]   ;;  %s679_s4 = inlined_call_operand.vmem [shape: f32[8,128], index: 4, kind: output, shape index: {1}]  }
   0x1   :  { %v520_v0 = vld [vmem:[%s675_s1] sm:$0xff]   ;;  %v521_v1 = vld [vmem:[%s675_s1 + $0x8] sm:$0xff]   ;;  %v522_v2 = vld [vmem:[%s675_s1 + $0x10] sm:$0xff]  }
   0x2   :  { %472 = vmatprep.subr.bf16.mxu0 %v520_v0  ;;  %504 = vmatprep.subr.bf16.mxu1 %v520_v0  ;;  %v523_v3 = vld [vmem:[%s675_s1 + $0x18] sm:$0xff]   ;;  %v528_v4 = vld [vmem:[%s676_s0] sm:$0xff]   ;;  %v525_v7 = vld [vmem:[%s675_s1 + $0x28] sm:$0xff]  }
   0x3   :  { %473 = vmatpush3.bf16.msra.mxu0 %v520_v0  ;;  %512 = vmatpush3.bf16.msra.mxu1 %v520_v0  ;;  %v524_v5 = vld [vmem:[%s675_s1 + $0x20] sm:$0xff]   ;;  %v526_v8 = vld [vmem:[%s675_s1 + $0x30] sm:$0xff]   ;;  %v527_v9 = vld [vmem:[%s675_s1 + $0x38] sm:$0xff]  }
   0x4   :  { %474 = vmatprep.subr.bf16.mxu0 %v521_v1  ;;  %505 = vmatprep.subr.bf16.mxu1 %v521_v1  ;;  %v532_v6 = vld [vmem:[%s676_s0 + $0x20] sm:$0xff]   ;;  %v529_v10 = vld [vmem:[%s676_s0 + $0x8] sm:$0xff]   ;;  %v530_v12 = vld [vmem:[%s676_s0 + $0x10] sm:$0xff]  }
   0x5   :  { %488 = vmatprep.mubr.bf16.mxu0 %v528_v4  ;;  %496 = vmatprep.mubr.bf16.mxu1 %v532_v6  ;;  %v533_v11 = vld [vmem:[%s676_s0 + $0x28] sm:$0xff]   ;;  %v534_v13 = vld [vmem:[%s676_s0 + $0x30] sm:$0xff]   ;;  %v531_v14 = vld [vmem:[%s676_s0 + $0x18] sm:$0xff]  }
   0x6   :  { %v535_v15 = vld [vmem:[%s676_s0 + $0x38] sm:$0xff]   ;;  %v455_v16 = vld [vmem:[%s677_s2] ss:$0 sm:$0xff] }
   0x7   :  { %475 = vmatpush3.bf16.msra.mxu0 %v521_v1  ;;  %513 = vmatpush3.bf16.msra.mxu1 %v521_v1 }
   0x8   :  { %476 = vmatprep.subr.bf16.mxu0 %v522_v2  ;;  %506 = vmatprep.subr.bf16.mxu1 %v522_v2 }
   0xb   :  { %477 = vmatpush3.bf16.msra.mxu0 %v522_v2  ;;  %514 = vmatpush3.bf16.msra.mxu1 %v522_v2 }
   0xc   :  { %478 = vmatprep.subr.bf16.mxu0 %v523_v3  ;;  %507 = vmatprep.subr.bf16.mxu1 %v523_v3 }
   0xf   :  { %479 = vmatpush3.bf16.msra.mxu0 %v523_v3  ;;  %515 = vmatpush3.bf16.msra.mxu1 %v523_v3 }
  0x10   :  { %480 = vmatprep.subr.bf16.mxu0 %v524_v5  ;;  %508 = vmatprep.subr.bf16.mxu1 %v524_v5 }
  0x13   :  { %481 = vmatpush3.bf16.msra.mxu0 %v524_v5  ;;  %516 = vmatpush3.bf16.msra.mxu1 %v524_v5 }
  0x14   :  { %482 = vmatprep.subr.bf16.mxu0 %v525_v7  ;;  %509 = vmatprep.subr.bf16.mxu1 %v525_v7 }
  0x17   :  { %483 = vmatpush3.bf16.msra.mxu0 %v525_v7  ;;  %517 = vmatpush3.bf16.msra.mxu1 %v525_v7 }
  0x18   :  { %484 = vmatprep.subr.bf16.mxu0 %v526_v8  ;;  %510 = vmatprep.subr.bf16.mxu1 %v526_v8 }
  0x1b   :  { %485 = vmatpush3.bf16.msra.mxu0 %v526_v8  ;;  %518 = vmatpush3.bf16.msra.mxu1 %v526_v8 }
  0x1c   :  { %486 = vmatprep.subr.bf16.mxu0 %v527_v9  ;;  %511 = vmatprep.subr.bf16.mxu1 %v527_v9 }
  0x1f   :  { %487 = vmatpush3.bf16.msra.mxu0 %v527_v9  ;;  %519 = vmatpush3.bf16.msra.mxu1 %v527_v9 }
  0x22   :  { %489 = vmatmul.mubr.bf16.vlgmr.msra.gmra.mrb[0].mxu0 %v529_v10  ;;  %497 = vmatmul.mubr.bf16.vlgmr.msra.gmra.mrb[0].mxu1 %v533_v11 }
  0x23   :  { %492 = vmatprep.mubr.bf16.mxu0 %v530_v12  ;;  %500 = vmatprep.mubr.bf16.mxu1 %v534_v13 }
  0x2a   :  { %493 = vmatmul.mubr.bf16.gmra.mrb[4].mxu0 %v531_v14  ;;  %501 = vmatmul.mubr.bf16.gmra.mrb[4].mxu1 %v535_v15 }
  0xf5   :  { %v490_v17 = vpop.f32.mrb[0].mxu0  ;;  %v498_v18 = vpop.f32.mrb[0].mxu1 }
  0xf6   :  { %v338_v19 = vadd.f32 %v490_v17, %v455_v16  ;;  %v215_v20 = vpop.f32.mrb[1].mxu0  ;;  %v612_v21 = vadd.f32 %v498_v18, %v455_v16  ;;  %v247_v22 = vpop.f32.mrb[1].mxu1 }
  0xf7   :  { %v336_v23 = vadd.f32 %v455_v16, %v215_v20  ;;  %v491_v24 = vpop.f32.mrb[2].mxu0  ;;  %v344_v25 = vadd.f32 %v455_v16, %v247_v22  ;;  %v499_v26 = vpop.f32.mrb[2].mxu1 }
  0xf8   :  { %354 = vst [vmem:[%s678_s3 + $0x10] sm:$0xff] %v338_v19  ;;  %v339_v27 = vadd.f32 %v491_v24, %v455_v16  ;;  %v218_v28 = vpop.f32.mrb[3].mxu0  ;;  %362 = vst [vmem:[%s678_s3 + $0x50] sm:$0xff] %v612_v21  ;;  %v621_v29 = vadd.f32 %v499_v26, %v455_v16  ;;  %v250_v30 = vpop.f32.mrb[3].mxu1  ;;  %v391_v36 = vmul.f32 %v338_v19, %v338_v19 }
  0xf9   :  { %352 = vst [vmem:[%s678_s3] sm:$0xff] %v336_v23  ;;  %v337_v31 = vadd.f32 %v455_v16, %v218_v28  ;;  %360 = vst [vmem:[%s678_s3 + $0x40] sm:$0xff] %v344_v25  ;;  %v345_v32 = vadd.f32 %v455_v16, %v250_v30  ;;  %v389_v33 = vmul.f32 %v336_v23, %v336_v23 }
  0xfa   :  { %355 = vst [vmem:[%s678_s3 + $0x18] sm:$0xff] %v339_v27  ;;  %363 = vst [vmem:[%s678_s3 + $0x58] sm:$0xff] %v621_v29  ;;  %v392_v41 = vmul.f32 %v339_v27, %v339_v27  ;;  %v397_v6 = vmul.f32 %v344_v25, %v344_v25  ;;  %v399_v12 = vmul.f32 %v612_v21, %v612_v21 }
  0xfb   :  { %353 = vst [vmem:[%s678_s3 + $0x8] sm:$0xff] %v337_v31  ;;  %v368_v34 = vadd.f32 %v337_v31, %v336_v23  ;;  %v390_v35 = vmul.f32 %v337_v31, %v337_v31  ;;  %361 = vst [vmem:[%s678_s3 + $0x48] sm:$0xff] %v345_v32  ;;  %v398_v11 = vmul.f32 %v345_v32, %v345_v32 }
  0xfc   :  { %v400_v15 = vmul.f32 %v621_v29, %v621_v29 }
  0xfd   :  { %v369_v37 = vadd.f32 %v368_v34, %v338_v19  ;;  %v405_v38 = vadd.f32 %v390_v35, %v389_v33  ;;  %v494_v39 = vpop.f32.mrb[4].mxu0  ;;  %v502_v40 = vpop.f32.mrb[4].mxu1 }
  0xfe   :  { %v342_v42 = vadd.f32 %v494_v39, %v455_v16  ;;  %v231_v43 = vpop.f32.mrb[5].mxu0  ;;  %v350_v44 = vadd.f32 %v502_v40, %v455_v16  ;;  %v263_v45 = vpop.f32.mrb[5].mxu1 }
  0xff   :  { %v406_v46 = vadd.f32 %v405_v38, %v391_v36  ;;  %v340_v47 = vadd.f32 %v455_v16, %v231_v43  ;;  %v370_v48 = vadd.f32 %v369_v37, %v339_v27  ;;  %v495_v49 = vpop.f32.mrb[6].mxu0  ;;  %v348_v50 = vadd.f32 %v455_v16, %v263_v45  ;;  %v503_v51 = vpop.f32.mrb[6].mxu1 }
 0x100   :  { %358 = vst [vmem:[%s678_s3 + $0x30] sm:$0xff] %v342_v42  ;;  %v343_v52 = vadd.f32 %v495_v49, %v455_v16  ;;  %v234_v53 = vpop.f32.mrb[7].mxu0  ;;  %366 = vst [vmem:[%s678_s3 + $0x70] sm:$0xff] %v350_v44  ;;  %v351_v54 = vadd.f32 %v503_v51, %v455_v16  ;;  %v266_v55 = vpop.f32.mrb[7].mxu1  ;;  %v395_v0 = vmul.f32 %v342_v42, %v342_v42 }
 0x101   :  { %356 = vst [vmem:[%s678_s3 + $0x20] sm:$0xff] %v340_v47  ;;  %v371_v56 = vadd.f32 %v370_v48, %v340_v47  ;;  %v393_v57 = vmul.f32 %v340_v47, %v340_v47  ;;  %v407_v58 = vadd.f32 %v406_v46, %v392_v41  ;;  %v341_v59 = vadd.f32 %v455_v16, %v234_v53 }
 0x102   :  { %364 = vst [vmem:[%s678_s3 + $0x60] sm:$0xff] %v348_v50  ;;  %359 = vst [vmem:[%s678_s3 + $0x38] sm:$0xff] %v343_v52  ;;  %v349_v60 = vadd.f32 %v455_v16, %v266_v55  ;;  %v396_v3 = vmul.f32 %v343_v52, %v343_v52  ;;  %v401_v18 = vmul.f32 %v348_v50, %v348_v50 }
 0x103   :  { %367 = vst [vmem:[%s678_s3 + $0x78] sm:$0xff] %v351_v54  ;;  %v408_v61 = vadd.f32 %v407_v58, %v393_v57  ;;  %357 = vst [vmem:[%s678_s3 + $0x28] sm:$0xff] %v341_v59  ;;  %v372_v62 = vadd.f32 %v371_v56, %v341_v59  ;;  %v394_v63 = vmul.f32 %v341_v59, %v341_v59 }
 0x104   :  { %365 = vst [vmem:[%s678_s3 + $0x68] sm:$0xff] %v349_v60  ;;  %v402_v24 = vmul.f32 %v349_v60, %v349_v60  ;;  %v404_v28 = vmul.f32 %v351_v54, %v351_v54 }
 0x105   :  { %v373_v1 = vadd.f32 %v372_v62, %v342_v42  ;;  %v409_v2 = vadd.f32 %v408_v61, %v394_v63 }
 0x107   :  { %v410_v4 = vadd.f32 %v409_v2, %v395_v0  ;;  %v374_v5 = vadd.f32 %v373_v1, %v343_v52 }
 0x109   :  { %v375_v7 = vadd.f32 %v374_v5, %v344_v25  ;;  %v411_v8 = vadd.f32 %v410_v4, %v396_v3  ;;  %v403_v25 = vmul.f32 %v350_v44, %v350_v44 }
 0x10b   :  { %v412_v9 = vadd.f32 %v411_v8, %v397_v6  ;;  %v376_v10 = vadd.f32 %v375_v7, %v345_v32 }
 0x10d   :  { %v377_v13 = vadd.f32 %v376_v10, %v612_v21  ;;  %v413_v14 = vadd.f32 %v412_v9, %v398_v11 }
 0x10f   :  { %v414_v16 = vadd.f32 %v413_v14, %v399_v12  ;;  %v378_v17 = vadd.f32 %v377_v13, %v621_v29 }
 0x111   :  { %v379_v19 = vadd.f32 %v378_v17, %v348_v50  ;;  %v415_v20 = vadd.f32 %v414_v16, %v400_v15 }
 0x113   :  { %v416_v22 = vadd.f32 %v415_v20, %v401_v18  ;;  %v380_v23 = vadd.f32 %v379_v19, %v349_v60 }
 0x115   :  { %v381_v26 = vadd.f32 %v380_v23, %v350_v44  ;;  %v417_v27 = vadd.f32 %v416_v22, %v402_v24 }
 0x117   :  { %v382_v30 = vadd.f32 %v381_v26, %v351_v54  ;;  %v418_v31 = vadd.f32 %v417_v27, %v403_v25 }
 0x119   :  { %v383_v21 = vrot.slane %v382_v30, 4  ;;  %v419_v32 = vadd.f32 %v418_v31, %v404_v28 }
 0x11b   :  { %v384_v33 = vadd.f32 %v383_v21, %v382_v30  ;;  %v420_v34 = vrot.slane %v419_v32, 4 }
 0x11d   :  { %v385_v35 = vrot.slane %v384_v33, 2  ;;  %v421_v36 = vadd.f32 %v420_v34, %v419_v32 }
 0x11f   :  { %v386_v37 = vadd.f32 %v385_v35, %v384_v33  ;;  %v422_v29 = vrot.slane %v421_v36, 2 }
 0x121   :  { %v387_v38 = vrot.slane %v386_v37, 1  ;;  %v423_v39 = vadd.f32 %v422_v29, %v421_v36 }
 0x123   :  { %v424_v40 = vrot.slane %v423_v39, 1  ;;  %v388_v41 = vadd.f32 %v387_v38, %v386_v37 }
 0x125   :  { %v425_v42 = vadd.f32 %v424_v40, %v423_v39 }
 0x127   :  { %v427_v43 = vsel %vm426_vm0, %v388_v41, %v425_v42 }
 0x128   :  { %v429_v44 = vsel %vm428_vm1, %v427_v43, 0.0 }
 0x129   :  { %430 = vst [vmem:[%s679_s4] sm:$0xff] %v429_v44 }

// kernel: deep_koalarization_norm_forward.32
= control target key start
LH: loop header
LB: loop body
LE: loop exit
PB: predicated region body
PF: predicated region fallthrough
CT: control target
= control target key end

     0   :  { %vm1068_vm0 = vcmask 1040384   ;;  %vm1070_vm1 = vcmask 1041408   ;;  %s1841_s1 = inlined_call_operand.vmem [shape: bf16[640,128], index: 1, kind: input, shape index: {}]   ;;  %s1842_s0 = inlined_call_operand.vmem [shape: bf16[128,640], index: 0, kind: input, shape index: {}]   ;;  %s1843_s2 = inlined_call_operand.vmem [shape: f32[1,128], index: 2, kind: input, shape index: {}]   ;;  %s1844_s3 = inlined_call_operand.vmem [shape: f32[128,128], index: 3, kind: output, shape index: {0}]   ;;  %s1845_s4 = inlined_call_operand.vmem [shape: f32[8,128], index: 4, kind: output, shape index: {1}]  }
   0x1   :  { %v1354_v0 = vld [vmem:[%s1841_s1 + $0x40] sm:$0xff]   ;;  %v1358_v4 = vld [vmem:[%s1841_s1 + $0x48] sm:$0xff]   ;;  %v1362_v8 = vld [vmem:[%s1841_s1 + $0x50] sm:$0xff]  }
   0x2   :  { %v1355_v1 = vld [vmem:[%s1841_s1 + $0xc0] sm:$0xff]   ;;  %1162 = vmatprep.subr.bf16.mxu0 %v1354_v0  ;;  %v1359_v5 = vld [vmem:[%s1841_s1 + $0xc8] sm:$0xff]   ;;  %v1363_v9 = vld [vmem:[%s1841_s1 + $0xd0] sm:$0xff]  }
   0x3   :  { %v1356_v2 = vld [vmem:[%s1841_s1] sm:$0xff]   ;;  %1226 = vmatprep.subr.bf16.mxu1 %v1355_v1  ;;  %v1360_v6 = vld [vmem:[%s1841_s1 + $0x8] sm:$0xff]   ;;  %v1364_v10 = vld [vmem:[%s1841_s1 + $0x10] sm:$0xff]  }
   0x4   :  { %v1357_v3 = vld [vmem:[%s1841_s1 + $0x80] sm:$0xff]   ;;  %1163 = vmatpush3.bf16.msra.mxu0 %v1356_v2  ;;  %v1361_v7 = vld [vmem:[%s1841_s1 + $0x88] sm:$0xff]   ;;  %v1365_v11 = vld [vmem:[%s1841_s1 + $0x90] sm:$0xff]  }
   0x5   :  { %1227 = vmatpush3.bf16.msra.mxu1 %v1357_v3  ;;  %1164 = vmatprep.subr.bf16.mxu0 %v1358_v4  ;;  %v1366_v12 = vld [vmem:[%s1841_s1 + $0x58] sm:$0xff]   ;;  %v1370_v16 = vld [vmem:[%s1841_s1 + $0x60] sm:$0xff]   ;;  %v1374_v20 = vld [vmem:[%s1841_s1 + $0x68] sm:$0xff]  }
   0x6   :  { %1228 = vmatprep.subr.bf16.mxu1 %v1359_v5  ;;  %v1367_v13 = vld [vmem:[%s1841_s1 + $0xd8] sm:$0xff]   ;;  %v1371_v17 = vld [vmem:[%s1841_s1 + $0xe0] sm:$0xff]   ;;  %v1375_v21 = vld [vmem:[%s1841_s1 + $0xe8] sm:$0xff]  }
   0x7   :  { %v1368_v14 = vld [vmem:[%s1841_s1 + $0x18] sm:$0xff]   ;;  %v1372_v18 = vld [vmem:[%s1841_s1 + $0x20] sm:$0xff]   ;;  %v1376_v22 = vld [vmem:[%s1841_s1 + $0x28] sm:$0xff]  }
   0x8   :  { %1165 = vmatpush3.bf16.msra.mxu0 %v1360_v6  ;;  %v1369_v15 = vld [vmem:[%s1841_s1 + $0x98] sm:$0xff]   ;;  %v1373_v19 = vld [vmem:[%s1841_s1 + $0xa0] sm:$0xff]   ;;  %v1377_v23 = vld [vmem:[%s1841_s1 + $0xa8] sm:$0xff]  }
   0x9   :  { %1229 = vmatpush3.bf16.msra.mxu1 %v1361_v7  ;;  %1166 = vmatprep.subr.bf16.mxu0 %v1362_v8  ;;  %v1378_v24 = vld [vmem:[%s1841_s1 + $0x70] sm:$0xff]   ;;  %v1382_v28 = vld [vmem:[%s1841_s1 + $0x78] sm:$0xff]   ;;  %v1391_v35 = vld [vmem:[%s1842_s0 + $0xc] ss:$20 sps:$4 sm:$0xff]  }
   0xa   :  { %1230 = vmatprep.subr.bf16.mxu1 %v1363_v9  ;;  %v1379_v25 = vld [vmem:[%s1841_s1 + $0xf0] sm:$0xff]   ;;  %v1383_v29 = vld [vmem:[%s1841_s1 + $0xf8] sm:$0xff]   ;;  %v1392_v36 = vld [vmem:[%s1841_s1 + $0x100] sm:$0xff]   ;;  %758 = vmatprep.mubr.bf16.mxu1 %v1391_v35 }
   0xb   :  { %v1380_v26 = vld [vmem:[%s1841_s1 + $0x30] sm:$0xff]   ;;  %v1384_v30 = vld [vmem:[%s1841_s1 + $0x38] sm:$0xff]   ;;  %v1393_v37 = vld [vmem:[%s1842_s0 + $0x2c] ss:$20 sps:$4 sm:$0xff]  }
   0xc   :  { %1167 = vmatpush3.bf16.msra.mxu0 %v1364_v10  ;;  %v1381_v27 = vld [vmem:[%s1841_s1 + $0xb0] sm:$0xff]   ;;  %v1385_v31 = vld [vmem:[%s1841_s1 + $0xb8] sm:$0xff]   ;;  %v1399_v39 = vld [vmem:[%s1841_s1 + $0x108] sm:$0xff]  }
   0xd   :  { %1231 = vmatpush3.bf16.msra.mxu1 %v1365_v11  ;;  %1168 = vmatprep.subr.bf16.mxu0 %v1366_v12  ;;  %v1386_v32 = vld [vmem:[%s1842_s0] ss:$20 sps:$4 sm:$0xff]   ;;  %v1388_v33 = vld [vmem:[%s1842_s0 + $0x4] ss:$20 sps:$4 sm:$0xff]   ;;  %v1389_v34 = vld [vmem:[%s1842_s0 + $0x8] ss:$20 sps:$4 sm:$0xff]  }
   0xe   :  { %1232 = vmatprep.subr.bf16.mxu1 %v1367_v13  ;;  %661 = vmatprep.mubr.bf16.mxu0 %v1388_v33  ;;  %v1395_v38 = vld [vmem:[%s1842_s0 + $0x34] ss:$20 sps:$4 sm:$0xff]   ;;  %v1398_v41 = vld [vmem:[%s1842_s0 + $0x30] ss:$20 sps:$4 sm:$0xff]   ;;  %v1413_v45 = vld [vmem:[%s1841_s1 + $0x118] sm:$0xff]  }
   0xf   :  { %v1397_v40 = vld [vmem:[%s1842_s0 + $0x28] ss:$20 sps:$4 sm:$0xff]   ;;  %v1406_v44 = vld [vmem:[%s1841_s1 + $0x110] sm:$0xff]   ;;  %v1405_v47 = vld [vmem:[%s1842_s0 + $0x58] ss:$20 sps:$4 sm:$0xff]  }
  0x10   :  { %1169 = vmatpush3.bf16.msra.mxu0 %v1368_v14  ;;  %v1400_v42 = vld [vmem:[%s1842_s0 + $0x54] ss:$20 sps:$4 sm:$0xff]   ;;  %v1402_v43 = vld [vmem:[%s1842_s0 + $0x5c] ss:$20 sps:$4 sm:$0xff]   ;;  %v1409_v49 = vld [vmem:[%s1842_s0 + $0x84] ss:$20 sps:$4 sm:$0xff]  }
  0x11   :  { %1233 = vmatpush3.bf16.msra.mxu1 %v1369_v15  ;;  %1170 = vmatprep.subr.bf16.mxu0 %v1370_v16  ;;  %v1404_v46 = vld [vmem:[%s1842_s0 + $0x50] ss:$20 sps:$4 sm:$0xff]   ;;  %v1427_v51 = vld [vmem:[%s1841_s1 + $0x128] sm:$0xff]   ;;  %v1412_v53 = vld [vmem:[%s1842_s0 + $0x80] ss:$20 sps:$4 sm:$0xff]  }
  0x12   :  { %1234 = vmatprep.subr.bf16.mxu1 %v1371_v17  ;;  %v1407_v48 = vld [vmem:[%s1842_s0 + $0x7c] ss:$20 sps:$4 sm:$0xff]   ;;  %v1420_v50 = vld [vmem:[%s1841_s1 + $0x120] sm:$0xff]   ;;  %v1411_v52 = vld [vmem:[%s1842_s0 + $0x78] ss:$20 sps:$4 sm:$0xff]  }
  0x13   :  { %v1414_v54 = vld [vmem:[%s1842_s0 + $0xa4] ss:$20 sps:$4 sm:$0xff]   ;;  %v1434_v55 = vld [vmem:[%s1841_s1 + $0x130] sm:$0xff]   ;;  %v1416_v56 = vld [vmem:[%s1842_s0 + $0xac] ss:$20 sps:$4 sm:$0xff]  }
  0x14   :  { %1171 = vmatpush3.bf16.msra.mxu0 %v1372_v18  ;;  %v1441_v57 = vld [vmem:[%s1841_s1 + $0x138] sm:$0xff]   ;;  %v1418_v58 = vld [vmem:[%s1842_s0 + $0xa0] ss:$20 sps:$4 sm:$0xff]   ;;  %v1426_v63 = vld [vmem:[%s1842_s0 + $0xd0] ss:$20 sps:$4 sm:$0xff]  }
  0x15   :  { %1235 = vmatpush3.bf16.msra.mxu1 %v1373_v19  ;;  %1172 = vmatprep.subr.bf16.mxu0 %v1374_v20  ;;  %v1419_v59 = vld [vmem:[%s1842_s0 + $0xa8] ss:$20 sps:$4 sm:$0xff]   ;;  %v1421_v60 = vld [vmem:[%s1842_s0 + $0xcc] ss:$20 sps:$4 sm:$0xff]   ;;  %v1432_v2 = vld [vmem:[%s1842_s0 + $0xf0] ss:$20 sps:$4 sm:$0xff]  }
  0x16   :  { %1236 = vmatprep.subr.bf16.mxu1 %v1375_v21  ;;  %v1423_v61 = vld [vmem:[%s1842_s0 + $0xd4] ss:$20 sps:$4 sm:$0xff]   ;;  %v1430_v1 = vld [vmem:[%s1842_s0 + $0xfc] ss:$20 sps:$4 sm:$0xff]   ;;  %v1433_v3 = vld [vmem:[%s1842_s0 + $0xf8] ss:$20 sps:$4 sm:$0xff]  }
  0x17   :  { %v1425_v62 = vld [vmem:[%s1842_s0 + $0xc8] ss:$20 sps:$4 sm:$0xff]   ;;  %v1437_v5 = vld [vmem:[%s1842_s0 + $0x124] ss:$20 sps:$4 sm:$0xff]   ;;  %v1440_v7 = vld [vmem:[%s1842_s0 + $0x120] ss:$20 sps:$4 sm:$0xff]  }
  0x18   :  { %1173 = vmatpush3.bf16.msra.mxu0 %v1376_v22  ;;  %v1428_v0 = vld [vmem:[%s1842_s0 + $0xf4] ss:$20 sps:$4 sm:$0xff]   ;;  %v1435_v4 = vld [vmem:[%s1842_s0 + $0x11c] ss:$20 sps:$4 sm:$0xff]   ;;  %v1439_v6 = vld [vmem:[%s1842_s0 + $0x118] ss:$20 sps:$4 sm:$0xff]  }
  0x19   :  { %1237 = vmatpush3.bf16.msra.mxu1 %v1377_v23  ;;  %1174 = vmatprep.subr.bf16.mxu0 %v1378_v24  ;;  %v1442_v8 = vld [vmem:[%s1842_s0 + $0x10] ss:$20 sps:$4 sm:$0xff]   ;;  %v1444_v10 = vld [vmem:[%s1842_s0 + $0x38] ss:$20 sps:$4 sm:$0xff]   ;;  %v1446_v12 = vld [vmem:[%s1842_s0 + $0x60] ss:$20 sps:$4 sm:$0xff]  }
  0x1a   :  { %1238 = vmatprep.subr.bf16.mxu1 %v1379_v25  ;;  %v1443_v9 = vld [vmem:[%s1842_s0 + $0xb0] ss:$20 sps:$4 sm:$0xff]   ;;  %v1445_v11 = vld [vmem:[%s1842_s0 + $0xd8] ss:$20 sps:$4 sm:$0xff]   ;;  %v1447_v13 = vld [vmem:[%s1842_s0 + $0x100] ss:$20 sps:$4 sm:$0xff]  }
  0x1b   :  { %v1448_v14 = vld [vmem:[%s1842_s0 + $0x88] ss:$20 sps:$4 sm:$0xff]  }
  0x1c   :  { %1175 = vmatpush3.bf16.msra.mxu0 %v1380_v26  ;;  %v1449_v15 = vld [vmem:[%s1842_s0 + $0x128] ss:$20 sps:$4 sm:$0xff]  }
  0x1d   :  { %1239 = vmatpush3.bf16.msra.mxu1 %v1381_v27  ;;  %1176 = vmatprep.subr.bf16.mxu0 %v1382_v28 }
  0x1e   :  { %1240 = vmatprep.subr.bf16.mxu1 %v1383_v29 }
  0x20   :  { %1177 = vmatpush3.bf16.msra.mxu0 %v1384_v30 }
  0x21   :  { %1241 = vmatpush3.bf16.msra.mxu1 %v1385_v31  ;;  %1306 = vmatprep.subr.bf16.mxu0 %v1392_v36 }
  0x22   :  { %1338 = vmatprep.subr.bf16.mxu1 %v1392_v36 }
  0x23   :  { %662 = vmatmul.mubr.bf16.vlgmr.msra.gmra.mrb[0].mxu0 %v1386_v32 }
  0x24   :  { %759 = vmatmul.mubr.bf16.vlgmr.msra.gmra.mrb[0].mxu1 %v1389_v34  ;;  %1307 = vmatpush3.bf16.msra.mxu0 %v1392_v36 }
  0x25   :  { %669 = vmatprep.mubr.bf16.mxu0 %v1393_v37  ;;  %766 = vmatprep.mubr.bf16.mxu1 %v1395_v38 }
  0x26   :  { %1346 = vmatpush3.bf16.msra.mxu1 %v1392_v36  ;;  %1308 = vmatprep.subr.bf16.mxu0 %v1399_v39 }
  0x27   :  { %1339 = vmatprep.subr.bf16.mxu1 %v1399_v39 }
  0x28   :  { %1309 = vmatpush3.bf16.msra.mxu0 %v1399_v39 }
  0x29   :  { %1310 = vmatprep.subr.bf16.mxu0 %v1406_v44 }
  0x2a   :  { %1347 = vmatpush3.bf16.msra.mxu1 %v1399_v39 }
  0x2b   :  { %670 = vmatmul.mubr.bf16.gmra.mrb[4].mxu0 %v1397_v40  ;;  %1340 = vmatprep.subr.bf16.mxu1 %v1406_v44 }
  0x2c   :  { %767 = vmatmul.mubr.bf16.gmra.mrb[4].mxu1 %v1398_v41  ;;  %677 = vmatprep.mubr.bf16.mxu0 %v1400_v42 }
  0x2d   :  { %774 = vmatprep.mubr.bf16.mxu1 %v1402_v43  ;;  %1311 = vmatpush3.bf16.msra.mxu0 %v1406_v44 }
  0x2e   :  { %1312 = vmatprep.subr.bf16.mxu0 %v1413_v45  ;;  %1348 = vmatpush3.bf16.msra.mxu1 %v1406_v44 }
  0x2f   :  { %1341 = vmatprep.subr.bf16.mxu1 %v1413_v45 }
  0x31   :  { %1313 = vmatpush3.bf16.msra.mxu0 %v1413_v45 }
  0x32   :  { %1314 = vmatprep.subr.bf16.mxu0 %v1420_v50  ;;  %1349 = vmatpush3.bf16.msra.mxu1 %v1413_v45 }
  0x33   :  { %678 = vmatmul.mubr.bf16.gmra.mrb[8].mxu0 %v1404_v46  ;;  %1342 = vmatprep.subr.bf16.mxu1 %v1420_v50 }
  0x34   :  { %775 = vmatmul.mubr.bf16.gmra.mrb[8].mxu1 %v1405_v47  ;;  %685 = vmatprep.mubr.bf16.mxu0 %v1407_v48 }
  0x35   :  { %782 = vmatprep.mubr.bf16.mxu1 %v1409_v49  ;;  %1315 = vmatpush3.bf16.msra.mxu0 %v1420_v50 }
  0x36   :  { %1316 = vmatprep.subr.bf16.mxu0 %v1427_v51  ;;  %1350 = vmatpush3.bf16.msra.mxu1 %v1420_v50 }
  0x37   :  { %1343 = vmatprep.subr.bf16.mxu1 %v1427_v51 }
  0x39   :  { %1317 = vmatpush3.bf16.msra.mxu0 %v1427_v51 }
  0x3a   :  { %1318 = vmatprep.subr.bf16.mxu0 %v1434_v55  ;;  %1351 = vmatpush3.bf16.msra.mxu1 %v1427_v51 }
  0x3b   :  { %686 = vmatmul.mubr.bf16.gmra.mrb[12].mxu0 %v1411_v52  ;;  %1344 = vmatprep.subr.bf16.mxu1 %v1434_v55 }
  0x3c   :  { %783 = vmatmul.mubr.bf16.gmra.mrb[12].mxu1 %v1412_v53  ;;  %693 = vmatprep.mubr.bf16.mxu0 %v1414_v54 }
  0x3d   :  { %790 = vmatprep.mubr.bf16.mxu1 %v1416_v56  ;;  %1319 = vmatpush3.bf16.msra.mxu0 %v1434_v55 }
  0x3e   :  { %1320 = vmatprep.subr.bf16.mxu0 %v1441_v57  ;;  %1352 = vmatpush3.bf16.msra.mxu1 %v1434_v55 }
  0x3f   :  { %1345 = vmatprep.subr.bf16.mxu1 %v1441_v57 }
  0x41   :  { %1321 = vmatpush3.bf16.msra.mxu0 %v1441_v57 }
  0x42   :  { %1353 = vmatpush3.bf16.msra.mxu1 %v1441_v57 }
  0x43   :  { %694 = vmatmul.mubr.bf16.gmra.mrb[16].mxu0 %v1418_v58 }
  0x44   :  { %791 = vmatmul.mubr.bf16.gmra.mrb[16].mxu1 %v1419_v59  ;;  %701 = vmatprep.mubr.bf16.mxu0 %v1421_v60 }
  0x45   :  { %798 = vmatprep.mubr.bf16.mxu1 %v1423_v61 }
  0x4b   :  { %702 = vmatmul.mubr.bf16.gmra.mrb[20].mxu0 %v1425_v62 }
  0x4c   :  { %799 = vmatmul.mubr.bf16.gmra.mrb[20].mxu1 %v1426_v63  ;;  %709 = vmatprep.mubr.bf16.mxu0 %v1428_v0 }
  0x4d   :  { %806 = vmatprep.mubr.bf16.mxu1 %v1430_v1 }
  0x53   :  { %710 = vmatmul.mubr.bf16.gmra.mrb[24].mxu0 %v1432_v2 }
  0x54   :  { %807 = vmatmul.mubr.bf16.gmra.mrb[24].mxu1 %v1433_v3  ;;  %717 = vmatprep.mubr.bf16.mxu0 %v1435_v4 }
  0x55   :  { %814 = vmatprep.mubr.bf16.mxu1 %v1437_v5 }
  0x5b   :  { %718 = vmatmul.mubr.bf16.gmra.mrb[28].mxu0 %v1439_v6 }
  0x5c   :  { %815 = vmatmul.mubr.bf16.gmra.mrb[28].mxu1 %v1440_v7  ;;  %1322 = vmatprep.mubr.bf16.mxu0 %v1442_v8 }
  0x5d   :  { %1330 = vmatprep.mubr.bf16.mxu1 %v1443_v9 }
  0x63   :  { %1323 = vmatmul.mubr.bf16.vlgmr.msra.gmra.mrb[32].mxu0 %v1444_v10 }
  0x64   :  { %1331 = vmatmul.mubr.bf16.vlgmr.msra.gmra.mrb[32].mxu1 %v1445_v11  ;;  %1326 = vmatprep.mubr.bf16.mxu0 %v1446_v12 }
  0x65   :  { %1334 = vmatprep.mubr.bf16.mxu1 %v1447_v13 }
  0x6b   :  { %1327 = vmatmul.mubr.bf16.gmra.mrb[36].mxu0 %v1448_v14 }
  0x6c   :  { %1335 = vmatmul.mubr.bf16.gmra.mrb[36].mxu1 %v1449_v15 }
  0xf6   :  { %v1178_v16 = vpop.f32.mrb[0].mxu0 }
  0xf7   :  { %v1242_v17 = vpop.f32.mrb[0].mxu1  ;;  %v1179_v18 = vpop.f32.mrb[1].mxu0 }
  0xf8   :  { %v1180_v19 = vadd.f32 %v1179_v18, %v1178_v16  ;;  %v1243_v20 = vpop.f32.mrb[1].mxu1  ;;  %v1181_v21 = vpop.f32.mrb[2].mxu0 }
  0xf9   :  { %v1244_v22 = vadd.f32 %v1243_v20, %v1242_v17  ;;  %v1245_v23 = vpop.f32.mrb[2].mxu1  ;;  %v1182_v24 = vpop.f32.mrb[3].mxu0 }
  0xfa   :  { %v1183_v25 = vadd.f32 %v1182_v24, %v1181_v21  ;;  %v1246_v26 = vpop.f32.mrb[3].mxu1 }
  0xfb   :  { %v1247_v27 = vadd.f32 %v1246_v26, %v1245_v23  ;;  %v1715_v28 = vadd.f32 %v1244_v22, %v1180_v19 }
  0xfd   :  { %v1717_v29 = vadd.f32 %v1247_v27, %v1183_v25 }
  0xfe   :  { %v1184_v30 = vpop.f32.mrb[4].mxu0 }
  0xff   :  { %v1248_v31 = vpop.f32.mrb[4].mxu1  ;;  %v1185_v32 = vpop.f32.mrb[5].mxu0 }
 0x100   :  { %v1186_v33 = vadd.f32 %v1185_v32, %v1184_v30  ;;  %v1249_v34 = vpop.f32.mrb[5].mxu1  ;;  %v1187_v35 = vpop.f32.mrb[6].mxu0 }
 0x101   :  { %v1250_v36 = vadd.f32 %v1249_v34, %v1248_v31  ;;  %v1251_v37 = vpop.f32.mrb[6].mxu1  ;;  %v1188_v38 = vpop.f32.mrb[7].mxu0 }
 0x102   :  { %v1189_v39 = vadd.f32 %v1188_v38, %v1187_v35  ;;  %v1252_v40 = vpop.f32.mrb[7].mxu1 }
 0x103   :  { %v1253_v41 = vadd.f32 %v1252_v40, %v1251_v37  ;;  %v1719_v42 = vadd.f32 %v1250_v36, %v1186_v33 }
 0x105   :  { %v1721_v43 = vadd.f32 %v1253_v41, %v1189_v39 }
 0x106   :  { %v1190_v44 = vpop.f32.mrb[8].mxu0 }
 0x107   :  { %v1254_v45 = vpop.f32.mrb[8].mxu1  ;;  %v1191_v46 = vpop.f32.mrb[9].mxu0 }
 0x108   :  { %v1192_v47 = vadd.f32 %v1191_v46, %v1190_v44  ;;  %v1255_v48 = vpop.f32.mrb[9].mxu1  ;;  %v1193_v49 = vpop.f32.mrb[10].mxu0 }
 0x109   :  { %v1256_v50 = vadd.f32 %v1255_v48, %v1254_v45  ;;  %v1257_v51 = vpop.f32.mrb[10].mxu1  ;;  %v1194_v52 = vpop.f32.mrb[11].mxu0 }
 0x10a   :  { %v1195_v53 = vadd.f32 %v1194_v52, %v1193_v49  ;;  %v1258_v54 = vpop.f32.mrb[11].mxu1 }
 0x10b   :  { %v1259_v55 = vadd.f32 %v1258_v54, %v1257_v51  ;;  %v1723_v56 = vadd.f32 %v1256_v50, %v1192_v47 }
 0x10d   :  { %v1725_v57 = vadd.f32 %v1259_v55, %v1195_v53 }
 0x10e   :  { %v1196_v58 = vpop.f32.mrb[12].mxu0 }
 0x10f   :  { %v1260_v59 = vpop.f32.mrb[12].mxu1  ;;  %v1197_v60 = vpop.f32.mrb[13].mxu0 }
 0x110   :  { %v1198_v61 = vadd.f32 %v1197_v60, %v1196_v58  ;;  %v1261_v62 = vpop.f32.mrb[13].mxu1  ;;  %v1199_v63 = vpop.f32.mrb[14].mxu0 }
 0x111   :  { %v1262_v0 = vadd.f32 %v1261_v62, %v1260_v59  ;;  %v1263_v1 = vpop.f32.mrb[14].mxu1  ;;  %v1200_v2 = vpop.f32.mrb[15].mxu0 }
 0x112   :  { %v1201_v3 = vadd.f32 %v1200_v2, %v1199_v63  ;;  %v1264_v4 = vpop.f32.mrb[15].mxu1 }
 0x113   :  { %v1265_v5 = vadd.f32 %v1264_v4, %v1263_v1  ;;  %v1727_v6 = vadd.f32 %v1262_v0, %v1198_v61 }
 0x115   :  { %v1729_v7 = vadd.f32 %v1265_v5, %v1201_v3 }
 0x116   :  { %v1202_v8 = vpop.f32.mrb[16].mxu0 }
 0x117   :  { %v1266_v9 = vpop.f32.mrb[16].mxu1  ;;  %v1203_v10 = vpop.f32.mrb[17].mxu0 }
 0x118   :  { %v1204_v11 = vadd.f32 %v1203_v10, %v1202_v8  ;;  %v1267_v12 = vpop.f32.mrb[17].mxu1  ;;  %v1205_v13 = vpop.f32.mrb[18].mxu0 }
 0x119   :  { %v1268_v14 = vadd.f32 %v1267_v12, %v1266_v9  ;;  %v1269_v15 = vpop.f32.mrb[18].mxu1  ;;  %v1206_v16 = vpop.f32.mrb[19].mxu0  ;;  %v1742_v9 = vld [vmem:[%s1843_s2] ss:$0 sm:$0xff] }
 0x11a   :  { %v1207_v17 = vadd.f32 %v1206_v16, %v1205_v13  ;;  %v1270_v18 = vpop.f32.mrb[19].mxu1 }
 0x11b   :  { %v1271_v19 = vadd.f32 %v1270_v18, %v1269_v15  ;;  %v793_v20 = vadd.f32 %v1268_v14, %v1204_v11 }
 0x11d   :  { %v1731_v21 = vadd.f32 %v1271_v19, %v1207_v17 }
 0x11e   :  { %v1208_v22 = vpop.f32.mrb[20].mxu0 }
 0x11f   :  { %v1272_v23 = vpop.f32.mrb[20].mxu1  ;;  %v1209_v24 = vpop.f32.mrb[21].mxu0 }
 0x120   :  { %v1210_v25 = vadd.f32 %v1209_v24, %v1208_v22  ;;  %v1273_v26 = vpop.f32.mrb[21].mxu1  ;;  %v1211_v27 = vpop.f32.mrb[22].mxu0 }
 0x121   :  { %v1274_v30 = vadd.f32 %v1273_v26, %v1272_v23  ;;  %v1275_v31 = vpop.f32.mrb[22].mxu1  ;;  %v1212_v32 = vpop.f32.mrb[23].mxu0 }
 0x122   :  { %v1213_v33 = vadd.f32 %v1212_v32, %v1211_v27  ;;  %v1276_v34 = vpop.f32.mrb[23].mxu1 }
 0x123   :  { %v1277_v35 = vadd.f32 %v1276_v34, %v1275_v31  ;;  %v801_v36 = vadd.f32 %v1274_v30, %v1210_v25 }
 0x125   :  { %v804_v37 = vadd.f32 %v1277_v35, %v1213_v33 }
 0x126   :  { %v1214_v38 = vpop.f32.mrb[24].mxu0 }
 0x127   :  { %v1278_v39 = vpop.f32.mrb[24].mxu1  ;;  %v1215_v40 = vpop.f32.mrb[25].mxu0 }
 0x128   :  { %v1216_v41 = vadd.f32 %v1215_v40, %v1214_v38  ;;  %v1279_v44 = vpop.f32.mrb[25].mxu1  ;;  %v1217_v45 = vpop.f32.mrb[26].mxu0 }
 0x129   :  { %v1280_v46 = vadd.f32 %v1279_v44, %v1278_v39  ;;  %v1281_v47 = vpop.f32.mrb[26].mxu1  ;;  %v1218_v48 = vpop.f32.mrb[27].mxu0 }
 0x12a   :  { %v1219_v49 = vadd.f32 %v1218_v48, %v1217_v45  ;;  %v1282_v50 = vpop.f32.mrb[27].mxu1 }
 0x12b   :  { %v1283_v51 = vadd.f32 %v1282_v50, %v1281_v47  ;;  %v1733_v52 = vadd.f32 %v1280_v46, %v1216_v41 }
 0x12d   :  { %v1735_v53 = vadd.f32 %v1283_v51, %v1219_v49 }
 0x12e   :  { %v1220_v54 = vpop.f32.mrb[28].mxu0 }
 0x12f   :  { %v1284_v55 = vpop.f32.mrb[28].mxu1  ;;  %v1221_v58 = vpop.f32.mrb[29].mxu0 }
 0x130   :  { %v1222_v59 = vadd.f32 %v1221_v58, %v1220_v54  ;;  %v1285_v60 = vpop.f32.mrb[29].mxu1  ;;  %v1223_v61 = vpop.f32.mrb[30].mxu0 }
 0x131   :  { %v1286_v62 = vadd.f32 %v1285_v60, %v1284_v55  ;;  %v1287_v63 = vpop.f32.mrb[30].mxu1  ;;  %v1224_v0 = vpop.f32.mrb[31].mxu0 }
 0x132   :  { %v1225_v1 = vadd.f32 %v1224_v0, %v1223_v61  ;;  %v1288_v2 = vpop.f32.mrb[31].mxu1 }
 0x133   :  { %v1289_v3 = vadd.f32 %v1288_v2, %v1287_v63  ;;  %v817_v4 = vadd.f32 %v1286_v62, %v1222_v59 }
 0x135   :  { %v1737_v5 = vadd.f32 %v1289_v3, %v1225_v1 }
 0x136   :  { %v1324_v8 = vpop.f32.mrb[32].mxu0 }
 0x137   :  { %v866_v10 = vadd.f32 %v1324_v8, %v1719_v42  ;;  %v1332_v11 = vpop.f32.mrb[32].mxu1  ;;  %v857_v12 = vpop.f32.mrb[33].mxu0 }
 0x138   :  { %v898_v13 = vadd.f32 %v1332_v11, %v801_v36  ;;  %v858_v14 = vadd.f32 %v857_v12, %v1715_v28  ;;  %v889_v15 = vpop.f32.mrb[33].mxu1  ;;  %v1325_v16 = vpop.f32.mrb[34].mxu0 }
 0x139   :  { %v980_v17 = vadd.f32 %v1742_v9, %v866_v10  ;;  %v890_v18 = vadd.f32 %v889_v15, %v793_v20  ;;  %v869_v19 = vadd.f32 %v1325_v16, %v1721_v43  ;;  %v1333_v22 = vpop.f32.mrb[34].mxu1  ;;  %v860_v23 = vpop.f32.mrb[35].mxu0 }
 0x13a   :  { %v1749_v24 = vadd.f32 %v1742_v9, %v898_v13  ;;  %v978_v25 = vadd.f32 %v1742_v9, %v858_v14  ;;  %v901_v42 = vadd.f32 %v1333_v22, %v804_v37  ;;  %v861_v26 = vadd.f32 %v860_v23, %v1717_v29  ;;  %v892_v27 = vpop.f32.mrb[35].mxu1 }
 0x13b   :  { %996 = vst [vmem:[%s1844_s3 + $0x10] sm:$0xff] %v980_v17  ;;  %v1757_v28 = vadd.f32 %v1742_v9, %v890_v18  ;;  %v981_v43 = vadd.f32 %v1742_v9, %v869_v19  ;;  %v893_v20 = vadd.f32 %v892_v27, %v1731_v21  ;;  %v1033_v35 = vmul.f32 %v980_v17, %v980_v17 }
 0x13c   :  { %1004 = vst [vmem:[%s1844_s3 + $0x50] sm:$0xff] %v1749_v24  ;;  %994 = vst [vmem:[%s1844_s3] sm:$0xff] %v978_v25  ;;  %v1769_v29 = vadd.f32 %v1742_v9, %v901_v42  ;;  %v979_v30 = vadd.f32 %v1742_v9, %v861_v26  ;;  %v1031_v31 = vmul.f32 %v978_v25, %v978_v25 }
 0x13d   :  { %1002 = vst [vmem:[%s1844_s3 + $0x40] sm:$0xff] %v1757_v28  ;;  %997 = vst [vmem:[%s1844_s3 + $0x18] sm:$0xff] %v981_v43  ;;  %v987_v21 = vadd.f32 %v1742_v9, %v893_v20  ;;  %v1034_v47 = vmul.f32 %v981_v43, %v981_v43  ;;  %v1039_v15 = vmul.f32 %v1757_v28, %v1757_v28 }
 0x13e   :  { %1005 = vst [vmem:[%s1844_s3 + $0x58] sm:$0xff] %v1769_v29  ;;  %995 = vst [vmem:[%s1844_s3 + $0x8] sm:$0xff] %v979_v30  ;;  %v1010_v32 = vadd.f32 %v979_v30, %v978_v25  ;;  %v1032_v33 = vmul.f32 %v979_v30, %v979_v30  ;;  %v1328_v34 = vpop.f32.mrb[36].mxu0  ;;  %v1041_v22 = vmul.f32 %v1749_v24, %v1749_v24 }
 0x13f   :  { %1003 = vst [vmem:[%s1844_s3 + $0x48] sm:$0xff] %v987_v21  ;;  %v882_v36 = vadd.f32 %v1328_v34, %v1727_v6  ;;  %v1336_v37 = vpop.f32.mrb[36].mxu1  ;;  %v873_v38 = vpop.f32.mrb[37].mxu0  ;;  %v1042_v42 = vmul.f32 %v1769_v29, %v1769_v29 }
 0x140   :  { %v1011_v39 = vadd.f32 %v1010_v32, %v980_v17  ;;  %v1047_v40 = vadd.f32 %v1032_v33, %v1031_v31  ;;  %v914_v41 = vadd.f32 %v1336_v37, %v817_v4  ;;  %v874_v44 = vadd.f32 %v873_v38, %v1723_v56  ;;  %v905_v45 = vpop.f32.mrb[37].mxu1  ;;  %v1329_v46 = vpop.f32.mrb[38].mxu0 }
 0x141   :  { %v984_v48 = vadd.f32 %v1742_v9, %v882_v36  ;;  %v906_v49 = vadd.f32 %v905_v45, %v1733_v52  ;;  %v885_v50 = vadd.f32 %v1329_v46, %v1729_v7  ;;  %v1337_v51 = vpop.f32.mrb[38].mxu1  ;;  %v876_v54 = vpop.f32.mrb[39].mxu0  ;;  %v1040_v17 = vmul.f32 %v987_v21, %v987_v21 }
 0x142   :  { %v1048_v55 = vadd.f32 %v1047_v40, %v1033_v35  ;;  %v992_v6 = vadd.f32 %v1742_v9, %v914_v41  ;;  %v982_v58 = vadd.f32 %v1742_v9, %v874_v44  ;;  %v1012_v59 = vadd.f32 %v1011_v39, %v981_v43  ;;  %v908_v60 = vpop.f32.mrb[39].mxu1 }
 0x143   :  { %1000 = vst [vmem:[%s1844_s3 + $0x30] sm:$0xff] %v984_v48  ;;  %v990_v56 = vadd.f32 %v1742_v9, %v906_v49  ;;  %v985_v61 = vadd.f32 %v1742_v9, %v885_v50  ;;  %v917_v52 = vadd.f32 %v1337_v51, %v1737_v5  ;;  %v877_v1 = vadd.f32 %v876_v54, %v1725_v57 }
 0x144   :  { %1008 = vst [vmem:[%s1844_s3 + $0x70] sm:$0xff] %v992_v6  ;;  %998 = vst [vmem:[%s1844_s3 + $0x20] sm:$0xff] %v982_v58  ;;  %v1013_v7 = vadd.f32 %v1012_v59, %v982_v58  ;;  %v1035_v62 = vmul.f32 %v982_v58, %v982_v58  ;;  %v1049_v63 = vadd.f32 %v1048_v55, %v1034_v47 }
 0x145   :  { %1006 = vst [vmem:[%s1844_s3 + $0x60] sm:$0xff] %v990_v56  ;;  %1001 = vst [vmem:[%s1844_s3 + $0x38] sm:$0xff] %v985_v61  ;;  %v993_v0 = vadd.f32 %v1742_v9, %v917_v52  ;;  %v909_v3 = vadd.f32 %v908_v60, %v1735_v53  ;;  %v983_v4 = vadd.f32 %v1742_v9, %v877_v1 }
 0x146   :  { %v1050_v2 = vadd.f32 %v1049_v63, %v1035_v62  ;;  %v1037_v57 = vmul.f32 %v984_v48, %v984_v48  ;;  %v1038_v12 = vmul.f32 %v985_v61, %v985_v61  ;;  %v1043_v43 = vmul.f32 %v990_v56, %v990_v56 }
 0x147   :  { %1009 = vst [vmem:[%s1844_s3 + $0x78] sm:$0xff] %v993_v0  ;;  %v991_v5 = vadd.f32 %v1742_v9, %v909_v3  ;;  %999 = vst [vmem:[%s1844_s3 + $0x28] sm:$0xff] %v983_v4  ;;  %v1014_v8 = vadd.f32 %v1013_v7, %v983_v4  ;;  %v1036_v10 = vmul.f32 %v983_v4, %v983_v4 }
 0x148   :  { %v1045_v33 = vmul.f32 %v992_v6, %v992_v6  ;;  %v1046_v35 = vmul.f32 %v993_v0, %v993_v0 }
 0x149   :  { %1007 = vst [vmem:[%s1844_s3 + $0x68] sm:$0xff] %v991_v5  ;;  %v1015_v53 = vadd.f32 %v1014_v8, %v984_v48  ;;  %v1051_v11 = vadd.f32 %v1050_v2, %v1036_v10  ;;  %v1044_v31 = vmul.f32 %v991_v5, %v991_v5 }
 0x14b   :  { %v1016_v13 = vadd.f32 %v1015_v53, %v985_v61  ;;  %v1052_v14 = vadd.f32 %v1051_v11, %v1037_v57 }
 0x14d   :  { %v1017_v9 = vadd.f32 %v1016_v13, %v1757_v28  ;;  %v1053_v16 = vadd.f32 %v1052_v14, %v1038_v12 }
 0x14f   :  { %v1054_v18 = vadd.f32 %v1053_v16, %v1039_v15  ;;  %v1018_v19 = vadd.f32 %v1017_v9, %v987_v21 }
 0x151   :  { %v1019_v23 = vadd.f32 %v1018_v19, %v1749_v24  ;;  %v1055_v25 = vadd.f32 %v1054_v18, %v1040_v17 }
 0x153   :  { %v1020_v26 = vadd.f32 %v1019_v23, %v1769_v29  ;;  %v1056_v27 = vadd.f32 %v1055_v25, %v1041_v22 }
 0x155   :  { %v1021_v20 = vadd.f32 %v1020_v26, %v990_v56  ;;  %v1057_v30 = vadd.f32 %v1056_v27, %v1042_v42 }
 0x157   :  { %v1022_v28 = vadd.f32 %v1021_v20, %v991_v5  ;;  %v1058_v32 = vadd.f32 %v1057_v30, %v1043_v43 }
 0x159   :  { %v1023_v21 = vadd.f32 %v1022_v28, %v992_v6  ;;  %v1059_v34 = vadd.f32 %v1058_v32, %v1044_v31 }
 0x15b   :  { %v1024_v36 = vadd.f32 %v1023_v21, %v993_v0  ;;  %v1060_v37 = vadd.f32 %v1059_v34, %v1045_v33 }
 0x15d   :  { %v1025_v24 = vrot.slane %v1024_v36, 4  ;;  %v1061_v38 = vadd.f32 %v1060_v37, %v1046_v35 }
 0x15f   :  { %v1026_v39 = vadd.f32 %v1025_v24, %v1024_v36  ;;  %v1062_v40 = vrot.slane %v1061_v38, 4 }
 0x161   :  { %v1027_v41 = vrot.slane %v1026_v39, 2  ;;  %v1063_v44 = vadd.f32 %v1062_v40, %v1061_v38 }
 0x163   :  { %v1028_v29 = vadd.f32 %v1027_v41, %v1026_v39  ;;  %v1064_v45 = vrot.slane %v1063_v44, 2 }
 0x165   :  { %v1029_v46 = vrot.slane %v1028_v29, 1  ;;  %v1065_v47 = vadd.f32 %v1064_v45, %v1063_v44 }
 0x167   :  { %v1066_v48 = vrot.slane %v1065_v47, 1  ;;  %v1030_v49 = vadd.f32 %v1029_v46, %v1028_v29 }
 0x169   :  { %v1067_v50 = vadd.f32 %v1066_v48, %v1065_v47 }
 0x16b   :  { %v1069_v51 = vsel %vm1068_vm0, %v1030_v49, %v1067_v50 }
 0x16c   :  { %v1071_v54 = vsel %vm1070_vm1, %v1069_v51, 0.0 }
 0x16d   :  { %1072 = vst [vmem:[%s1845_s4] sm:$0xff] %v1071_v54 }

// kernel: deep_koalarization_norm_forward.34
= control target key start
LH: loop header
LB: loop body
LE: loop exit
PB: predicated region body
PF: predicated region fallthrough
CT: control target
= control target key end

     0   :  { %s1135_s15 = smov 0   ;;  %s1137_s16 = smov 0   ;;  %s1264_s0 = inlined_call_operand.vmem [shape: bf16[32,1536], index: 0, kind: input, shape index: {}]   ;;  %s1265_s1 = inlined_call_operand.vmem [shape: bf16[1536,128], index: 1, kind: input, shape index: {}]   ;;  %s1266_s2 = inlined_call_operand.vmem [shape: f32[1,128], index: 2, kind: input, shape index: {}]   ;;  %s1267_s3 = inlined_call_operand.vmem [shape: f32[32,128], index: 3, kind: output, shape index: {0}]   ;;  %s1268_s4 = inlined_call_operand.vmem [shape: f32[8,128], index: 4, kind: output, shape index: {1}]  }
   0x1   :  { %s1139_s17 = smov 0   ;;  %s1141_s18 = smov 0  }
   0x2   :  { %s1143_s19 = smov 0  }
   0x3 LB: > { %s24_s20 = sadd.s32 1, %s1103_s18  ;;  %p43_p1 = scmp.ne.s32.totalorder %s1095_s16, %s1091_s15  ;;  %s1107_s19 = sphi %s1143_s19, %s15_s19   ;;  %s1103_s18 = sphi %s1141_s18, %s1272_s18   ;;  %s1099_s17 = sphi %s1139_s17, %s1271_s17   ;;  %s1095_s16 = sphi %s1137_s16, %s1270_s16   ;;  %s1091_s15 = sphi %s1135_s15, %s1269_s15  }
   0x4   : > { %p25_p0 = scmp.ge.s32.totalorder %s24_s20, 3  ;;  %p44_p2 = scmp.eq.s32.totalorder %s1107_s19, 0 }
   0x5   : > { %s36_s22 = sadd.s32 1, %s1095_s16  ;;  %p871_p5 = scmp.ge.s32.totalorder %s1107_s19, 3 }
   0x6   : > { %s1274_s20 = smov (%p25_p0, %s24_s20), 0  ;;  %p45_p3 = por %p44_p2, %p43_p1 }
   0x7   : > { %s32_s21 = ssub.s32 %s1103_s18, %s1274_s20  ;;  %171 = sbr.rel (%p871_p5) target bundleno = 22 (0x16), region = 20 }
   0x8   : > { %p34_p4 = scmp.eq.s32.totalorder %s32_s21, 0 }
   0xa   : > { %s1170_s23 = scalar_select %p34_p4, %s1095_s16, %s36_s22  }
   0xe   : > { %174 = sbr.rel (!%p45_p3) target bundleno = 22 (0x16), region = 24  ;;  %s176_s24 = sand.u32 (%p45_p3), 1, %s1095_s16  }
   0xf   : > { %s927_s25 = sshll.u32 (%p45_p3), %s1103_s18, 4  ;;  %s872_s26 = sshll.u32 (%p45_p3), %s176_s24, 6 }
  0x10   : > { %s184_s29 = scalar_lea.vmem (%p45_p3), %s1264_s0, %s927_s25  ;;  %s178_s30 = scalar_lea.vmem (%p45_p3), [#allocation3], %s872_s26 }
  0x11   : > { %v197_v0 = vld [vmem:[%s184_s29] sm:$0xff] (%p45_p3)  ;;  %v199_v1 = vld [vmem:[%s184_s29 + $0x8] sm:$0xff] (%p45_p3)  ;;  %v201_v2 = vld [vmem:[%s184_s29 + $0x30] sm:$0xff] (%p45_p3) }
  0x12   : > { %198 = vst [vmem:[%s178_s30] sm:$0xff] (%p45_p3), %v197_v0  ;;  %200 = vst [vmem:[%s178_s30 + $0x8] sm:$0xff] (%p45_p3), %v199_v1  ;;  %v203_v3 = vld [vmem:[%s184_s29 + $0x38] sm:$0xff] (%p45_p3)  ;;  %v205_v4 = vld [vmem:[%s184_s29 + $0x60] sm:$0xff] (%p45_p3) }
  0x13   : > { %202 = vst [vmem:[%s178_s30 + $0x10] sm:$0xff] (%p45_p3), %v201_v2  ;;  %v207_v5 = vld [vmem:[%s184_s29 + $0x68] sm:$0xff] (%p45_p3)  ;;  %204 = vst [vmem:[%s178_s30 + $0x18] sm:$0xff] (%p45_p3), %v203_v3  ;;  %v209_v6 = vld [vmem:[%s184_s29 + $0x90] sm:$0xff] (%p45_p3) }
  0x14   : > { %206 = vst [vmem:[%s178_s30 + $0x20] sm:$0xff] (%p45_p3), %v205_v4  ;;  %208 = vst [vmem:[%s178_s30 + $0x28] sm:$0xff] (%p45_p3), %v207_v5  ;;  %v211_v7 = vld [vmem:[%s184_s29 + $0x98] sm:$0xff] (%p45_p3) }
  0x15   : > { %210 = vst [vmem:[%s178_s30 + $0x30] sm:$0xff] %v209_v6  ;;  %212 = vst [vmem:[%s178_s30 + $0x38] sm:$0xff] %v211_v7 }
  0x16 PF: > { %p875_p6 = scmp.ge.s32.totalorder %s1107_s19, 1  ;;  %p226_p7 = scmp.lt.s32.totalorder %s1107_s19, 4 }
  0x18   : > { %p227_p8 = pnand %p875_p6, %p226_p7 }
  0x19   : > { %s233_s5 = sand.u32 (!%p227_p8), 1, %s1091_s15   ;;  %s877_s6 = sshll.u32 (!%p227_p8), %s1099_s17, 6 }
  0x1a   : > { %230 = sbr.rel (%p227_p8) target bundleno = 333 (0x14d), region = 51  ;;  %s876_s7 = sshll.u32 (!%p227_p8), %s233_s5, 6 }
  0x1b   : > { %p270_p9 = scmp.lt.s32.totalorder (!%p227_p8), %s877_s6, 191  ;;  %s1187_s12 = scalar_lea.vmem (!%p227_p8), [#allocation3], %s876_s7 }
  0x1c   : > { %p879_p10 = scmp.ne.s32.totalorder (!%p227_p8), %s1099_s17, 0 }
  0x21   : > { %s1276_s6 = smov (!%p270_p9, %s877_s6), 191  ;;  %289 = sbr.rel (%p879_p10) target bundleno = 40 (0x28), region = 59 }
  0x22   : > { %s878_s8 = sshll.u32 %s1276_s6, 2  ;;  %v1109_v8 = vmov (!%p879_p10), 0.0  }
  0x23   : > { %s1185_s11 = scalar_lea.vmem %s1265_s1, %s878_s8  ;;  %290 = vst [vmem:[#allocation2] sm:$0xff] (!%p879_p10), %v1109_v8  ;;  %291 = vst [vmem:[#allocation2 + $0x8] sm:$0xff] (!%p879_p10), %v1109_v8 }
  0x24   : > { %292 = vst [vmem:[#allocation2 + $0x10] sm:$0xff] (!%p879_p10), %v1109_v8  ;;  %293 = vst [vmem:[#allocation2 + $0x18] sm:$0xff] (!%p879_p10), %v1109_v8 }
  0x28 PF: > { %v1025_v9 = vld [vmem:[%s1185_s11 + $0x40] sm:$0xff]   ;;  %v1029_v13 = vld [vmem:[%s1185_s11 + $0x48] sm:$0xff]   ;;  %v1033_v17 = vld [vmem:[%s1185_s11 + $0x50] sm:$0xff]   ;;  %p920_p11 = scmp.ne.s32.totalorder %s1099_s17, 2 }
  0x29   : > { %v1026_v10 = vld [vmem:[%s1185_s11 + $0xc0] sm:$0xff]   ;;  %928 = vmatprep.subr.bf16.mxu0 %v1025_v9  ;;  %v1030_v14 = vld [vmem:[%s1185_s11 + $0xc8] sm:$0xff]   ;;  %v1034_v18 = vld [vmem:[%s1185_s11 + $0xd0] sm:$0xff]   ;;  %vm753_vm0 = vcmask (!%p920_p11), 1040384   ;;  %vm755_vm1 = vcmask (!%p920_p11), 1041408  }
  0x2a   : > { %v1027_v11 = vld [vmem:[%s1185_s11] sm:$0xff]   ;;  %956 = vmatprep.subr.bf16.mxu1 %v1026_v10  ;;  %v1031_v15 = vld [vmem:[%s1185_s11 + $0x8] sm:$0xff]   ;;  %v1035_v19 = vld [vmem:[%s1185_s11 + $0x10] sm:$0xff]  }
  0x2b   : > { %v1028_v12 = vld [vmem:[%s1185_s11 + $0x80] sm:$0xff]   ;;  %929 = vmatpush3.bf16.msra.mxu0 %v1027_v11  ;;  %v1032_v16 = vld [vmem:[%s1185_s11 + $0x88] sm:$0xff]   ;;  %v1036_v20 = vld [vmem:[%s1185_s11 + $0x90] sm:$0xff]  }
  0x2c   : > { %957 = vmatpush3.bf16.msra.mxu1 %v1028_v12  ;;  %930 = vmatprep.subr.bf16.mxu0 %v1029_v13  ;;  %v1037_v21 = vld [vmem:[%s1185_s11 + $0x58] sm:$0xff]   ;;  %v1041_v25 = vld [vmem:[%s1185_s11 + $0x60] sm:$0xff]   ;;  %v1045_v29 = vld [vmem:[%s1185_s11 + $0x68] sm:$0xff]  }
  0x2d   : > { %958 = vmatprep.subr.bf16.mxu1 %v1030_v14  ;;  %v1038_v22 = vld [vmem:[%s1185_s11 + $0xd8] sm:$0xff]   ;;  %v1042_v26 = vld [vmem:[%s1185_s11 + $0xe0] sm:$0xff]   ;;  %v1046_v30 = vld [vmem:[%s1185_s11 + $0xe8] sm:$0xff]  }
  0x2e   : > { %v1039_v23 = vld [vmem:[%s1185_s11 + $0x18] sm:$0xff]   ;;  %v1043_v27 = vld [vmem:[%s1185_s11 + $0x20] sm:$0xff]   ;;  %v1047_v31 = vld [vmem:[%s1185_s11 + $0x28] sm:$0xff]  }
  0x2f   : > { %931 = vmatpush3.bf16.msra.mxu0 %v1031_v15  ;;  %v1040_v24 = vld [vmem:[%s1185_s11 + $0x98] sm:$0xff]   ;;  %v1044_v28 = vld [vmem:[%s1185_s11 + $0xa0] sm:$0xff]   ;;  %v1048_v32 = vld [vmem:[%s1185_s11 + $0xa8] sm:$0xff]  }
  0x30   : > { %959 = vmatpush3.bf16.msra.mxu1 %v1032_v16  ;;  %932 = vmatprep.subr.bf16.mxu0 %v1033_v17  ;;  %v1049_v33 = vld [vmem:[%s1185_s11 + $0x70] sm:$0xff]   ;;  %v1053_v37 = vld [vmem:[%s1185_s11 + $0x78] sm:$0xff]   ;;  %v294_v58 = vld [vmem:[#allocation2] sm:$0xff] }
  0x31   : > { %960 = vmatprep.subr.bf16.mxu1 %v1034_v18  ;;  %v1050_v34 = vld [vmem:[%s1185_s11 + $0xf0] sm:$0xff]   ;;  %v1054_v38 = vld [vmem:[%s1185_s11 + $0xf8] sm:$0xff]   ;;  %v295_v63 = vld [vmem:[#allocation2 + $0x8] sm:$0xff] }
  0x32   : > { %v1051_v35 = vld [vmem:[%s1185_s11 + $0x30] sm:$0xff]   ;;  %v1055_v39 = vld [vmem:[%s1185_s11 + $0x38] sm:$0xff]  }
  0x33   : > { %933 = vmatpush3.bf16.msra.mxu0 %v1035_v19  ;;  %v1052_v36 = vld [vmem:[%s1185_s11 + $0xb0] sm:$0xff]   ;;  %v1056_v40 = vld [vmem:[%s1185_s11 + $0xb8] sm:$0xff]  }
  0x34   : > { %961 = vmatpush3.bf16.msra.mxu1 %v1036_v20  ;;  %934 = vmatprep.subr.bf16.mxu0 %v1037_v21  ;;  %v1057_v41 = vld [vmem:[%s1187_s12] ss:$16 sps:$4 sm:$0xff]   ;;  %v1059_v42 = vld [vmem:[%s1187_s12 + $0x4] ss:$16 sps:$4 sm:$0xff]   ;;  %v1060_v43 = vld [vmem:[%s1187_s12 + $0x8] ss:$16 sps:$4 sm:$0xff]  }
  0x35   : > { %962 = vmatprep.subr.bf16.mxu1 %v1038_v22  ;;  %v1062_v44 = vld [vmem:[%s1187_s12 + $0xc] ss:$16 sps:$4 sm:$0xff]   ;;  %634 = vmatprep.mubr.bf16.mxu0 %v1059_v42  ;;  %v1063_v45 = vld [vmem:[%s1187_s12 + $0x24] ss:$16 sps:$4 sm:$0xff]   ;;  %v1067_v47 = vld [vmem:[%s1187_s12 + $0x20] ss:$16 sps:$4 sm:$0xff]  }
  0x36   : > { %683 = vmatprep.mubr.bf16.mxu1 %v1062_v44  ;;  %v1065_v46 = vld [vmem:[%s1187_s12 + $0x2c] ss:$16 sps:$4 sm:$0xff]   ;;  %v1068_v48 = vld [vmem:[%s1187_s12 + $0x28] ss:$16 sps:$4 sm:$0xff]   ;;  %v296_v12 = vld [vmem:[#allocation2 + $0x10] sm:$0xff] }
  0x37   : > { %935 = vmatpush3.bf16.msra.mxu0 %v1039_v23  ;;  %v297_v17 = vld [vmem:[#allocation2 + $0x18] sm:$0xff]  ;;  %v921_v22 = vld [vmem:[%s1266_s2] ss:$0 sm:$0xff] (!%p920_p11) }
  0x38   : > { %963 = vmatpush3.bf16.msra.mxu1 %v1040_v24  ;;  %936 = vmatprep.subr.bf16.mxu0 %v1041_v25 }
  0x39   : > { %964 = vmatprep.subr.bf16.mxu1 %v1042_v26 }
  0x3b   : > { %937 = vmatpush3.bf16.msra.mxu0 %v1043_v27 }
  0x3c   : > { %965 = vmatpush3.bf16.msra.mxu1 %v1044_v28  ;;  %938 = vmatprep.subr.bf16.mxu0 %v1045_v29 }
  0x3d   : > { %966 = vmatprep.subr.bf16.mxu1 %v1046_v30 }
  0x3f   : > { %939 = vmatpush3.bf16.msra.mxu0 %v1047_v31 }
  0x40   : > { %967 = vmatpush3.bf16.msra.mxu1 %v1048_v32  ;;  %940 = vmatprep.subr.bf16.mxu0 %v1049_v33 }
  0x41   : > { %968 = vmatprep.subr.bf16.mxu1 %v1050_v34 }
  0x43   : > { %941 = vmatpush3.bf16.msra.mxu0 %v1051_v35 }
  0x44   : > { %969 = vmatpush3.bf16.msra.mxu1 %v1052_v36  ;;  %942 = vmatprep.subr.bf16.mxu0 %v1053_v37 }
  0x45   : > { %970 = vmatprep.subr.bf16.mxu1 %v1054_v38 }
  0x47   : > { %943 = vmatpush3.bf16.msra.mxu0 %v1055_v39 }
  0x48   : > { %971 = vmatpush3.bf16.msra.mxu1 %v1056_v40 }
  0x4a   : > { %635 = vmatmul.mubr.bf16.vlgmr.msra.gmra.mrb[0].mxu0 %v1057_v41 }
  0x4b   : > { %684 = vmatmul.mubr.bf16.vlgmr.msra.gmra.mrb[0].mxu1 %v1060_v43  ;;  %642 = vmatprep.mubr.bf16.mxu0 %v1063_v45 }
  0x4c   : > { %691 = vmatprep.mubr.bf16.mxu1 %v1065_v46 }
  0x52   : > { %643 = vmatmul.mubr.bf16.gmra.mrb[4].mxu0 %v1067_v47 }
  0x53   : > { %692 = vmatmul.mubr.bf16.gmra.mrb[4].mxu1 %v1068_v48 }
 0x11d   : > { %v944_v49 = vpop.f32.mrb[0].mxu0 }
 0x11e   : > { %v972_v50 = vpop.f32.mrb[0].mxu1  ;;  %v945_v51 = vpop.f32.mrb[1].mxu0 }
 0x11f   : > { %v946_v52 = vadd.f32 %v945_v51, %v944_v49  ;;  %v973_v53 = vpop.f32.mrb[1].mxu1  ;;  %v947_v54 = vpop.f32.mrb[2].mxu0 }
 0x120   : > { %v974_v55 = vadd.f32 %v973_v53, %v972_v50  ;;  %v975_v56 = vpop.f32.mrb[2].mxu1  ;;  %v948_v57 = vpop.f32.mrb[3].mxu0 }
 0x121   : > { %v949_v59 = vadd.f32 %v948_v57, %v947_v54  ;;  %v976_v60 = vpop.f32.mrb[3].mxu1 }
 0x122   : > { %v686_v61 = vadd.f32 %v974_v55, %v946_v52  ;;  %v977_v62 = vadd.f32 %v976_v60, %v975_v56 }
 0x124   : > { %v700_v0 = vadd.f32 %v686_v61, %v294_v58  ;;  %v689_v1 = vadd.f32 %v977_v62, %v949_v59 }
 0x125   : > { %v950_v2 = vpop.f32.mrb[4].mxu0 }
 0x126   : > { %704 = vst [vmem:[#allocation2] sm:$0xff] %v700_v0  ;;  %v701_v3 = vadd.f32 %v689_v1, %v295_v63  ;;  %v978_v4 = vpop.f32.mrb[4].mxu1  ;;  %v951_v5 = vpop.f32.mrb[5].mxu0 }
 0x127   : > { %v952_v6 = vadd.f32 %v951_v5, %v950_v2  ;;  %v979_v7 = vpop.f32.mrb[5].mxu1  ;;  %v953_v8 = vpop.f32.mrb[6].mxu0 }
 0x128   : > { %705 = vst [vmem:[#allocation2 + $0x8] sm:$0xff] %v701_v3  ;;  %v980_v9 = vadd.f32 %v979_v7, %v978_v4  ;;  %v981_v10 = vpop.f32.mrb[6].mxu1  ;;  %v954_v11 = vpop.f32.mrb[7].mxu0 }
 0x129   : > { %v955_v13 = vadd.f32 %v954_v11, %v953_v8  ;;  %v982_v14 = vpop.f32.mrb[7].mxu1 }
 0x12a   : > { %v694_v15 = vadd.f32 %v980_v9, %v952_v6  ;;  %v983_v16 = vadd.f32 %v982_v14, %v981_v10  ;;  %711 = sbr.rel (%p920_p11) target bundleno = 333 (0x14d), region = 63 }
 0x12c   : > { %v702_v18 = vadd.f32 %v694_v15, %v296_v12  ;;  %v697_v19 = vadd.f32 %v983_v16, %v955_v13 }
 0x12d   : > { %v712_v21 = vld [vmem:[#allocation2] sm:$0xff] (!%p920_p11) }
 0x12e   : > { %706 = vst [vmem:[#allocation2 + $0x10] sm:$0xff] %v702_v18  ;;  %v703_v20 = vadd.f32 %v697_v19, %v297_v17  ;;  %v723_v24 = vadd.f32 (!%p920_p11), %v921_v22, %v712_v21 }
 0x12f   : > { %v713_v23 = vld [vmem:[#allocation2 + $0x8] sm:$0xff] (!%p920_p11) }
 0x130   : > { %707 = vst [vmem:[#allocation2 + $0x18] sm:$0xff] %v703_v20  ;;  %v724_v25 = vadd.f32 (!%p920_p11), %v921_v22, %v713_v23  ;;  %727 = vst [vmem:[%s1267_s3] sm:$0xff] (!%p920_p11), %v723_v24  ;;  %v740_v30 = vmul.f32 (!%p920_p11), %v723_v24, %v723_v24 }
 0x132   : > { %728 = vst [vmem:[%s1267_s3 + $0x8] sm:$0xff] %v724_v25  ;;  %v731_v31 = vadd.f32 %v724_v25, %v723_v24  ;;  %v741_v32 = vmul.f32 %v724_v25, %v724_v25 }
 0x134   : > { %v744_v34 = vadd.f32 %v741_v32, %v740_v30 }
 0x135   : > { %v714_v26 = vld [vmem:[#allocation2 + $0x10] sm:$0xff] }
 0x136   : > { %v725_v28 = vadd.f32 %v921_v22, %v714_v26 }
 0x137   : > { %v715_v27 = vld [vmem:[#allocation2 + $0x18] sm:$0xff] }
 0x138   : > { %v726_v29 = vadd.f32 %v921_v22, %v715_v27  ;;  %729 = vst [vmem:[%s1267_s3 + $0x10] sm:$0xff] %v725_v28  ;;  %v742_v33 = vmul.f32 %v725_v28, %v725_v28  ;;  %v732_v35 = vadd.f32 %v731_v31, %v725_v28 }
 0x13a   : > { %730 = vst [vmem:[%s1267_s3 + $0x18] sm:$0xff] %v726_v29  ;;  %v743_v36 = vmul.f32 %v726_v29, %v726_v29  ;;  %v745_v37 = vadd.f32 %v744_v34, %v742_v33  ;;  %v733_v38 = vadd.f32 %v732_v35, %v726_v29 }
 0x13c   : > { %v734_v39 = vrot.slane %v733_v38, 4  ;;  %v746_v40 = vadd.f32 %v745_v37, %v743_v36 }
 0x13e   : > { %v735_v41 = vadd.f32 %v734_v39, %v733_v38  ;;  %v747_v42 = vrot.slane %v746_v40, 4 }
 0x140   : > { %v736_v43 = vrot.slane %v735_v41, 2  ;;  %v748_v44 = vadd.f32 %v747_v42, %v746_v40 }
 0x142   : > { %v737_v45 = vadd.f32 %v736_v43, %v735_v41  ;;  %v749_v46 = vrot.slane %v748_v44, 2 }
 0x144   : > { %v738_v47 = vrot.slane %v737_v45, 1  ;;  %v750_v48 = vadd.f32 %v749_v46, %v748_v44 }
 0x146   : > { %v739_v49 = vadd.f32 %v738_v47, %v737_v45  ;;  %v751_v50 = vrot.slane %v750_v48, 1 }
 0x148   : > { %v752_v51 = vadd.f32 %v751_v50, %v750_v48 }
 0x14a   : > { %v754_v52 = vsel %vm753_vm0, %v739_v49, %v752_v51 }
 0x14b   : > { %v756_v53 = vsel %vm755_vm1, %v754_v52, 0.0 }
 0x14c   : > { %757 = vst [vmem:[%s1268_s4] sm:$0xff] %v756_v53 }
 0x14d PF: > { %s15_s19 = sadd.s32 1, %s1107_s19   ;;  %s1269_s15 = smov %s1095_s16 }
 0x14e   : > { %p12_p12 = scmp.ge.s32.totalorder %s15_s19, 5   ;;  %s1270_s16 = smov %s1170_s23 }
 0x14f   : > { %s1271_s17 = smov %s1103_s18  ;;  %s1272_s18 = smov %s1274_s20 }
 0x150   :  { %14 = sbr.rel (!%p12_p12) target bundleno = 3 (0x3), region = 113 }

// kernel: deep_koalarization_norm_forward.35
= control target key start
LH: loop header
LB: loop body
LE: loop exit
PB: predicated region body
PF: predicated region fallthrough
CT: control target
= control target key end

     0   :  { %s104_s0 = inlined_call_operand.vmem [shape: f32[32,128], index: 0, kind: input, shape index: {}]   ;;  %s105_s1 = inlined_call_operand.vmem [shape: f32[1,128], index: 1, kind: input, shape index: {}]   ;;  %s106_s2 = inlined_call_operand.vmem [shape: f32[1,128], index: 2, kind: input, shape index: {}]   ;;  %s107_s3 = inlined_call_operand.vmem [shape: f32[32,128], index: 3, kind: output, shape index: {}]  }
   0x1   :  { %v14_v0 = vld [vmem:[%s104_s0] sm:$0xff]  ;;  %v15_v4 = vld [vmem:[%s104_s0 + $0x8] sm:$0xff]  ;;  %v16_v5 = vld [vmem:[%s104_s0 + $0x10] sm:$0xff] }
   0x2   :  { %v52_v1 = vld [vmem:[%s105_s1] ss:$0 sm:$0xff]  ;;  %v17_v6 = vld [vmem:[%s104_s0 + $0x18] sm:$0xff] }
   0x3   :  { %v53_v2 = vld [vmem:[%s106_s2] ss:$0 sm:$0xff]  ;;  %v25_v3 = vmul.f32 %v52_v1, %v14_v0  ;;  %v26_v7 = vmul.f32 %v52_v1, %v15_v4  ;;  %v27_v8 = vmul.f32 %v52_v1, %v16_v5  ;;  %v28_v9 = vmul.f32 %v52_v1, %v17_v6 }
   0x5   :  { %v36_v10 = vadd.f32 %v53_v2, %v25_v3  ;;  %v37_v11 = vadd.f32 %v53_v2, %v26_v7  ;;  %v38_v12 = vadd.f32 %v53_v2, %v27_v8  ;;  %v39_v13 = vadd.f32 %v53_v2, %v28_v9 }
   0x7   :  { %v40_v14 = vmax.f32 %v36_v10, 0.0  ;;  %v41_v15 = vmax.f32 %v37_v11, 0.0  ;;  %v42_v16 = vmax.f32 %v38_v12, 0.0  ;;  %v43_v17 = vmax.f32 %v39_v13, 0.0 }
   0x9   :  { %44 = vst [vmem:[%s107_s3] sm:$0xff] %v40_v14  ;;  %45 = vst [vmem:[%s107_s3 + $0x8] sm:$0xff] %v41_v15 }
   0xa   :  { %46 = vst [vmem:[%s107_s3 + $0x10] sm:$0xff] %v42_v16  ;;  %47 = vst [vmem:[%s107_s3 + $0x18] sm:$0xff] %v43_v17 }

// kernel: deep_koalarization_norm_forward.37
= control target key start
LH: loop header
LB: loop body
LE: loop exit
PB: predicated region body
PF: predicated region fallthrough
CT: control target
= control target key end

     0   :  { %v24_v0 = vlaneseq  ;;  %s156_s1 = inlined_call_operand.vmem [shape: f32[1,256], index: 1, kind: input, shape index: {}]   ;;  %s157_s2 = inlined_call_operand.vmem [shape: f32[1,256], index: 2, kind: input, shape index: {}]   ;;  %s158_s0 = inlined_call_operand.vmem [shape: f32[32,256], index: 0, kind: input, shape index: {}]   ;;  %s159_s3 = inlined_call_operand.vmem [shape: f32[32,256], index: 3, kind: output, shape index: {}]  }
   0x1   :  { %v22_v2 = vld [vmem:[%s156_s1] sm:$0x3]  ;;  %v15_v6 = vld [vmem:[%s158_s0 + $0x8] sm:$0xff]  ;;  %v16_v8 = vld [vmem:[%s158_s0 + $0x10] sm:$0xff] }
   0x2   :  { %v25_v1 = vshrl.u32 %v24_v0, 7  ;;  %v42_v3 = vld [vmem:[%s157_s2] sm:$0x3]  ;;  %v17_v9 = vld [vmem:[%s158_s0 + $0x18] sm:$0xff]  ;;  %v19_v15 = vld [vmem:[%s158_s0 + $0x28] sm:$0xff] }
   0x3   :  { %v14_v4 = vld [vmem:[%s158_s0] sm:$0xff]  ;;  %v20_v16 = vld [vmem:[%s158_s0 + $0x30] sm:$0xff]  ;;  %v21_v17 = vld [vmem:[%s158_s0 + $0x38] sm:$0xff] }
   0x4   :  { %v26_v5 = vsub.s32 0, %v25_v1  ;;  %v30_v7 = vsub.s32 1, %v25_v1  ;;  %v18_v10 = vld [vmem:[%s158_s0 + $0x20] sm:$0xff] }
   0x6   :  { %v27_v11 = vrot.slane %v22_v2, %v26_v5  ;;  %v47_v12 = vrot.slane %v42_v3, %v26_v5  ;;  %v31_v13 = vrot.slane %v22_v2, %v30_v7  ;;  %v51_v14 = vrot.slane %v42_v3, %v30_v7 }
   0x8   :  { %v34_v18 = vmul.f32 %v27_v11, %v14_v4  ;;  %v35_v19 = vmul.f32 %v31_v13, %v15_v6  ;;  %v36_v20 = vmul.f32 %v27_v11, %v16_v8  ;;  %v37_v21 = vmul.f32 %v31_v13, %v17_v9 }
   0x9   :  { %v38_v22 = vmul.f32 %v27_v11, %v18_v10  ;;  %v39_v23 = vmul.f32 %v31_v13, %v19_v15  ;;  %v40_v24 = vmul.f32 %v27_v11, %v20_v16  ;;  %v41_v25 = vmul.f32 %v31_v13, %v21_v17 }
   0xa   :  { %v54_v26 = vadd.f32 %v47_v12, %v34_v18  ;;  %v55_v27 = vadd.f32 %v51_v14, %v35_v19  ;;  %v56_v28 = vadd.f32 %v47_v12, %v36_v20  ;;  %v57_v29 = vadd.f32 %v51_v14, %v37_v21 }
   0xb   :  { %v58_v30 = vadd.f32 %v47_v12, %v38_v22  ;;  %v59_v31 = vadd.f32 %v51_v14, %v39_v23  ;;  %v60_v32 = vadd.f32 %v47_v12, %v40_v24  ;;  %v61_v33 = vadd.f32 %v51_v14, %v41_v25 }
   0xc   :  { %v62_v34 = vmax.f32 %v54_v26, 0.0  ;;  %v63_v35 = vmax.f32 %v55_v27, 0.0  ;;  %v64_v36 = vmax.f32 %v56_v28, 0.0  ;;  %v65_v37 = vmax.f32 %v57_v29, 0.0 }
   0xd   :  { %v66_v38 = vmax.f32 %v58_v30, 0.0  ;;  %v67_v39 = vmax.f32 %v59_v31, 0.0  ;;  %v68_v40 = vmax.f32 %v60_v32, 0.0  ;;  %v69_v41 = vmax.f32 %v61_v33, 0.0 }
   0xe   :  { %70 = vst [vmem:[%s159_s3] sm:$0xff] %v62_v34  ;;  %71 = vst [vmem:[%s159_s3 + $0x8] sm:$0xff] %v63_v35 }
   0xf   :  { %72 = vst [vmem:[%s159_s3 + $0x10] sm:$0xff] %v64_v36  ;;  %73 = vst [vmem:[%s159_s3 + $0x18] sm:$0xff] %v65_v37 }
  0x10   :  { %74 = vst [vmem:[%s159_s3 + $0x20] sm:$0xff] %v66_v38  ;;  %75 = vst [vmem:[%s159_s3 + $0x28] sm:$0xff] %v67_v39 }
  0x11   :  { %76 = vst [vmem:[%s159_s3 + $0x30] sm:$0xff] %v68_v40  ;;  %77 = vst [vmem:[%s159_s3 + $0x38] sm:$0xff] %v69_v41 }

// kernel: deep_koalarization_norm_forward.36
= control target key start
LH: loop header
LB: loop body
LE: loop exit
PB: predicated region body
PF: predicated region fallthrough
CT: control target
= control target key end

     0   :  { %s1388_s15 = smov 0   ;;  %s1390_s16 = smov 0   ;;  %s1564_s0 = inlined_call_operand.vmem [shape: bf16[32,1536], index: 0, kind: input, shape index: {}]   ;;  %s1565_s1 = inlined_call_operand.vmem [shape: bf16[1536,256], index: 1, kind: input, shape index: {}]   ;;  %s1566_s2 = inlined_call_operand.vmem [shape: f32[1,256], index: 2, kind: input, shape index: {}]   ;;  %s1567_s3 = inlined_call_operand.vmem [shape: f32[32,256], index: 3, kind: output, shape index: {0}]   ;;  %s1568_s4 = inlined_call_operand.vmem [shape: f32[8,256], index: 4, kind: output, shape index: {1}]  }
   0x1   :  { %s1392_s17 = smov 0   ;;  %s1394_s18 = smov 0  }
   0x2   :  { %s1396_s19 = smov 0  }
   0x3 LB: > { %s24_s20 = sadd.s32 1, %s1356_s18  ;;  %p43_p1 = scmp.ne.s32.totalorder %s1348_s16, %s1344_s15  ;;  %s1360_s19 = sphi %s1396_s19, %s15_s19   ;;  %s1356_s18 = sphi %s1394_s18, %s1572_s18   ;;  %s1352_s17 = sphi %s1392_s17, %s1571_s17   ;;  %s1348_s16 = sphi %s1390_s16, %s1570_s16   ;;  %s1344_s15 = sphi %s1388_s15, %s1569_s15  }
   0x4   : > { %p25_p0 = scmp.ge.s32.totalorder %s24_s20, 3  ;;  %p44_p2 = scmp.eq.s32.totalorder %s1360_s19, 0 }
   0x5   : > { %s36_s22 = sadd.s32 1, %s1348_s16  ;;  %p1075_p5 = scmp.ge.s32.totalorder %s1360_s19, 3 }
   0x6   : > { %s1574_s20 = smov (%p25_p0, %s24_s20), 0  ;;  %p45_p3 = por %p44_p2, %p43_p1 }
   0x7   : > { %s32_s21 = ssub.s32 %s1356_s18, %s1574_s20  ;;  %171 = sbr.rel (%p1075_p5) target bundleno = 22 (0x16), region = 20 }
   0x8   : > { %p34_p4 = scmp.eq.s32.totalorder %s32_s21, 0 }
   0xa   : > { %s1423_s23 = scalar_select %p34_p4, %s1348_s16, %s36_s22  }
   0xe   : > { %174 = sbr.rel (!%p45_p3) target bundleno = 22 (0x16), region = 24  ;;  %s176_s24 = sand.u32 (%p45_p3), 1, %s1348_s16  }
   0xf   : > { %s1163_s25 = sshll.u32 (%p45_p3), %s1356_s18, 4  ;;  %s1076_s26 = sshll.u32 (%p45_p3), %s176_s24, 6 }
  0x10   : > { %s184_s29 = scalar_lea.vmem (%p45_p3), %s1564_s0, %s1163_s25  ;;  %s178_s30 = scalar_lea.vmem (%p45_p3), [#allocation3], %s1076_s26 }
  0x11   : > { %v197_v0 = vld [vmem:[%s184_s29] sm:$0xff] (%p45_p3)  ;;  %v199_v1 = vld [vmem:[%s184_s29 + $0x8] sm:$0xff] (%p45_p3)  ;;  %v201_v2 = vld [vmem:[%s184_s29 + $0x30] sm:$0xff] (%p45_p3) }
  0x12   : > { %198 = vst [vmem:[%s178_s30] sm:$0xff] (%p45_p3), %v197_v0  ;;  %200 = vst [vmem:[%s178_s30 + $0x8] sm:$0xff] (%p45_p3), %v199_v1  ;;  %v203_v3 = vld [vmem:[%s184_s29 + $0x38] sm:$0xff] (%p45_p3)  ;;  %v205_v4 = vld [vmem:[%s184_s29 + $0x60] sm:$0xff] (%p45_p3) }
  0x13   : > { %202 = vst [vmem:[%s178_s30 + $0x10] sm:$0xff] (%p45_p3), %v201_v2  ;;  %v207_v5 = vld [vmem:[%s184_s29 + $0x68] sm:$0xff] (%p45_p3)  ;;  %204 = vst [vmem:[%s178_s30 + $0x18] sm:$0xff] (%p45_p3), %v203_v3  ;;  %v209_v6 = vld [vmem:[%s184_s29 + $0x90] sm:$0xff] (%p45_p3) }
  0x14   : > { %206 = vst [vmem:[%s178_s30 + $0x20] sm:$0xff] (%p45_p3), %v205_v4  ;;  %208 = vst [vmem:[%s178_s30 + $0x28] sm:$0xff] (%p45_p3), %v207_v5  ;;  %v211_v7 = vld [vmem:[%s184_s29 + $0x98] sm:$0xff] (%p45_p3) }
  0x15   : > { %210 = vst [vmem:[%s178_s30 + $0x30] sm:$0xff] %v209_v6  ;;  %212 = vst [vmem:[%s178_s30 + $0x38] sm:$0xff] %v211_v7 }
  0x16 PF: > { %p1079_p6 = scmp.ge.s32.totalorder %s1360_s19, 1  ;;  %p227_p7 = scmp.lt.s32.totalorder %s1360_s19, 4 }
  0x18   : > { %p228_p8 = pnand %p1079_p6, %p227_p7 }
  0x19   : > { %s234_s5 = sand.u32 (!%p228_p8), 1, %s1344_s15   ;;  %s1081_s6 = sshll.u32 (!%p228_p8), %s1352_s17, 6 }
  0x1a   : > { %231 = sbr.rel (%p228_p8) target bundleno = 362 (0x16a), region = 51  ;;  %s1080_s7 = sshll.u32 (!%p228_p8), %s234_s5, 6 }
  0x1b   : > { %p274_p9 = scmp.lt.s32.totalorder (!%p228_p8), %s1081_s6, 191  ;;  %s1440_s12 = scalar_lea.vmem (!%p228_p8), [#allocation3], %s1080_s7 }
  0x1c   : > { %p1084_p10 = scmp.ne.s32.totalorder (!%p228_p8), %s1352_s17, 0 }
  0x21   : > { %s1576_s6 = smov (!%p274_p9, %s1081_s6), 191  ;;  %295 = sbr.rel (%p1084_p10) target bundleno = 40 (0x28), region = 59 }
  0x22   : > { %s1164_s8 = sshll.u32 %s1576_s6, 3  ;;  %v1362_v8 = vmov (!%p1084_p10), 0.0  }
  0x23   : > { %s1438_s11 = scalar_lea.vmem %s1565_s1, %s1164_s8  ;;  %296 = vst [vmem:[#allocation2] sm:$0xff] (!%p1084_p10), %v1362_v8  ;;  %297 = vst [vmem:[#allocation2 + $0x8] sm:$0xff] (!%p1084_p10), %v1362_v8 }
  0x24   : > { %298 = vst [vmem:[#allocation2 + $0x10] sm:$0xff] (!%p1084_p10), %v1362_v8  ;;  %299 = vst [vmem:[#allocation2 + $0x18] sm:$0xff] (!%p1084_p10), %v1362_v8 }
  0x25   : > { %300 = vst [vmem:[#allocation2 + $0x20] sm:$0xff] (!%p1084_p10), %v1362_v8  ;;  %301 = vst [vmem:[#allocation2 + $0x28] sm:$0xff] (!%p1084_p10), %v1362_v8 }
  0x26   : > { %302 = vst [vmem:[#allocation2 + $0x30] sm:$0xff] (!%p1084_p10), %v1362_v8  ;;  %303 = vst [vmem:[#allocation2 + $0x38] sm:$0xff] (!%p1084_p10), %v1362_v8 }
  0x28 PF: > { %v1214_v9 = vld [vmem:[%s1438_s11 + $0x4] ss:$8 sps:$4 sm:$0xff]   ;;  %v1218_v11 = vld [vmem:[%s1438_s11] ss:$8 sps:$4 sm:$0xff]   ;;  %v1220_v13 = vld [vmem:[%s1438_s11 + $0x14] ss:$8 sps:$4 sm:$0xff]  }
  0x29   : > { %v1216_v10 = vld [vmem:[%s1438_s11 + $0x104] ss:$8 sps:$4 sm:$0xff]   ;;  %744 = vmatprep.subr.bf16.mxu1 %v1214_v9  ;;  %v1219_v12 = vld [vmem:[%s1438_s11 + $0x100] ss:$8 sps:$4 sm:$0xff]   ;;  %v1222_v14 = vld [vmem:[%s1438_s11 + $0x114] ss:$8 sps:$4 sm:$0xff]  }
  0x2a   : > { %797 = vmatprep.subr.bf16.mxu0 %v1216_v10  ;;  %745 = vmatpush1.bf16.msra.mxu1 %v1218_v11  ;;  %v1224_v15 = vld [vmem:[%s1438_s11 + $0x10] ss:$8 sps:$4 sm:$0xff]   ;;  %v1226_v17 = vld [vmem:[%s1438_s11 + $0x24] ss:$8 sps:$4 sm:$0xff]   ;;  %v1230_v19 = vld [vmem:[%s1438_s11 + $0x20] ss:$8 sps:$4 sm:$0xff]  }
  0x2b   : > { %798 = vmatpush1.bf16.msra.mxu0 %v1219_v12  ;;  %746 = vmatprep.subr.bf16.mxu1 %v1220_v13  ;;  %v1225_v16 = vld [vmem:[%s1438_s11 + $0x110] ss:$8 sps:$4 sm:$0xff]   ;;  %v1228_v18 = vld [vmem:[%s1438_s11 + $0x124] ss:$8 sps:$4 sm:$0xff]   ;;  %v1231_v20 = vld [vmem:[%s1438_s11 + $0x120] ss:$8 sps:$4 sm:$0xff]  }
  0x2c   : > { %799 = vmatprep.subr.bf16.mxu0 %v1222_v14  ;;  %v1232_v21 = vld [vmem:[%s1438_s11 + $0x34] ss:$8 sps:$4 sm:$0xff]   ;;  %v1236_v23 = vld [vmem:[%s1438_s11 + $0x30] ss:$8 sps:$4 sm:$0xff]   ;;  %v1238_v25 = vld [vmem:[%s1438_s11 + $0x44] ss:$8 sps:$4 sm:$0xff]  }
  0x2d   : > { %v1234_v22 = vld [vmem:[%s1438_s11 + $0x134] ss:$8 sps:$4 sm:$0xff]   ;;  %v1237_v24 = vld [vmem:[%s1438_s11 + $0x130] ss:$8 sps:$4 sm:$0xff]   ;;  %v1240_v26 = vld [vmem:[%s1438_s11 + $0x144] ss:$8 sps:$4 sm:$0xff]  }
  0x2e   : > { %747 = vmatpush1.bf16.msra.mxu1 %v1224_v15  ;;  %v1242_v27 = vld [vmem:[%s1438_s11 + $0x40] ss:$8 sps:$4 sm:$0xff]   ;;  %v1244_v29 = vld [vmem:[%s1438_s11 + $0x54] ss:$8 sps:$4 sm:$0xff]   ;;  %v1248_v31 = vld [vmem:[%s1438_s11 + $0x50] ss:$8 sps:$4 sm:$0xff]  }
  0x2f   : > { %800 = vmatpush1.bf16.msra.mxu0 %v1225_v16  ;;  %748 = vmatprep.subr.bf16.mxu1 %v1226_v17  ;;  %v1243_v28 = vld [vmem:[%s1438_s11 + $0x140] ss:$8 sps:$4 sm:$0xff]   ;;  %v1246_v30 = vld [vmem:[%s1438_s11 + $0x154] ss:$8 sps:$4 sm:$0xff]   ;;  %v1249_v32 = vld [vmem:[%s1438_s11 + $0x150] ss:$8 sps:$4 sm:$0xff]  }
  0x30   : > { %801 = vmatprep.subr.bf16.mxu0 %v1228_v18  ;;  %v1250_v33 = vld [vmem:[%s1438_s11 + $0x64] ss:$8 sps:$4 sm:$0xff]   ;;  %v1254_v35 = vld [vmem:[%s1438_s11 + $0x60] ss:$8 sps:$4 sm:$0xff]   ;;  %v1256_v37 = vld [vmem:[%s1438_s11 + $0x74] ss:$8 sps:$4 sm:$0xff]  }
  0x31   : > { %v1252_v34 = vld [vmem:[%s1438_s11 + $0x164] ss:$8 sps:$4 sm:$0xff]   ;;  %v1255_v36 = vld [vmem:[%s1438_s11 + $0x160] ss:$8 sps:$4 sm:$0xff]   ;;  %v1258_v38 = vld [vmem:[%s1438_s11 + $0x174] ss:$8 sps:$4 sm:$0xff]  }
  0x32   : > { %749 = vmatpush1.bf16.msra.mxu1 %v1230_v19  ;;  %v1260_v39 = vld [vmem:[%s1438_s11 + $0x70] ss:$8 sps:$4 sm:$0xff]   ;;  %v1262_v41 = vld [vmem:[%s1438_s11 + $0x84] ss:$8 sps:$4 sm:$0xff]   ;;  %v1266_v43 = vld [vmem:[%s1438_s11 + $0x80] ss:$8 sps:$4 sm:$0xff]  }
  0x33   : > { %802 = vmatpush1.bf16.msra.mxu0 %v1231_v20  ;;  %750 = vmatprep.subr.bf16.mxu1 %v1232_v21  ;;  %v1261_v40 = vld [vmem:[%s1438_s11 + $0x170] ss:$8 sps:$4 sm:$0xff]   ;;  %v1264_v42 = vld [vmem:[%s1438_s11 + $0x184] ss:$8 sps:$4 sm:$0xff]   ;;  %v1267_v44 = vld [vmem:[%s1438_s11 + $0x180] ss:$8 sps:$4 sm:$0xff]  }
  0x34   : > { %803 = vmatprep.subr.bf16.mxu0 %v1234_v22  ;;  %v1268_v45 = vld [vmem:[%s1438_s11 + $0x94] ss:$8 sps:$4 sm:$0xff]   ;;  %v1272_v47 = vld [vmem:[%s1438_s11 + $0x90] ss:$8 sps:$4 sm:$0xff]   ;;  %v1274_v49 = vld [vmem:[%s1438_s11 + $0xa4] ss:$8 sps:$4 sm:$0xff]  }
  0x35   : > { %v1270_v46 = vld [vmem:[%s1438_s11 + $0x194] ss:$8 sps:$4 sm:$0xff]   ;;  %v1273_v48 = vld [vmem:[%s1438_s11 + $0x190] ss:$8 sps:$4 sm:$0xff]   ;;  %v1276_v50 = vld [vmem:[%s1438_s11 + $0x1a4] ss:$8 sps:$4 sm:$0xff]  }
  0x36   : > { %751 = vmatpush1.bf16.msra.mxu1 %v1236_v23  ;;  %v1278_v51 = vld [vmem:[%s1438_s11 + $0xa0] ss:$8 sps:$4 sm:$0xff]   ;;  %v1280_v53 = vld [vmem:[%s1438_s11 + $0xb4] ss:$8 sps:$4 sm:$0xff]   ;;  %v1284_v55 = vld [vmem:[%s1438_s11 + $0xb0] ss:$8 sps:$4 sm:$0xff]  }
  0x37   : > { %804 = vmatpush1.bf16.msra.mxu0 %v1237_v24  ;;  %752 = vmatprep.subr.bf16.mxu1 %v1238_v25  ;;  %v1279_v52 = vld [vmem:[%s1438_s11 + $0x1a0] ss:$8 sps:$4 sm:$0xff]   ;;  %v1282_v54 = vld [vmem:[%s1438_s11 + $0x1b4] ss:$8 sps:$4 sm:$0xff]   ;;  %v1285_v56 = vld [vmem:[%s1438_s11 + $0x1b0] ss:$8 sps:$4 sm:$0xff]  }
  0x38   : > { %805 = vmatprep.subr.bf16.mxu0 %v1240_v26  ;;  %v1286_v57 = vld [vmem:[%s1438_s11 + $0xc4] ss:$8 sps:$4 sm:$0xff]   ;;  %v1290_v61 = vld [vmem:[%s1438_s11 + $0xc0] ss:$8 sps:$4 sm:$0xff]   ;;  %v1292_v63 = vld [vmem:[%s1438_s11 + $0xd4] ss:$8 sps:$4 sm:$0xff]  }
  0x39   : > { %v1312_v58 = vld [vmem:[%s1440_s12 + $0x4] ss:$16 sps:$4 sm:$0xff]   ;;  %v1315_v60 = vld [vmem:[%s1440_s12 + $0xc] ss:$16 sps:$4 sm:$0xff]   ;;  %v1291_v62 = vld [vmem:[%s1438_s11 + $0x1c0] ss:$8 sps:$4 sm:$0xff]  }
  0x3a   : > { %753 = vmatpush1.bf16.msra.mxu1 %v1242_v27  ;;  %v1288_v59 = vld [vmem:[%s1438_s11 + $0x1c4] ss:$8 sps:$4 sm:$0xff]   ;;  %776 = vmatprep.mubr.bf16.mxu1 %v1312_v58  ;;  %v1294_v0 = vld [vmem:[%s1438_s11 + $0x1d4] ss:$8 sps:$4 sm:$0xff]   ;;  %v1296_v1 = vld [vmem:[%s1438_s11 + $0xd0] ss:$8 sps:$4 sm:$0xff]  }
  0x3b   : > { %806 = vmatpush1.bf16.msra.mxu0 %v1243_v28  ;;  %754 = vmatprep.subr.bf16.mxu1 %v1244_v29  ;;  %v1297_v2 = vld [vmem:[%s1438_s11 + $0x1d0] ss:$8 sps:$4 sm:$0xff]   ;;  %v1298_v3 = vld [vmem:[%s1438_s11 + $0xe4] ss:$8 sps:$4 sm:$0xff]   ;;  %v1302_v5 = vld [vmem:[%s1438_s11 + $0xe0] ss:$8 sps:$4 sm:$0xff]  }
  0x3c   : > { %807 = vmatprep.subr.bf16.mxu0 %v1246_v30  ;;  %829 = vmatprep.mubr.bf16.mxu0 %v1315_v60  ;;  %v1300_v4 = vld [vmem:[%s1438_s11 + $0x1e4] ss:$8 sps:$4 sm:$0xff]   ;;  %v1303_v6 = vld [vmem:[%s1438_s11 + $0x1e0] ss:$8 sps:$4 sm:$0xff]   ;;  %v1304_v7 = vld [vmem:[%s1438_s11 + $0xf4] ss:$8 sps:$4 sm:$0xff]  }
  0x3d   : > { %v1306_v8 = vld [vmem:[%s1438_s11 + $0x1f4] ss:$8 sps:$4 sm:$0xff]   ;;  %v1308_v9 = vld [vmem:[%s1438_s11 + $0xf0] ss:$8 sps:$4 sm:$0xff]   ;;  %v304_v18 = vld [vmem:[#allocation2] sm:$0xff]  ;;  %p1157_p11 = scmp.ne.s32.totalorder %s1352_s17, 2 }
  0x3e   : > { %755 = vmatpush1.bf16.msra.mxu1 %v1248_v31  ;;  %v1309_v10 = vld [vmem:[%s1438_s11 + $0x1f0] ss:$8 sps:$4 sm:$0xff]   ;;  %v1316_v13 = vld [vmem:[%s1440_s12 + $0x24] ss:$16 sps:$4 sm:$0xff]   ;;  %v1318_v14 = vld [vmem:[%s1440_s12 + $0x2c] ss:$16 sps:$4 sm:$0xff]  }
  0x3f   : > { %808 = vmatpush1.bf16.msra.mxu0 %v1249_v32  ;;  %756 = vmatprep.subr.bf16.mxu1 %v1250_v33  ;;  %v1310_v11 = vld [vmem:[%s1440_s12] ss:$16 sps:$4 sm:$0xff]   ;;  %v1313_v12 = vld [vmem:[%s1440_s12 + $0x8] ss:$16 sps:$4 sm:$0xff]   ;;  %vm950_vm0 = vcmask (!%p1157_p11), 1040384   ;;  %vm953_vm1 = vcmask (!%p1157_p11), 1041408  }
  0x40   : > { %809 = vmatprep.subr.bf16.mxu0 %v1252_v34  ;;  %v1320_v15 = vld [vmem:[%s1440_s12 + $0x20] ss:$16 sps:$4 sm:$0xff]   ;;  %v1321_v16 = vld [vmem:[%s1440_s12 + $0x28] ss:$16 sps:$4 sm:$0xff]  }
  0x41   : > { %v305_v22 = vld [vmem:[#allocation2 + $0x8] sm:$0xff]  ;;  %v306_v26 = vld [vmem:[#allocation2 + $0x10] sm:$0xff]  ;;  %v307_v31 = vld [vmem:[#allocation2 + $0x18] sm:$0xff] }
  0x42   : > { %757 = vmatpush1.bf16.msra.mxu1 %v1254_v35 }
  0x43   : > { %810 = vmatpush1.bf16.msra.mxu0 %v1255_v36  ;;  %758 = vmatprep.subr.bf16.mxu1 %v1256_v37 }
  0x44   : > { %811 = vmatprep.subr.bf16.mxu0 %v1258_v38  ;;  %v308_v38 = vld [vmem:[#allocation2 + $0x20] sm:$0xff] }
  0x46   : > { %759 = vmatpush1.bf16.msra.mxu1 %v1260_v39 }
  0x47   : > { %812 = vmatpush1.bf16.msra.mxu0 %v1261_v40  ;;  %760 = vmatprep.subr.bf16.mxu1 %v1262_v41 }
  0x48   : > { %813 = vmatprep.subr.bf16.mxu0 %v1264_v42  ;;  %v309_v42 = vld [vmem:[#allocation2 + $0x28] sm:$0xff] }
  0x4a   : > { %761 = vmatpush1.bf16.msra.mxu1 %v1266_v43 }
  0x4b   : > { %814 = vmatpush1.bf16.msra.mxu0 %v1267_v44  ;;  %762 = vmatprep.subr.bf16.mxu1 %v1268_v45 }
  0x4c   : > { %815 = vmatprep.subr.bf16.mxu0 %v1270_v46  ;;  %v310_v46 = vld [vmem:[#allocation2 + $0x30] sm:$0xff] }
  0x4e   : > { %763 = vmatpush1.bf16.msra.mxu1 %v1272_v47 }
  0x4f   : > { %816 = vmatpush1.bf16.msra.mxu0 %v1273_v48  ;;  %764 = vmatprep.subr.bf16.mxu1 %v1274_v49 }
  0x50   : > { %817 = vmatprep.subr.bf16.mxu0 %v1276_v50 }
  0x52   : > { %765 = vmatpush1.bf16.msra.mxu1 %v1278_v51  ;;  %v311_v51 = vld [vmem:[#allocation2 + $0x38] sm:$0xff] }
  0x53   : > { %818 = vmatpush1.bf16.msra.mxu0 %v1279_v52  ;;  %766 = vmatprep.subr.bf16.mxu1 %v1280_v53 }
  0x54   : > { %819 = vmatprep.subr.bf16.mxu0 %v1282_v54 }
  0x56   : > { %767 = vmatpush1.bf16.msra.mxu1 %v1284_v55 }
  0x57   : > { %820 = vmatpush1.bf16.msra.mxu0 %v1285_v56  ;;  %768 = vmatprep.subr.bf16.mxu1 %v1286_v57  ;;  %v880_v57 = vlaneseq (!%p1157_p11) }
  0x58   : > { %821 = vmatprep.subr.bf16.mxu0 %v1288_v59  ;;  %v878_v59 = vld [vmem:[%s1566_s2] sm:$0x3] (!%p1157_p11) }
  0x59   : > { %v881_v58 = vshrl.u32 (!%p1157_p11), %v880_v57, 7 }
  0x5a   : > { %769 = vmatpush1.bf16.msra.mxu1 %v1290_v61 }
  0x5b   : > { %822 = vmatpush1.bf16.msra.mxu0 %v1291_v62  ;;  %770 = vmatprep.subr.bf16.mxu1 %v1292_v63  ;;  %v882_v61 = vsub.s32 (!%p1157_p11), 0, %v881_v58  ;;  %v886_v63 = vsub.s32 (!%p1157_p11), 1, %v881_v58 }
  0x5c   : > { %823 = vmatprep.subr.bf16.mxu0 %v1294_v0 }
  0x5e   : > { %771 = vmatpush1.bf16.msra.mxu1 %v1296_v1 }
  0x5f   : > { %824 = vmatpush1.bf16.msra.mxu0 %v1297_v2  ;;  %772 = vmatprep.subr.bf16.mxu1 %v1298_v3  ;;  %v883_v3 = vrot.slane (!%p1157_p11), %v878_v59, %v882_v61 }
  0x60   : > { %825 = vmatprep.subr.bf16.mxu0 %v1300_v4  ;;  %v887_v4 = vrot.slane (!%p1157_p11), %v878_v59, %v886_v63 }
  0x62   : > { %773 = vmatpush1.bf16.msra.mxu1 %v1302_v5 }
  0x63   : > { %826 = vmatpush1.bf16.msra.mxu0 %v1303_v6  ;;  %774 = vmatprep.subr.bf16.mxu1 %v1304_v7 }
  0x64   : > { %827 = vmatprep.subr.bf16.mxu0 %v1306_v8 }
  0x66   : > { %775 = vmatpush1.bf16.msra.mxu1 %v1308_v9 }
  0x67   : > { %828 = vmatpush1.bf16.msra.mxu0 %v1309_v10 }
  0x69   : > { %777 = vmatmul.mubr.bf16.vlgmr.msra.gmra.mrb[0].mxu1 %v1310_v11 }
  0x6a   : > { %830 = vmatmul.mubr.bf16.vlgmr.msra.gmra.mrb[0].mxu0 %v1313_v12  ;;  %786 = vmatprep.mubr.bf16.mxu1 %v1316_v13 }
  0x6b   : > { %839 = vmatprep.mubr.bf16.mxu0 %v1318_v14 }
  0x71   : > { %787 = vmatmul.mubr.bf16.gmra.mrb[4].mxu1 %v1320_v15 }
  0x72   : > { %840 = vmatmul.mubr.bf16.gmra.mrb[4].mxu0 %v1321_v16 }
 0x13c   : > { %v778_v17 = vpop.f32.mrb[0].mxu1 }
 0x13d   : > { %v831_v19 = vpop.f32.mrb[0].mxu0  ;;  %v780_v21 = vpop.f32.mrb[1].mxu1 }
 0x13e   : > { %v832_v20 = vadd.f32 %v831_v19, %v778_v17  ;;  %v833_v23 = vpop.f32.mrb[1].mxu0  ;;  %v782_v25 = vpop.f32.mrb[2].mxu1 }
 0x13f   : > { %v834_v24 = vadd.f32 %v833_v23, %v780_v21  ;;  %v835_v27 = vpop.f32.mrb[2].mxu0  ;;  %v784_v30 = vpop.f32.mrb[3].mxu1 }
 0x140   : > { %v850_v28 = vadd.f32 %v832_v20, %v304_v18  ;;  %v836_v29 = vadd.f32 %v835_v27, %v782_v25  ;;  %v837_v32 = vpop.f32.mrb[3].mxu0 }
 0x141   : > { %v851_v33 = vadd.f32 %v834_v24, %v305_v22  ;;  %v838_v34 = vadd.f32 %v837_v32, %v784_v30 }
 0x142   : > { %858 = vst [vmem:[#allocation2] sm:$0xff] %v850_v28  ;;  %v852_v35 = vadd.f32 %v836_v29, %v306_v26 }
 0x143   : > { %859 = vst [vmem:[#allocation2 + $0x8] sm:$0xff] %v851_v33  ;;  %v853_v36 = vadd.f32 %v838_v34, %v307_v31 }
 0x144   : > { %860 = vst [vmem:[#allocation2 + $0x10] sm:$0xff] %v852_v35  ;;  %v788_v37 = vpop.f32.mrb[4].mxu1 }
 0x145   : > { %861 = vst [vmem:[#allocation2 + $0x18] sm:$0xff] %v853_v36  ;;  %v841_v39 = vpop.f32.mrb[4].mxu0  ;;  %v790_v41 = vpop.f32.mrb[5].mxu1 }
 0x146   : > { %v842_v40 = vadd.f32 %v841_v39, %v788_v37  ;;  %v843_v43 = vpop.f32.mrb[5].mxu0  ;;  %v792_v45 = vpop.f32.mrb[6].mxu1 }
 0x147   : > { %v844_v44 = vadd.f32 %v843_v43, %v790_v41  ;;  %v845_v47 = vpop.f32.mrb[6].mxu0  ;;  %v794_v50 = vpop.f32.mrb[7].mxu1  ;;  %869 = sbr.rel (%p1157_p11) target bundleno = 362 (0x16a), region = 63 }
 0x148   : > { %v854_v48 = vadd.f32 %v842_v40, %v308_v38  ;;  %v846_v49 = vadd.f32 %v845_v47, %v792_v45  ;;  %v847_v52 = vpop.f32.mrb[7].mxu0 }
 0x149   : > { %v855_v53 = vadd.f32 %v844_v44, %v309_v42  ;;  %v848_v54 = vadd.f32 %v847_v52, %v794_v50  ;;  %v870_v60 = vld [vmem:[#allocation2] sm:$0xff] (!%p1157_p11) }
 0x14a   : > { %862 = vst [vmem:[#allocation2 + $0x20] sm:$0xff] %v854_v48  ;;  %v856_v55 = vadd.f32 %v846_v49, %v310_v46  ;;  %v871_v62 = vld [vmem:[#allocation2 + $0x8] sm:$0xff] (!%p1157_p11)  ;;  %v890_v8 = vadd.f32 (!%p1157_p11), %v883_v3, %v870_v60 }
 0x14b   : > { %863 = vst [vmem:[#allocation2 + $0x28] sm:$0xff] %v855_v53  ;;  %v857_v56 = vadd.f32 %v848_v54, %v311_v51  ;;  %v872_v0 = vld [vmem:[#allocation2 + $0x10] sm:$0xff] (!%p1157_p11)  ;;  %v891_v9 = vadd.f32 (!%p1157_p11), %v887_v4, %v871_v62 }
 0x14c   : > { %864 = vst [vmem:[#allocation2 + $0x30] sm:$0xff] %v856_v55  ;;  %v873_v1 = vld [vmem:[#allocation2 + $0x18] sm:$0xff] (!%p1157_p11)  ;;  %v892_v10 = vadd.f32 (!%p1157_p11), %v883_v3, %v872_v0  ;;  %898 = vst [vmem:[%s1567_s3] sm:$0xff] (!%p1157_p11), %v890_v8  ;;  %v924_v16 = vmul.f32 (!%p1157_p11), %v890_v8, %v890_v8 }
 0x14d   : > { %865 = vst [vmem:[#allocation2 + $0x38] sm:$0xff] %v857_v56  ;;  %v893_v11 = vadd.f32 (!%p1157_p11), %v887_v4, %v873_v1  ;;  %899 = vst [vmem:[%s1567_s3 + $0x8] sm:$0xff] (!%p1157_p11), %v891_v9  ;;  %v925_v17 = vmul.f32 (!%p1157_p11), %v891_v9, %v891_v9 }
 0x14e   : > { %900 = vst [vmem:[%s1567_s3 + $0x10] sm:$0xff] %v892_v10  ;;  %v906_v18 = vadd.f32 %v892_v10, %v890_v8  ;;  %v926_v19 = vmul.f32 %v892_v10, %v892_v10 }
 0x14f   : > { %901 = vst [vmem:[%s1567_s3 + $0x18] sm:$0xff] %v893_v11  ;;  %v915_v20 = vadd.f32 %v893_v11, %v891_v9  ;;  %v927_v21 = vmul.f32 %v893_v11, %v893_v11 }
 0x150   : > { %v932_v24 = vadd.f32 %v926_v19, %v924_v16 }
 0x151   : > { %v874_v2 = vld [vmem:[#allocation2 + $0x20] sm:$0xff]  ;;  %v941_v27 = vadd.f32 %v927_v21, %v925_v17 }
 0x152   : > { %v875_v5 = vld [vmem:[#allocation2 + $0x28] sm:$0xff]  ;;  %v894_v12 = vadd.f32 %v883_v3, %v874_v2 }
 0x153   : > { %v876_v6 = vld [vmem:[#allocation2 + $0x30] sm:$0xff]  ;;  %v895_v13 = vadd.f32 %v887_v4, %v875_v5 }
 0x154   : > { %v877_v7 = vld [vmem:[#allocation2 + $0x38] sm:$0xff]  ;;  %v896_v14 = vadd.f32 %v883_v3, %v876_v6  ;;  %902 = vst [vmem:[%s1567_s3 + $0x20] sm:$0xff] %v894_v12  ;;  %v928_v22 = vmul.f32 %v894_v12, %v894_v12  ;;  %v907_v25 = vadd.f32 %v906_v18, %v894_v12 }
 0x155   : > { %v897_v15 = vadd.f32 %v887_v4, %v877_v7  ;;  %903 = vst [vmem:[%s1567_s3 + $0x28] sm:$0xff] %v895_v13  ;;  %v929_v23 = vmul.f32 %v895_v13, %v895_v13  ;;  %v916_v28 = vadd.f32 %v915_v20, %v895_v13 }
 0x156   : > { %904 = vst [vmem:[%s1567_s3 + $0x30] sm:$0xff] %v896_v14  ;;  %v930_v26 = vmul.f32 %v896_v14, %v896_v14  ;;  %v933_v30 = vadd.f32 %v932_v24, %v928_v22  ;;  %v908_v31 = vadd.f32 %v907_v25, %v896_v14 }
 0x157   : > { %905 = vst [vmem:[%s1567_s3 + $0x38] sm:$0xff] %v897_v15  ;;  %v931_v29 = vmul.f32 %v897_v15, %v897_v15  ;;  %v942_v32 = vadd.f32 %v941_v27, %v929_v23  ;;  %v917_v33 = vadd.f32 %v916_v28, %v897_v15 }
 0x158   : > { %v909_v34 = vrot.slane %v908_v31, 4  ;;  %v934_v35 = vadd.f32 %v933_v30, %v930_v26 }
 0x159   : > { %v918_v36 = vrot.slane %v917_v33, 4  ;;  %v943_v37 = vadd.f32 %v942_v32, %v931_v29 }
 0x15a   : > { %v910_v38 = vadd.f32 %v909_v34, %v908_v31  ;;  %v935_v39 = vrot.slane %v934_v35, 4 }
 0x15b   : > { %v919_v40 = vadd.f32 %v918_v36, %v917_v33  ;;  %v944_v41 = vrot.slane %v943_v37, 4 }
 0x15c   : > { %v911_v42 = vrot.slane %v910_v38, 2  ;;  %v936_v43 = vadd.f32 %v935_v39, %v934_v35 }
 0x15d   : > { %v920_v44 = vrot.slane %v919_v40, 2  ;;  %v945_v45 = vadd.f32 %v944_v41, %v943_v37 }
 0x15e   : > { %v912_v46 = vadd.f32 %v911_v42, %v910_v38  ;;  %v937_v47 = vrot.slane %v936_v43, 2 }
 0x15f   : > { %v921_v48 = vadd.f32 %v920_v44, %v919_v40  ;;  %v946_v49 = vrot.slane %v945_v45, 2 }
 0x160   : > { %v913_v50 = vrot.slane %v912_v46, 1  ;;  %v938_v51 = vadd.f32 %v937_v47, %v936_v43 }
 0x161   : > { %v922_v52 = vrot.slane %v921_v48, 1  ;;  %v947_v53 = vadd.f32 %v946_v49, %v945_v45 }
 0x162   : > { %v914_v54 = vadd.f32 %v913_v50, %v912_v46  ;;  %v939_v55 = vrot.slane %v938_v51, 1 }
 0x163   : > { %v923_v56 = vadd.f32 %v922_v52, %v921_v48  ;;  %v948_v57 = vrot.slane %v947_v53, 1 }
 0x164   : > { %v940_v58 = vadd.f32 %v939_v55, %v938_v51 }
 0x165   : > { %v949_v59 = vadd.f32 %v948_v57, %v947_v53 }
 0x166   : > { %v951_v60 = vsel %vm950_vm0, %v914_v54, %v940_v58 }
 0x167   : > { %v954_v61 = vsel %vm953_vm1, %v951_v60, 0.0  ;;  %v952_v62 = vsel %vm950_vm0, %v923_v56, %v949_v59 }
 0x168   : > { %956 = vst [vmem:[%s1568_s4] sm:$0xff] %v954_v61  ;;  %v955_v63 = vsel %vm953_vm1, %v952_v62, 0.0 }
 0x169   : > { %957 = vst [vmem:[%s1568_s4 + $0x8] sm:$0xff] %v955_v63 }
 0x16a PF: > { %s15_s19 = sadd.s32 1, %s1360_s19   ;;  %s1569_s15 = smov %s1348_s16 }
 0x16b   : > { %p12_p12 = scmp.ge.s32.totalorder %s15_s19, 5   ;;  %s1570_s16 = smov %s1423_s23 }
 0x16c   : > { %s1571_s17 = smov %s1356_s18  ;;  %s1572_s18 = smov %s1574_s20 }
 0x16d   :  { %14 = sbr.rel (!%p12_p12) target bundleno = 3 (0x3), region = 113 }

// kernel: deep_koalarization_norm_forward.39
= control target key start
LH: loop header
LB: loop body
LE: loop exit
PB: predicated region body
PF: predicated region fallthrough
CT: control target
= control target key end

     0   :  { %v18_v0 = vlaneseq  ;;  %s90_s1 = inlined_call_operand.vmem [shape: f32[1,256], index: 1, kind: input, shape index: {}]   ;;  %s91_s2 = inlined_call_operand.vmem [shape: f32[1,256], index: 2, kind: input, shape index: {}]   ;;  %s92_s0 = inlined_call_operand.vmem [shape: f32[8,256], index: 0, kind: input, shape index: {}]   ;;  %s93_s3 = inlined_call_operand.vmem [shape: f32[8,256], index: 3, kind: output, shape index: {}]  }
   0x1   :  { %v16_v2 = vld [vmem:[%s90_s1] sm:$0x3]  ;;  %v15_v7 = vld [vmem:[%s92_s0 + $0x8] sm:$0xff] }
   0x2   :  { %v19_v1 = vshrl.u32 %v18_v0, 7  ;;  %v30_v3 = vld [vmem:[%s91_s2] sm:$0x3] }
   0x3   :  { %v14_v6 = vld [vmem:[%s92_s0] sm:$0xff] }
   0x4   :  { %v20_v4 = vsub.s32 0, %v19_v1  ;;  %v24_v5 = vsub.s32 1, %v19_v1 }
   0x6   :  { %v21_v8 = vrot.slane %v16_v2, %v20_v4  ;;  %v35_v9 = vrot.slane %v30_v3, %v20_v4  ;;  %v25_v10 = vrot.slane %v16_v2, %v24_v5  ;;  %v39_v11 = vrot.slane %v30_v3, %v24_v5 }
   0x8   :  { %v28_v12 = vmul.f32 %v21_v8, %v14_v6  ;;  %v29_v13 = vmul.f32 %v25_v10, %v15_v7 }
   0xa   :  { %v42_v14 = vadd.f32 %v35_v9, %v28_v12  ;;  %v43_v15 = vadd.f32 %v39_v11, %v29_v13 }
   0xc   :  { %v44_v16 = vmax.f32 %v42_v14, 0.0  ;;  %v45_v17 = vmax.f32 %v43_v15, 0.0 }
   0xe   :  { %46 = vst [vmem:[%s93_s3] sm:$0xff] %v44_v16  ;;  %47 = vst [vmem:[%s93_s3 + $0x8] sm:$0xff] %v45_v17 }

// kernel: deep_koalarization_norm_forward.38
= control target key start
LH: loop header
LB: loop body
LE: loop exit
PB: predicated region body
PF: predicated region fallthrough
CT: control target
= control target key end

     0   :  { %s1182_s15 = smov 0   ;;  %s1184_s16 = smov 0   ;;  %s1306_s0 = inlined_call_operand.vmem [shape: bf16[8,2560], index: 0, kind: input, shape index: {}]   ;;  %s1307_s1 = inlined_call_operand.vmem [shape: bf16[2560,256], index: 1, kind: input, shape index: {}]   ;;  %s1308_s2 = inlined_call_operand.vmem [shape: f32[1,256], index: 2, kind: input, shape index: {}]   ;;  %s1309_s3 = inlined_call_operand.vmem [shape: f32[8,256], index: 3, kind: output, shape index: {0}]   ;;  %s1310_s4 = inlined_call_operand.vmem [shape: f32[8,256], index: 4, kind: output, shape index: {1}]  }
   0x1   :  { %s1186_s17 = smov 0  }
   0x2 LB: > { %s24_s18 = sadd.s32 1, %s1150_s16  ;;  %p926_p0 = scmp.ge.s32.totalorder %s1154_s17, 1  ;;  %s1154_s17 = sphi %s1186_s17, %s15_s17   ;;  %s1150_s16 = sphi %s1184_s16, %s1312_s16   ;;  %s1146_s15 = sphi %s1182_s15, %s1311_s15  }
   0x3   : > { %p25_p1 = scmp.ge.s32.totalorder %s24_s18, 5  ;;  %p196_p2 = scmp.lt.s32.totalorder %s1154_s17, 6 }
   0x5   : > { %s1314_s18 = smov (%p25_p1, %s24_s18), 0  ;;  %p197_p3 = pnand %p926_p0, %p196_p2 }
   0x6   : > { %s927_s19 = sshll.u32 (!%p197_p3), %s1146_s15, 2  ;;  %s929_s20 = sshll.u32 (!%p197_p3), %s1146_s15, 6 }
   0x7   : > { %200 = sbr.rel (%p197_p3) target bundleno = 334 (0x14e), region = 32  ;;  %p240_p4 = scmp.lt.s32.totalorder (!%p197_p3), %s927_s19, 19 }
   0x8   : > { %p248_p5 = scmp.lt.s32.totalorder (!%p197_p3), %s929_s20, 319  ;;  %p932_p6 = scmp.ne.s32.totalorder (!%p197_p3), %s1146_s15, 0 }
   0xe   : > { %s1316_s19 = smov (!%p240_p4, %s927_s19), 19  ;;  %s1318_s20 = smov (!%p248_p5, %s929_s20), 319 }
   0xf   : > { %s928_s21 = sshll.u32 %s1316_s19, 2  ;;  %s1006_s25 = sshll.u32 %s1318_s20, 3  ;;  %v1156_v0 = vmov (!%p932_p6), 0.0  }
  0x10   : > { %s1207_s24 = scalar_lea.vmem %s1306_s0, %s928_s21  ;;  %s1212_s28 = scalar_lea.vmem %s1307_s1, %s1006_s25  ;;  %268 = vst [vmem:[#allocation2] sm:$0xff] (!%p932_p6), %v1156_v0  ;;  %269 = vst [vmem:[#allocation2 + $0x8] sm:$0xff] (!%p932_p6), %v1156_v0 }
  0x11   : > { %267 = sbr.rel (%p932_p6) target bundleno = 24 (0x18), region = 36 }
  0x18 PF: > { %v1032_v1 = vld [vmem:[%s1212_s28 + $0x4] ss:$8 sps:$4 sm:$0xff]   ;;  %v1036_v3 = vld [vmem:[%s1212_s28] ss:$8 sps:$4 sm:$0xff]   ;;  %v1038_v5 = vld [vmem:[%s1212_s28 + $0x14] ss:$8 sps:$4 sm:$0xff]  }
  0x19   : > { %v1034_v2 = vld [vmem:[%s1212_s28 + $0x104] ss:$8 sps:$4 sm:$0xff]   ;;  %672 = vmatprep.subr.bf16.mxu0 %v1032_v1  ;;  %v1037_v4 = vld [vmem:[%s1212_s28 + $0x100] ss:$8 sps:$4 sm:$0xff]   ;;  %v1040_v6 = vld [vmem:[%s1212_s28 + $0x114] ss:$8 sps:$4 sm:$0xff]  }
  0x1a   : > { %713 = vmatprep.subr.bf16.mxu1 %v1034_v2  ;;  %673 = vmatpush1.bf16.msra.mxu0 %v1036_v3  ;;  %v1042_v7 = vld [vmem:[%s1212_s28 + $0x10] ss:$8 sps:$4 sm:$0xff]   ;;  %v1044_v9 = vld [vmem:[%s1212_s28 + $0x24] ss:$8 sps:$4 sm:$0xff]   ;;  %v1048_v11 = vld [vmem:[%s1212_s28 + $0x20] ss:$8 sps:$4 sm:$0xff]  }
  0x1b   : > { %714 = vmatpush1.bf16.msra.mxu1 %v1037_v4  ;;  %674 = vmatprep.subr.bf16.mxu0 %v1038_v5  ;;  %v1043_v8 = vld [vmem:[%s1212_s28 + $0x110] ss:$8 sps:$4 sm:$0xff]   ;;  %v1046_v10 = vld [vmem:[%s1212_s28 + $0x124] ss:$8 sps:$4 sm:$0xff]   ;;  %v1049_v12 = vld [vmem:[%s1212_s28 + $0x120] ss:$8 sps:$4 sm:$0xff]  }
  0x1c   : > { %715 = vmatprep.subr.bf16.mxu1 %v1040_v6  ;;  %v1050_v13 = vld [vmem:[%s1212_s28 + $0x34] ss:$8 sps:$4 sm:$0xff]   ;;  %v1054_v15 = vld [vmem:[%s1212_s28 + $0x30] ss:$8 sps:$4 sm:$0xff]   ;;  %v1056_v17 = vld [vmem:[%s1212_s28 + $0x44] ss:$8 sps:$4 sm:$0xff]  }
  0x1d   : > { %v1052_v14 = vld [vmem:[%s1212_s28 + $0x134] ss:$8 sps:$4 sm:$0xff]   ;;  %v1055_v16 = vld [vmem:[%s1212_s28 + $0x130] ss:$8 sps:$4 sm:$0xff]   ;;  %v1058_v18 = vld [vmem:[%s1212_s28 + $0x144] ss:$8 sps:$4 sm:$0xff]  }
  0x1e   : > { %675 = vmatpush1.bf16.msra.mxu0 %v1042_v7  ;;  %v1060_v19 = vld [vmem:[%s1212_s28 + $0x40] ss:$8 sps:$4 sm:$0xff]   ;;  %v1062_v21 = vld [vmem:[%s1212_s28 + $0x54] ss:$8 sps:$4 sm:$0xff]   ;;  %v1066_v23 = vld [vmem:[%s1212_s28 + $0x50] ss:$8 sps:$4 sm:$0xff]  }
  0x1f   : > { %716 = vmatpush1.bf16.msra.mxu1 %v1043_v8  ;;  %676 = vmatprep.subr.bf16.mxu0 %v1044_v9  ;;  %v1061_v20 = vld [vmem:[%s1212_s28 + $0x140] ss:$8 sps:$4 sm:$0xff]   ;;  %v1064_v22 = vld [vmem:[%s1212_s28 + $0x154] ss:$8 sps:$4 sm:$0xff]   ;;  %v1067_v24 = vld [vmem:[%s1212_s28 + $0x150] ss:$8 sps:$4 sm:$0xff]  }
  0x20   : > { %717 = vmatprep.subr.bf16.mxu1 %v1046_v10  ;;  %v1068_v25 = vld [vmem:[%s1212_s28 + $0x64] ss:$8 sps:$4 sm:$0xff]   ;;  %v1072_v27 = vld [vmem:[%s1212_s28 + $0x60] ss:$8 sps:$4 sm:$0xff]   ;;  %v1074_v29 = vld [vmem:[%s1212_s28 + $0x74] ss:$8 sps:$4 sm:$0xff]  }
  0x21   : > { %v1070_v26 = vld [vmem:[%s1212_s28 + $0x164] ss:$8 sps:$4 sm:$0xff]   ;;  %v1073_v28 = vld [vmem:[%s1212_s28 + $0x160] ss:$8 sps:$4 sm:$0xff]   ;;  %v1076_v30 = vld [vmem:[%s1212_s28 + $0x174] ss:$8 sps:$4 sm:$0xff]  }
  0x22   : > { %677 = vmatpush1.bf16.msra.mxu0 %v1048_v11  ;;  %v1078_v31 = vld [vmem:[%s1212_s28 + $0x70] ss:$8 sps:$4 sm:$0xff]   ;;  %v1080_v33 = vld [vmem:[%s1212_s28 + $0x84] ss:$8 sps:$4 sm:$0xff]   ;;  %v1084_v35 = vld [vmem:[%s1212_s28 + $0x80] ss:$8 sps:$4 sm:$0xff]  }
  0x23   : > { %718 = vmatpush1.bf16.msra.mxu1 %v1049_v12  ;;  %678 = vmatprep.subr.bf16.mxu0 %v1050_v13  ;;  %v1079_v32 = vld [vmem:[%s1212_s28 + $0x170] ss:$8 sps:$4 sm:$0xff]   ;;  %v1082_v34 = vld [vmem:[%s1212_s28 + $0x184] ss:$8 sps:$4 sm:$0xff]   ;;  %v1085_v36 = vld [vmem:[%s1212_s28 + $0x180] ss:$8 sps:$4 sm:$0xff]  }
  0x24   : > { %719 = vmatprep.subr.bf16.mxu1 %v1052_v14  ;;  %v1086_v37 = vld [vmem:[%s1212_s28 + $0x94] ss:$8 sps:$4 sm:$0xff]   ;;  %v1090_v39 = vld [vmem:[%s1212_s28 + $0x90] ss:$8 sps:$4 sm:$0xff]   ;;  %v1092_v41 = vld [vmem:[%s1212_s28 + $0xa4] ss:$8 sps:$4 sm:$0xff]  }
  0x25   : > { %v1088_v38 = vld [vmem:[%s1212_s28 + $0x194] ss:$8 sps:$4 sm:$0xff]   ;;  %v1091_v40 = vld [vmem:[%s1212_s28 + $0x190] ss:$8 sps:$4 sm:$0xff]   ;;  %v1094_v42 = vld [vmem:[%s1212_s28 + $0x1a4] ss:$8 sps:$4 sm:$0xff]  }
  0x26   : > { %679 = vmatpush1.bf16.msra.mxu0 %v1054_v15  ;;  %v1096_v43 = vld [vmem:[%s1212_s28 + $0xa0] ss:$8 sps:$4 sm:$0xff]   ;;  %v1098_v45 = vld [vmem:[%s1212_s28 + $0xb4] ss:$8 sps:$4 sm:$0xff]   ;;  %v1102_v50 = vld [vmem:[%s1212_s28 + $0xb0] ss:$8 sps:$4 sm:$0xff]  }
  0x27   : > { %720 = vmatpush1.bf16.msra.mxu1 %v1055_v16  ;;  %680 = vmatprep.subr.bf16.mxu0 %v1056_v17  ;;  %v1097_v44 = vld [vmem:[%s1212_s28 + $0x1a0] ss:$8 sps:$4 sm:$0xff]   ;;  %v1100_v46 = vld [vmem:[%s1212_s28 + $0x1b4] ss:$8 sps:$4 sm:$0xff]   ;;  %v1103_v51 = vld [vmem:[%s1212_s28 + $0x1b0] ss:$8 sps:$4 sm:$0xff]  }
  0x28   : > { %721 = vmatprep.subr.bf16.mxu1 %v1058_v18  ;;  %v272_v47 = vld [vmem:[%s1207_s24] sm:$0xff]  ;;  %v273_v49 = vld [vmem:[%s1207_s24 + $0x8] sm:$0xff]  ;;  %v1110_v57 = vld [vmem:[%s1212_s28 + $0xd4] ss:$8 sps:$4 sm:$0xff]   ;;  %p1001_p7 = scmp.ne.s32.totalorder %s1146_s15, 4 }
  0x29   : > { %v934_v48 = vcombine.high %v272_v47, %v272_v47  ;;  %v936_v52 = vcombine.high %v273_v49, %v273_v49  ;;  %v1104_v53 = vld [vmem:[%s1212_s28 + $0xc4] ss:$8 sps:$4 sm:$0xff]   ;;  %v1108_v55 = vld [vmem:[%s1212_s28 + $0xc0] ss:$8 sps:$4 sm:$0xff]   ;;  %v1112_v58 = vld [vmem:[%s1212_s28 + $0x1d4] ss:$8 sps:$4 sm:$0xff]   ;;  %v933_v5 = vcombine.low %v272_v47, %v272_v47  ;;  %v935_v6 = vcombine.low %v273_v49, %v273_v49 }
  0x2a   : > { %681 = vmatpush1.bf16.msra.mxu0 %v1060_v19  ;;  %v1106_v54 = vld [vmem:[%s1212_s28 + $0x1c4] ss:$8 sps:$4 sm:$0xff]   ;;  %v1109_v56 = vld [vmem:[%s1212_s28 + $0x1c0] ss:$8 sps:$4 sm:$0xff]   ;;  %v1114_v59 = vld [vmem:[%s1212_s28 + $0xd0] ss:$8 sps:$4 sm:$0xff]  }
  0x2b   : > { %722 = vmatpush1.bf16.msra.mxu1 %v1061_v20  ;;  %682 = vmatprep.subr.bf16.mxu0 %v1062_v21  ;;  %v1115_v60 = vld [vmem:[%s1212_s28 + $0x1d0] ss:$8 sps:$4 sm:$0xff]   ;;  %v1116_v61 = vld [vmem:[%s1212_s28 + $0xe4] ss:$8 sps:$4 sm:$0xff]   ;;  %v1120_v63 = vld [vmem:[%s1212_s28 + $0xe0] ss:$8 sps:$4 sm:$0xff]   ;;  %v766_v21 = vlaneseq (!%p1001_p7) }
  0x2c   : > { %723 = vmatprep.subr.bf16.mxu1 %v1064_v22  ;;  %704 = vmatprep.mubr.bf16.mxu0 %v934_v48  ;;  %v1118_v62 = vld [vmem:[%s1212_s28 + $0x1e4] ss:$8 sps:$4 sm:$0xff]   ;;  %v1121_v0 = vld [vmem:[%s1212_s28 + $0x1e0] ss:$8 sps:$4 sm:$0xff]   ;;  %v1122_v1 = vld [vmem:[%s1212_s28 + $0xf4] ss:$8 sps:$4 sm:$0xff]  }
  0x2d   : > { %745 = vmatprep.mubr.bf16.mxu1 %v936_v52  ;;  %v1124_v2 = vld [vmem:[%s1212_s28 + $0x1f4] ss:$8 sps:$4 sm:$0xff]   ;;  %v1126_v3 = vld [vmem:[%s1212_s28 + $0xf0] ss:$8 sps:$4 sm:$0xff]   ;;  %v270_v8 = vld [vmem:[#allocation2] sm:$0xff]  ;;  %v767_v22 = vshrl.u32 (!%p1001_p7), %v766_v21, 7 }
  0x2e   : > { %683 = vmatpush1.bf16.msra.mxu0 %v1066_v23  ;;  %v1127_v4 = vld [vmem:[%s1212_s28 + $0x1f0] ss:$8 sps:$4 sm:$0xff]   ;;  %v271_v12 = vld [vmem:[#allocation2 + $0x8] sm:$0xff]  ;;  %v764_v23 = vld [vmem:[%s1308_s2] sm:$0x3] (!%p1001_p7)  ;;  %vm806_vm0 = vcmask (!%p1001_p7), 1040384  }
  0x2f   : > { %724 = vmatpush1.bf16.msra.mxu1 %v1067_v24  ;;  %684 = vmatprep.subr.bf16.mxu0 %v1068_v25  ;;  %v768_v24 = vsub.s32 (!%p1001_p7), 0, %v767_v22  ;;  %v772_v25 = vsub.s32 (!%p1001_p7), 1, %v767_v22  ;;  %vm809_vm1 = vcmask (!%p1001_p7), 1041408  }
  0x30   : > { %725 = vmatprep.subr.bf16.mxu1 %v1070_v26 }
  0x32   : > { %685 = vmatpush1.bf16.msra.mxu0 %v1072_v27 }
  0x33   : > { %726 = vmatpush1.bf16.msra.mxu1 %v1073_v28  ;;  %686 = vmatprep.subr.bf16.mxu0 %v1074_v29  ;;  %v769_v28 = vrot.slane (!%p1001_p7), %v764_v23, %v768_v24  ;;  %v773_v29 = vrot.slane (!%p1001_p7), %v764_v23, %v772_v25 }
  0x34   : > { %727 = vmatprep.subr.bf16.mxu1 %v1076_v30 }
  0x36   : > { %687 = vmatpush1.bf16.msra.mxu0 %v1078_v31 }
  0x37   : > { %728 = vmatpush1.bf16.msra.mxu1 %v1079_v32  ;;  %688 = vmatprep.subr.bf16.mxu0 %v1080_v33 }
  0x38   : > { %729 = vmatprep.subr.bf16.mxu1 %v1082_v34 }
  0x3a   : > { %689 = vmatpush1.bf16.msra.mxu0 %v1084_v35 }
  0x3b   : > { %730 = vmatpush1.bf16.msra.mxu1 %v1085_v36  ;;  %690 = vmatprep.subr.bf16.mxu0 %v1086_v37 }
  0x3c   : > { %731 = vmatprep.subr.bf16.mxu1 %v1088_v38 }
  0x3e   : > { %691 = vmatpush1.bf16.msra.mxu0 %v1090_v39 }
  0x3f   : > { %732 = vmatpush1.bf16.msra.mxu1 %v1091_v40  ;;  %692 = vmatprep.subr.bf16.mxu0 %v1092_v41 }
  0x40   : > { %733 = vmatprep.subr.bf16.mxu1 %v1094_v42 }
  0x42   : > { %693 = vmatpush1.bf16.msra.mxu0 %v1096_v43 }
  0x43   : > { %734 = vmatpush1.bf16.msra.mxu1 %v1097_v44  ;;  %694 = vmatprep.subr.bf16.mxu0 %v1098_v45 }
  0x44   : > { %735 = vmatprep.subr.bf16.mxu1 %v1100_v46 }
  0x46   : > { %695 = vmatpush1.bf16.msra.mxu0 %v1102_v50 }
  0x47   : > { %736 = vmatpush1.bf16.msra.mxu1 %v1103_v51  ;;  %696 = vmatprep.subr.bf16.mxu0 %v1104_v53 }
  0x48   : > { %737 = vmatprep.subr.bf16.mxu1 %v1106_v54 }
  0x4a   : > { %697 = vmatpush1.bf16.msra.mxu0 %v1108_v55 }
  0x4b   : > { %738 = vmatpush1.bf16.msra.mxu1 %v1109_v56  ;;  %698 = vmatprep.subr.bf16.mxu0 %v1110_v57 }
  0x4c   : > { %739 = vmatprep.subr.bf16.mxu1 %v1112_v58 }
  0x4e   : > { %699 = vmatpush1.bf16.msra.mxu0 %v1114_v59 }
  0x4f   : > { %740 = vmatpush1.bf16.msra.mxu1 %v1115_v60  ;;  %700 = vmatprep.subr.bf16.mxu0 %v1116_v61 }
  0x50   : > { %741 = vmatprep.subr.bf16.mxu1 %v1118_v62 }
  0x52   : > { %701 = vmatpush1.bf16.msra.mxu0 %v1120_v63 }
  0x53   : > { %742 = vmatpush1.bf16.msra.mxu1 %v1121_v0  ;;  %702 = vmatprep.subr.bf16.mxu0 %v1122_v1 }
  0x54   : > { %743 = vmatprep.subr.bf16.mxu1 %v1124_v2 }
  0x56   : > { %703 = vmatpush1.bf16.msra.mxu0 %v1126_v3 }
  0x57   : > { %744 = vmatpush1.bf16.msra.mxu1 %v1127_v4 }
  0x59   : > { %705 = vmatmul.mubr.bf16.vlgmr.msra.gmra.mrb[0].mxu0 %v933_v5 }
  0x5a   : > { %746 = vmatmul.mubr.bf16.vlgmr.msra.gmra.mrb[0].mxu1 %v935_v6 }
 0x12c   : > { %v706_v7 = vpop.f32.mrb[0].mxu0 }
 0x12d   : > { %v747_v9 = vpop.f32.mrb[0].mxu1  ;;  %v708_v11 = vpop.f32.mrb[1].mxu0  ;;  %761 = sbr.rel (%p1001_p7) target bundleno = 334 (0x14e), region = 40 }
 0x12e   : > { %v748_v10 = vadd.f32 %v747_v9, %v706_v7  ;;  %v749_v13 = vpop.f32.mrb[1].mxu1  ;;  %v710_v15 = vpop.f32.mrb[2].mxu0 }
 0x12f   : > { %v750_v14 = vadd.f32 %v749_v13, %v708_v11  ;;  %v751_v16 = vpop.f32.mrb[2].mxu1  ;;  %v711_v18 = vpop.f32.mrb[3].mxu0 }
 0x130   : > { %v754_v17 = vadd.f32 %v748_v10, %v270_v8  ;;  %v752_v19 = vpop.f32.mrb[3].mxu1 }
 0x131   : > { %v755_v20 = vadd.f32 %v750_v14, %v271_v12 }
 0x132   : > { %756 = vst [vmem:[#allocation2] sm:$0xff] %v754_v17 }
 0x133   : > { %757 = vst [vmem:[#allocation2 + $0x8] sm:$0xff] %v755_v20 }
 0x139   : > { %v762_v26 = vld [vmem:[#allocation2] sm:$0xff] }
 0x13a   : > { %v763_v27 = vld [vmem:[#allocation2 + $0x8] sm:$0xff]  ;;  %v776_v30 = vadd.f32 %v769_v28, %v762_v26 }
 0x13b   : > { %v777_v31 = vadd.f32 %v773_v29, %v763_v27 }
 0x13c   : > { %778 = vst [vmem:[%s1309_s3] sm:$0xff] %v776_v30  ;;  %v780_v32 = vrot.slane %v776_v30, 4  ;;  %v792_v33 = vmul.f32 %v776_v30, %v776_v30 }
 0x13d   : > { %779 = vst [vmem:[%s1309_s3 + $0x8] sm:$0xff] %v777_v31  ;;  %v786_v34 = vrot.slane %v777_v31, 4  ;;  %v793_v35 = vmul.f32 %v777_v31, %v777_v31 }
 0x13e   : > { %v781_v36 = vadd.f32 %v780_v32, %v776_v30  ;;  %v794_v37 = vrot.slane %v792_v33, 4 }
 0x13f   : > { %v787_v38 = vadd.f32 %v786_v34, %v777_v31  ;;  %v800_v39 = vrot.slane %v793_v35, 4 }
 0x140   : > { %v782_v40 = vrot.slane %v781_v36, 2  ;;  %v795_v41 = vadd.f32 %v794_v37, %v792_v33 }
 0x141   : > { %v788_v42 = vrot.slane %v787_v38, 2  ;;  %v801_v43 = vadd.f32 %v800_v39, %v793_v35 }
 0x142   : > { %v783_v44 = vadd.f32 %v782_v40, %v781_v36  ;;  %v796_v45 = vrot.slane %v795_v41, 2 }
 0x143   : > { %v789_v46 = vadd.f32 %v788_v42, %v787_v38  ;;  %v802_v47 = vrot.slane %v801_v43, 2 }
 0x144   : > { %v784_v48 = vrot.slane %v783_v44, 1  ;;  %v797_v49 = vadd.f32 %v796_v45, %v795_v41 }
 0x145   : > { %v790_v50 = vrot.slane %v789_v46, 1  ;;  %v803_v51 = vadd.f32 %v802_v47, %v801_v43 }
 0x146   : > { %v785_v52 = vadd.f32 %v784_v48, %v783_v44  ;;  %v798_v53 = vrot.slane %v797_v49, 1 }
 0x147   : > { %v791_v54 = vadd.f32 %v790_v50, %v789_v46  ;;  %v804_v55 = vrot.slane %v803_v51, 1 }
 0x148   : > { %v799_v56 = vadd.f32 %v798_v53, %v797_v49 }
 0x149   : > { %v805_v57 = vadd.f32 %v804_v55, %v803_v51 }
 0x14a   : > { %v807_v58 = vsel %vm806_vm0, %v785_v52, %v799_v56 }
 0x14b   : > { %v808_v59 = vsel %vm806_vm0, %v791_v54, %v805_v57  ;;  %v810_v60 = vsel %vm809_vm1, %v807_v58, 0.0 }
 0x14c   : > { %v811_v61 = vsel %vm809_vm1, %v808_v59, 0.0  ;;  %812 = vst [vmem:[%s1310_s4] sm:$0xff] %v810_v60 }
 0x14d   : > { %813 = vst [vmem:[%s1310_s4 + $0x8] sm:$0xff] %v811_v61 }
 0x14e PF: > { %s15_s17 = sadd.s32 1, %s1154_s17   ;;  %s1311_s15 = smov %s1150_s16 }
 0x14f   : > { %p12_p8 = scmp.ge.s32.totalorder %s15_s17, 7   ;;  %s1312_s16 = smov %s1314_s18 }
 0x151   :  { %14 = sbr.rel (!%p12_p8) target bundleno = 2 (0x2), region = 85 }

// kernel: deep_koalarization_norm_forward.41
= control target key start
LH: loop header
LB: loop body
LE: loop exit
PB: predicated region body
PF: predicated region fallthrough
CT: control target
= control target key end

     0   :  { %v20_v0 = vlaneseq  ;;  %s132_s1 = inlined_call_operand.vmem [shape: f32[1,512], index: 1, kind: input, shape index: {}]   ;;  %s133_s2 = inlined_call_operand.vmem [shape: f32[1,512], index: 2, kind: input, shape index: {}]   ;;  %s134_s0 = inlined_call_operand.vmem [shape: f32[8,512], index: 0, kind: input, shape index: {}]   ;;  %s135_s3 = inlined_call_operand.vmem [shape: f32[8,512], index: 3, kind: output, shape index: {}]  }
   0x1   :  { %v18_v2 = vld [vmem:[%s132_s1] sm:$0xf]  ;;  %v15_v9 = vld [vmem:[%s134_s0 + $0x8] sm:$0xff]  ;;  %v16_v14 = vld [vmem:[%s134_s0 + $0x10] sm:$0xff] }
   0x2   :  { %v21_v1 = vshrl.u32 %v20_v0, 7  ;;  %v44_v3 = vld [vmem:[%s133_s2] sm:$0xf]  ;;  %v17_v15 = vld [vmem:[%s134_s0 + $0x18] sm:$0xff] }
   0x3   :  { %v14_v8 = vld [vmem:[%s134_s0] sm:$0xff] }
   0x4   :  { %v22_v4 = vsub.s32 0, %v21_v1  ;;  %v26_v5 = vsub.s32 1, %v21_v1  ;;  %v30_v6 = vsub.s32 2, %v21_v1  ;;  %v34_v7 = vsub.s32 3, %v21_v1 }
   0x6   :  { %v23_v10 = vrot.slane %v18_v2, %v22_v4  ;;  %v49_v11 = vrot.slane %v44_v3, %v22_v4  ;;  %v27_v12 = vrot.slane %v18_v2, %v26_v5  ;;  %v53_v13 = vrot.slane %v44_v3, %v26_v5 }
   0x7   :  { %v31_v16 = vrot.slane %v18_v2, %v30_v6  ;;  %v57_v17 = vrot.slane %v44_v3, %v30_v6  ;;  %v35_v18 = vrot.slane %v18_v2, %v34_v7  ;;  %v61_v19 = vrot.slane %v44_v3, %v34_v7 }
   0x8   :  { %v40_v20 = vmul.f32 %v23_v10, %v14_v8  ;;  %v41_v21 = vmul.f32 %v27_v12, %v15_v9 }
   0x9   :  { %v42_v22 = vmul.f32 %v31_v16, %v16_v14  ;;  %v43_v23 = vmul.f32 %v35_v18, %v17_v15 }
   0xa   :  { %v66_v24 = vadd.f32 %v49_v11, %v40_v20  ;;  %v67_v25 = vadd.f32 %v53_v13, %v41_v21 }
   0xb   :  { %v68_v26 = vadd.f32 %v57_v17, %v42_v22  ;;  %v69_v27 = vadd.f32 %v61_v19, %v43_v23 }
   0xc   :  { %v70_v28 = vmax.f32 %v66_v24, 0.0  ;;  %v71_v29 = vmax.f32 %v67_v25, 0.0 }
   0xd   :  { %v72_v30 = vmax.f32 %v68_v26, 0.0  ;;  %v73_v31 = vmax.f32 %v69_v27, 0.0 }
   0xe   :  { %74 = vst [vmem:[%s135_s3] sm:$0xff] %v70_v28  ;;  %75 = vst [vmem:[%s135_s3 + $0x8] sm:$0xff] %v71_v29 }
   0xf   :  { %76 = vst [vmem:[%s135_s3 + $0x10] sm:$0xff] %v72_v30  ;;  %77 = vst [vmem:[%s135_s3 + $0x18] sm:$0xff] %v73_v31 }

// kernel: deep_koalarization_norm_forward.40
= control target key start
LH: loop header
LB: loop body
LE: loop exit
PB: predicated region body
PF: predicated region fallthrough
CT: control target
= control target key end

     0   :  { %s1864_s15 = smov 0   ;;  %s1866_s16 = smov 0   ;;  %s2080_s0 = inlined_call_operand.vmem [shape: bf16[8,2560], index: 0, kind: input, shape index: {}]   ;;  %s2081_s1 = inlined_call_operand.vmem [shape: bf16[2560,512], index: 1, kind: input, shape index: {}]   ;;  %s2082_s2 = inlined_call_operand.vmem [shape: f32[1,512], index: 2, kind: input, shape index: {}]   ;;  %s2083_s3 = inlined_call_operand.vmem [shape: f32[8,512], index: 3, kind: output, shape index: {0}]   ;;  %s2084_s4 = inlined_call_operand.vmem [shape: f32[8,512], index: 4, kind: output, shape index: {1}]  }
   0x1   :  { %s1868_s17 = smov 0  }
   0x2 LB: > { %s24_s18 = sadd.s32 1, %s1832_s16  ;;  %p1448_p0 = scmp.ge.s32.totalorder %s1836_s17, 1  ;;  %s1836_s17 = sphi %s1868_s17, %s15_s17   ;;  %s1832_s16 = sphi %s1866_s16, %s2086_s16   ;;  %s1828_s15 = sphi %s1864_s15, %s2085_s15  }
   0x3   : > { %p25_p1 = scmp.ge.s32.totalorder %s24_s18, 5  ;;  %p196_p2 = scmp.lt.s32.totalorder %s1836_s17, 6 }
   0x5   : > { %s2088_s18 = smov (%p25_p1, %s24_s18), 0  ;;  %p197_p3 = pnand %p1448_p0, %p196_p2 }
   0x6   : > { %s1449_s19 = sshll.u32 (!%p197_p3), %s1828_s15, 2  ;;  %s1451_s20 = sshll.u32 (!%p197_p3), %s1828_s15, 6 }
   0x7   : > { %200 = sbr.rel (%p197_p3) target bundleno = 398 (0x18e), region = 32  ;;  %p240_p4 = scmp.lt.s32.totalorder (!%p197_p3), %s1449_s19, 19 }
   0x8   : > { %p248_p5 = scmp.lt.s32.totalorder (!%p197_p3), %s1451_s20, 319  ;;  %p1454_p6 = scmp.ne.s32.totalorder (!%p197_p3), %s1828_s15, 0 }
   0xe   : > { %s2090_s19 = smov (!%p240_p4, %s1449_s19), 19  ;;  %s2092_s20 = smov (!%p248_p5, %s1451_s20), 319 }
   0xf   : > { %s1450_s21 = sshll.u32 %s2090_s19, 2  ;;  %s1592_s25 = sshll.u32 %s2092_s20, 4  ;;  %v1838_v0 = vmov (!%p1454_p6), 0.0  }
  0x10   : > { %s1889_s24 = scalar_lea.vmem %s2080_s0, %s1450_s21  ;;  %s1894_s28 = scalar_lea.vmem %s2081_s1, %s1592_s25  ;;  %268 = vst [vmem:[#allocation2] sm:$0xff] (!%p1454_p6), %v1838_v0  ;;  %269 = vst [vmem:[#allocation2 + $0x8] sm:$0xff] (!%p1454_p6), %v1838_v0 }
  0x11   : > { %267 = sbr.rel (%p1454_p6) target bundleno = 24 (0x18), region = 36  ;;  %270 = vst [vmem:[#allocation2 + $0x10] sm:$0xff] (!%p1454_p6), %v1838_v0  ;;  %271 = vst [vmem:[#allocation2 + $0x18] sm:$0xff] (!%p1454_p6), %v1838_v0 }
  0x18 PF: > { %v1618_v1 = vld [vmem:[%s1894_s28 + $0x4] ss:$16 sps:$4 sm:$0xff]   ;;  %v1622_v3 = vld [vmem:[%s1894_s28] ss:$16 sps:$4 sm:$0xff]   ;;  %v277_v49 = vld [vmem:[%s1889_s24 + $0x8] sm:$0xff]  ;;  %p1587_p7 = scmp.ne.s32.totalorder %s1828_s15, 4 }
  0x19   : > { %v1620_v2 = vld [vmem:[%s1894_s28 + $0x204] ss:$16 sps:$4 sm:$0xff]   ;;  %1060 = vmatprep.subr.bf16.mxu0 %v1618_v1  ;;  %v1623_v4 = vld [vmem:[%s1894_s28 + $0x200] ss:$16 sps:$4 sm:$0xff]   ;;  %v1458_v52 = vcombine.high %v277_v49, %v277_v49  ;;  %vm1322_vm0 = vcmask (!%p1587_p7), 1040384   ;;  %vm1327_vm1 = vcmask (!%p1587_p7), 1041408  }
  0x1a   : > { %1101 = vmatprep.subr.bf16.mxu1 %v1620_v2  ;;  %v1624_v5 = vld [vmem:[%s1894_s28 + $0x24] ss:$16 sps:$4 sm:$0xff]   ;;  %1061 = vmatpush1.bf16.msra.mxu0 %v1622_v3  ;;  %v1628_v7 = vld [vmem:[%s1894_s28 + $0x20] ss:$16 sps:$4 sm:$0xff]  }
  0x1b   : > { %1102 = vmatpush1.bf16.msra.mxu1 %v1623_v4  ;;  %v1626_v6 = vld [vmem:[%s1894_s28 + $0x224] ss:$16 sps:$4 sm:$0xff]   ;;  %1062 = vmatprep.subr.bf16.mxu0 %v1624_v5  ;;  %v1629_v8 = vld [vmem:[%s1894_s28 + $0x220] ss:$16 sps:$4 sm:$0xff]   ;;  %v1720_v5 = vld [vmem:[%s1894_s28 + $0xc] ss:$16 sps:$4 sm:$0xff]  }
  0x1c   : > { %1103 = vmatprep.subr.bf16.mxu1 %v1626_v6  ;;  %v1630_v9 = vld [vmem:[%s1894_s28 + $0x44] ss:$16 sps:$4 sm:$0xff]   ;;  %v1634_v11 = vld [vmem:[%s1894_s28 + $0x40] ss:$16 sps:$4 sm:$0xff]   ;;  %1133 = vmatprep.mubr.bf16.mxu1 %v1458_v52  ;;  %v1723_v6 = vld [vmem:[%s1894_s28 + $0x20c] ss:$16 sps:$4 sm:$0xff]  }
  0x1d   : > { %v1632_v10 = vld [vmem:[%s1894_s28 + $0x244] ss:$16 sps:$4 sm:$0xff]   ;;  %v1635_v12 = vld [vmem:[%s1894_s28 + $0x240] ss:$16 sps:$4 sm:$0xff]  }
  0x1e   : > { %1063 = vmatpush1.bf16.msra.mxu0 %v1628_v7  ;;  %v1636_v13 = vld [vmem:[%s1894_s28 + $0x64] ss:$16 sps:$4 sm:$0xff]   ;;  %v1640_v15 = vld [vmem:[%s1894_s28 + $0x60] ss:$16 sps:$4 sm:$0xff]  }
  0x1f   : > { %1104 = vmatpush1.bf16.msra.mxu1 %v1629_v8  ;;  %1064 = vmatprep.subr.bf16.mxu0 %v1630_v9  ;;  %v1638_v14 = vld [vmem:[%s1894_s28 + $0x264] ss:$16 sps:$4 sm:$0xff]   ;;  %v1641_v16 = vld [vmem:[%s1894_s28 + $0x260] ss:$16 sps:$4 sm:$0xff]   ;;  %v1970_v8 = vcombine.low %v277_v49, %v277_v49  ;;  %v1718_v9 = vld [vmem:[%s1894_s28 + $0x8] ss:$16 sps:$4 sm:$0xff]  }
  0x20   : > { %1105 = vmatprep.subr.bf16.mxu1 %v1632_v10  ;;  %v1642_v17 = vld [vmem:[%s1894_s28 + $0x84] ss:$16 sps:$4 sm:$0xff]   ;;  %v1646_v19 = vld [vmem:[%s1894_s28 + $0x80] ss:$16 sps:$4 sm:$0xff]   ;;  %v1721_v10 = vld [vmem:[%s1894_s28 + $0x208] ss:$16 sps:$4 sm:$0xff]  }
  0x21   : > { %v1644_v18 = vld [vmem:[%s1894_s28 + $0x284] ss:$16 sps:$4 sm:$0xff]   ;;  %v1647_v20 = vld [vmem:[%s1894_s28 + $0x280] ss:$16 sps:$4 sm:$0xff]   ;;  %v1778_v49 = vld [vmem:[%s1894_s28 + $0x148] ss:$16 sps:$4 sm:$0xff]  }
  0x22   : > { %1065 = vmatpush1.bf16.msra.mxu0 %v1634_v11  ;;  %v1648_v21 = vld [vmem:[%s1894_s28 + $0xa4] ss:$16 sps:$4 sm:$0xff]   ;;  %v1652_v23 = vld [vmem:[%s1894_s28 + $0xa0] ss:$16 sps:$4 sm:$0xff]   ;;  %v1726_v11 = vld [vmem:[%s1894_s28 + $0x2c] ss:$16 sps:$4 sm:$0xff]  }
  0x23   : > { %1106 = vmatpush1.bf16.msra.mxu1 %v1635_v12  ;;  %1066 = vmatprep.subr.bf16.mxu0 %v1636_v13  ;;  %v1650_v22 = vld [vmem:[%s1894_s28 + $0x2a4] ss:$16 sps:$4 sm:$0xff]   ;;  %v1653_v24 = vld [vmem:[%s1894_s28 + $0x2a0] ss:$16 sps:$4 sm:$0xff]   ;;  %v1729_v12 = vld [vmem:[%s1894_s28 + $0x22c] ss:$16 sps:$4 sm:$0xff]  }
  0x24   : > { %1107 = vmatprep.subr.bf16.mxu1 %v1638_v14  ;;  %v1654_v25 = vld [vmem:[%s1894_s28 + $0xc4] ss:$16 sps:$4 sm:$0xff]   ;;  %v1658_v27 = vld [vmem:[%s1894_s28 + $0xc0] ss:$16 sps:$4 sm:$0xff]   ;;  %v1724_v13 = vld [vmem:[%s1894_s28 + $0x28] ss:$16 sps:$4 sm:$0xff]  }
  0x25   : > { %v1656_v26 = vld [vmem:[%s1894_s28 + $0x2c4] ss:$16 sps:$4 sm:$0xff]   ;;  %v1659_v28 = vld [vmem:[%s1894_s28 + $0x2c0] ss:$16 sps:$4 sm:$0xff]   ;;  %v1727_v14 = vld [vmem:[%s1894_s28 + $0x228] ss:$16 sps:$4 sm:$0xff]  }
  0x26   : > { %1067 = vmatpush1.bf16.msra.mxu0 %v1640_v15  ;;  %v1660_v29 = vld [vmem:[%s1894_s28 + $0xe4] ss:$16 sps:$4 sm:$0xff]   ;;  %v1664_v31 = vld [vmem:[%s1894_s28 + $0xe0] ss:$16 sps:$4 sm:$0xff]   ;;  %v1732_v15 = vld [vmem:[%s1894_s28 + $0x4c] ss:$16 sps:$4 sm:$0xff]  }
  0x27   : > { %1108 = vmatpush1.bf16.msra.mxu1 %v1641_v16  ;;  %1068 = vmatprep.subr.bf16.mxu0 %v1642_v17  ;;  %v1662_v30 = vld [vmem:[%s1894_s28 + $0x2e4] ss:$16 sps:$4 sm:$0xff]   ;;  %v1665_v32 = vld [vmem:[%s1894_s28 + $0x2e0] ss:$16 sps:$4 sm:$0xff]   ;;  %v1735_v16 = vld [vmem:[%s1894_s28 + $0x24c] ss:$16 sps:$4 sm:$0xff]  }
  0x28   : > { %1109 = vmatprep.subr.bf16.mxu1 %v1644_v18  ;;  %v1666_v33 = vld [vmem:[%s1894_s28 + $0x104] ss:$16 sps:$4 sm:$0xff]   ;;  %v1670_v35 = vld [vmem:[%s1894_s28 + $0x100] ss:$16 sps:$4 sm:$0xff]   ;;  %v1730_v17 = vld [vmem:[%s1894_s28 + $0x48] ss:$16 sps:$4 sm:$0xff]  }
  0x29   : > { %v1668_v34 = vld [vmem:[%s1894_s28 + $0x304] ss:$16 sps:$4 sm:$0xff]   ;;  %v1671_v36 = vld [vmem:[%s1894_s28 + $0x300] ss:$16 sps:$4 sm:$0xff]   ;;  %v1733_v18 = vld [vmem:[%s1894_s28 + $0x248] ss:$16 sps:$4 sm:$0xff]  }
  0x2a   : > { %1069 = vmatpush1.bf16.msra.mxu0 %v1646_v19  ;;  %v1672_v37 = vld [vmem:[%s1894_s28 + $0x124] ss:$16 sps:$4 sm:$0xff]   ;;  %v1676_v39 = vld [vmem:[%s1894_s28 + $0x120] ss:$16 sps:$4 sm:$0xff]   ;;  %v1738_v19 = vld [vmem:[%s1894_s28 + $0x6c] ss:$16 sps:$4 sm:$0xff]  }
  0x2b   : > { %1110 = vmatpush1.bf16.msra.mxu1 %v1647_v20  ;;  %1070 = vmatprep.subr.bf16.mxu0 %v1648_v21  ;;  %v1674_v38 = vld [vmem:[%s1894_s28 + $0x324] ss:$16 sps:$4 sm:$0xff]   ;;  %v1677_v40 = vld [vmem:[%s1894_s28 + $0x320] ss:$16 sps:$4 sm:$0xff]   ;;  %v1741_v20 = vld [vmem:[%s1894_s28 + $0x26c] ss:$16 sps:$4 sm:$0xff]  }
  0x2c   : > { %1111 = vmatprep.subr.bf16.mxu1 %v1650_v22  ;;  %v1678_v41 = vld [vmem:[%s1894_s28 + $0x144] ss:$16 sps:$4 sm:$0xff]   ;;  %v1682_v43 = vld [vmem:[%s1894_s28 + $0x140] ss:$16 sps:$4 sm:$0xff]   ;;  %v1736_v21 = vld [vmem:[%s1894_s28 + $0x68] ss:$16 sps:$4 sm:$0xff]  }
  0x2d   : > { %v1680_v42 = vld [vmem:[%s1894_s28 + $0x344] ss:$16 sps:$4 sm:$0xff]   ;;  %v1683_v44 = vld [vmem:[%s1894_s28 + $0x340] ss:$16 sps:$4 sm:$0xff]   ;;  %v1739_v22 = vld [vmem:[%s1894_s28 + $0x268] ss:$16 sps:$4 sm:$0xff]  }
  0x2e   : > { %1071 = vmatpush1.bf16.msra.mxu0 %v1652_v23  ;;  %v1684_v45 = vld [vmem:[%s1894_s28 + $0x164] ss:$16 sps:$4 sm:$0xff]   ;;  %v1688_v50 = vld [vmem:[%s1894_s28 + $0x160] ss:$16 sps:$4 sm:$0xff]   ;;  %v1744_v23 = vld [vmem:[%s1894_s28 + $0x8c] ss:$16 sps:$4 sm:$0xff]  }
  0x2f   : > { %1112 = vmatpush1.bf16.msra.mxu1 %v1653_v24  ;;  %1072 = vmatprep.subr.bf16.mxu0 %v1654_v25  ;;  %v1686_v46 = vld [vmem:[%s1894_s28 + $0x364] ss:$16 sps:$4 sm:$0xff]   ;;  %v1689_v51 = vld [vmem:[%s1894_s28 + $0x360] ss:$16 sps:$4 sm:$0xff]   ;;  %v1747_v24 = vld [vmem:[%s1894_s28 + $0x28c] ss:$16 sps:$4 sm:$0xff]  }
  0x30   : > { %1113 = vmatprep.subr.bf16.mxu1 %v1656_v26  ;;  %v276_v47 = vld [vmem:[%s1889_s24] sm:$0xff]  ;;  %v1742_v25 = vld [vmem:[%s1894_s28 + $0x88] ss:$16 sps:$4 sm:$0xff]  }
  0x31   : > { %v1944_v48 = vcombine.high %v276_v47, %v276_v47  ;;  %v1690_v53 = vld [vmem:[%s1894_s28 + $0x184] ss:$16 sps:$4 sm:$0xff]   ;;  %v1694_v55 = vld [vmem:[%s1894_s28 + $0x180] ss:$16 sps:$4 sm:$0xff]   ;;  %v1968_v7 = vcombine.low %v276_v47, %v276_v47  ;;  %v1745_v26 = vld [vmem:[%s1894_s28 + $0x288] ss:$16 sps:$4 sm:$0xff]  }
  0x32   : > { %1073 = vmatpush1.bf16.msra.mxu0 %v1658_v27  ;;  %v1692_v54 = vld [vmem:[%s1894_s28 + $0x384] ss:$16 sps:$4 sm:$0xff]   ;;  %v1695_v56 = vld [vmem:[%s1894_s28 + $0x380] ss:$16 sps:$4 sm:$0xff]   ;;  %v1750_v27 = vld [vmem:[%s1894_s28 + $0xac] ss:$16 sps:$4 sm:$0xff]  }
  0x33   : > { %1114 = vmatpush1.bf16.msra.mxu1 %v1659_v28  ;;  %1074 = vmatprep.subr.bf16.mxu0 %v1660_v29  ;;  %v1696_v57 = vld [vmem:[%s1894_s28 + $0x1a4] ss:$16 sps:$4 sm:$0xff]   ;;  %v1700_v59 = vld [vmem:[%s1894_s28 + $0x1a0] ss:$16 sps:$4 sm:$0xff]   ;;  %v1753_v28 = vld [vmem:[%s1894_s28 + $0x2ac] ss:$16 sps:$4 sm:$0xff]  }
  0x34   : > { %1115 = vmatprep.subr.bf16.mxu1 %v1662_v30  ;;  %1092 = vmatprep.mubr.bf16.mxu0 %v1944_v48  ;;  %v1698_v58 = vld [vmem:[%s1894_s28 + $0x3a4] ss:$16 sps:$4 sm:$0xff]   ;;  %v1701_v60 = vld [vmem:[%s1894_s28 + $0x3a0] ss:$16 sps:$4 sm:$0xff]   ;;  %v1748_v29 = vld [vmem:[%s1894_s28 + $0xa8] ss:$16 sps:$4 sm:$0xff]  }
  0x35   : > { %v1702_v61 = vld [vmem:[%s1894_s28 + $0x1c4] ss:$16 sps:$4 sm:$0xff]   ;;  %v1706_v63 = vld [vmem:[%s1894_s28 + $0x1c0] ss:$16 sps:$4 sm:$0xff]   ;;  %v1751_v30 = vld [vmem:[%s1894_s28 + $0x2a8] ss:$16 sps:$4 sm:$0xff]  }
  0x36   : > { %1075 = vmatpush1.bf16.msra.mxu0 %v1664_v31  ;;  %v1704_v62 = vld [vmem:[%s1894_s28 + $0x3c4] ss:$16 sps:$4 sm:$0xff]   ;;  %v1707_v0 = vld [vmem:[%s1894_s28 + $0x3c0] ss:$16 sps:$4 sm:$0xff]   ;;  %v1756_v31 = vld [vmem:[%s1894_s28 + $0xcc] ss:$16 sps:$4 sm:$0xff]  }
  0x37   : > { %1116 = vmatpush1.bf16.msra.mxu1 %v1665_v32  ;;  %1076 = vmatprep.subr.bf16.mxu0 %v1666_v33  ;;  %v1708_v1 = vld [vmem:[%s1894_s28 + $0x1e4] ss:$16 sps:$4 sm:$0xff]   ;;  %v1712_v3 = vld [vmem:[%s1894_s28 + $0x1e0] ss:$16 sps:$4 sm:$0xff]   ;;  %v1759_v32 = vld [vmem:[%s1894_s28 + $0x2cc] ss:$16 sps:$4 sm:$0xff]  }
  0x38   : > { %1117 = vmatprep.subr.bf16.mxu1 %v1668_v34  ;;  %v1710_v2 = vld [vmem:[%s1894_s28 + $0x3e4] ss:$16 sps:$4 sm:$0xff]   ;;  %v1713_v4 = vld [vmem:[%s1894_s28 + $0x3e0] ss:$16 sps:$4 sm:$0xff]   ;;  %v1754_v33 = vld [vmem:[%s1894_s28 + $0xc8] ss:$16 sps:$4 sm:$0xff]  }
  0x39   : > { %v1757_v34 = vld [vmem:[%s1894_s28 + $0x2c8] ss:$16 sps:$4 sm:$0xff]   ;;  %v1780_v47 = vld [vmem:[%s1894_s28 + $0x14c] ss:$16 sps:$4 sm:$0xff]  }
  0x3a   : > { %1077 = vmatpush1.bf16.msra.mxu0 %v1670_v35  ;;  %v1762_v35 = vld [vmem:[%s1894_s28 + $0xec] ss:$16 sps:$4 sm:$0xff]  }
  0x3b   : > { %1118 = vmatpush1.bf16.msra.mxu1 %v1671_v36  ;;  %1078 = vmatprep.subr.bf16.mxu0 %v1672_v37  ;;  %v1765_v36 = vld [vmem:[%s1894_s28 + $0x2ec] ss:$16 sps:$4 sm:$0xff]   ;;  %v1760_v37 = vld [vmem:[%s1894_s28 + $0xe8] ss:$16 sps:$4 sm:$0xff]  }
  0x3c   : > { %1119 = vmatprep.subr.bf16.mxu1 %v1674_v38  ;;  %v1763_v38 = vld [vmem:[%s1894_s28 + $0x2e8] ss:$16 sps:$4 sm:$0xff]  }
  0x3e   : > { %1079 = vmatpush1.bf16.msra.mxu0 %v1676_v39  ;;  %v1768_v39 = vld [vmem:[%s1894_s28 + $0x10c] ss:$16 sps:$4 sm:$0xff]  }
  0x3f   : > { %1120 = vmatpush1.bf16.msra.mxu1 %v1677_v40  ;;  %1080 = vmatprep.subr.bf16.mxu0 %v1678_v41  ;;  %v1771_v40 = vld [vmem:[%s1894_s28 + $0x30c] ss:$16 sps:$4 sm:$0xff]   ;;  %v1766_v41 = vld [vmem:[%s1894_s28 + $0x108] ss:$16 sps:$4 sm:$0xff]  }
  0x40   : > { %1121 = vmatprep.subr.bf16.mxu1 %v1680_v42  ;;  %v1769_v42 = vld [vmem:[%s1894_s28 + $0x308] ss:$16 sps:$4 sm:$0xff]  }
  0x42   : > { %1081 = vmatpush1.bf16.msra.mxu0 %v1682_v43  ;;  %v1774_v43 = vld [vmem:[%s1894_s28 + $0x12c] ss:$16 sps:$4 sm:$0xff]  }
  0x43   : > { %1122 = vmatpush1.bf16.msra.mxu1 %v1683_v44  ;;  %1082 = vmatprep.subr.bf16.mxu0 %v1684_v45  ;;  %v1777_v44 = vld [vmem:[%s1894_s28 + $0x32c] ss:$16 sps:$4 sm:$0xff]   ;;  %v1772_v45 = vld [vmem:[%s1894_s28 + $0x128] ss:$16 sps:$4 sm:$0xff]  }
  0x44   : > { %1123 = vmatprep.subr.bf16.mxu1 %v1686_v46  ;;  %v1775_v46 = vld [vmem:[%s1894_s28 + $0x328] ss:$16 sps:$4 sm:$0xff]  }
  0x46   : > { %1083 = vmatpush1.bf16.msra.mxu0 %v1688_v50  ;;  %v1781_v50 = vld [vmem:[%s1894_s28 + $0x348] ss:$16 sps:$4 sm:$0xff]  }
  0x47   : > { %1124 = vmatpush1.bf16.msra.mxu1 %v1689_v51  ;;  %1084 = vmatprep.subr.bf16.mxu0 %v1690_v53  ;;  %v1786_v51 = vld [vmem:[%s1894_s28 + $0x16c] ss:$16 sps:$4 sm:$0xff]   ;;  %v1784_v53 = vld [vmem:[%s1894_s28 + $0x168] ss:$16 sps:$4 sm:$0xff]  }
  0x48   : > { %1125 = vmatprep.subr.bf16.mxu1 %v1692_v54  ;;  %v1787_v54 = vld [vmem:[%s1894_s28 + $0x368] ss:$16 sps:$4 sm:$0xff]  }
  0x4a   : > { %1085 = vmatpush1.bf16.msra.mxu0 %v1694_v55  ;;  %v1792_v55 = vld [vmem:[%s1894_s28 + $0x18c] ss:$16 sps:$4 sm:$0xff]  }
  0x4b   : > { %1126 = vmatpush1.bf16.msra.mxu1 %v1695_v56  ;;  %1086 = vmatprep.subr.bf16.mxu0 %v1696_v57  ;;  %v1795_v56 = vld [vmem:[%s1894_s28 + $0x38c] ss:$16 sps:$4 sm:$0xff]   ;;  %v1790_v57 = vld [vmem:[%s1894_s28 + $0x188] ss:$16 sps:$4 sm:$0xff]  }
  0x4c   : > { %1127 = vmatprep.subr.bf16.mxu1 %v1698_v58  ;;  %v1793_v58 = vld [vmem:[%s1894_s28 + $0x388] ss:$16 sps:$4 sm:$0xff]  }
  0x4e   : > { %1087 = vmatpush1.bf16.msra.mxu0 %v1700_v59  ;;  %v1798_v59 = vld [vmem:[%s1894_s28 + $0x1ac] ss:$16 sps:$4 sm:$0xff]  }
  0x4f   : > { %1128 = vmatpush1.bf16.msra.mxu1 %v1701_v60  ;;  %1088 = vmatprep.subr.bf16.mxu0 %v1702_v61  ;;  %v1801_v60 = vld [vmem:[%s1894_s28 + $0x3ac] ss:$16 sps:$4 sm:$0xff]   ;;  %v1796_v61 = vld [vmem:[%s1894_s28 + $0x1a8] ss:$16 sps:$4 sm:$0xff]  }
  0x50   : > { %1129 = vmatprep.subr.bf16.mxu1 %v1704_v62  ;;  %v1799_v62 = vld [vmem:[%s1894_s28 + $0x3a8] ss:$16 sps:$4 sm:$0xff]  }
  0x52   : > { %1089 = vmatpush1.bf16.msra.mxu0 %v1706_v63  ;;  %v1804_v63 = vld [vmem:[%s1894_s28 + $0x1cc] ss:$16 sps:$4 sm:$0xff]  }
  0x53   : > { %1130 = vmatpush1.bf16.msra.mxu1 %v1707_v0  ;;  %1090 = vmatprep.subr.bf16.mxu0 %v1708_v1  ;;  %v1807_v0 = vld [vmem:[%s1894_s28 + $0x3cc] ss:$16 sps:$4 sm:$0xff]   ;;  %v1802_v1 = vld [vmem:[%s1894_s28 + $0x1c8] ss:$16 sps:$4 sm:$0xff]  }
  0x54   : > { %1131 = vmatprep.subr.bf16.mxu1 %v1710_v2  ;;  %v1805_v2 = vld [vmem:[%s1894_s28 + $0x3c8] ss:$16 sps:$4 sm:$0xff]  }
  0x56   : > { %1091 = vmatpush1.bf16.msra.mxu0 %v1712_v3  ;;  %v1810_v3 = vld [vmem:[%s1894_s28 + $0x1ec] ss:$16 sps:$4 sm:$0xff]  }
  0x57   : > { %1132 = vmatpush1.bf16.msra.mxu1 %v1713_v4  ;;  %1142 = vmatprep.subr.bf16.mxu0 %v1720_v5  ;;  %v1813_v4 = vld [vmem:[%s1894_s28 + $0x3ec] ss:$16 sps:$4 sm:$0xff]   ;;  %v1808_v5 = vld [vmem:[%s1894_s28 + $0x1e8] ss:$16 sps:$4 sm:$0xff]  }
  0x58   : > { %1183 = vmatprep.subr.bf16.mxu1 %v1723_v6  ;;  %v1811_v6 = vld [vmem:[%s1894_s28 + $0x3e8] ss:$16 sps:$4 sm:$0xff]  }
  0x59   : > { %1093 = vmatmul.mubr.bf16.vlgmr.msra.gmra.mrb[0].mxu0 %v1968_v7 }
  0x5a   : > { %1134 = vmatmul.mubr.bf16.vlgmr.msra.gmra.mrb[0].mxu1 %v1970_v8  ;;  %1143 = vmatpush1.bf16.msra.mxu0 %v1718_v9 }
  0x5b   : > { %1184 = vmatpush1.bf16.msra.mxu1 %v1721_v10  ;;  %1144 = vmatprep.subr.bf16.mxu0 %v1726_v11  ;;  %v272_v10 = vld [vmem:[#allocation2] sm:$0xff] }
  0x5c   : > { %1185 = vmatprep.subr.bf16.mxu1 %v1729_v12  ;;  %1174 = vmatprep.mubr.bf16.mxu0 %v1944_v48  ;;  %v1783_v48 = vld [vmem:[%s1894_s28 + $0x34c] ss:$16 sps:$4 sm:$0xff]  }
  0x5d   : > { %1215 = vmatprep.mubr.bf16.mxu1 %v1458_v52  ;;  %v1789_v52 = vld [vmem:[%s1894_s28 + $0x36c] ss:$16 sps:$4 sm:$0xff]  }
  0x5e   : > { %1145 = vmatpush1.bf16.msra.mxu0 %v1724_v13 }
  0x5f   : > { %1186 = vmatpush1.bf16.msra.mxu1 %v1727_v14  ;;  %1146 = vmatprep.subr.bf16.mxu0 %v1732_v15  ;;  %v273_v14 = vld [vmem:[#allocation2 + $0x8] sm:$0xff] }
  0x60   : > { %1187 = vmatprep.subr.bf16.mxu1 %v1735_v16 }
  0x62   : > { %1147 = vmatpush1.bf16.msra.mxu0 %v1730_v17 }
  0x63   : > { %1188 = vmatpush1.bf16.msra.mxu1 %v1733_v18  ;;  %1148 = vmatprep.subr.bf16.mxu0 %v1738_v19 }
  0x64   : > { %1189 = vmatprep.subr.bf16.mxu1 %v1741_v20 }
  0x66   : > { %1149 = vmatpush1.bf16.msra.mxu0 %v1736_v21 }
  0x67   : > { %1190 = vmatpush1.bf16.msra.mxu1 %v1739_v22  ;;  %1150 = vmatprep.subr.bf16.mxu0 %v1744_v23 }
  0x68   : > { %1191 = vmatprep.subr.bf16.mxu1 %v1747_v24 }
  0x6a   : > { %1151 = vmatpush1.bf16.msra.mxu0 %v1742_v25 }
  0x6b   : > { %1192 = vmatpush1.bf16.msra.mxu1 %v1745_v26  ;;  %1152 = vmatprep.subr.bf16.mxu0 %v1750_v27  ;;  %v275_v26 = vld [vmem:[#allocation2 + $0x18] sm:$0xff] }
  0x6c   : > { %1193 = vmatprep.subr.bf16.mxu1 %v1753_v28 }
  0x6e   : > { %1153 = vmatpush1.bf16.msra.mxu0 %v1748_v29 }
  0x6f   : > { %1194 = vmatpush1.bf16.msra.mxu1 %v1751_v30  ;;  %1154 = vmatprep.subr.bf16.mxu0 %v1756_v31 }
  0x70   : > { %1195 = vmatprep.subr.bf16.mxu1 %v1759_v32 }
  0x72   : > { %1155 = vmatpush1.bf16.msra.mxu0 %v1754_v33 }
  0x73   : > { %1196 = vmatpush1.bf16.msra.mxu1 %v1757_v34  ;;  %1156 = vmatprep.subr.bf16.mxu0 %v1762_v35  ;;  %v1242_v35 = vlaneseq (!%p1587_p7) }
  0x74   : > { %1197 = vmatprep.subr.bf16.mxu1 %v1765_v36 }
  0x75   : > { %v1243_v36 = vshrl.u32 (!%p1587_p7), %v1242_v35, 7 }
  0x76   : > { %1157 = vmatpush1.bf16.msra.mxu0 %v1760_v37  ;;  %v1240_v37 = vld [vmem:[%s2082_s2] sm:$0xf] (!%p1587_p7) }
  0x77   : > { %1198 = vmatpush1.bf16.msra.mxu1 %v1763_v38  ;;  %1158 = vmatprep.subr.bf16.mxu0 %v1768_v39  ;;  %v1244_v39 = vsub.s32 (!%p1587_p7), 0, %v1243_v36 }
  0x78   : > { %1199 = vmatprep.subr.bf16.mxu1 %v1771_v40  ;;  %v1248_v40 = vsub.s32 (!%p1587_p7), 1, %v1243_v36 }
  0x7a   : > { %1159 = vmatpush1.bf16.msra.mxu0 %v1766_v41  ;;  %v1252_v41 = vsub.s32 (!%p1587_p7), 2, %v1243_v36 }
  0x7b   : > { %1200 = vmatpush1.bf16.msra.mxu1 %v1769_v42  ;;  %1160 = vmatprep.subr.bf16.mxu0 %v1774_v43  ;;  %v1256_v42 = vsub.s32 (!%p1587_p7), 3, %v1243_v36 }
  0x7c   : > { %1201 = vmatprep.subr.bf16.mxu1 %v1777_v44 }
  0x7e   : > { %1161 = vmatpush1.bf16.msra.mxu0 %v1772_v45 }
  0x7f   : > { %1202 = vmatpush1.bf16.msra.mxu1 %v1775_v46  ;;  %1162 = vmatprep.subr.bf16.mxu0 %v1780_v47  ;;  %v1245_v46 = vrot.slane (!%p1587_p7), %v1240_v37, %v1244_v39  ;;  %v1249_v47 = vrot.slane (!%p1587_p7), %v1240_v37, %v1248_v40 }
  0x80   : > { %1203 = vmatprep.subr.bf16.mxu1 %v1783_v48  ;;  %v1253_v48 = vrot.slane (!%p1587_p7), %v1240_v37, %v1252_v41 }
  0x82   : > { %1163 = vmatpush1.bf16.msra.mxu0 %v1778_v49  ;;  %v1257_v49 = vrot.slane (!%p1587_p7), %v1240_v37, %v1256_v42 }
  0x83   : > { %1204 = vmatpush1.bf16.msra.mxu1 %v1781_v50  ;;  %1164 = vmatprep.subr.bf16.mxu0 %v1786_v51 }
  0x84   : > { %1205 = vmatprep.subr.bf16.mxu1 %v1789_v52 }
  0x86   : > { %1165 = vmatpush1.bf16.msra.mxu0 %v1784_v53 }
  0x87   : > { %1206 = vmatpush1.bf16.msra.mxu1 %v1787_v54  ;;  %1166 = vmatprep.subr.bf16.mxu0 %v1792_v55 }
  0x88   : > { %1207 = vmatprep.subr.bf16.mxu1 %v1795_v56 }
  0x8a   : > { %1167 = vmatpush1.bf16.msra.mxu0 %v1790_v57 }
  0x8b   : > { %1208 = vmatpush1.bf16.msra.mxu1 %v1793_v58  ;;  %1168 = vmatprep.subr.bf16.mxu0 %v1798_v59 }
  0x8c   : > { %1209 = vmatprep.subr.bf16.mxu1 %v1801_v60 }
  0x8e   : > { %1169 = vmatpush1.bf16.msra.mxu0 %v1796_v61 }
  0x8f   : > { %1210 = vmatpush1.bf16.msra.mxu1 %v1799_v62  ;;  %1170 = vmatprep.subr.bf16.mxu0 %v1804_v63 }
  0x90   : > { %1211 = vmatprep.subr.bf16.mxu1 %v1807_v0 }
  0x92   : > { %1171 = vmatpush1.bf16.msra.mxu0 %v1802_v1 }
  0x93   : > { %1212 = vmatpush1.bf16.msra.mxu1 %v1805_v2  ;;  %1172 = vmatprep.subr.bf16.mxu0 %v1810_v3 }
  0x94   : > { %1213 = vmatprep.subr.bf16.mxu1 %v1813_v4 }
  0x96   : > { %1173 = vmatpush1.bf16.msra.mxu0 %v1808_v5 }
  0x97   : > { %1214 = vmatpush1.bf16.msra.mxu1 %v1811_v6 }
  0x99   : > { %1175 = vmatmul.mubr.bf16.vlgmr.msra.gmra.mrb[4].mxu0 %v1968_v7  ;;  %v274_v7 = vld [vmem:[#allocation2 + $0x10] sm:$0xff] }
  0x9a   : > { %1216 = vmatmul.mubr.bf16.vlgmr.msra.gmra.mrb[4].mxu1 %v1970_v8 }
 0x12c   : > { %v1094_v9 = vpop.f32.mrb[0].mxu0 }
 0x12d   : > { %v1135_v11 = vpop.f32.mrb[0].mxu1  ;;  %v1096_v13 = vpop.f32.mrb[1].mxu0 }
 0x12e   : > { %v1136_v12 = vadd.f32 %v1135_v11, %v1094_v9  ;;  %v1137_v15 = vpop.f32.mrb[1].mxu1  ;;  %v1098_v17 = vpop.f32.mrb[2].mxu0 }
 0x12f   : > { %v1138_v16 = vadd.f32 %v1137_v15, %v1096_v13  ;;  %v1139_v18 = vpop.f32.mrb[2].mxu1  ;;  %v1099_v20 = vpop.f32.mrb[3].mxu0 }
 0x130   : > { %v1224_v19 = vadd.f32 %v1136_v12, %v272_v10  ;;  %v1140_v21 = vpop.f32.mrb[3].mxu1 }
 0x131   : > { %v1225_v22 = vadd.f32 %v1138_v16, %v273_v14 }
 0x132   : > { %1228 = vst [vmem:[#allocation2] sm:$0xff] %v1224_v19 }
 0x133   : > { %1229 = vst [vmem:[#allocation2 + $0x8] sm:$0xff] %v1225_v22 }
 0x139   : > { %v1236_v38 = vld [vmem:[#allocation2] sm:$0xff] (!%p1587_p7) }
 0x13a   : > { %v1237_v43 = vld [vmem:[#allocation2 + $0x8] sm:$0xff] (!%p1587_p7)  ;;  %v1262_v50 = vadd.f32 (!%p1587_p7), %v1245_v46, %v1236_v38 }
 0x13b   : > { %v1263_v51 = vadd.f32 (!%p1587_p7), %v1249_v47, %v1237_v43 }
 0x13c   : > { %1266 = vst [vmem:[%s2083_s3] sm:$0xff] (!%p1587_p7), %v1262_v50  ;;  %v1270_v54 = vrot.slane (!%p1587_p7), %v1262_v50, 4  ;;  %v1294_v55 = vmul.f32 (!%p1587_p7), %v1262_v50, %v1262_v50 }
 0x13d   : > { %1267 = vst [vmem:[%s2083_s3 + $0x8] sm:$0xff] (!%p1587_p7), %v1263_v51  ;;  %v1276_v56 = vrot.slane (!%p1587_p7), %v1263_v51, 4  ;;  %v1295_v57 = vmul.f32 (!%p1587_p7), %v1263_v51, %v1263_v51 }
 0x13e   : > { %v1271_v62 = vadd.f32 (!%p1587_p7), %v1270_v54, %v1262_v50  ;;  %v1298_v63 = vrot.slane (!%p1587_p7), %v1294_v55, 4 }
 0x13f   : > { %v1277_v0 = vadd.f32 (!%p1587_p7), %v1276_v56, %v1263_v51  ;;  %v1304_v1 = vrot.slane (!%p1587_p7), %v1295_v57, 4 }
 0x140   : > { %v1272_v6 = vrot.slane (!%p1587_p7), %v1271_v62, 2  ;;  %v1299_v9 = vadd.f32 (!%p1587_p7), %v1298_v63, %v1294_v55 }
 0x141   : > { %v1278_v10 = vrot.slane (!%p1587_p7), %v1277_v0, 2  ;;  %v1305_v11 = vadd.f32 (!%p1587_p7), %v1304_v1, %v1295_v57 }
 0x142   : > { %v1273_v16 = vadd.f32 (!%p1587_p7), %v1272_v6, %v1271_v62  ;;  %v1300_v17 = vrot.slane (!%p1587_p7), %v1299_v9, 2 }
 0x143   : > { %v1279_v18 = vadd.f32 (!%p1587_p7), %v1278_v10, %v1277_v0  ;;  %v1306_v19 = vrot.slane (!%p1587_p7), %v1305_v11, 2 }
 0x16c   : > { %v1176_v23 = vpop.f32.mrb[4].mxu0 }
 0x16d   : > { %v1217_v24 = vpop.f32.mrb[4].mxu1  ;;  %v1178_v25 = vpop.f32.mrb[5].mxu0  ;;  %1235 = sbr.rel (%p1587_p7) target bundleno = 398 (0x18e), region = 40 }
 0x16e   : > { %v1218_v8 = vadd.f32 %v1217_v24, %v1176_v23  ;;  %v1219_v27 = vpop.f32.mrb[5].mxu1  ;;  %v1180_v29 = vpop.f32.mrb[6].mxu0  ;;  %v1301_v24 = vadd.f32 (!%p1587_p7), %v1300_v17, %v1299_v9 }
 0x16f   : > { %v1220_v28 = vadd.f32 %v1219_v27, %v1178_v25  ;;  %v1221_v30 = vpop.f32.mrb[6].mxu1  ;;  %v1181_v32 = vpop.f32.mrb[7].mxu0  ;;  %v1307_v25 = vadd.f32 (!%p1587_p7), %v1306_v19, %v1305_v11 }
 0x170   : > { %v1226_v31 = vadd.f32 %v1218_v8, %v274_v7  ;;  %v1222_v33 = vpop.f32.mrb[7].mxu1  ;;  %v1274_v7 = vrot.slane (!%p1587_p7), %v1273_v16, 1  ;;  %v1280_v8 = vrot.slane (!%p1587_p7), %v1279_v18, 1 }
 0x171   : > { %v1227_v34 = vadd.f32 %v1220_v28, %v275_v26  ;;  %v1308_v33 = vrot.slane (!%p1587_p7), %v1307_v25, 1 }
 0x172   : > { %1230 = vst [vmem:[#allocation2 + $0x10] sm:$0xff] %v1226_v31  ;;  %v1275_v30 = vadd.f32 (!%p1587_p7), %v1274_v7, %v1273_v16  ;;  %v1302_v31 = vrot.slane (!%p1587_p7), %v1301_v24, 1  ;;  %v1281_v32 = vadd.f32 (!%p1587_p7), %v1280_v8, %v1279_v18 }
 0x173   : > { %1231 = vst [vmem:[#allocation2 + $0x18] sm:$0xff] %v1227_v34  ;;  %v1309_v39 = vadd.f32 (!%p1587_p7), %v1308_v33, %v1307_v25 }
 0x174   : > { %v1303_v38 = vadd.f32 %v1302_v31, %v1301_v24 }
 0x175   : > { %v1324_v43 = vsel %vm1322_vm0, %v1281_v32, %v1309_v39 }
 0x176   : > { %v1323_v42 = vsel %vm1322_vm0, %v1275_v30, %v1303_v38 }
 0x179   : > { %v1238_v44 = vld [vmem:[#allocation2 + $0x10] sm:$0xff] }
 0x17a   : > { %v1239_v45 = vld [vmem:[#allocation2 + $0x18] sm:$0xff]  ;;  %v1264_v52 = vadd.f32 %v1253_v48, %v1238_v44  ;;  %v1328_v44 = vsel %vm1327_vm1, %v1323_v42, 0.0 }
 0x17b   : > { %v1265_v53 = vadd.f32 %v1257_v49, %v1239_v45  ;;  %v1329_v45 = vsel %vm1327_vm1, %v1324_v43, 0.0  ;;  %1332 = vst [vmem:[%s2084_s4] sm:$0xff] %v1328_v44 }
 0x17c   : > { %1268 = vst [vmem:[%s2083_s3 + $0x10] sm:$0xff] %v1264_v52  ;;  %v1282_v58 = vrot.slane %v1264_v52, 4  ;;  %v1296_v59 = vmul.f32 %v1264_v52, %v1264_v52  ;;  %1333 = vst [vmem:[%s2084_s4 + $0x8] sm:$0xff] %v1329_v45 }
 0x17d   : > { %1269 = vst [vmem:[%s2083_s3 + $0x18] sm:$0xff] %v1265_v53  ;;  %v1288_v60 = vrot.slane %v1265_v53, 4  ;;  %v1297_v61 = vmul.f32 %v1265_v53, %v1265_v53 }
 0x17e   : > { %v1283_v2 = vadd.f32 %v1282_v58, %v1264_v52  ;;  %v1310_v3 = vrot.slane %v1296_v59, 4 }
 0x17f   : > { %v1289_v4 = vadd.f32 %v1288_v60, %v1265_v53  ;;  %v1316_v5 = vrot.slane %v1297_v61, 4 }
 0x180   : > { %v1284_v12 = vrot.slane %v1283_v2, 2  ;;  %v1311_v13 = vadd.f32 %v1310_v3, %v1296_v59 }
 0x181   : > { %v1290_v14 = vrot.slane %v1289_v4, 2  ;;  %v1317_v15 = vadd.f32 %v1316_v5, %v1297_v61 }
 0x182   : > { %v1285_v20 = vadd.f32 %v1284_v12, %v1283_v2  ;;  %v1312_v21 = vrot.slane %v1311_v13, 2 }
 0x183   : > { %v1291_v22 = vadd.f32 %v1290_v14, %v1289_v4  ;;  %v1318_v23 = vrot.slane %v1317_v15, 2 }
 0x184   : > { %v1286_v26 = vrot.slane %v1285_v20, 1  ;;  %v1313_v27 = vadd.f32 %v1312_v21, %v1311_v13 }
 0x185   : > { %v1292_v28 = vrot.slane %v1291_v22, 1  ;;  %v1319_v29 = vadd.f32 %v1318_v23, %v1317_v15 }
 0x186   : > { %v1287_v34 = vadd.f32 %v1286_v26, %v1285_v20  ;;  %v1314_v35 = vrot.slane %v1313_v27, 1 }
 0x187   : > { %v1293_v36 = vadd.f32 %v1292_v28, %v1291_v22  ;;  %v1320_v37 = vrot.slane %v1319_v29, 1 }
 0x188   : > { %v1315_v40 = vadd.f32 %v1314_v35, %v1313_v27 }
 0x189   : > { %v1321_v41 = vadd.f32 %v1320_v37, %v1319_v29 }
 0x18a   : > { %v1325_v46 = vsel %vm1322_vm0, %v1287_v34, %v1315_v40 }
 0x18b   : > { %v1326_v47 = vsel %vm1322_vm0, %v1293_v36, %v1321_v41  ;;  %v1330_v48 = vsel %vm1327_vm1, %v1325_v46, 0.0 }
 0x18c   : > { %v1331_v49 = vsel %vm1327_vm1, %v1326_v47, 0.0  ;;  %1334 = vst [vmem:[%s2084_s4 + $0x10] sm:$0xff] %v1330_v48 }
 0x18d   : > { %1335 = vst [vmem:[%s2084_s4 + $0x18] sm:$0xff] %v1331_v49 }
 0x18e PF: > { %s15_s17 = sadd.s32 1, %s1836_s17   ;;  %s2085_s15 = smov %s1832_s16 }
 0x18f   : > { %p12_p8 = scmp.ge.s32.totalorder %s15_s17, 7   ;;  %s2086_s16 = smov %s2088_s18 }
 0x191   :  { %14 = sbr.rel (!%p12_p8) target bundleno = 2 (0x2), region = 85 }

// kernel: deep_koalarization_norm_forward.42
= control target key start
LH: loop header
LB: loop body
LE: loop exit
PB: predicated region body
PF: predicated region fallthrough
CT: control target
= control target key end

     0   :  { %s1864_s15 = smov 0   ;;  %s1866_s16 = smov 0   ;;  %s2080_s0 = inlined_call_operand.vmem [shape: bf16[8,4608], index: 0, kind: input, shape index: {}]   ;;  %s2081_s1 = inlined_call_operand.vmem [shape: bf16[4608,512], index: 1, kind: input, shape index: {}]   ;;  %s2082_s2 = inlined_call_operand.vmem [shape: f32[1,512], index: 2, kind: input, shape index: {}]   ;;  %s2083_s3 = inlined_call_operand.vmem [shape: f32[8,512], index: 3, kind: output, shape index: {0}]   ;;  %s2084_s4 = inlined_call_operand.vmem [shape: f32[8,512], index: 4, kind: output, shape index: {1}]  }
   0x1   :  { %s1868_s17 = smov 0  }
   0x2 LB: > { %s24_s18 = sadd.s32 1, %s1832_s16  ;;  %p1448_p0 = scmp.ge.s32.totalorder %s1836_s17, 1  ;;  %s1836_s17 = sphi %s1868_s17, %s15_s17   ;;  %s1832_s16 = sphi %s1866_s16, %s2086_s16   ;;  %s1828_s15 = sphi %s1864_s15, %s2085_s15  }
   0x3   : > { %p25_p1 = scmp.ge.s32.totalorder %s24_s18, 9  ;;  %p196_p2 = scmp.lt.s32.totalorder %s1836_s17, 10 }
   0x5   : > { %s2088_s18 = smov (%p25_p1, %s24_s18), 0  ;;  %p197_p3 = pnand %p1448_p0, %p196_p2 }
   0x6   : > { %s1449_s19 = sshll.u32 (!%p197_p3), %s1828_s15, 2  ;;  %s1451_s20 = sshll.u32 (!%p197_p3), %s1828_s15, 6 }
   0x7   : > { %200 = sbr.rel (%p197_p3) target bundleno = 398 (0x18e), region = 32  ;;  %p240_p4 = scmp.lt.s32.totalorder (!%p197_p3), %s1449_s19, 35 }
   0x8   : > { %p248_p5 = scmp.lt.s32.totalorder (!%p197_p3), %s1451_s20, 575  ;;  %p1454_p6 = scmp.ne.s32.totalorder (!%p197_p3), %s1828_s15, 0 }
   0xe   : > { %s2090_s19 = smov (!%p240_p4, %s1449_s19), 35  ;;  %s2092_s20 = smov (!%p248_p5, %s1451_s20), 575 }
   0xf   : > { %s1450_s21 = sshll.u32 %s2090_s19, 2  ;;  %s1592_s25 = sshll.u32 %s2092_s20, 4  ;;  %v1838_v0 = vmov (!%p1454_p6), 0.0  }
  0x10   : > { %s1889_s24 = scalar_lea.vmem %s2080_s0, %s1450_s21  ;;  %s1894_s28 = scalar_lea.vmem %s2081_s1, %s1592_s25  ;;  %268 = vst [vmem:[#allocation2] sm:$0xff] (!%p1454_p6), %v1838_v0  ;;  %269 = vst [vmem:[#allocation2 + $0x8] sm:$0xff] (!%p1454_p6), %v1838_v0 }
  0x11   : > { %267 = sbr.rel (%p1454_p6) target bundleno = 24 (0x18), region = 36  ;;  %270 = vst [vmem:[#allocation2 + $0x10] sm:$0xff] (!%p1454_p6), %v1838_v0  ;;  %271 = vst [vmem:[#allocation2 + $0x18] sm:$0xff] (!%p1454_p6), %v1838_v0 }
  0x18 PF: > { %v1618_v1 = vld [vmem:[%s1894_s28 + $0x4] ss:$16 sps:$4 sm:$0xff]   ;;  %v1622_v3 = vld [vmem:[%s1894_s28] ss:$16 sps:$4 sm:$0xff]   ;;  %v277_v49 = vld [vmem:[%s1889_s24 + $0x8] sm:$0xff]  ;;  %p1587_p7 = scmp.ne.s32.totalorder %s1828_s15, 8 }
  0x19   : > { %v1620_v2 = vld [vmem:[%s1894_s28 + $0x204] ss:$16 sps:$4 sm:$0xff]   ;;  %1060 = vmatprep.subr.bf16.mxu0 %v1618_v1  ;;  %v1623_v4 = vld [vmem:[%s1894_s28 + $0x200] ss:$16 sps:$4 sm:$0xff]   ;;  %v1458_v52 = vcombine.high %v277_v49, %v277_v49  ;;  %vm1322_vm0 = vcmask (!%p1587_p7), 1040384   ;;  %vm1327_vm1 = vcmask (!%p1587_p7), 1041408  }
  0x1a   : > { %1101 = vmatprep.subr.bf16.mxu1 %v1620_v2  ;;  %v1624_v5 = vld [vmem:[%s1894_s28 + $0x24] ss:$16 sps:$4 sm:$0xff]   ;;  %1061 = vmatpush1.bf16.msra.mxu0 %v1622_v3  ;;  %v1628_v7 = vld [vmem:[%s1894_s28 + $0x20] ss:$16 sps:$4 sm:$0xff]  }
  0x1b   : > { %1102 = vmatpush1.bf16.msra.mxu1 %v1623_v4  ;;  %v1626_v6 = vld [vmem:[%s1894_s28 + $0x224] ss:$16 sps:$4 sm:$0xff]   ;;  %1062 = vmatprep.subr.bf16.mxu0 %v1624_v5  ;;  %v1629_v8 = vld [vmem:[%s1894_s28 + $0x220] ss:$16 sps:$4 sm:$0xff]   ;;  %v1720_v5 = vld [vmem:[%s1894_s28 + $0xc] ss:$16 sps:$4 sm:$0xff]  }
  0x1c   : > { %1103 = vmatprep.subr.bf16.mxu1 %v1626_v6  ;;  %v1630_v9 = vld [vmem:[%s1894_s28 + $0x44] ss:$16 sps:$4 sm:$0xff]   ;;  %v1634_v11 = vld [vmem:[%s1894_s28 + $0x40] ss:$16 sps:$4 sm:$0xff]   ;;  %1133 = vmatprep.mubr.bf16.mxu1 %v1458_v52  ;;  %v1723_v6 = vld [vmem:[%s1894_s28 + $0x20c] ss:$16 sps:$4 sm:$0xff]  }
  0x1d   : > { %v1632_v10 = vld [vmem:[%s1894_s28 + $0x244] ss:$16 sps:$4 sm:$0xff]   ;;  %v1635_v12 = vld [vmem:[%s1894_s28 + $0x240] ss:$16 sps:$4 sm:$0xff]  }
  0x1e   : > { %1063 = vmatpush1.bf16.msra.mxu0 %v1628_v7  ;;  %v1636_v13 = vld [vmem:[%s1894_s28 + $0x64] ss:$16 sps:$4 sm:$0xff]   ;;  %v1640_v15 = vld [vmem:[%s1894_s28 + $0x60] ss:$16 sps:$4 sm:$0xff]  }
  0x1f   : > { %1104 = vmatpush1.bf16.msra.mxu1 %v1629_v8  ;;  %1064 = vmatprep.subr.bf16.mxu0 %v1630_v9  ;;  %v1638_v14 = vld [vmem:[%s1894_s28 + $0x264] ss:$16 sps:$4 sm:$0xff]   ;;  %v1641_v16 = vld [vmem:[%s1894_s28 + $0x260] ss:$16 sps:$4 sm:$0xff]   ;;  %v1970_v8 = vcombine.low %v277_v49, %v277_v49  ;;  %v1718_v9 = vld [vmem:[%s1894_s28 + $0x8] ss:$16 sps:$4 sm:$0xff]  }
  0x20   : > { %1105 = vmatprep.subr.bf16.mxu1 %v1632_v10  ;;  %v1642_v17 = vld [vmem:[%s1894_s28 + $0x84] ss:$16 sps:$4 sm:$0xff]   ;;  %v1646_v19 = vld [vmem:[%s1894_s28 + $0x80] ss:$16 sps:$4 sm:$0xff]   ;;  %v1721_v10 = vld [vmem:[%s1894_s28 + $0x208] ss:$16 sps:$4 sm:$0xff]  }
  0x21   : > { %v1644_v18 = vld [vmem:[%s1894_s28 + $0x284] ss:$16 sps:$4 sm:$0xff]   ;;  %v1647_v20 = vld [vmem:[%s1894_s28 + $0x280] ss:$16 sps:$4 sm:$0xff]   ;;  %v1778_v49 = vld [vmem:[%s1894_s28 + $0x148] ss:$16 sps:$4 sm:$0xff]  }
  0x22   : > { %1065 = vmatpush1.bf16.msra.mxu0 %v1634_v11  ;;  %v1648_v21 = vld [vmem:[%s1894_s28 + $0xa4] ss:$16 sps:$4 sm:$0xff]   ;;  %v1652_v23 = vld [vmem:[%s1894_s28 + $0xa0] ss:$16 sps:$4 sm:$0xff]   ;;  %v1726_v11 = vld [vmem:[%s1894_s28 + $0x2c] ss:$16 sps:$4 sm:$0xff]  }
  0x23   : > { %1106 = vmatpush1.bf16.msra.mxu1 %v1635_v12  ;;  %1066 = vmatprep.subr.bf16.mxu0 %v1636_v13  ;;  %v1650_v22 = vld [vmem:[%s1894_s28 + $0x2a4] ss:$16 sps:$4 sm:$0xff]   ;;  %v1653_v24 = vld [vmem:[%s1894_s28 + $0x2a0] ss:$16 sps:$4 sm:$0xff]   ;;  %v1729_v12 = vld [vmem:[%s1894_s28 + $0x22c] ss:$16 sps:$4 sm:$0xff]  }
  0x24   : > { %1107 = vmatprep.subr.bf16.mxu1 %v1638_v14  ;;  %v1654_v25 = vld [vmem:[%s1894_s28 + $0xc4] ss:$16 sps:$4 sm:$0xff]   ;;  %v1658_v27 = vld [vmem:[%s1894_s28 + $0xc0] ss:$16 sps:$4 sm:$0xff]   ;;  %v1724_v13 = vld [vmem:[%s1894_s28 + $0x28] ss:$16 sps:$4 sm:$0xff]  }
  0x25   : > { %v1656_v26 = vld [vmem:[%s1894_s28 + $0x2c4] ss:$16 sps:$4 sm:$0xff]   ;;  %v1659_v28 = vld [vmem:[%s1894_s28 + $0x2c0] ss:$16 sps:$4 sm:$0xff]   ;;  %v1727_v14 = vld [vmem:[%s1894_s28 + $0x228] ss:$16 sps:$4 sm:$0xff]  }
  0x26   : > { %1067 = vmatpush1.bf16.msra.mxu0 %v1640_v15  ;;  %v1660_v29 = vld [vmem:[%s1894_s28 + $0xe4] ss:$16 sps:$4 sm:$0xff]   ;;  %v1664_v31 = vld [vmem:[%s1894_s28 + $0xe0] ss:$16 sps:$4 sm:$0xff]   ;;  %v1732_v15 = vld [vmem:[%s1894_s28 + $0x4c] ss:$16 sps:$4 sm:$0xff]  }
  0x27   : > { %1108 = vmatpush1.bf16.msra.mxu1 %v1641_v16  ;;  %1068 = vmatprep.subr.bf16.mxu0 %v1642_v17  ;;  %v1662_v30 = vld [vmem:[%s1894_s28 + $0x2e4] ss:$16 sps:$4 sm:$0xff]   ;;  %v1665_v32 = vld [vmem:[%s1894_s28 + $0x2e0] ss:$16 sps:$4 sm:$0xff]   ;;  %v1735_v16 = vld [vmem:[%s1894_s28 + $0x24c] ss:$16 sps:$4 sm:$0xff]  }
  0x28   : > { %1109 = vmatprep.subr.bf16.mxu1 %v1644_v18  ;;  %v1666_v33 = vld [vmem:[%s1894_s28 + $0x104] ss:$16 sps:$4 sm:$0xff]   ;;  %v1670_v35 = vld [vmem:[%s1894_s28 + $0x100] ss:$16 sps:$4 sm:$0xff]   ;;  %v1730_v17 = vld [vmem:[%s1894_s28 + $0x48] ss:$16 sps:$4 sm:$0xff]  }
  0x29   : > { %v1668_v34 = vld [vmem:[%s1894_s28 + $0x304] ss:$16 sps:$4 sm:$0xff]   ;;  %v1671_v36 = vld [vmem:[%s1894_s28 + $0x300] ss:$16 sps:$4 sm:$0xff]   ;;  %v1733_v18 = vld [vmem:[%s1894_s28 + $0x248] ss:$16 sps:$4 sm:$0xff]  }
  0x2a   : > { %1069 = vmatpush1.bf16.msra.mxu0 %v1646_v19  ;;  %v1672_v37 = vld [vmem:[%s1894_s28 + $0x124] ss:$16 sps:$4 sm:$0xff]   ;;  %v1676_v39 = vld [vmem:[%s1894_s28 + $0x120] ss:$16 sps:$4 sm:$0xff]   ;;  %v1738_v19 = vld [vmem:[%s1894_s28 + $0x6c] ss:$16 sps:$4 sm:$0xff]  }
  0x2b   : > { %1110 = vmatpush1.bf16.msra.mxu1 %v1647_v20  ;;  %1070 = vmatprep.subr.bf16.mxu0 %v1648_v21  ;;  %v1674_v38 = vld [vmem:[%s1894_s28 + $0x324] ss:$16 sps:$4 sm:$0xff]   ;;  %v1677_v40 = vld [vmem:[%s1894_s28 + $0x320] ss:$16 sps:$4 sm:$0xff]   ;;  %v1741_v20 = vld [vmem:[%s1894_s28 + $0x26c] ss:$16 sps:$4 sm:$0xff]  }
  0x2c   : > { %1111 = vmatprep.subr.bf16.mxu1 %v1650_v22  ;;  %v1678_v41 = vld [vmem:[%s1894_s28 + $0x144] ss:$16 sps:$4 sm:$0xff]   ;;  %v1682_v43 = vld [vmem:[%s1894_s28 + $0x140] ss:$16 sps:$4 sm:$0xff]   ;;  %v1736_v21 = vld [vmem:[%s1894_s28 + $0x68] ss:$16 sps:$4 sm:$0xff]  }
  0x2d   : > { %v1680_v42 = vld [vmem:[%s1894_s28 + $0x344] ss:$16 sps:$4 sm:$0xff]   ;;  %v1683_v44 = vld [vmem:[%s1894_s28 + $0x340] ss:$16 sps:$4 sm:$0xff]   ;;  %v1739_v22 = vld [vmem:[%s1894_s28 + $0x268] ss:$16 sps:$4 sm:$0xff]  }
  0x2e   : > { %1071 = vmatpush1.bf16.msra.mxu0 %v1652_v23  ;;  %v1684_v45 = vld [vmem:[%s1894_s28 + $0x164] ss:$16 sps:$4 sm:$0xff]   ;;  %v1688_v50 = vld [vmem:[%s1894_s28 + $0x160] ss:$16 sps:$4 sm:$0xff]   ;;  %v1744_v23 = vld [vmem:[%s1894_s28 + $0x8c] ss:$16 sps:$4 sm:$0xff]  }
  0x2f   : > { %1112 = vmatpush1.bf16.msra.mxu1 %v1653_v24  ;;  %1072 = vmatprep.subr.bf16.mxu0 %v1654_v25  ;;  %v1686_v46 = vld [vmem:[%s1894_s28 + $0x364] ss:$16 sps:$4 sm:$0xff]   ;;  %v1689_v51 = vld [vmem:[%s1894_s28 + $0x360] ss:$16 sps:$4 sm:$0xff]   ;;  %v1747_v24 = vld [vmem:[%s1894_s28 + $0x28c] ss:$16 sps:$4 sm:$0xff]  }
  0x30   : > { %1113 = vmatprep.subr.bf16.mxu1 %v1656_v26  ;;  %v276_v47 = vld [vmem:[%s1889_s24] sm:$0xff]  ;;  %v1742_v25 = vld [vmem:[%s1894_s28 + $0x88] ss:$16 sps:$4 sm:$0xff]  }
  0x31   : > { %v1944_v48 = vcombine.high %v276_v47, %v276_v47  ;;  %v1690_v53 = vld [vmem:[%s1894_s28 + $0x184] ss:$16 sps:$4 sm:$0xff]   ;;  %v1694_v55 = vld [vmem:[%s1894_s28 + $0x180] ss:$16 sps:$4 sm:$0xff]   ;;  %v1968_v7 = vcombine.low %v276_v47, %v276_v47  ;;  %v1745_v26 = vld [vmem:[%s1894_s28 + $0x288] ss:$16 sps:$4 sm:$0xff]  }
  0x32   : > { %1073 = vmatpush1.bf16.msra.mxu0 %v1658_v27  ;;  %v1692_v54 = vld [vmem:[%s1894_s28 + $0x384] ss:$16 sps:$4 sm:$0xff]   ;;  %v1695_v56 = vld [vmem:[%s1894_s28 + $0x380] ss:$16 sps:$4 sm:$0xff]   ;;  %v1750_v27 = vld [vmem:[%s1894_s28 + $0xac] ss:$16 sps:$4 sm:$0xff]  }
  0x33   : > { %1114 = vmatpush1.bf16.msra.mxu1 %v1659_v28  ;;  %1074 = vmatprep.subr.bf16.mxu0 %v1660_v29  ;;  %v1696_v57 = vld [vmem:[%s1894_s28 + $0x1a4] ss:$16 sps:$4 sm:$0xff]   ;;  %v1700_v59 = vld [vmem:[%s1894_s28 + $0x1a0] ss:$16 sps:$4 sm:$0xff]   ;;  %v1753_v28 = vld [vmem:[%s1894_s28 + $0x2ac] ss:$16 sps:$4 sm:$0xff]  }
  0x34   : > { %1115 = vmatprep.subr.bf16.mxu1 %v1662_v30  ;;  %1092 = vmatprep.mubr.bf16.mxu0 %v1944_v48  ;;  %v1698_v58 = vld [vmem:[%s1894_s28 + $0x3a4] ss:$16 sps:$4 sm:$0xff]   ;;  %v1701_v60 = vld [vmem:[%s1894_s28 + $0x3a0] ss:$16 sps:$4 sm:$0xff]   ;;  %v1748_v29 = vld [vmem:[%s1894_s28 + $0xa8] ss:$16 sps:$4 sm:$0xff]  }
  0x35   : > { %v1702_v61 = vld [vmem:[%s1894_s28 + $0x1c4] ss:$16 sps:$4 sm:$0xff]   ;;  %v1706_v63 = vld [vmem:[%s1894_s28 + $0x1c0] ss:$16 sps:$4 sm:$0xff]   ;;  %v1751_v30 = vld [vmem:[%s1894_s28 + $0x2a8] ss:$16 sps:$4 sm:$0xff]  }
  0x36   : > { %1075 = vmatpush1.bf16.msra.mxu0 %v1664_v31  ;;  %v1704_v62 = vld [vmem:[%s1894_s28 + $0x3c4] ss:$16 sps:$4 sm:$0xff]   ;;  %v1707_v0 = vld [vmem:[%s1894_s28 + $0x3c0] ss:$16 sps:$4 sm:$0xff]   ;;  %v1756_v31 = vld [vmem:[%s1894_s28 + $0xcc] ss:$16 sps:$4 sm:$0xff]  }
  0x37   : > { %1116 = vmatpush1.bf16.msra.mxu1 %v1665_v32  ;;  %1076 = vmatprep.subr.bf16.mxu0 %v1666_v33  ;;  %v1708_v1 = vld [vmem:[%s1894_s28 + $0x1e4] ss:$16 sps:$4 sm:$0xff]   ;;  %v1712_v3 = vld [vmem:[%s1894_s28 + $0x1e0] ss:$16 sps:$4 sm:$0xff]   ;;  %v1759_v32 = vld [vmem:[%s1894_s28 + $0x2cc] ss:$16 sps:$4 sm:$0xff]  }
  0x38   : > { %1117 = vmatprep.subr.bf16.mxu1 %v1668_v34  ;;  %v1710_v2 = vld [vmem:[%s1894_s28 + $0x3e4] ss:$16 sps:$4 sm:$0xff]   ;;  %v1713_v4 = vld [vmem:[%s1894_s28 + $0x3e0] ss:$16 sps:$4 sm:$0xff]   ;;  %v1754_v33 = vld [vmem:[%s1894_s28 + $0xc8] ss:$16 sps:$4 sm:$0xff]  }
  0x39   : > { %v1757_v34 = vld [vmem:[%s1894_s28 + $0x2c8] ss:$16 sps:$4 sm:$0xff]   ;;  %v1780_v47 = vld [vmem:[%s1894_s28 + $0x14c] ss:$16 sps:$4 sm:$0xff]  }
  0x3a   : > { %1077 = vmatpush1.bf16.msra.mxu0 %v1670_v35  ;;  %v1762_v35 = vld [vmem:[%s1894_s28 + $0xec] ss:$16 sps:$4 sm:$0xff]  }
  0x3b   : > { %1118 = vmatpush1.bf16.msra.mxu1 %v1671_v36  ;;  %1078 = vmatprep.subr.bf16.mxu0 %v1672_v37  ;;  %v1765_v36 = vld [vmem:[%s1894_s28 + $0x2ec] ss:$16 sps:$4 sm:$0xff]   ;;  %v1760_v37 = vld [vmem:[%s1894_s28 + $0xe8] ss:$16 sps:$4 sm:$0xff]  }
  0x3c   : > { %1119 = vmatprep.subr.bf16.mxu1 %v1674_v38  ;;  %v1763_v38 = vld [vmem:[%s1894_s28 + $0x2e8] ss:$16 sps:$4 sm:$0xff]  }
  0x3e   : > { %1079 = vmatpush1.bf16.msra.mxu0 %v1676_v39  ;;  %v1768_v39 = vld [vmem:[%s1894_s28 + $0x10c] ss:$16 sps:$4 sm:$0xff]  }
  0x3f   : > { %1120 = vmatpush1.bf16.msra.mxu1 %v1677_v40  ;;  %1080 = vmatprep.subr.bf16.mxu0 %v1678_v41  ;;  %v1771_v40 = vld [vmem:[%s1894_s28 + $0x30c] ss:$16 sps:$4 sm:$0xff]   ;;  %v1766_v41 = vld [vmem:[%s1894_s28 + $0x108] ss:$16 sps:$4 sm:$0xff]  }
  0x40   : > { %1121 = vmatprep.subr.bf16.mxu1 %v1680_v42  ;;  %v1769_v42 = vld [vmem:[%s1894_s28 + $0x308] ss:$16 sps:$4 sm:$0xff]  }
  0x42   : > { %1081 = vmatpush1.bf16.msra.mxu0 %v1682_v43  ;;  %v1774_v43 = vld [vmem:[%s1894_s28 + $0x12c] ss:$16 sps:$4 sm:$0xff]  }
  0x43   : > { %1122 = vmatpush1.bf16.msra.mxu1 %v1683_v44  ;;  %1082 = vmatprep.subr.bf16.mxu0 %v1684_v45  ;;  %v1777_v44 = vld [vmem:[%s1894_s28 + $0x32c] ss:$16 sps:$4 sm:$0xff]   ;;  %v1772_v45 = vld [vmem:[%s1894_s28 + $0x128] ss:$16 sps:$4 sm:$0xff]  }
  0x44   : > { %1123 = vmatprep.subr.bf16.mxu1 %v1686_v46  ;;  %v1775_v46 = vld [vmem:[%s1894_s28 + $0x328] ss:$16 sps:$4 sm:$0xff]  }
  0x46   : > { %1083 = vmatpush1.bf16.msra.mxu0 %v1688_v50  ;;  %v1781_v50 = vld [vmem:[%s1894_s28 + $0x348] ss:$16 sps:$4 sm:$0xff]  }
  0x47   : > { %1124 = vmatpush1.bf16.msra.mxu1 %v1689_v51  ;;  %1084 = vmatprep.subr.bf16.mxu0 %v1690_v53  ;;  %v1786_v51 = vld [vmem:[%s1894_s28 + $0x16c] ss:$16 sps:$4 sm:$0xff]   ;;  %v1784_v53 = vld [vmem:[%s1894_s28 + $0x168] ss:$16 sps:$4 sm:$0xff]  }
  0x48   : > { %1125 = vmatprep.subr.bf16.mxu1 %v1692_v54  ;;  %v1787_v54 = vld [vmem:[%s1894_s28 + $0x368] ss:$16 sps:$4 sm:$0xff]  }
  0x4a   : > { %1085 = vmatpush1.bf16.msra.mxu0 %v1694_v55  ;;  %v1792_v55 = vld [vmem:[%s1894_s28 + $0x18c] ss:$16 sps:$4 sm:$0xff]  }
  0x4b   : > { %1126 = vmatpush1.bf16.msra.mxu1 %v1695_v56  ;;  %1086 = vmatprep.subr.bf16.mxu0 %v1696_v57  ;;  %v1795_v56 = vld [vmem:[%s1894_s28 + $0x38c] ss:$16 sps:$4 sm:$0xff]   ;;  %v1790_v57 = vld [vmem:[%s1894_s28 + $0x188] ss:$16 sps:$4 sm:$0xff]  }
  0x4c   : > { %1127 = vmatprep.subr.bf16.mxu1 %v1698_v58  ;;  %v1793_v58 = vld [vmem:[%s1894_s28 + $0x388] ss:$16 sps:$4 sm:$0xff]  }
  0x4e   : > { %1087 = vmatpush1.bf16.msra.mxu0 %v1700_v59  ;;  %v1798_v59 = vld [vmem:[%s1894_s28 + $0x1ac] ss:$16 sps:$4 sm:$0xff]  }
  0x4f   : > { %1128 = vmatpush1.bf16.msra.mxu1 %v1701_v60  ;;  %1088 = vmatprep.subr.bf16.mxu0 %v1702_v61  ;;  %v1801_v60 = vld [vmem:[%s1894_s28 + $0x3ac] ss:$16 sps:$4 sm:$0xff]   ;;  %v1796_v61 = vld [vmem:[%s1894_s28 + $0x1a8] ss:$16 sps:$4 sm:$0xff]  }
  0x50   : > { %1129 = vmatprep.subr.bf16.mxu1 %v1704_v62  ;;  %v1799_v62 = vld [vmem:[%s1894_s28 + $0x3a8] ss:$16 sps:$4 sm:$0xff]  }
  0x52   : > { %1089 = vmatpush1.bf16.msra.mxu0 %v1706_v63  ;;  %v1804_v63 = vld [vmem:[%s1894_s28 + $0x1cc] ss:$16 sps:$4 sm:$0xff]  }
  0x53   : > { %1130 = vmatpush1.bf16.msra.mxu1 %v1707_v0  ;;  %1090 = vmatprep.subr.bf16.mxu0 %v1708_v1  ;;  %v1807_v0 = vld [vmem:[%s1894_s28 + $0x3cc] ss:$16 sps:$4 sm:$0xff]   ;;  %v1802_v1 = vld [vmem:[%s1894_s28 + $0x1c8] ss:$16 sps:$4 sm:$0xff]  }
  0x54   : > { %1131 = vmatprep.subr.bf16.mxu1 %v1710_v2  ;;  %v1805_v2 = vld [vmem:[%s1894_s28 + $0x3c8] ss:$16 sps:$4 sm:$0xff]  }
  0x56   : > { %1091 = vmatpush1.bf16.msra.mxu0 %v1712_v3  ;;  %v1810_v3 = vld [vmem:[%s1894_s28 + $0x1ec] ss:$16 sps:$4 sm:$0xff]  }
  0x57   : > { %1132 = vmatpush1.bf16.msra.mxu1 %v1713_v4  ;;  %1142 = vmatprep.subr.bf16.mxu0 %v1720_v5  ;;  %v1813_v4 = vld [vmem:[%s1894_s28 + $0x3ec] ss:$16 sps:$4 sm:$0xff]   ;;  %v1808_v5 = vld [vmem:[%s1894_s28 + $0x1e8] ss:$16 sps:$4 sm:$0xff]  }
  0x58   : > { %1183 = vmatprep.subr.bf16.mxu1 %v1723_v6  ;;  %v1811_v6 = vld [vmem:[%s1894_s28 + $0x3e8] ss:$16 sps:$4 sm:$0xff]  }
  0x59   : > { %1093 = vmatmul.mubr.bf16.vlgmr.msra.gmra.mrb[0].mxu0 %v1968_v7 }
  0x5a   : > { %1134 = vmatmul.mubr.bf16.vlgmr.msra.gmra.mrb[0].mxu1 %v1970_v8  ;;  %1143 = vmatpush1.bf16.msra.mxu0 %v1718_v9 }
  0x5b   : > { %1184 = vmatpush1.bf16.msra.mxu1 %v1721_v10  ;;  %1144 = vmatprep.subr.bf16.mxu0 %v1726_v11  ;;  %v272_v10 = vld [vmem:[#allocation2] sm:$0xff] }
  0x5c   : > { %1185 = vmatprep.subr.bf16.mxu1 %v1729_v12  ;;  %1174 = vmatprep.mubr.bf16.mxu0 %v1944_v48  ;;  %v1783_v48 = vld [vmem:[%s1894_s28 + $0x34c] ss:$16 sps:$4 sm:$0xff]  }
  0x5d   : > { %1215 = vmatprep.mubr.bf16.mxu1 %v1458_v52  ;;  %v1789_v52 = vld [vmem:[%s1894_s28 + $0x36c] ss:$16 sps:$4 sm:$0xff]  }
  0x5e   : > { %1145 = vmatpush1.bf16.msra.mxu0 %v1724_v13 }
  0x5f   : > { %1186 = vmatpush1.bf16.msra.mxu1 %v1727_v14  ;;  %1146 = vmatprep.subr.bf16.mxu0 %v1732_v15  ;;  %v273_v14 = vld [vmem:[#allocation2 + $0x8] sm:$0xff] }
  0x60   : > { %1187 = vmatprep.subr.bf16.mxu1 %v1735_v16 }
  0x62   : > { %1147 = vmatpush1.bf16.msra.mxu0 %v1730_v17 }
  0x63   : > { %1188 = vmatpush1.bf16.msra.mxu1 %v1733_v18  ;;  %1148 = vmatprep.subr.bf16.mxu0 %v1738_v19 }
  0x64   : > { %1189 = vmatprep.subr.bf16.mxu1 %v1741_v20 }
  0x66   : > { %1149 = vmatpush1.bf16.msra.mxu0 %v1736_v21 }
  0x67   : > { %1190 = vmatpush1.bf16.msra.mxu1 %v1739_v22  ;;  %1150 = vmatprep.subr.bf16.mxu0 %v1744_v23 }
  0x68   : > { %1191 = vmatprep.subr.bf16.mxu1 %v1747_v24 }
  0x6a   : > { %1151 = vmatpush1.bf16.msra.mxu0 %v1742_v25 }
  0x6b   : > { %1192 = vmatpush1.bf16.msra.mxu1 %v1745_v26  ;;  %1152 = vmatprep.subr.bf16.mxu0 %v1750_v27  ;;  %v275_v26 = vld [vmem:[#allocation2 + $0x18] sm:$0xff] }
  0x6c   : > { %1193 = vmatprep.subr.bf16.mxu1 %v1753_v28 }
  0x6e   : > { %1153 = vmatpush1.bf16.msra.mxu0 %v1748_v29 }
  0x6f   : > { %1194 = vmatpush1.bf16.msra.mxu1 %v1751_v30  ;;  %1154 = vmatprep.subr.bf16.mxu0 %v1756_v31 }
  0x70   : > { %1195 = vmatprep.subr.bf16.mxu1 %v1759_v32 }
  0x72   : > { %1155 = vmatpush1.bf16.msra.mxu0 %v1754_v33 }
  0x73   : > { %1196 = vmatpush1.bf16.msra.mxu1 %v1757_v34  ;;  %1156 = vmatprep.subr.bf16.mxu0 %v1762_v35  ;;  %v1242_v35 = vlaneseq (!%p1587_p7) }
  0x74   : > { %1197 = vmatprep.subr.bf16.mxu1 %v1765_v36 }
  0x75   : > { %v1243_v36 = vshrl.u32 (!%p1587_p7), %v1242_v35, 7 }
  0x76   : > { %1157 = vmatpush1.bf16.msra.mxu0 %v1760_v37  ;;  %v1240_v37 = vld [vmem:[%s2082_s2] sm:$0xf] (!%p1587_p7) }
  0x77   : > { %1198 = vmatpush1.bf16.msra.mxu1 %v1763_v38  ;;  %1158 = vmatprep.subr.bf16.mxu0 %v1768_v39  ;;  %v1244_v39 = vsub.s32 (!%p1587_p7), 0, %v1243_v36 }
  0x78   : > { %1199 = vmatprep.subr.bf16.mxu1 %v1771_v40  ;;  %v1248_v40 = vsub.s32 (!%p1587_p7), 1, %v1243_v36 }
  0x7a   : > { %1159 = vmatpush1.bf16.msra.mxu0 %v1766_v41  ;;  %v1252_v41 = vsub.s32 (!%p1587_p7), 2, %v1243_v36 }
  0x7b   : > { %1200 = vmatpush1.bf16.msra.mxu1 %v1769_v42  ;;  %1160 = vmatprep.subr.bf16.mxu0 %v1774_v43  ;;  %v1256_v42 = vsub.s32 (!%p1587_p7), 3, %v1243_v36 }
  0x7c   : > { %1201 = vmatprep.subr.bf16.mxu1 %v1777_v44 }
  0x7e   : > { %1161 = vmatpush1.bf16.msra.mxu0 %v1772_v45 }
  0x7f   : > { %1202 = vmatpush1.bf16.msra.mxu1 %v1775_v46  ;;  %1162 = vmatprep.subr.bf16.mxu0 %v1780_v47  ;;  %v1245_v46 = vrot.slane (!%p1587_p7), %v1240_v37, %v1244_v39  ;;  %v1249_v47 = vrot.slane (!%p1587_p7), %v1240_v37, %v1248_v40 }
  0x80   : > { %1203 = vmatprep.subr.bf16.mxu1 %v1783_v48  ;;  %v1253_v48 = vrot.slane (!%p1587_p7), %v1240_v37, %v1252_v41 }
  0x82   : > { %1163 = vmatpush1.bf16.msra.mxu0 %v1778_v49  ;;  %v1257_v49 = vrot.slane (!%p1587_p7), %v1240_v37, %v1256_v42 }
  0x83   : > { %1204 = vmatpush1.bf16.msra.mxu1 %v1781_v50  ;;  %1164 = vmatprep.subr.bf16.mxu0 %v1786_v51 }
  0x84   : > { %1205 = vmatprep.subr.bf16.mxu1 %v1789_v52 }
  0x86   : > { %1165 = vmatpush1.bf16.msra.mxu0 %v1784_v53 }
  0x87   : > { %1206 = vmatpush1.bf16.msra.mxu1 %v1787_v54  ;;  %1166 = vmatprep.subr.bf16.mxu0 %v1792_v55 }
  0x88   : > { %1207 = vmatprep.subr.bf16.mxu1 %v1795_v56 }
  0x8a   : > { %1167 = vmatpush1.bf16.msra.mxu0 %v1790_v57 }
  0x8b   : > { %1208 = vmatpush1.bf16.msra.mxu1 %v1793_v58  ;;  %1168 = vmatprep.subr.bf16.mxu0 %v1798_v59 }
  0x8c   : > { %1209 = vmatprep.subr.bf16.mxu1 %v1801_v60 }
  0x8e   : > { %1169 = vmatpush1.bf16.msra.mxu0 %v1796_v61 }
  0x8f   : > { %1210 = vmatpush1.bf16.msra.mxu1 %v1799_v62  ;;  %1170 = vmatprep.subr.bf16.mxu0 %v1804_v63 }
  0x90   : > { %1211 = vmatprep.subr.bf16.mxu1 %v1807_v0 }
  0x92   : > { %1171 = vmatpush1.bf16.msra.mxu0 %v1802_v1 }
  0x93   : > { %1212 = vmatpush1.bf16.msra.mxu1 %v1805_v2  ;;  %1172 = vmatprep.subr.bf16.mxu0 %v1810_v3 }
  0x94   : > { %1213 = vmatprep.subr.bf16.mxu1 %v1813_v4 }
  0x96   : > { %1173 = vmatpush1.bf16.msra.mxu0 %v1808_v5 }
  0x97   : > { %1214 = vmatpush1.bf16.msra.mxu1 %v1811_v6 }
  0x99   : > { %1175 = vmatmul.mubr.bf16.vlgmr.msra.gmra.mrb[4].mxu0 %v1968_v7  ;;  %v274_v7 = vld [vmem:[#allocation2 + $0x10] sm:$0xff] }
  0x9a   : > { %1216 = vmatmul.mubr.bf16.vlgmr.msra.gmra.mrb[4].mxu1 %v1970_v8 }
 0x12c   : > { %v1094_v9 = vpop.f32.mrb[0].mxu0 }
 0x12d   : > { %v1135_v11 = vpop.f32.mrb[0].mxu1  ;;  %v1096_v13 = vpop.f32.mrb[1].mxu0 }
 0x12e   : > { %v1136_v12 = vadd.f32 %v1135_v11, %v1094_v9  ;;  %v1137_v15 = vpop.f32.mrb[1].mxu1  ;;  %v1098_v17 = vpop.f32.mrb[2].mxu0 }
 0x12f   : > { %v1138_v16 = vadd.f32 %v1137_v15, %v1096_v13  ;;  %v1139_v18 = vpop.f32.mrb[2].mxu1  ;;  %v1099_v20 = vpop.f32.mrb[3].mxu0 }
 0x130   : > { %v1224_v19 = vadd.f32 %v1136_v12, %v272_v10  ;;  %v1140_v21 = vpop.f32.mrb[3].mxu1 }
 0x131   : > { %v1225_v22 = vadd.f32 %v1138_v16, %v273_v14 }
 0x132   : > { %1228 = vst [vmem:[#allocation2] sm:$0xff] %v1224_v19 }
 0x133   : > { %1229 = vst [vmem:[#allocation2 + $0x8] sm:$0xff] %v1225_v22 }
 0x139   : > { %v1236_v38 = vld [vmem:[#allocation2] sm:$0xff] (!%p1587_p7) }
 0x13a   : > { %v1237_v43 = vld [vmem:[#allocation2 + $0x8] sm:$0xff] (!%p1587_p7)  ;;  %v1262_v50 = vadd.f32 (!%p1587_p7), %v1245_v46, %v1236_v38 }
 0x13b   : > { %v1263_v51 = vadd.f32 (!%p1587_p7), %v1249_v47, %v1237_v43 }
 0x13c   : > { %1266 = vst [vmem:[%s2083_s3] sm:$0xff] (!%p1587_p7), %v1262_v50  ;;  %v1270_v54 = vrot.slane (!%p1587_p7), %v1262_v50, 4  ;;  %v1294_v55 = vmul.f32 (!%p1587_p7), %v1262_v50, %v1262_v50 }
 0x13d   : > { %1267 = vst [vmem:[%s2083_s3 + $0x8] sm:$0xff] (!%p1587_p7), %v1263_v51  ;;  %v1276_v56 = vrot.slane (!%p1587_p7), %v1263_v51, 4  ;;  %v1295_v57 = vmul.f32 (!%p1587_p7), %v1263_v51, %v1263_v51 }
 0x13e   : > { %v1271_v62 = vadd.f32 (!%p1587_p7), %v1270_v54, %v1262_v50  ;;  %v1298_v63 = vrot.slane (!%p1587_p7), %v1294_v55, 4 }
 0x13f   : > { %v1277_v0 = vadd.f32 (!%p1587_p7), %v1276_v56, %v1263_v51  ;;  %v1304_v1 = vrot.slane (!%p1587_p7), %v1295_v57, 4 }
 0x140   : > { %v1272_v6 = vrot.slane (!%p1587_p7), %v1271_v62, 2  ;;  %v1299_v9 = vadd.f32 (!%p1587_p7), %v1298_v63, %v1294_v55 }
 0x141   : > { %v1278_v10 = vrot.slane (!%p1587_p7), %v1277_v0, 2  ;;  %v1305_v11 = vadd.f32 (!%p1587_p7), %v1304_v1, %v1295_v57 }
 0x142   : > { %v1273_v16 = vadd.f32 (!%p1587_p7), %v1272_v6, %v1271_v62  ;;  %v1300_v17 = vrot.slane (!%p1587_p7), %v1299_v9, 2 }
 0x143   : > { %v1279_v18 = vadd.f32 (!%p1587_p7), %v1278_v10, %v1277_v0  ;;  %v1306_v19 = vrot.slane (!%p1587_p7), %v1305_v11, 2 }
 0x16c   : > { %v1176_v23 = vpop.f32.mrb[4].mxu0 }
 0x16d   : > { %v1217_v24 = vpop.f32.mrb[4].mxu1  ;;  %v1178_v25 = vpop.f32.mrb[5].mxu0  ;;  %1235 = sbr.rel (%p1587_p7) target bundleno = 398 (0x18e), region = 40 }
 0x16e   : > { %v1218_v8 = vadd.f32 %v1217_v24, %v1176_v23  ;;  %v1219_v27 = vpop.f32.mrb[5].mxu1  ;;  %v1180_v29 = vpop.f32.mrb[6].mxu0  ;;  %v1301_v24 = vadd.f32 (!%p1587_p7), %v1300_v17, %v1299_v9 }
 0x16f   : > { %v1220_v28 = vadd.f32 %v1219_v27, %v1178_v25  ;;  %v1221_v30 = vpop.f32.mrb[6].mxu1  ;;  %v1181_v32 = vpop.f32.mrb[7].mxu0  ;;  %v1307_v25 = vadd.f32 (!%p1587_p7), %v1306_v19, %v1305_v11 }
 0x170   : > { %v1226_v31 = vadd.f32 %v1218_v8, %v274_v7  ;;  %v1222_v33 = vpop.f32.mrb[7].mxu1  ;;  %v1274_v7 = vrot.slane (!%p1587_p7), %v1273_v16, 1  ;;  %v1280_v8 = vrot.slane (!%p1587_p7), %v1279_v18, 1 }
 0x171   : > { %v1227_v34 = vadd.f32 %v1220_v28, %v275_v26  ;;  %v1308_v33 = vrot.slane (!%p1587_p7), %v1307_v25, 1 }
 0x172   : > { %1230 = vst [vmem:[#allocation2 + $0x10] sm:$0xff] %v1226_v31  ;;  %v1275_v30 = vadd.f32 (!%p1587_p7), %v1274_v7, %v1273_v16  ;;  %v1302_v31 = vrot.slane (!%p1587_p7), %v1301_v24, 1  ;;  %v1281_v32 = vadd.f32 (!%p1587_p7), %v1280_v8, %v1279_v18 }
 0x173   : > { %1231 = vst [vmem:[#allocation2 + $0x18] sm:$0xff] %v1227_v34  ;;  %v1309_v39 = vadd.f32 (!%p1587_p7), %v1308_v33, %v1307_v25 }
 0x174   : > { %v1303_v38 = vadd.f32 %v1302_v31, %v1301_v24 }
 0x175   : > { %v1324_v43 = vsel %vm1322_vm0, %v1281_v32, %v1309_v39 }
 0x176   : > { %v1323_v42 = vsel %vm1322_vm0, %v1275_v30, %v1303_v38 }
 0x179   : > { %v1238_v44 = vld [vmem:[#allocation2 + $0x10] sm:$0xff] }
 0x17a   : > { %v1239_v45 = vld [vmem:[#allocation2 + $0x18] sm:$0xff]  ;;  %v1264_v52 = vadd.f32 %v1253_v48, %v1238_v44  ;;  %v1328_v44 = vsel %vm1327_vm1, %v1323_v42, 0.0 }
 0x17b   : > { %v1265_v53 = vadd.f32 %v1257_v49, %v1239_v45  ;;  %v1329_v45 = vsel %vm1327_vm1, %v1324_v43, 0.0  ;;  %1332 = vst [vmem:[%s2084_s4] sm:$0xff] %v1328_v44 }
 0x17c   : > { %1268 = vst [vmem:[%s2083_s3 + $0x10] sm:$0xff] %v1264_v52  ;;  %v1282_v58 = vrot.slane %v1264_v52, 4  ;;  %v1296_v59 = vmul.f32 %v1264_v52, %v1264_v52  ;;  %1333 = vst [vmem:[%s2084_s4 + $0x8] sm:$0xff] %v1329_v45 }
 0x17d   : > { %1269 = vst [vmem:[%s2083_s3 + $0x18] sm:$0xff] %v1265_v53  ;;  %v1288_v60 = vrot.slane %v1265_v53, 4  ;;  %v1297_v61 = vmul.f32 %v1265_v53, %v1265_v53 }
 0x17e   : > { %v1283_v2 = vadd.f32 %v1282_v58, %v1264_v52  ;;  %v1310_v3 = vrot.slane %v1296_v59, 4 }
 0x17f   : > { %v1289_v4 = vadd.f32 %v1288_v60, %v1265_v53  ;;  %v1316_v5 = vrot.slane %v1297_v61, 4 }
 0x180   : > { %v1284_v12 = vrot.slane %v1283_v2, 2  ;;  %v1311_v13 = vadd.f32 %v1310_v3, %v1296_v59 }
 0x181   : > { %v1290_v14 = vrot.slane %v1289_v4, 2  ;;  %v1317_v15 = vadd.f32 %v1316_v5, %v1297_v61 }
 0x182   : > { %v1285_v20 = vadd.f32 %v1284_v12, %v1283_v2  ;;  %v1312_v21 = vrot.slane %v1311_v13, 2 }
 0x183   : > { %v1291_v22 = vadd.f32 %v1290_v14, %v1289_v4  ;;  %v1318_v23 = vrot.slane %v1317_v15, 2 }
 0x184   : > { %v1286_v26 = vrot.slane %v1285_v20, 1  ;;  %v1313_v27 = vadd.f32 %v1312_v21, %v1311_v13 }
 0x185   : > { %v1292_v28 = vrot.slane %v1291_v22, 1  ;;  %v1319_v29 = vadd.f32 %v1318_v23, %v1317_v15 }
 0x186   : > { %v1287_v34 = vadd.f32 %v1286_v26, %v1285_v20  ;;  %v1314_v35 = vrot.slane %v1313_v27, 1 }
 0x187   : > { %v1293_v36 = vadd.f32 %v1292_v28, %v1291_v22  ;;  %v1320_v37 = vrot.slane %v1319_v29, 1 }
 0x188   : > { %v1315_v40 = vadd.f32 %v1314_v35, %v1313_v27 }
 0x189   : > { %v1321_v41 = vadd.f32 %v1320_v37, %v1319_v29 }
 0x18a   : > { %v1325_v46 = vsel %vm1322_vm0, %v1287_v34, %v1315_v40 }
 0x18b   : > { %v1326_v47 = vsel %vm1322_vm0, %v1293_v36, %v1321_v41  ;;  %v1330_v48 = vsel %vm1327_vm1, %v1325_v46, 0.0 }
 0x18c   : > { %v1331_v49 = vsel %vm1327_vm1, %v1326_v47, 0.0  ;;  %1334 = vst [vmem:[%s2084_s4 + $0x10] sm:$0xff] %v1330_v48 }
 0x18d   : > { %1335 = vst [vmem:[%s2084_s4 + $0x18] sm:$0xff] %v1331_v49 }
 0x18e PF: > { %s15_s17 = sadd.s32 1, %s1836_s17   ;;  %s2085_s15 = smov %s1832_s16 }
 0x18f   : > { %p12_p8 = scmp.ge.s32.totalorder %s15_s17, 11   ;;  %s2086_s16 = smov %s2088_s18 }
 0x191   :  { %14 = sbr.rel (!%p12_p8) target bundleno = 2 (0x2), region = 85 }

// kernel: deep_koalarization_norm_forward.44
= control target key start
LH: loop header
LB: loop body
LE: loop exit
PB: predicated region body
PF: predicated region fallthrough
CT: control target
= control target key end

     0   :  { %s1182_s15 = smov 0   ;;  %s1184_s16 = smov 0   ;;  %s1306_s0 = inlined_call_operand.vmem [shape: bf16[8,4608], index: 0, kind: input, shape index: {}]   ;;  %s1307_s1 = inlined_call_operand.vmem [shape: bf16[4608,256], index: 1, kind: input, shape index: {}]   ;;  %s1308_s2 = inlined_call_operand.vmem [shape: f32[1,256], index: 2, kind: input, shape index: {}]   ;;  %s1309_s3 = inlined_call_operand.vmem [shape: f32[8,256], index: 3, kind: output, shape index: {0}]   ;;  %s1310_s4 = inlined_call_operand.vmem [shape: f32[8,256], index: 4, kind: output, shape index: {1}]  }
   0x1   :  { %s1186_s17 = smov 0  }
   0x2 LB: > { %s24_s18 = sadd.s32 1, %s1150_s16  ;;  %p926_p0 = scmp.ge.s32.totalorder %s1154_s17, 1  ;;  %s1154_s17 = sphi %s1186_s17, %s15_s17   ;;  %s1150_s16 = sphi %s1184_s16, %s1312_s16   ;;  %s1146_s15 = sphi %s1182_s15, %s1311_s15  }
   0x3   : > { %p25_p1 = scmp.ge.s32.totalorder %s24_s18, 9  ;;  %p196_p2 = scmp.lt.s32.totalorder %s1154_s17, 10 }
   0x5   : > { %s1314_s18 = smov (%p25_p1, %s24_s18), 0  ;;  %p197_p3 = pnand %p926_p0, %p196_p2 }
   0x6   : > { %s927_s19 = sshll.u32 (!%p197_p3), %s1146_s15, 2  ;;  %s929_s20 = sshll.u32 (!%p197_p3), %s1146_s15, 6 }
   0x7   : > { %200 = sbr.rel (%p197_p3) target bundleno = 334 (0x14e), region = 32  ;;  %p240_p4 = scmp.lt.s32.totalorder (!%p197_p3), %s927_s19, 35 }
   0x8   : > { %p248_p5 = scmp.lt.s32.totalorder (!%p197_p3), %s929_s20, 575  ;;  %p932_p6 = scmp.ne.s32.totalorder (!%p197_p3), %s1146_s15, 0 }
   0xe   : > { %s1316_s19 = smov (!%p240_p4, %s927_s19), 35  ;;  %s1318_s20 = smov (!%p248_p5, %s929_s20), 575 }
   0xf   : > { %s928_s21 = sshll.u32 %s1316_s19, 2  ;;  %s1006_s25 = sshll.u32 %s1318_s20, 3  ;;  %v1156_v0 = vmov (!%p932_p6), 0.0  }
  0x10   : > { %s1207_s24 = scalar_lea.vmem %s1306_s0, %s928_s21  ;;  %s1212_s28 = scalar_lea.vmem %s1307_s1, %s1006_s25  ;;  %268 = vst [vmem:[#allocation2] sm:$0xff] (!%p932_p6), %v1156_v0  ;;  %269 = vst [vmem:[#allocation2 + $0x8] sm:$0xff] (!%p932_p6), %v1156_v0 }
  0x11   : > { %267 = sbr.rel (%p932_p6) target bundleno = 24 (0x18), region = 36 }
  0x18 PF: > { %v1032_v1 = vld [vmem:[%s1212_s28 + $0x4] ss:$8 sps:$4 sm:$0xff]   ;;  %v1036_v3 = vld [vmem:[%s1212_s28] ss:$8 sps:$4 sm:$0xff]   ;;  %v1038_v5 = vld [vmem:[%s1212_s28 + $0x14] ss:$8 sps:$4 sm:$0xff]  }
  0x19   : > { %v1034_v2 = vld [vmem:[%s1212_s28 + $0x104] ss:$8 sps:$4 sm:$0xff]   ;;  %672 = vmatprep.subr.bf16.mxu0 %v1032_v1  ;;  %v1037_v4 = vld [vmem:[%s1212_s28 + $0x100] ss:$8 sps:$4 sm:$0xff]   ;;  %v1040_v6 = vld [vmem:[%s1212_s28 + $0x114] ss:$8 sps:$4 sm:$0xff]  }
  0x1a   : > { %713 = vmatprep.subr.bf16.mxu1 %v1034_v2  ;;  %673 = vmatpush1.bf16.msra.mxu0 %v1036_v3  ;;  %v1042_v7 = vld [vmem:[%s1212_s28 + $0x10] ss:$8 sps:$4 sm:$0xff]   ;;  %v1044_v9 = vld [vmem:[%s1212_s28 + $0x24] ss:$8 sps:$4 sm:$0xff]   ;;  %v1048_v11 = vld [vmem:[%s1212_s28 + $0x20] ss:$8 sps:$4 sm:$0xff]  }
  0x1b   : > { %714 = vmatpush1.bf16.msra.mxu1 %v1037_v4  ;;  %674 = vmatprep.subr.bf16.mxu0 %v1038_v5  ;;  %v1043_v8 = vld [vmem:[%s1212_s28 + $0x110] ss:$8 sps:$4 sm:$0xff]   ;;  %v1046_v10 = vld [vmem:[%s1212_s28 + $0x124] ss:$8 sps:$4 sm:$0xff]   ;;  %v1049_v12 = vld [vmem:[%s1212_s28 + $0x120] ss:$8 sps:$4 sm:$0xff]  }
  0x1c   : > { %715 = vmatprep.subr.bf16.mxu1 %v1040_v6  ;;  %v1050_v13 = vld [vmem:[%s1212_s28 + $0x34] ss:$8 sps:$4 sm:$0xff]   ;;  %v1054_v15 = vld [vmem:[%s1212_s28 + $0x30] ss:$8 sps:$4 sm:$0xff]   ;;  %v1056_v17 = vld [vmem:[%s1212_s28 + $0x44] ss:$8 sps:$4 sm:$0xff]  }
  0x1d   : > { %v1052_v14 = vld [vmem:[%s1212_s28 + $0x134] ss:$8 sps:$4 sm:$0xff]   ;;  %v1055_v16 = vld [vmem:[%s1212_s28 + $0x130] ss:$8 sps:$4 sm:$0xff]   ;;  %v1058_v18 = vld [vmem:[%s1212_s28 + $0x144] ss:$8 sps:$4 sm:$0xff]  }
  0x1e   : > { %675 = vmatpush1.bf16.msra.mxu0 %v1042_v7  ;;  %v1060_v19 = vld [vmem:[%s1212_s28 + $0x40] ss:$8 sps:$4 sm:$0xff]   ;;  %v1062_v21 = vld [vmem:[%s1212_s28 + $0x54] ss:$8 sps:$4 sm:$0xff]   ;;  %v1066_v23 = vld [vmem:[%s1212_s28 + $0x50] ss:$8 sps:$4 sm:$0xff]  }
  0x1f   : > { %716 = vmatpush1.bf16.msra.mxu1 %v1043_v8  ;;  %676 = vmatprep.subr.bf16.mxu0 %v1044_v9  ;;  %v1061_v20 = vld [vmem:[%s1212_s28 + $0x140] ss:$8 sps:$4 sm:$0xff]   ;;  %v1064_v22 = vld [vmem:[%s1212_s28 + $0x154] ss:$8 sps:$4 sm:$0xff]   ;;  %v1067_v24 = vld [vmem:[%s1212_s28 + $0x150] ss:$8 sps:$4 sm:$0xff]  }
  0x20   : > { %717 = vmatprep.subr.bf16.mxu1 %v1046_v10  ;;  %v1068_v25 = vld [vmem:[%s1212_s28 + $0x64] ss:$8 sps:$4 sm:$0xff]   ;;  %v1072_v27 = vld [vmem:[%s1212_s28 + $0x60] ss:$8 sps:$4 sm:$0xff]   ;;  %v1074_v29 = vld [vmem:[%s1212_s28 + $0x74] ss:$8 sps:$4 sm:$0xff]  }
  0x21   : > { %v1070_v26 = vld [vmem:[%s1212_s28 + $0x164] ss:$8 sps:$4 sm:$0xff]   ;;  %v1073_v28 = vld [vmem:[%s1212_s28 + $0x160] ss:$8 sps:$4 sm:$0xff]   ;;  %v1076_v30 = vld [vmem:[%s1212_s28 + $0x174] ss:$8 sps:$4 sm:$0xff]  }
  0x22   : > { %677 = vmatpush1.bf16.msra.mxu0 %v1048_v11  ;;  %v1078_v31 = vld [vmem:[%s1212_s28 + $0x70] ss:$8 sps:$4 sm:$0xff]   ;;  %v1080_v33 = vld [vmem:[%s1212_s28 + $0x84] ss:$8 sps:$4 sm:$0xff]   ;;  %v1084_v35 = vld [vmem:[%s1212_s28 + $0x80] ss:$8 sps:$4 sm:$0xff]  }
  0x23   : > { %718 = vmatpush1.bf16.msra.mxu1 %v1049_v12  ;;  %678 = vmatprep.subr.bf16.mxu0 %v1050_v13  ;;  %v1079_v32 = vld [vmem:[%s1212_s28 + $0x170] ss:$8 sps:$4 sm:$0xff]   ;;  %v1082_v34 = vld [vmem:[%s1212_s28 + $0x184] ss:$8 sps:$4 sm:$0xff]   ;;  %v1085_v36 = vld [vmem:[%s1212_s28 + $0x180] ss:$8 sps:$4 sm:$0xff]  }
  0x24   : > { %719 = vmatprep.subr.bf16.mxu1 %v1052_v14  ;;  %v1086_v37 = vld [vmem:[%s1212_s28 + $0x94] ss:$8 sps:$4 sm:$0xff]   ;;  %v1090_v39 = vld [vmem:[%s1212_s28 + $0x90] ss:$8 sps:$4 sm:$0xff]   ;;  %v1092_v41 = vld [vmem:[%s1212_s28 + $0xa4] ss:$8 sps:$4 sm:$0xff]  }
  0x25   : > { %v1088_v38 = vld [vmem:[%s1212_s28 + $0x194] ss:$8 sps:$4 sm:$0xff]   ;;  %v1091_v40 = vld [vmem:[%s1212_s28 + $0x190] ss:$8 sps:$4 sm:$0xff]   ;;  %v1094_v42 = vld [vmem:[%s1212_s28 + $0x1a4] ss:$8 sps:$4 sm:$0xff]  }
  0x26   : > { %679 = vmatpush1.bf16.msra.mxu0 %v1054_v15  ;;  %v1096_v43 = vld [vmem:[%s1212_s28 + $0xa0] ss:$8 sps:$4 sm:$0xff]   ;;  %v1098_v45 = vld [vmem:[%s1212_s28 + $0xb4] ss:$8 sps:$4 sm:$0xff]   ;;  %v1102_v50 = vld [vmem:[%s1212_s28 + $0xb0] ss:$8 sps:$4 sm:$0xff]  }
  0x27   : > { %720 = vmatpush1.bf16.msra.mxu1 %v1055_v16  ;;  %680 = vmatprep.subr.bf16.mxu0 %v1056_v17  ;;  %v1097_v44 = vld [vmem:[%s1212_s28 + $0x1a0] ss:$8 sps:$4 sm:$0xff]   ;;  %v1100_v46 = vld [vmem:[%s1212_s28 + $0x1b4] ss:$8 sps:$4 sm:$0xff]   ;;  %v1103_v51 = vld [vmem:[%s1212_s28 + $0x1b0] ss:$8 sps:$4 sm:$0xff]  }
  0x28   : > { %721 = vmatprep.subr.bf16.mxu1 %v1058_v18  ;;  %v272_v47 = vld [vmem:[%s1207_s24] sm:$0xff]  ;;  %v273_v49 = vld [vmem:[%s1207_s24 + $0x8] sm:$0xff]  ;;  %v1110_v57 = vld [vmem:[%s1212_s28 + $0xd4] ss:$8 sps:$4 sm:$0xff]   ;;  %p1001_p7 = scmp.ne.s32.totalorder %s1146_s15, 8 }
  0x29   : > { %v934_v48 = vcombine.high %v272_v47, %v272_v47  ;;  %v936_v52 = vcombine.high %v273_v49, %v273_v49  ;;  %v1104_v53 = vld [vmem:[%s1212_s28 + $0xc4] ss:$8 sps:$4 sm:$0xff]   ;;  %v1108_v55 = vld [vmem:[%s1212_s28 + $0xc0] ss:$8 sps:$4 sm:$0xff]   ;;  %v1112_v58 = vld [vmem:[%s1212_s28 + $0x1d4] ss:$8 sps:$4 sm:$0xff]   ;;  %v933_v5 = vcombine.low %v272_v47, %v272_v47  ;;  %v935_v6 = vcombine.low %v273_v49, %v273_v49 }
  0x2a   : > { %681 = vmatpush1.bf16.msra.mxu0 %v1060_v19  ;;  %v1106_v54 = vld [vmem:[%s1212_s28 + $0x1c4] ss:$8 sps:$4 sm:$0xff]   ;;  %v1109_v56 = vld [vmem:[%s1212_s28 + $0x1c0] ss:$8 sps:$4 sm:$0xff]   ;;  %v1114_v59 = vld [vmem:[%s1212_s28 + $0xd0] ss:$8 sps:$4 sm:$0xff]  }
  0x2b   : > { %722 = vmatpush1.bf16.msra.mxu1 %v1061_v20  ;;  %682 = vmatprep.subr.bf16.mxu0 %v1062_v21  ;;  %v1115_v60 = vld [vmem:[%s1212_s28 + $0x1d0] ss:$8 sps:$4 sm:$0xff]   ;;  %v1116_v61 = vld [vmem:[%s1212_s28 + $0xe4] ss:$8 sps:$4 sm:$0xff]   ;;  %v1120_v63 = vld [vmem:[%s1212_s28 + $0xe0] ss:$8 sps:$4 sm:$0xff]   ;;  %v766_v21 = vlaneseq (!%p1001_p7) }
  0x2c   : > { %723 = vmatprep.subr.bf16.mxu1 %v1064_v22  ;;  %704 = vmatprep.mubr.bf16.mxu0 %v934_v48  ;;  %v1118_v62 = vld [vmem:[%s1212_s28 + $0x1e4] ss:$8 sps:$4 sm:$0xff]   ;;  %v1121_v0 = vld [vmem:[%s1212_s28 + $0x1e0] ss:$8 sps:$4 sm:$0xff]   ;;  %v1122_v1 = vld [vmem:[%s1212_s28 + $0xf4] ss:$8 sps:$4 sm:$0xff]  }
  0x2d   : > { %745 = vmatprep.mubr.bf16.mxu1 %v936_v52  ;;  %v1124_v2 = vld [vmem:[%s1212_s28 + $0x1f4] ss:$8 sps:$4 sm:$0xff]   ;;  %v1126_v3 = vld [vmem:[%s1212_s28 + $0xf0] ss:$8 sps:$4 sm:$0xff]   ;;  %v270_v8 = vld [vmem:[#allocation2] sm:$0xff]  ;;  %v767_v22 = vshrl.u32 (!%p1001_p7), %v766_v21, 7 }
  0x2e   : > { %683 = vmatpush1.bf16.msra.mxu0 %v1066_v23  ;;  %v1127_v4 = vld [vmem:[%s1212_s28 + $0x1f0] ss:$8 sps:$4 sm:$0xff]   ;;  %v271_v12 = vld [vmem:[#allocation2 + $0x8] sm:$0xff]  ;;  %v764_v23 = vld [vmem:[%s1308_s2] sm:$0x3] (!%p1001_p7)  ;;  %vm806_vm0 = vcmask (!%p1001_p7), 1040384  }
  0x2f   : > { %724 = vmatpush1.bf16.msra.mxu1 %v1067_v24  ;;  %684 = vmatprep.subr.bf16.mxu0 %v1068_v25  ;;  %v768_v24 = vsub.s32 (!%p1001_p7), 0, %v767_v22  ;;  %v772_v25 = vsub.s32 (!%p1001_p7), 1, %v767_v22  ;;  %vm809_vm1 = vcmask (!%p1001_p7), 1041408  }
  0x30   : > { %725 = vmatprep.subr.bf16.mxu1 %v1070_v26 }
  0x32   : > { %685 = vmatpush1.bf16.msra.mxu0 %v1072_v27 }
  0x33   : > { %726 = vmatpush1.bf16.msra.mxu1 %v1073_v28  ;;  %686 = vmatprep.subr.bf16.mxu0 %v1074_v29  ;;  %v769_v28 = vrot.slane (!%p1001_p7), %v764_v23, %v768_v24  ;;  %v773_v29 = vrot.slane (!%p1001_p7), %v764_v23, %v772_v25 }
  0x34   : > { %727 = vmatprep.subr.bf16.mxu1 %v1076_v30 }
  0x36   : > { %687 = vmatpush1.bf16.msra.mxu0 %v1078_v31 }
  0x37   : > { %728 = vmatpush1.bf16.msra.mxu1 %v1079_v32  ;;  %688 = vmatprep.subr.bf16.mxu0 %v1080_v33 }
  0x38   : > { %729 = vmatprep.subr.bf16.mxu1 %v1082_v34 }
  0x3a   : > { %689 = vmatpush1.bf16.msra.mxu0 %v1084_v35 }
  0x3b   : > { %730 = vmatpush1.bf16.msra.mxu1 %v1085_v36  ;;  %690 = vmatprep.subr.bf16.mxu0 %v1086_v37 }
  0x3c   : > { %731 = vmatprep.subr.bf16.mxu1 %v1088_v38 }
  0x3e   : > { %691 = vmatpush1.bf16.msra.mxu0 %v1090_v39 }
  0x3f   : > { %732 = vmatpush1.bf16.msra.mxu1 %v1091_v40  ;;  %692 = vmatprep.subr.bf16.mxu0 %v1092_v41 }
  0x40   : > { %733 = vmatprep.subr.bf16.mxu1 %v1094_v42 }
  0x42   : > { %693 = vmatpush1.bf16.msra.mxu0 %v1096_v43 }
  0x43   : > { %734 = vmatpush1.bf16.msra.mxu1 %v1097_v44  ;;  %694 = vmatprep.subr.bf16.mxu0 %v1098_v45 }
  0x44   : > { %735 = vmatprep.subr.bf16.mxu1 %v1100_v46 }
  0x46   : > { %695 = vmatpush1.bf16.msra.mxu0 %v1102_v50 }
  0x47   : > { %736 = vmatpush1.bf16.msra.mxu1 %v1103_v51  ;;  %696 = vmatprep.subr.bf16.mxu0 %v1104_v53 }
  0x48   : > { %737 = vmatprep.subr.bf16.mxu1 %v1106_v54 }
  0x4a   : > { %697 = vmatpush1.bf16.msra.mxu0 %v1108_v55 }
  0x4b   : > { %738 = vmatpush1.bf16.msra.mxu1 %v1109_v56  ;;  %698 = vmatprep.subr.bf16.mxu0 %v1110_v57 }
  0x4c   : > { %739 = vmatprep.subr.bf16.mxu1 %v1112_v58 }
  0x4e   : > { %699 = vmatpush1.bf16.msra.mxu0 %v1114_v59 }
  0x4f   : > { %740 = vmatpush1.bf16.msra.mxu1 %v1115_v60  ;;  %700 = vmatprep.subr.bf16.mxu0 %v1116_v61 }
  0x50   : > { %741 = vmatprep.subr.bf16.mxu1 %v1118_v62 }
  0x52   : > { %701 = vmatpush1.bf16.msra.mxu0 %v1120_v63 }
  0x53   : > { %742 = vmatpush1.bf16.msra.mxu1 %v1121_v0  ;;  %702 = vmatprep.subr.bf16.mxu0 %v1122_v1 }
  0x54   : > { %743 = vmatprep.subr.bf16.mxu1 %v1124_v2 }
  0x56   : > { %703 = vmatpush1.bf16.msra.mxu0 %v1126_v3 }
  0x57   : > { %744 = vmatpush1.bf16.msra.mxu1 %v1127_v4 }
  0x59   : > { %705 = vmatmul.mubr.bf16.vlgmr.msra.gmra.mrb[0].mxu0 %v933_v5 }
  0x5a   : > { %746 = vmatmul.mubr.bf16.vlgmr.msra.gmra.mrb[0].mxu1 %v935_v6 }
 0x12c   : > { %v706_v7 = vpop.f32.mrb[0].mxu0 }
 0x12d   : > { %v747_v9 = vpop.f32.mrb[0].mxu1  ;;  %v708_v11 = vpop.f32.mrb[1].mxu0  ;;  %761 = sbr.rel (%p1001_p7) target bundleno = 334 (0x14e), region = 40 }
 0x12e   : > { %v748_v10 = vadd.f32 %v747_v9, %v706_v7  ;;  %v749_v13 = vpop.f32.mrb[1].mxu1  ;;  %v710_v15 = vpop.f32.mrb[2].mxu0 }
 0x12f   : > { %v750_v14 = vadd.f32 %v749_v13, %v708_v11  ;;  %v751_v16 = vpop.f32.mrb[2].mxu1  ;;  %v711_v18 = vpop.f32.mrb[3].mxu0 }
 0x130   : > { %v754_v17 = vadd.f32 %v748_v10, %v270_v8  ;;  %v752_v19 = vpop.f32.mrb[3].mxu1 }
 0x131   : > { %v755_v20 = vadd.f32 %v750_v14, %v271_v12 }
 0x132   : > { %756 = vst [vmem:[#allocation2] sm:$0xff] %v754_v17 }
 0x133   : > { %757 = vst [vmem:[#allocation2 + $0x8] sm:$0xff] %v755_v20 }
 0x139   : > { %v762_v26 = vld [vmem:[#allocation2] sm:$0xff] }
 0x13a   : > { %v763_v27 = vld [vmem:[#allocation2 + $0x8] sm:$0xff]  ;;  %v776_v30 = vadd.f32 %v769_v28, %v762_v26 }
 0x13b   : > { %v777_v31 = vadd.f32 %v773_v29, %v763_v27 }
 0x13c   : > { %778 = vst [vmem:[%s1309_s3] sm:$0xff] %v776_v30  ;;  %v780_v32 = vrot.slane %v776_v30, 4  ;;  %v792_v33 = vmul.f32 %v776_v30, %v776_v30 }
 0x13d   : > { %779 = vst [vmem:[%s1309_s3 + $0x8] sm:$0xff] %v777_v31  ;;  %v786_v34 = vrot.slane %v777_v31, 4  ;;  %v793_v35 = vmul.f32 %v777_v31, %v777_v31 }
 0x13e   : > { %v781_v36 = vadd.f32 %v780_v32, %v776_v30  ;;  %v794_v37 = vrot.slane %v792_v33, 4 }
 0x13f   : > { %v787_v38 = vadd.f32 %v786_v34, %v777_v31  ;;  %v800_v39 = vrot.slane %v793_v35, 4 }
 0x140   : > { %v782_v40 = vrot.slane %v781_v36, 2  ;;  %v795_v41 = vadd.f32 %v794_v37, %v792_v33 }
 0x141   : > { %v788_v42 = vrot.slane %v787_v38, 2  ;;  %v801_v43 = vadd.f32 %v800_v39, %v793_v35 }
 0x142   : > { %v783_v44 = vadd.f32 %v782_v40, %v781_v36  ;;  %v796_v45 = vrot.slane %v795_v41, 2 }
 0x143   : > { %v789_v46 = vadd.f32 %v788_v42, %v787_v38  ;;  %v802_v47 = vrot.slane %v801_v43, 2 }
 0x144   : > { %v784_v48 = vrot.slane %v783_v44, 1  ;;  %v797_v49 = vadd.f32 %v796_v45, %v795_v41 }
 0x145   : > { %v790_v50 = vrot.slane %v789_v46, 1  ;;  %v803_v51 = vadd.f32 %v802_v47, %v801_v43 }
 0x146   : > { %v785_v52 = vadd.f32 %v784_v48, %v783_v44  ;;  %v798_v53 = vrot.slane %v797_v49, 1 }
 0x147   : > { %v791_v54 = vadd.f32 %v790_v50, %v789_v46  ;;  %v804_v55 = vrot.slane %v803_v51, 1 }
 0x148   : > { %v799_v56 = vadd.f32 %v798_v53, %v797_v49 }
 0x149   : > { %v805_v57 = vadd.f32 %v804_v55, %v803_v51 }
 0x14a   : > { %v807_v58 = vsel %vm806_vm0, %v785_v52, %v799_v56 }
 0x14b   : > { %v808_v59 = vsel %vm806_vm0, %v791_v54, %v805_v57  ;;  %v810_v60 = vsel %vm809_vm1, %v807_v58, 0.0 }
 0x14c   : > { %v811_v61 = vsel %vm809_vm1, %v808_v59, 0.0  ;;  %812 = vst [vmem:[%s1310_s4] sm:$0xff] %v810_v60 }
 0x14d   : > { %813 = vst [vmem:[%s1310_s4 + $0x8] sm:$0xff] %v811_v61 }
 0x14e PF: > { %s15_s17 = sadd.s32 1, %s1154_s17   ;;  %s1311_s15 = smov %s1150_s16 }
 0x14f   : > { %p12_p8 = scmp.ge.s32.totalorder %s15_s17, 11   ;;  %s1312_s16 = smov %s1314_s18 }
 0x151   :  { %14 = sbr.rel (!%p12_p8) target bundleno = 2 (0x2), region = 85 }

// kernel: deep_koalarization_norm_forward.29
= control target key start
LH: loop header
LB: loop body
LE: loop exit
PB: predicated region body
PF: predicated region fallthrough
CT: control target
= control target key end

     0   :  { %v738_v3 = vmov 0   ;;  %s991_s1 = inlined_call_operand.vmem [shape: bf16[128,1024], index: 1, kind: input, shape index: {}]   ;;  %s992_s0 = inlined_call_operand.vmem [shape: bf16[8,128], index: 0, kind: input, shape index: {}]   ;;  %s993_s2 = inlined_call_operand.vmem [shape: f32[1,1024], index: 2, kind: input, shape index: {}]   ;;  %s994_s3 = inlined_call_operand.vmem [shape: f32[8,1024], index: 3, kind: output, shape index: {}]  }
   0x1   :  { %v36_v0 = vld [vmem:[%s991_s1] sm:$0xff]  ;;  %v37_v2 = vld [vmem:[%s991_s1 + $0x8] sm:$0xff]  ;;  %452 = vmatprep.mubr.bf16.mxu0 %v738_v3  ;;  %493 = vmatprep.mubr.bf16.mxu1 %v738_v3  ;;  %v38_v63 = vld [vmem:[%s991_s1 + $0x10] sm:$0xff] }
   0x2   :  { %v40_v1 = vld [vmem:[%s991_s1 + $0x20] sm:$0xff]  ;;  %v41_v5 = vld [vmem:[%s991_s1 + $0x28] sm:$0xff] }
   0x3   :  { %v674_v4 = vcombine.high %v36_v0, %v40_v1  ;;  %v673_v6 = vcombine.low %v36_v0, %v40_v1  ;;  %v44_v7 = vld [vmem:[%s991_s1 + $0x40] sm:$0xff]  ;;  %v676_v9 = vcombine.high %v37_v2, %v41_v5  ;;  %v675_v10 = vcombine.low %v37_v2, %v41_v5  ;;  %v45_v12 = vld [vmem:[%s991_s1 + $0x48] sm:$0xff]  ;;  %v42_v0 = vld [vmem:[%s991_s1 + $0x30] sm:$0xff] }
   0x4   :  { %v48_v8 = vld [vmem:[%s991_s1 + $0x60] sm:$0xff]  ;;  %v49_v13 = vld [vmem:[%s991_s1 + $0x68] sm:$0xff]  ;;  %v39_v1 = vld [vmem:[%s991_s1 + $0x18] sm:$0xff] }
   0x5   :  { %v682_v11 = vcombine.high %v44_v7, %v48_v8  ;;  %v52_v14 = vld [vmem:[%s991_s1 + $0x80] sm:$0xff]  ;;  %420 = vmatprep.subr.bf16.mxu0 %v674_v4  ;;  %v684_v15 = vcombine.high %v45_v12, %v49_v13  ;;  %v53_v17 = vld [vmem:[%s991_s1 + $0x88] sm:$0xff]  ;;  %461 = vmatprep.subr.bf16.mxu1 %v676_v9  ;;  %v681_v19 = vcombine.low %v44_v7, %v48_v8  ;;  %v43_v2 = vld [vmem:[%s991_s1 + $0x38] sm:$0xff] }
   0x6   :  { %v56_v16 = vld [vmem:[%s991_s1 + $0xa0] sm:$0xff]  ;;  %v57_v18 = vld [vmem:[%s991_s1 + $0xa8] sm:$0xff]  ;;  %421 = vmatpush1.bf16.msra.mxu0 %v673_v6  ;;  %462 = vmatpush1.bf16.msra.mxu1 %v675_v10  ;;  %v683_v20 = vcombine.low %v45_v12, %v49_v13  ;;  %v678_v6 = vcombine.high %v38_v63, %v42_v0  ;;  %v680_v7 = vcombine.high %v39_v1, %v43_v2  ;;  %v46_v8 = vld [vmem:[%s991_s1 + $0x50] sm:$0xff] }
   0x7   :  { %422 = vmatprep.subr.bf16.mxu0 %v682_v11  ;;  %v690_v21 = vcombine.high %v52_v14, %v56_v16  ;;  %463 = vmatprep.subr.bf16.mxu1 %v684_v15  ;;  %v692_v22 = vcombine.high %v53_v17, %v57_v18  ;;  %v60_v23 = vld [vmem:[%s991_s1 + $0xc0] sm:$0xff]  ;;  %v61_v25 = vld [vmem:[%s991_s1 + $0xc8] sm:$0xff]  ;;  %v689_v27 = vcombine.low %v52_v14, %v56_v16  ;;  %v50_v9 = vld [vmem:[%s991_s1 + $0x70] sm:$0xff] }
   0x8   :  { %v64_v24 = vld [vmem:[%s991_s1 + $0xe0] sm:$0xff]  ;;  %v65_v26 = vld [vmem:[%s991_s1 + $0xe8] sm:$0xff]  ;;  %v691_v28 = vcombine.low %v53_v17, %v57_v18  ;;  %v47_v10 = vld [vmem:[%s991_s1 + $0x58] sm:$0xff]  ;;  %v677_v13 = vcombine.low %v38_v63, %v42_v0  ;;  %v679_v14 = vcombine.low %v39_v1, %v43_v2  ;;  %v686_v15 = vcombine.high %v46_v8, %v50_v9 }
   0x9   :  { %v698_v29 = vcombine.high %v60_v23, %v64_v24  ;;  %v700_v30 = vcombine.high %v61_v25, %v65_v26  ;;  %v68_v31 = vld [vmem:[%s991_s1 + $0x100] sm:$0xff]  ;;  %v69_v33 = vld [vmem:[%s991_s1 + $0x108] sm:$0xff]  ;;  %v697_v35 = vcombine.low %v60_v23, %v64_v24  ;;  %v699_v36 = vcombine.low %v61_v25, %v65_v26  ;;  %v51_v11 = vld [vmem:[%s991_s1 + $0x78] sm:$0xff] }
   0xa   :  { %423 = vmatpush1.bf16.msra.mxu0 %v681_v19  ;;  %464 = vmatpush1.bf16.msra.mxu1 %v683_v20  ;;  %v72_v32 = vld [vmem:[%s991_s1 + $0x120] sm:$0xff]  ;;  %v73_v34 = vld [vmem:[%s991_s1 + $0x128] sm:$0xff]  ;;  %v688_v16 = vcombine.high %v47_v10, %v51_v11  ;;  %v54_v17 = vld [vmem:[%s991_s1 + $0x90] sm:$0xff]  ;;  %v613_v2 = vlaneseq }
   0xb   :  { %424 = vmatprep.subr.bf16.mxu0 %v690_v21  ;;  %465 = vmatprep.subr.bf16.mxu1 %v692_v22  ;;  %v706_v37 = vcombine.high %v68_v31, %v72_v32  ;;  %v708_v38 = vcombine.high %v69_v33, %v73_v34  ;;  %v76_v39 = vld [vmem:[%s991_s1 + $0x140] sm:$0xff]  ;;  %v77_v41 = vld [vmem:[%s991_s1 + $0x148] sm:$0xff]  ;;  %v705_v43 = vcombine.low %v68_v31, %v72_v32  ;;  %v58_v18 = vld [vmem:[%s991_s1 + $0xb0] sm:$0xff] }
   0xc   :  { %v80_v40 = vld [vmem:[%s991_s1 + $0x160] sm:$0xff]  ;;  %v81_v42 = vld [vmem:[%s991_s1 + $0x168] sm:$0xff]  ;;  %v707_v44 = vcombine.low %v69_v33, %v73_v34  ;;  %v55_v19 = vld [vmem:[%s991_s1 + $0x98] sm:$0xff]  ;;  %v685_v21 = vcombine.low %v46_v8, %v50_v9  ;;  %v687_v22 = vcombine.low %v47_v10, %v51_v11  ;;  %v694_v23 = vcombine.high %v54_v17, %v58_v18 }
   0xd   :  { %v714_v45 = vcombine.high %v76_v39, %v80_v40  ;;  %v716_v46 = vcombine.high %v77_v41, %v81_v42  ;;  %v84_v47 = vld [vmem:[%s991_s1 + $0x180] sm:$0xff]  ;;  %v85_v49 = vld [vmem:[%s991_s1 + $0x188] sm:$0xff]  ;;  %v713_v51 = vcombine.low %v76_v39, %v80_v40  ;;  %v715_v52 = vcombine.low %v77_v41, %v81_v42  ;;  %v59_v20 = vld [vmem:[%s991_s1 + $0xb8] sm:$0xff] }
   0xe   :  { %425 = vmatpush1.bf16.msra.mxu0 %v689_v27  ;;  %466 = vmatpush1.bf16.msra.mxu1 %v691_v28  ;;  %v88_v48 = vld [vmem:[%s991_s1 + $0x1a0] sm:$0xff]  ;;  %v89_v50 = vld [vmem:[%s991_s1 + $0x1a8] sm:$0xff]  ;;  %v696_v24 = vcombine.high %v55_v19, %v59_v20  ;;  %v62_v25 = vld [vmem:[%s991_s1 + $0xd0] sm:$0xff] }
   0xf   :  { %426 = vmatprep.subr.bf16.mxu0 %v698_v29  ;;  %467 = vmatprep.subr.bf16.mxu1 %v700_v30  ;;  %v722_v53 = vcombine.high %v84_v47, %v88_v48  ;;  %v724_v54 = vcombine.high %v85_v49, %v89_v50  ;;  %v92_v55 = vld [vmem:[%s991_s1 + $0x1c0] sm:$0xff]  ;;  %v93_v57 = vld [vmem:[%s991_s1 + $0x1c8] sm:$0xff]  ;;  %v721_v59 = vcombine.low %v84_v47, %v88_v48  ;;  %v66_v26 = vld [vmem:[%s991_s1 + $0xf0] sm:$0xff] }
  0x10   :  { %v96_v56 = vld [vmem:[%s991_s1 + $0x1e0] sm:$0xff]  ;;  %v97_v58 = vld [vmem:[%s991_s1 + $0x1e8] sm:$0xff]  ;;  %v723_v60 = vcombine.low %v85_v49, %v89_v50  ;;  %v63_v27 = vld [vmem:[%s991_s1 + $0xd8] sm:$0xff]  ;;  %v693_v29 = vcombine.low %v54_v17, %v58_v18  ;;  %v695_v30 = vcombine.low %v55_v19, %v59_v20  ;;  %v702_v31 = vcombine.high %v62_v25, %v66_v26 }
  0x11   :  { %v730_v61 = vcombine.high %v92_v55, %v96_v56  ;;  %v732_v62 = vcombine.high %v93_v57, %v97_v58  ;;  %v729_v4 = vcombine.low %v92_v55, %v96_v56  ;;  %v731_v5 = vcombine.low %v93_v57, %v97_v58  ;;  %v884_v12 = vld [vmem:[%s992_s0] sm:$0xf]  ;;  %v67_v28 = vld [vmem:[%s991_s1 + $0xf8] sm:$0xff]  ;;  %v70_v33 = vld [vmem:[%s991_s1 + $0x110] sm:$0xff] }
  0x12   :  { %427 = vmatpush1.bf16.msra.mxu0 %v697_v35  ;;  %468 = vmatpush1.bf16.msra.mxu1 %v699_v36  ;;  %v704_v32 = vcombine.high %v63_v27, %v67_v28  ;;  %v74_v34 = vld [vmem:[%s991_s1 + $0x130] sm:$0xff]  ;;  %v75_v35 = vld [vmem:[%s991_s1 + $0x138] sm:$0xff]  ;;  %v701_v36 = vcombine.low %v62_v25, %v66_v26 }
  0x13   :  { %428 = vmatprep.subr.bf16.mxu0 %v706_v37  ;;  %469 = vmatprep.subr.bf16.mxu1 %v708_v38  ;;  %v703_v37 = vcombine.low %v63_v27, %v67_v28  ;;  %v710_v38 = vcombine.high %v70_v33, %v74_v34  ;;  %v78_v40 = vld [vmem:[%s991_s1 + $0x150] sm:$0xff]  ;;  %v79_v42 = vld [vmem:[%s991_s1 + $0x158] sm:$0xff] }
  0x14   :  { %v82_v41 = vld [vmem:[%s991_s1 + $0x170] sm:$0xff]  ;;  %v87_v50 = vld [vmem:[%s991_s1 + $0x198] sm:$0xff] }
  0x15   :  { %v86_v48 = vld [vmem:[%s991_s1 + $0x190] sm:$0xff]  ;;  %v95_v58 = vld [vmem:[%s991_s1 + $0x1d8] sm:$0xff] }
  0x16   :  { %429 = vmatpush1.bf16.msra.mxu0 %v705_v43  ;;  %470 = vmatpush1.bf16.msra.mxu1 %v707_v44  ;;  %v83_v43 = vld [vmem:[%s991_s1 + $0x178] sm:$0xff]  ;;  %v709_v44 = vcombine.low %v70_v33, %v74_v34  ;;  %v90_v49 = vld [vmem:[%s991_s1 + $0x1b0] sm:$0xff] }
  0x17   :  { %430 = vmatprep.subr.bf16.mxu0 %v714_v45  ;;  %471 = vmatprep.subr.bf16.mxu1 %v716_v46  ;;  %v718_v46 = vcombine.high %v78_v40, %v82_v41  ;;  %v720_v47 = vcombine.high %v79_v42, %v83_v43  ;;  %v94_v56 = vld [vmem:[%s991_s1 + $0x1d0] sm:$0xff] }
  0x18   :  { %v98_v57 = vld [vmem:[%s991_s1 + $0x1f0] sm:$0xff] }
  0x19   :  { %v733_v0 = vcombine.low %v94_v56, %v98_v57 }
  0x1a   :  { %431 = vmatpush1.bf16.msra.mxu0 %v713_v51  ;;  %472 = vmatpush1.bf16.msra.mxu1 %v715_v52  ;;  %v91_v51 = vld [vmem:[%s991_s1 + $0x1b8] sm:$0xff]  ;;  %v717_v52 = vcombine.low %v78_v40, %v82_v41 }
  0x1b   :  { %432 = vmatprep.subr.bf16.mxu0 %v722_v53  ;;  %473 = vmatprep.subr.bf16.mxu1 %v724_v54  ;;  %v719_v53 = vcombine.low %v79_v42, %v83_v43  ;;  %v726_v54 = vcombine.high %v86_v48, %v90_v49  ;;  %v728_v55 = vcombine.high %v87_v50, %v91_v51 }
  0x1e   :  { %433 = vmatpush1.bf16.msra.mxu0 %v721_v59  ;;  %474 = vmatpush1.bf16.msra.mxu1 %v723_v60  ;;  %v99_v59 = vld [vmem:[%s991_s1 + $0x1f8] sm:$0xff]  ;;  %v725_v60 = vcombine.low %v86_v48, %v90_v49 }
  0x1f   :  { %434 = vmatprep.subr.bf16.mxu0 %v730_v61  ;;  %475 = vmatprep.subr.bf16.mxu1 %v732_v62  ;;  %v727_v61 = vcombine.low %v87_v50, %v91_v51  ;;  %v734_v62 = vcombine.high %v94_v56, %v98_v57  ;;  %v736_v63 = vcombine.high %v95_v58, %v99_v59 }
  0x20   :  { %v735_v1 = vcombine.low %v95_v58, %v99_v59 }
  0x22   :  { %435 = vmatpush1.bf16.msra.mxu0 %v729_v4  ;;  %476 = vmatpush1.bf16.msra.mxu1 %v731_v5  ;;  %v614_v4 = vshrl.u32 %v613_v2, 7 }
  0x23   :  { %502 = vmatprep.subr.bf16.mxu0 %v678_v6  ;;  %543 = vmatprep.subr.bf16.mxu1 %v680_v7  ;;  %v611_v6 = vld [vmem:[%s993_s2] sm:$0xff] }
  0x24   :  { %v615_v5 = vsub.s32 0, %v614_v4  ;;  %v623_v7 = vsub.s32 2, %v614_v4  ;;  %v619_v8 = vsub.s32 1, %v614_v4  ;;  %v627_v9 = vsub.s32 3, %v614_v4 }
  0x25   :  { %453 = vmatmul.mubr.bf16.vlgmr.msra.gmra.mrb[0].mxu0 %v884_v12  ;;  %494 = vmatmul.mubr.bf16.vlgmr.msra.gmra.mrb[0].mxu1 %v884_v12  ;;  %v631_v26 = vsub.s32 4, %v614_v4  ;;  %v639_v27 = vsub.s32 6, %v614_v4  ;;  %v635_v28 = vsub.s32 5, %v614_v4 }
  0x26   :  { %503 = vmatpush1.bf16.msra.mxu0 %v677_v13  ;;  %544 = vmatpush1.bf16.msra.mxu1 %v679_v14  ;;  %v616_v10 = vrot.slane %v611_v6, %v615_v5  ;;  %v624_v11 = vrot.slane %v611_v6, %v623_v7  ;;  %v620_v13 = vrot.slane %v611_v6, %v619_v8 }
  0x27   :  { %504 = vmatprep.subr.bf16.mxu0 %v686_v15  ;;  %545 = vmatprep.subr.bf16.mxu1 %v688_v16  ;;  %v628_v14 = vrot.slane %v611_v6, %v627_v9 }
  0x28   :  { %534 = vmatprep.mubr.bf16.mxu0 %v738_v3  ;;  %575 = vmatprep.mubr.bf16.mxu1 %v738_v3  ;;  %v71_v3 = vld [vmem:[%s991_s1 + $0x118] sm:$0xff] }
  0x29   :  { %v712_v39 = vcombine.high %v71_v3, %v75_v35  ;;  %v711_v45 = vcombine.low %v71_v3, %v75_v35 }
  0x2a   :  { %505 = vmatpush1.bf16.msra.mxu0 %v685_v21  ;;  %546 = vmatpush1.bf16.msra.mxu1 %v687_v22 }
  0x2b   :  { %506 = vmatprep.subr.bf16.mxu0 %v694_v23  ;;  %547 = vmatprep.subr.bf16.mxu1 %v696_v24 }
  0x2e   :  { %507 = vmatpush1.bf16.msra.mxu0 %v693_v29  ;;  %548 = vmatpush1.bf16.msra.mxu1 %v695_v30  ;;  %v643_v29 = vsub.s32 7, %v614_v4  ;;  %v632_v30 = vrot.slane %v611_v6, %v631_v26 }
  0x2f   :  { %508 = vmatprep.subr.bf16.mxu0 %v702_v31  ;;  %549 = vmatprep.subr.bf16.mxu1 %v704_v32  ;;  %v640_v31 = vrot.slane %v611_v6, %v639_v27  ;;  %v636_v32 = vrot.slane %v611_v6, %v635_v28 }
  0x30   :  { %v644_v33 = vrot.slane %v611_v6, %v643_v29 }
  0x32   :  { %509 = vmatpush1.bf16.msra.mxu0 %v701_v36  ;;  %550 = vmatpush1.bf16.msra.mxu1 %v703_v37 }
  0x33   :  { %510 = vmatprep.subr.bf16.mxu0 %v710_v38  ;;  %551 = vmatprep.subr.bf16.mxu1 %v712_v39 }
  0x36   :  { %511 = vmatpush1.bf16.msra.mxu0 %v709_v44  ;;  %552 = vmatpush1.bf16.msra.mxu1 %v711_v45 }
  0x37   :  { %512 = vmatprep.subr.bf16.mxu0 %v718_v46  ;;  %553 = vmatprep.subr.bf16.mxu1 %v720_v47 }
  0x3a   :  { %513 = vmatpush1.bf16.msra.mxu0 %v717_v52  ;;  %554 = vmatpush1.bf16.msra.mxu1 %v719_v53 }
  0x3b   :  { %514 = vmatprep.subr.bf16.mxu0 %v726_v54  ;;  %555 = vmatprep.subr.bf16.mxu1 %v728_v55 }
  0x3e   :  { %515 = vmatpush1.bf16.msra.mxu0 %v725_v60  ;;  %556 = vmatpush1.bf16.msra.mxu1 %v727_v61 }
  0x3f   :  { %516 = vmatprep.subr.bf16.mxu0 %v734_v62  ;;  %557 = vmatprep.subr.bf16.mxu1 %v736_v63 }
  0x42   :  { %517 = vmatpush1.bf16.msra.mxu0 %v733_v0  ;;  %558 = vmatpush1.bf16.msra.mxu1 %v735_v1 }
  0x45   :  { %535 = vmatmul.mubr.bf16.vlgmr.msra.gmra.mrb[4].mxu0 %v884_v12  ;;  %576 = vmatmul.mubr.bf16.vlgmr.msra.gmra.mrb[4].mxu1 %v884_v12 }
  0xf8   :  { %v454_v15 = vpop.f32.mrb[0].mxu0  ;;  %v495_v17 = vpop.f32.mrb[0].mxu1 }
  0xf9   :  { %v653_v16 = vadd.f32 %v616_v10, %v454_v15  ;;  %v456_v18 = vpop.f32.mrb[1].mxu0  ;;  %v655_v19 = vadd.f32 %v624_v11, %v495_v17  ;;  %v497_v20 = vpop.f32.mrb[1].mxu1 }
  0xfa   :  { %v654_v12 = vadd.f32 %v620_v13, %v456_v18  ;;  %v458_v21 = vpop.f32.mrb[2].mxu0  ;;  %v656_v22 = vadd.f32 %v628_v14, %v497_v20  ;;  %v499_v23 = vpop.f32.mrb[2].mxu1 }
  0xfb   :  { %661 = vst [vmem:[%s994_s3] sm:$0xff] %v653_v16  ;;  %v459_v24 = vpop.f32.mrb[3].mxu0  ;;  %663 = vst [vmem:[%s994_s3 + $0x10] sm:$0xff] %v655_v19  ;;  %v500_v25 = vpop.f32.mrb[3].mxu1 }
  0xfc   :  { %662 = vst [vmem:[%s994_s3 + $0x8] sm:$0xff] %v654_v12  ;;  %664 = vst [vmem:[%s994_s3 + $0x18] sm:$0xff] %v656_v22 }
 0x118   :  { %v536_v34 = vpop.f32.mrb[4].mxu0  ;;  %v577_v35 = vpop.f32.mrb[4].mxu1 }
 0x119   :  { %v657_v3 = vadd.f32 %v632_v30, %v536_v34  ;;  %v538_v36 = vpop.f32.mrb[5].mxu0  ;;  %v659_v37 = vadd.f32 %v640_v31, %v577_v35  ;;  %v579_v39 = vpop.f32.mrb[5].mxu1 }
 0x11a   :  { %v658_v38 = vadd.f32 %v636_v32, %v538_v36  ;;  %v540_v40 = vpop.f32.mrb[6].mxu0  ;;  %v660_v41 = vadd.f32 %v644_v33, %v579_v39  ;;  %v581_v42 = vpop.f32.mrb[6].mxu1 }
 0x11b   :  { %665 = vst [vmem:[%s994_s3 + $0x20] sm:$0xff] %v657_v3  ;;  %v541_v43 = vpop.f32.mrb[7].mxu0  ;;  %667 = vst [vmem:[%s994_s3 + $0x30] sm:$0xff] %v659_v37  ;;  %v582_v44 = vpop.f32.mrb[7].mxu1 }
 0x11c   :  { %666 = vst [vmem:[%s994_s3 + $0x28] sm:$0xff] %v658_v38  ;;  %668 = vst [vmem:[%s994_s3 + $0x38] sm:$0xff] %v660_v41 }

// kernel: deep_koalarization_norm_forward.46
= control target key start
LH: loop header
LB: loop body
LE: loop exit
PB: predicated region body
PF: predicated region fallthrough
CT: control target
= control target key end

     0   :  { %s1788_s1 = inlined_call_operand.vmem [shape: bf16[1024,256], index: 1, kind: input, shape index: {}]   ;;  %s1789_s0 = inlined_call_operand.vmem [shape: bf16[8,1024], index: 0, kind: input, shape index: {}]   ;;  %s1790_s2 = inlined_call_operand.vmem [shape: f32[1,256], index: 2, kind: input, shape index: {}]   ;;  %s1791_s3 = inlined_call_operand.vmem [shape: f32[8,256], index: 3, kind: output, shape index: {}]  }
   0x1   :  { %v1151_v0 = vld [vmem:[%s1788_s1 + $0x4] ss:$8 sps:$4 sm:$0xff]   ;;  %v1155_v2 = vld [vmem:[%s1788_s1] ss:$8 sps:$4 sm:$0xff]   ;;  %v1157_v4 = vld [vmem:[%s1788_s1 + $0x14] ss:$8 sps:$4 sm:$0xff]  }
   0x2   :  { %v1153_v1 = vld [vmem:[%s1788_s1 + $0x104] ss:$8 sps:$4 sm:$0xff]   ;;  %822 = vmatprep.subr.bf16.mxu0 %v1151_v0  ;;  %v1156_v3 = vld [vmem:[%s1788_s1 + $0x100] ss:$8 sps:$4 sm:$0xff]   ;;  %v1159_v5 = vld [vmem:[%s1788_s1 + $0x114] ss:$8 sps:$4 sm:$0xff]  }
   0x3   :  { %863 = vmatprep.subr.bf16.mxu1 %v1153_v1  ;;  %823 = vmatpush1.bf16.msra.mxu0 %v1155_v2  ;;  %v1161_v6 = vld [vmem:[%s1788_s1 + $0x10] ss:$8 sps:$4 sm:$0xff]   ;;  %v1163_v8 = vld [vmem:[%s1788_s1 + $0x24] ss:$8 sps:$4 sm:$0xff]   ;;  %v1167_v10 = vld [vmem:[%s1788_s1 + $0x20] ss:$8 sps:$4 sm:$0xff]  }
   0x4   :  { %864 = vmatpush1.bf16.msra.mxu1 %v1156_v3  ;;  %824 = vmatprep.subr.bf16.mxu0 %v1157_v4  ;;  %v1162_v7 = vld [vmem:[%s1788_s1 + $0x110] ss:$8 sps:$4 sm:$0xff]   ;;  %v1165_v9 = vld [vmem:[%s1788_s1 + $0x124] ss:$8 sps:$4 sm:$0xff]   ;;  %v1168_v11 = vld [vmem:[%s1788_s1 + $0x120] ss:$8 sps:$4 sm:$0xff]  }
   0x5   :  { %865 = vmatprep.subr.bf16.mxu1 %v1159_v5  ;;  %v1169_v12 = vld [vmem:[%s1788_s1 + $0x34] ss:$8 sps:$4 sm:$0xff]   ;;  %v1173_v14 = vld [vmem:[%s1788_s1 + $0x30] ss:$8 sps:$4 sm:$0xff]   ;;  %v1175_v16 = vld [vmem:[%s1788_s1 + $0x44] ss:$8 sps:$4 sm:$0xff]  }
   0x6   :  { %v1171_v13 = vld [vmem:[%s1788_s1 + $0x134] ss:$8 sps:$4 sm:$0xff]   ;;  %v1174_v15 = vld [vmem:[%s1788_s1 + $0x130] ss:$8 sps:$4 sm:$0xff]   ;;  %v1177_v17 = vld [vmem:[%s1788_s1 + $0x144] ss:$8 sps:$4 sm:$0xff]  }
   0x7   :  { %825 = vmatpush1.bf16.msra.mxu0 %v1161_v6  ;;  %v1179_v18 = vld [vmem:[%s1788_s1 + $0x40] ss:$8 sps:$4 sm:$0xff]   ;;  %v1181_v20 = vld [vmem:[%s1788_s1 + $0x54] ss:$8 sps:$4 sm:$0xff]   ;;  %v1185_v22 = vld [vmem:[%s1788_s1 + $0x50] ss:$8 sps:$4 sm:$0xff]  }
   0x8   :  { %866 = vmatpush1.bf16.msra.mxu1 %v1162_v7  ;;  %826 = vmatprep.subr.bf16.mxu0 %v1163_v8  ;;  %v1180_v19 = vld [vmem:[%s1788_s1 + $0x140] ss:$8 sps:$4 sm:$0xff]   ;;  %v1183_v21 = vld [vmem:[%s1788_s1 + $0x154] ss:$8 sps:$4 sm:$0xff]   ;;  %v1186_v23 = vld [vmem:[%s1788_s1 + $0x150] ss:$8 sps:$4 sm:$0xff]  }
   0x9   :  { %867 = vmatprep.subr.bf16.mxu1 %v1165_v9  ;;  %v1187_v24 = vld [vmem:[%s1788_s1 + $0x64] ss:$8 sps:$4 sm:$0xff]   ;;  %v1191_v26 = vld [vmem:[%s1788_s1 + $0x60] ss:$8 sps:$4 sm:$0xff]   ;;  %v1193_v28 = vld [vmem:[%s1788_s1 + $0x74] ss:$8 sps:$4 sm:$0xff]  }
   0xa   :  { %v1189_v25 = vld [vmem:[%s1788_s1 + $0x164] ss:$8 sps:$4 sm:$0xff]   ;;  %v1192_v27 = vld [vmem:[%s1788_s1 + $0x160] ss:$8 sps:$4 sm:$0xff]   ;;  %v1195_v29 = vld [vmem:[%s1788_s1 + $0x174] ss:$8 sps:$4 sm:$0xff]  }
   0xb   :  { %827 = vmatpush1.bf16.msra.mxu0 %v1167_v10  ;;  %v1197_v30 = vld [vmem:[%s1788_s1 + $0x70] ss:$8 sps:$4 sm:$0xff]   ;;  %v1199_v32 = vld [vmem:[%s1788_s1 + $0x84] ss:$8 sps:$4 sm:$0xff]   ;;  %v1203_v34 = vld [vmem:[%s1788_s1 + $0x80] ss:$8 sps:$4 sm:$0xff]  }
   0xc   :  { %868 = vmatpush1.bf16.msra.mxu1 %v1168_v11  ;;  %828 = vmatprep.subr.bf16.mxu0 %v1169_v12  ;;  %v1198_v31 = vld [vmem:[%s1788_s1 + $0x170] ss:$8 sps:$4 sm:$0xff]   ;;  %v1201_v33 = vld [vmem:[%s1788_s1 + $0x184] ss:$8 sps:$4 sm:$0xff]   ;;  %v1204_v35 = vld [vmem:[%s1788_s1 + $0x180] ss:$8 sps:$4 sm:$0xff]  }
   0xd   :  { %869 = vmatprep.subr.bf16.mxu1 %v1171_v13  ;;  %v1205_v36 = vld [vmem:[%s1788_s1 + $0x94] ss:$8 sps:$4 sm:$0xff]   ;;  %v1209_v38 = vld [vmem:[%s1788_s1 + $0x90] ss:$8 sps:$4 sm:$0xff]   ;;  %v1211_v40 = vld [vmem:[%s1788_s1 + $0xa4] ss:$8 sps:$4 sm:$0xff]  }
   0xe   :  { %v1207_v37 = vld [vmem:[%s1788_s1 + $0x194] ss:$8 sps:$4 sm:$0xff]   ;;  %v1210_v39 = vld [vmem:[%s1788_s1 + $0x190] ss:$8 sps:$4 sm:$0xff]   ;;  %v1213_v41 = vld [vmem:[%s1788_s1 + $0x1a4] ss:$8 sps:$4 sm:$0xff]  }
   0xf   :  { %829 = vmatpush1.bf16.msra.mxu0 %v1173_v14  ;;  %v1215_v42 = vld [vmem:[%s1788_s1 + $0xa0] ss:$8 sps:$4 sm:$0xff]   ;;  %v1217_v44 = vld [vmem:[%s1788_s1 + $0xb4] ss:$8 sps:$4 sm:$0xff]   ;;  %v1221_v49 = vld [vmem:[%s1788_s1 + $0xb0] ss:$8 sps:$4 sm:$0xff]  }
  0x10   :  { %870 = vmatpush1.bf16.msra.mxu1 %v1174_v15  ;;  %830 = vmatprep.subr.bf16.mxu0 %v1175_v16  ;;  %v1216_v43 = vld [vmem:[%s1788_s1 + $0x1a0] ss:$8 sps:$4 sm:$0xff]   ;;  %v1219_v45 = vld [vmem:[%s1788_s1 + $0x1b4] ss:$8 sps:$4 sm:$0xff]   ;;  %v1222_v50 = vld [vmem:[%s1788_s1 + $0x1b0] ss:$8 sps:$4 sm:$0xff]  }
  0x11   :  { %871 = vmatprep.subr.bf16.mxu1 %v1177_v17  ;;  %v22_v46 = vld [vmem:[%s1789_s0] sm:$0xff]  ;;  %v23_v48 = vld [vmem:[%s1789_s0 + $0x8] sm:$0xff]  ;;  %v1229_v56 = vld [vmem:[%s1788_s1 + $0xd4] ss:$8 sps:$4 sm:$0xff]  }
  0x12   :  { %v1016_v47 = vcombine.high %v22_v46, %v22_v46  ;;  %v1018_v51 = vcombine.high %v23_v48, %v23_v48  ;;  %v1223_v52 = vld [vmem:[%s1788_s1 + $0xc4] ss:$8 sps:$4 sm:$0xff]   ;;  %v1227_v54 = vld [vmem:[%s1788_s1 + $0xc0] ss:$8 sps:$4 sm:$0xff]   ;;  %v1231_v57 = vld [vmem:[%s1788_s1 + $0x1d4] ss:$8 sps:$4 sm:$0xff]   ;;  %v1015_v6 = vcombine.low %v22_v46, %v22_v46  ;;  %v1017_v7 = vcombine.low %v23_v48, %v23_v48 }
  0x13   :  { %831 = vmatpush1.bf16.msra.mxu0 %v1179_v18  ;;  %v1225_v53 = vld [vmem:[%s1788_s1 + $0x1c4] ss:$8 sps:$4 sm:$0xff]   ;;  %v1228_v55 = vld [vmem:[%s1788_s1 + $0x1c0] ss:$8 sps:$4 sm:$0xff]   ;;  %v1233_v58 = vld [vmem:[%s1788_s1 + $0xd0] ss:$8 sps:$4 sm:$0xff]  }
  0x14   :  { %872 = vmatpush1.bf16.msra.mxu1 %v1180_v19  ;;  %832 = vmatprep.subr.bf16.mxu0 %v1181_v20  ;;  %v1234_v59 = vld [vmem:[%s1788_s1 + $0x1d0] ss:$8 sps:$4 sm:$0xff]   ;;  %v1235_v60 = vld [vmem:[%s1788_s1 + $0xe4] ss:$8 sps:$4 sm:$0xff]   ;;  %v1239_v62 = vld [vmem:[%s1788_s1 + $0xe0] ss:$8 sps:$4 sm:$0xff]  }
  0x15   :  { %873 = vmatprep.subr.bf16.mxu1 %v1183_v21  ;;  %854 = vmatprep.mubr.bf16.mxu0 %v1016_v47  ;;  %v1237_v61 = vld [vmem:[%s1788_s1 + $0x1e4] ss:$8 sps:$4 sm:$0xff]   ;;  %v1240_v63 = vld [vmem:[%s1788_s1 + $0x1e0] ss:$8 sps:$4 sm:$0xff]   ;;  %v1241_v0 = vld [vmem:[%s1788_s1 + $0xf4] ss:$8 sps:$4 sm:$0xff]  }
  0x16   :  { %895 = vmatprep.mubr.bf16.mxu1 %v1018_v51  ;;  %v1243_v1 = vld [vmem:[%s1788_s1 + $0x1f4] ss:$8 sps:$4 sm:$0xff]   ;;  %v1245_v2 = vld [vmem:[%s1788_s1 + $0xf0] ss:$8 sps:$4 sm:$0xff]   ;;  %v1253_v4 = vld [vmem:[%s1788_s1 + $0x204] ss:$8 sps:$4 sm:$0xff]  }
  0x17   :  { %833 = vmatpush1.bf16.msra.mxu0 %v1185_v22  ;;  %v1246_v3 = vld [vmem:[%s1788_s1 + $0x1f0] ss:$8 sps:$4 sm:$0xff]   ;;  %v1256_v5 = vld [vmem:[%s1788_s1 + $0x304] ss:$8 sps:$4 sm:$0xff]   ;;  %v1251_v8 = vld [vmem:[%s1788_s1 + $0x200] ss:$8 sps:$4 sm:$0xff]  }
  0x18   :  { %874 = vmatpush1.bf16.msra.mxu1 %v1186_v23  ;;  %834 = vmatprep.subr.bf16.mxu0 %v1187_v24  ;;  %v1254_v9 = vld [vmem:[%s1788_s1 + $0x300] ss:$8 sps:$4 sm:$0xff]   ;;  %v1259_v10 = vld [vmem:[%s1788_s1 + $0x214] ss:$8 sps:$4 sm:$0xff]   ;;  %v1257_v12 = vld [vmem:[%s1788_s1 + $0x210] ss:$8 sps:$4 sm:$0xff]  }
  0x19   :  { %875 = vmatprep.subr.bf16.mxu1 %v1189_v25  ;;  %v1262_v11 = vld [vmem:[%s1788_s1 + $0x314] ss:$8 sps:$4 sm:$0xff]   ;;  %v1260_v13 = vld [vmem:[%s1788_s1 + $0x310] ss:$8 sps:$4 sm:$0xff]   ;;  %v1265_v14 = vld [vmem:[%s1788_s1 + $0x224] ss:$8 sps:$4 sm:$0xff]  }
  0x1a   :  { %v1268_v15 = vld [vmem:[%s1788_s1 + $0x324] ss:$8 sps:$4 sm:$0xff]   ;;  %v1263_v16 = vld [vmem:[%s1788_s1 + $0x220] ss:$8 sps:$4 sm:$0xff]   ;;  %v1271_v18 = vld [vmem:[%s1788_s1 + $0x234] ss:$8 sps:$4 sm:$0xff]  }
  0x1b   :  { %835 = vmatpush1.bf16.msra.mxu0 %v1191_v26  ;;  %v1266_v17 = vld [vmem:[%s1788_s1 + $0x320] ss:$8 sps:$4 sm:$0xff]   ;;  %v1274_v19 = vld [vmem:[%s1788_s1 + $0x334] ss:$8 sps:$4 sm:$0xff]   ;;  %v1269_v20 = vld [vmem:[%s1788_s1 + $0x230] ss:$8 sps:$4 sm:$0xff]  }
  0x1c   :  { %876 = vmatpush1.bf16.msra.mxu1 %v1192_v27  ;;  %836 = vmatprep.subr.bf16.mxu0 %v1193_v28  ;;  %v1272_v21 = vld [vmem:[%s1788_s1 + $0x330] ss:$8 sps:$4 sm:$0xff]   ;;  %v1277_v22 = vld [vmem:[%s1788_s1 + $0x244] ss:$8 sps:$4 sm:$0xff]   ;;  %v1275_v24 = vld [vmem:[%s1788_s1 + $0x240] ss:$8 sps:$4 sm:$0xff]  }
  0x1d   :  { %877 = vmatprep.subr.bf16.mxu1 %v1195_v29  ;;  %v1280_v23 = vld [vmem:[%s1788_s1 + $0x344] ss:$8 sps:$4 sm:$0xff]   ;;  %v1278_v25 = vld [vmem:[%s1788_s1 + $0x340] ss:$8 sps:$4 sm:$0xff]   ;;  %v1283_v26 = vld [vmem:[%s1788_s1 + $0x254] ss:$8 sps:$4 sm:$0xff]  }
  0x1e   :  { %v1286_v27 = vld [vmem:[%s1788_s1 + $0x354] ss:$8 sps:$4 sm:$0xff]   ;;  %v1281_v28 = vld [vmem:[%s1788_s1 + $0x250] ss:$8 sps:$4 sm:$0xff]   ;;  %v1316_v51 = vld [vmem:[%s1788_s1 + $0x3a4] ss:$8 sps:$4 sm:$0xff]  }
  0x1f   :  { %837 = vmatpush1.bf16.msra.mxu0 %v1197_v30  ;;  %v1284_v29 = vld [vmem:[%s1788_s1 + $0x350] ss:$8 sps:$4 sm:$0xff]   ;;  %v1289_v30 = vld [vmem:[%s1788_s1 + $0x264] ss:$8 sps:$4 sm:$0xff]   ;;  %v1307_v46 = vld [vmem:[%s1788_s1 + $0x294] ss:$8 sps:$4 sm:$0xff]  }
  0x20   :  { %878 = vmatpush1.bf16.msra.mxu1 %v1198_v31  ;;  %838 = vmatprep.subr.bf16.mxu0 %v1199_v32  ;;  %v1292_v31 = vld [vmem:[%s1788_s1 + $0x364] ss:$8 sps:$4 sm:$0xff]   ;;  %v1650_v32 = vld [vmem:[%s1789_s0 + $0x10] sm:$0xff] }
  0x21   :  { %879 = vmatprep.subr.bf16.mxu1 %v1201_v33  ;;  %v1655_v33 = vld [vmem:[%s1789_s0 + $0x18] sm:$0xff] }
  0x22   :  { %v1310_v47 = vld [vmem:[%s1788_s1 + $0x394] ss:$8 sps:$4 sm:$0xff]   ;;  %v1305_v48 = vld [vmem:[%s1788_s1 + $0x290] ss:$8 sps:$4 sm:$0xff]  }
  0x23   :  { %839 = vmatpush1.bf16.msra.mxu0 %v1203_v34  ;;  %v1020_v34 = vcombine.high %v1650_v32, %v1650_v32 }
  0x24   :  { %880 = vmatpush1.bf16.msra.mxu1 %v1204_v35  ;;  %840 = vmatprep.subr.bf16.mxu0 %v1205_v36  ;;  %v1022_v35 = vcombine.high %v1655_v33, %v1655_v33  ;;  %v1287_v36 = vld [vmem:[%s1788_s1 + $0x260] ss:$8 sps:$4 sm:$0xff]  }
  0x25   :  { %881 = vmatprep.subr.bf16.mxu1 %v1207_v37  ;;  %v1290_v37 = vld [vmem:[%s1788_s1 + $0x360] ss:$8 sps:$4 sm:$0xff]  }
  0x27   :  { %841 = vmatpush1.bf16.msra.mxu0 %v1209_v38  ;;  %v1295_v38 = vld [vmem:[%s1788_s1 + $0x274] ss:$8 sps:$4 sm:$0xff]  }
  0x28   :  { %882 = vmatpush1.bf16.msra.mxu1 %v1210_v39  ;;  %842 = vmatprep.subr.bf16.mxu0 %v1211_v40  ;;  %v1298_v39 = vld [vmem:[%s1788_s1 + $0x374] ss:$8 sps:$4 sm:$0xff]   ;;  %v1293_v40 = vld [vmem:[%s1788_s1 + $0x270] ss:$8 sps:$4 sm:$0xff]  }
  0x29   :  { %883 = vmatprep.subr.bf16.mxu1 %v1213_v41  ;;  %v1296_v41 = vld [vmem:[%s1788_s1 + $0x370] ss:$8 sps:$4 sm:$0xff]  }
  0x2b   :  { %843 = vmatpush1.bf16.msra.mxu0 %v1215_v42  ;;  %v1301_v42 = vld [vmem:[%s1788_s1 + $0x284] ss:$8 sps:$4 sm:$0xff]  }
  0x2c   :  { %884 = vmatpush1.bf16.msra.mxu1 %v1216_v43  ;;  %844 = vmatprep.subr.bf16.mxu0 %v1217_v44  ;;  %v1304_v43 = vld [vmem:[%s1788_s1 + $0x384] ss:$8 sps:$4 sm:$0xff]   ;;  %v1299_v44 = vld [vmem:[%s1788_s1 + $0x280] ss:$8 sps:$4 sm:$0xff]  }
  0x2d   :  { %885 = vmatprep.subr.bf16.mxu1 %v1219_v45  ;;  %v1302_v45 = vld [vmem:[%s1788_s1 + $0x380] ss:$8 sps:$4 sm:$0xff]  }
  0x2f   :  { %845 = vmatpush1.bf16.msra.mxu0 %v1221_v49  ;;  %v1308_v49 = vld [vmem:[%s1788_s1 + $0x390] ss:$8 sps:$4 sm:$0xff]  }
  0x30   :  { %886 = vmatpush1.bf16.msra.mxu1 %v1222_v50  ;;  %846 = vmatprep.subr.bf16.mxu0 %v1223_v52  ;;  %v1313_v50 = vld [vmem:[%s1788_s1 + $0x2a4] ss:$8 sps:$4 sm:$0xff]   ;;  %v1311_v52 = vld [vmem:[%s1788_s1 + $0x2a0] ss:$8 sps:$4 sm:$0xff]  }
  0x31   :  { %887 = vmatprep.subr.bf16.mxu1 %v1225_v53  ;;  %v1314_v53 = vld [vmem:[%s1788_s1 + $0x3a0] ss:$8 sps:$4 sm:$0xff]  }
  0x33   :  { %847 = vmatpush1.bf16.msra.mxu0 %v1227_v54  ;;  %v1319_v54 = vld [vmem:[%s1788_s1 + $0x2b4] ss:$8 sps:$4 sm:$0xff]  }
  0x34   :  { %888 = vmatpush1.bf16.msra.mxu1 %v1228_v55  ;;  %848 = vmatprep.subr.bf16.mxu0 %v1229_v56  ;;  %v1322_v55 = vld [vmem:[%s1788_s1 + $0x3b4] ss:$8 sps:$4 sm:$0xff]   ;;  %v1317_v56 = vld [vmem:[%s1788_s1 + $0x2b0] ss:$8 sps:$4 sm:$0xff]  }
  0x35   :  { %889 = vmatprep.subr.bf16.mxu1 %v1231_v57  ;;  %v1320_v57 = vld [vmem:[%s1788_s1 + $0x3b0] ss:$8 sps:$4 sm:$0xff]  }
  0x37   :  { %849 = vmatpush1.bf16.msra.mxu0 %v1233_v58  ;;  %v1325_v58 = vld [vmem:[%s1788_s1 + $0x2c4] ss:$8 sps:$4 sm:$0xff]  }
  0x38   :  { %890 = vmatpush1.bf16.msra.mxu1 %v1234_v59  ;;  %850 = vmatprep.subr.bf16.mxu0 %v1235_v60  ;;  %v1328_v59 = vld [vmem:[%s1788_s1 + $0x3c4] ss:$8 sps:$4 sm:$0xff]   ;;  %v1323_v60 = vld [vmem:[%s1788_s1 + $0x2c0] ss:$8 sps:$4 sm:$0xff]  }
  0x39   :  { %891 = vmatprep.subr.bf16.mxu1 %v1237_v61  ;;  %v1326_v61 = vld [vmem:[%s1788_s1 + $0x3c0] ss:$8 sps:$4 sm:$0xff]  }
  0x3b   :  { %851 = vmatpush1.bf16.msra.mxu0 %v1239_v62  ;;  %v1331_v62 = vld [vmem:[%s1788_s1 + $0x2d4] ss:$8 sps:$4 sm:$0xff]  }
  0x3c   :  { %892 = vmatpush1.bf16.msra.mxu1 %v1240_v63  ;;  %852 = vmatprep.subr.bf16.mxu0 %v1241_v0  ;;  %v1334_v63 = vld [vmem:[%s1788_s1 + $0x3d4] ss:$8 sps:$4 sm:$0xff]   ;;  %v1329_v0 = vld [vmem:[%s1788_s1 + $0x2d0] ss:$8 sps:$4 sm:$0xff]  }
  0x3d   :  { %893 = vmatprep.subr.bf16.mxu1 %v1243_v1  ;;  %v1332_v1 = vld [vmem:[%s1788_s1 + $0x3d0] ss:$8 sps:$4 sm:$0xff]  }
  0x3f   :  { %853 = vmatpush1.bf16.msra.mxu0 %v1245_v2  ;;  %v1337_v2 = vld [vmem:[%s1788_s1 + $0x2e4] ss:$8 sps:$4 sm:$0xff]  }
  0x40   :  { %894 = vmatpush1.bf16.msra.mxu1 %v1246_v3  ;;  %904 = vmatprep.subr.bf16.mxu0 %v1253_v4  ;;  %v1340_v3 = vld [vmem:[%s1788_s1 + $0x3e4] ss:$8 sps:$4 sm:$0xff]   ;;  %v1335_v4 = vld [vmem:[%s1788_s1 + $0x2e0] ss:$8 sps:$4 sm:$0xff]  }
  0x41   :  { %945 = vmatprep.subr.bf16.mxu1 %v1256_v5  ;;  %v1338_v5 = vld [vmem:[%s1788_s1 + $0x3e0] ss:$8 sps:$4 sm:$0xff]  }
  0x42   :  { %855 = vmatmul.mubr.bf16.vlgmr.msra.gmra.mrb[0].mxu0 %v1015_v6  ;;  %v1343_v6 = vld [vmem:[%s1788_s1 + $0x2f4] ss:$8 sps:$4 sm:$0xff]  }
  0x43   :  { %896 = vmatmul.mubr.bf16.vlgmr.msra.gmra.mrb[0].mxu1 %v1017_v7  ;;  %905 = vmatpush1.bf16.msra.mxu0 %v1251_v8  ;;  %v1346_v7 = vld [vmem:[%s1788_s1 + $0x3f4] ss:$8 sps:$4 sm:$0xff]   ;;  %v1341_v8 = vld [vmem:[%s1788_s1 + $0x2f0] ss:$8 sps:$4 sm:$0xff]  }
  0x44   :  { %946 = vmatpush1.bf16.msra.mxu1 %v1254_v9  ;;  %906 = vmatprep.subr.bf16.mxu0 %v1259_v10  ;;  %v1344_v9 = vld [vmem:[%s1788_s1 + $0x3f0] ss:$8 sps:$4 sm:$0xff]   ;;  %v1019_v10 = vcombine.low %v1650_v32, %v1650_v32 }
  0x45   :  { %947 = vmatprep.subr.bf16.mxu1 %v1262_v11  ;;  %936 = vmatprep.mubr.bf16.mxu0 %v1020_v34  ;;  %v1021_v11 = vcombine.low %v1655_v33, %v1655_v33 }
  0x46   :  { %977 = vmatprep.mubr.bf16.mxu1 %v1022_v35 }
  0x47   :  { %907 = vmatpush1.bf16.msra.mxu0 %v1257_v12 }
  0x48   :  { %948 = vmatpush1.bf16.msra.mxu1 %v1260_v13  ;;  %908 = vmatprep.subr.bf16.mxu0 %v1265_v14 }
  0x49   :  { %949 = vmatprep.subr.bf16.mxu1 %v1268_v15 }
  0x4b   :  { %909 = vmatpush1.bf16.msra.mxu0 %v1263_v16 }
  0x4c   :  { %950 = vmatpush1.bf16.msra.mxu1 %v1266_v17  ;;  %910 = vmatprep.subr.bf16.mxu0 %v1271_v18 }
  0x4d   :  { %951 = vmatprep.subr.bf16.mxu1 %v1274_v19 }
  0x4f   :  { %911 = vmatpush1.bf16.msra.mxu0 %v1269_v20 }
  0x50   :  { %952 = vmatpush1.bf16.msra.mxu1 %v1272_v21  ;;  %912 = vmatprep.subr.bf16.mxu0 %v1277_v22  ;;  %v997_v22 = vlaneseq }
  0x51   :  { %953 = vmatprep.subr.bf16.mxu1 %v1280_v23 }
  0x52   :  { %v998_v23 = vshrl.u32 %v997_v22, 7 }
  0x53   :  { %913 = vmatpush1.bf16.msra.mxu0 %v1275_v24 }
  0x54   :  { %954 = vmatpush1.bf16.msra.mxu1 %v1278_v25  ;;  %914 = vmatprep.subr.bf16.mxu0 %v1283_v26  ;;  %v999_v24 = vsub.s32 0, %v998_v23  ;;  %v995_v25 = vld [vmem:[%s1790_s2] sm:$0x3]  ;;  %v1003_v26 = vsub.s32 1, %v998_v23 }
  0x55   :  { %955 = vmatprep.subr.bf16.mxu1 %v1286_v27 }
  0x56   :  { %v1004_v34 = vrot.slane %v995_v25, %v1003_v26 }
  0x57   :  { %915 = vmatpush1.bf16.msra.mxu0 %v1281_v28 }
  0x58   :  { %956 = vmatpush1.bf16.msra.mxu1 %v1284_v29  ;;  %916 = vmatprep.subr.bf16.mxu0 %v1289_v30  ;;  %v1000_v30 = vrot.slane %v995_v25, %v999_v24 }
  0x59   :  { %957 = vmatprep.subr.bf16.mxu1 %v1292_v31 }
  0x5b   :  { %917 = vmatpush1.bf16.msra.mxu0 %v1287_v36 }
  0x5c   :  { %958 = vmatpush1.bf16.msra.mxu1 %v1290_v37  ;;  %918 = vmatprep.subr.bf16.mxu0 %v1295_v38 }
  0x5d   :  { %959 = vmatprep.subr.bf16.mxu1 %v1298_v39 }
  0x5f   :  { %919 = vmatpush1.bf16.msra.mxu0 %v1293_v40 }
  0x60   :  { %960 = vmatpush1.bf16.msra.mxu1 %v1296_v41  ;;  %920 = vmatprep.subr.bf16.mxu0 %v1301_v42 }
  0x61   :  { %961 = vmatprep.subr.bf16.mxu1 %v1304_v43 }
  0x63   :  { %921 = vmatpush1.bf16.msra.mxu0 %v1299_v44 }
  0x64   :  { %962 = vmatpush1.bf16.msra.mxu1 %v1302_v45  ;;  %922 = vmatprep.subr.bf16.mxu0 %v1307_v46 }
  0x65   :  { %963 = vmatprep.subr.bf16.mxu1 %v1310_v47 }
  0x67   :  { %923 = vmatpush1.bf16.msra.mxu0 %v1305_v48 }
  0x68   :  { %964 = vmatpush1.bf16.msra.mxu1 %v1308_v49  ;;  %924 = vmatprep.subr.bf16.mxu0 %v1313_v50 }
  0x69   :  { %965 = vmatprep.subr.bf16.mxu1 %v1316_v51 }
  0x6b   :  { %925 = vmatpush1.bf16.msra.mxu0 %v1311_v52 }
  0x6c   :  { %966 = vmatpush1.bf16.msra.mxu1 %v1314_v53  ;;  %926 = vmatprep.subr.bf16.mxu0 %v1319_v54 }
  0x6d   :  { %967 = vmatprep.subr.bf16.mxu1 %v1322_v55 }
  0x6f   :  { %927 = vmatpush1.bf16.msra.mxu0 %v1317_v56 }
  0x70   :  { %968 = vmatpush1.bf16.msra.mxu1 %v1320_v57  ;;  %928 = vmatprep.subr.bf16.mxu0 %v1325_v58 }
  0x71   :  { %969 = vmatprep.subr.bf16.mxu1 %v1328_v59 }
  0x73   :  { %929 = vmatpush1.bf16.msra.mxu0 %v1323_v60 }
  0x74   :  { %970 = vmatpush1.bf16.msra.mxu1 %v1326_v61  ;;  %930 = vmatprep.subr.bf16.mxu0 %v1331_v62 }
  0x75   :  { %971 = vmatprep.subr.bf16.mxu1 %v1334_v63 }
  0x77   :  { %931 = vmatpush1.bf16.msra.mxu0 %v1329_v0 }
  0x78   :  { %972 = vmatpush1.bf16.msra.mxu1 %v1332_v1  ;;  %932 = vmatprep.subr.bf16.mxu0 %v1337_v2 }
  0x79   :  { %973 = vmatprep.subr.bf16.mxu1 %v1340_v3 }
  0x7b   :  { %933 = vmatpush1.bf16.msra.mxu0 %v1335_v4 }
  0x7c   :  { %974 = vmatpush1.bf16.msra.mxu1 %v1338_v5  ;;  %934 = vmatprep.subr.bf16.mxu0 %v1343_v6 }
  0x7d   :  { %975 = vmatprep.subr.bf16.mxu1 %v1346_v7 }
  0x7f   :  { %935 = vmatpush1.bf16.msra.mxu0 %v1341_v8 }
  0x80   :  { %976 = vmatpush1.bf16.msra.mxu1 %v1344_v9 }
  0x82   :  { %937 = vmatmul.mubr.bf16.vlgmr.msra.gmra.mrb[4].mxu0 %v1019_v10 }
  0x83   :  { %978 = vmatmul.mubr.bf16.vlgmr.msra.gmra.mrb[4].mxu1 %v1021_v11 }
 0x115   :  { %v856_v12 = vpop.f32.mrb[0].mxu0 }
 0x116   :  { %v897_v13 = vpop.f32.mrb[0].mxu1  ;;  %v858_v15 = vpop.f32.mrb[1].mxu0 }
 0x117   :  { %v898_v14 = vadd.f32 %v897_v13, %v856_v12  ;;  %v899_v16 = vpop.f32.mrb[1].mxu1  ;;  %v860_v18 = vpop.f32.mrb[2].mxu0 }
 0x118   :  { %v900_v17 = vadd.f32 %v899_v16, %v858_v15  ;;  %v901_v19 = vpop.f32.mrb[2].mxu1  ;;  %v861_v20 = vpop.f32.mrb[3].mxu0 }
 0x119   :  { %v902_v21 = vpop.f32.mrb[3].mxu1 }
 0x155   :  { %v938_v27 = vpop.f32.mrb[4].mxu0 }
 0x156   :  { %v979_v28 = vpop.f32.mrb[4].mxu1  ;;  %v939_v29 = vadd.f32 %v938_v27, %v898_v14  ;;  %v940_v31 = vpop.f32.mrb[5].mxu0 }
 0x157   :  { %v981_v32 = vpop.f32.mrb[5].mxu1  ;;  %v941_v33 = vadd.f32 %v940_v31, %v900_v17  ;;  %v942_v35 = vpop.f32.mrb[6].mxu0 }
 0x158   :  { %v983_v36 = vpop.f32.mrb[6].mxu1  ;;  %v980_v37 = vadd.f32 %v979_v28, %v939_v29  ;;  %v943_v38 = vpop.f32.mrb[7].mxu0 }
 0x159   :  { %v984_v39 = vpop.f32.mrb[7].mxu1  ;;  %v982_v40 = vadd.f32 %v981_v32, %v941_v33 }
 0x15a   :  { %v1007_v41 = vadd.f32 %v1000_v30, %v980_v37 }
 0x15b   :  { %v1008_v42 = vadd.f32 %v1004_v34, %v982_v40 }
 0x15c   :  { %1009 = vst [vmem:[%s1791_s3] sm:$0xff] %v1007_v41 }
 0x15d   :  { %1010 = vst [vmem:[%s1791_s3 + $0x8] sm:$0xff] %v1008_v42 }

// kernel: deep_koalarization_norm_forward.48
= control target key start
LH: loop header
LB: loop body
LE: loop exit
PB: predicated region body
PF: predicated region fallthrough
CT: control target
= control target key end

     0   :  { %v18_v0 = vlaneseq  ;;  %s88_s1 = inlined_call_operand.vmem [shape: f32[1,256], index: 1, kind: input, shape index: {}]   ;;  %s89_s2 = inlined_call_operand.vmem [shape: f32[1,256], index: 2, kind: input, shape index: {}]   ;;  %s90_s0 = inlined_call_operand.vmem [shape: f32[8,256], index: 0, kind: input, shape index: {}]   ;;  %s91_s3 = inlined_call_operand.vmem [shape: f32[8,256], index: 3, kind: output, shape index: {}]  }
   0x1   :  { %v16_v2 = vld [vmem:[%s88_s1] sm:$0x3]  ;;  %v15_v7 = vld [vmem:[%s90_s0 + $0x8] sm:$0xff] }
   0x2   :  { %v19_v1 = vshrl.u32 %v18_v0, 7  ;;  %v30_v3 = vld [vmem:[%s89_s2] sm:$0x3] }
   0x3   :  { %v14_v6 = vld [vmem:[%s90_s0] sm:$0xff] }
   0x4   :  { %v20_v4 = vsub.s32 0, %v19_v1  ;;  %v24_v5 = vsub.s32 1, %v19_v1 }
   0x6   :  { %v21_v8 = vrot.slane %v16_v2, %v20_v4  ;;  %v35_v9 = vrot.slane %v30_v3, %v20_v4  ;;  %v25_v10 = vrot.slane %v16_v2, %v24_v5  ;;  %v39_v11 = vrot.slane %v30_v3, %v24_v5 }
   0x8   :  { %v28_v12 = vmul.f32 %v21_v8, %v14_v6  ;;  %v29_v13 = vmul.f32 %v25_v10, %v15_v7 }
   0xa   :  { %v42_v14 = vadd.f32 %v35_v9, %v28_v12  ;;  %v43_v15 = vadd.f32 %v39_v11, %v29_v13 }
   0xc   :  { %44 = vst [vmem:[%s91_s3] sm:$0xff] %v42_v14  ;;  %45 = vst [vmem:[%s91_s3 + $0x8] sm:$0xff] %v43_v15 }

// kernel: deep_koalarization_norm_forward.47
= control target key start
LH: loop header
LB: loop body
LE: loop exit
PB: predicated region body
PF: predicated region fallthrough
CT: control target
= control target key end

     0   :  { %vm308_vm0 = vcmask 1040384   ;;  %vm311_vm1 = vcmask 1041408   ;;  %s550_s1 = inlined_call_operand.vmem [shape: bf16[256,256], index: 1, kind: input, shape index: {}]   ;;  %s551_s0 = inlined_call_operand.vmem [shape: bf16[8,256], index: 0, kind: input, shape index: {}]   ;;  %s552_s2 = inlined_call_operand.vmem [shape: f32[8,256], index: 2, kind: input, shape index: {}]   ;;  %s553_s3 = inlined_call_operand.vmem [shape: f32[8,256], index: 3, kind: output, shape index: {0}]   ;;  %s554_s4 = inlined_call_operand.vmem [shape: f32[8,256], index: 4, kind: output, shape index: {1}]  }
   0x1   :  { %v358_v0 = vld [vmem:[%s550_s1 + $0x4] ss:$8 sps:$4 sm:$0xff]   ;;  %v360_v1 = vld [vmem:[%s550_s1] ss:$8 sps:$4 sm:$0xff]   ;;  %v361_v2 = vld [vmem:[%s550_s1 + $0x14] ss:$8 sps:$4 sm:$0xff]  }
   0x2   :  { %224 = vmatprep.subr.bf16.mxu0 %v358_v0  ;;  %v363_v3 = vld [vmem:[%s550_s1 + $0x10] ss:$8 sps:$4 sm:$0xff]   ;;  %v364_v4 = vld [vmem:[%s550_s1 + $0x24] ss:$8 sps:$4 sm:$0xff]   ;;  %v366_v5 = vld [vmem:[%s550_s1 + $0x20] ss:$8 sps:$4 sm:$0xff]  }
   0x3   :  { %225 = vmatpush1.bf16.msra.mxu0 %v360_v1  ;;  %v367_v6 = vld [vmem:[%s550_s1 + $0x34] ss:$8 sps:$4 sm:$0xff]   ;;  %v369_v7 = vld [vmem:[%s550_s1 + $0x30] ss:$8 sps:$4 sm:$0xff]   ;;  %v370_v8 = vld [vmem:[%s550_s1 + $0x44] ss:$8 sps:$4 sm:$0xff]  }
   0x4   :  { %226 = vmatprep.subr.bf16.mxu0 %v361_v2  ;;  %v372_v9 = vld [vmem:[%s550_s1 + $0x40] ss:$8 sps:$4 sm:$0xff]   ;;  %v373_v10 = vld [vmem:[%s550_s1 + $0x54] ss:$8 sps:$4 sm:$0xff]   ;;  %v375_v11 = vld [vmem:[%s550_s1 + $0x50] ss:$8 sps:$4 sm:$0xff]  }
   0x5   :  { %v376_v12 = vld [vmem:[%s550_s1 + $0x64] ss:$8 sps:$4 sm:$0xff]   ;;  %v378_v15 = vld [vmem:[%s550_s1 + $0x60] ss:$8 sps:$4 sm:$0xff]   ;;  %v379_v16 = vld [vmem:[%s550_s1 + $0x74] ss:$8 sps:$4 sm:$0xff]  }
   0x6   :  { %v24_v13 = vld [vmem:[%s551_s0] sm:$0xff]  ;;  %v381_v17 = vld [vmem:[%s550_s1 + $0x70] ss:$8 sps:$4 sm:$0xff]   ;;  %v385_v20 = vld [vmem:[%s550_s1 + $0x94] ss:$8 sps:$4 sm:$0xff]  }
   0x7   :  { %227 = vmatpush1.bf16.msra.mxu0 %v363_v3  ;;  %v325_v14 = vcombine.high %v24_v13, %v24_v13  ;;  %v382_v18 = vld [vmem:[%s550_s1 + $0x84] ss:$8 sps:$4 sm:$0xff]   ;;  %v384_v19 = vld [vmem:[%s550_s1 + $0x80] ss:$8 sps:$4 sm:$0xff]   ;;  %v387_v21 = vld [vmem:[%s550_s1 + $0x90] ss:$8 sps:$4 sm:$0xff]   ;;  %v324_v34 = vcombine.low %v24_v13, %v24_v13 }
   0x8   :  { %228 = vmatprep.subr.bf16.mxu0 %v364_v4  ;;  %v388_v22 = vld [vmem:[%s550_s1 + $0xa4] ss:$8 sps:$4 sm:$0xff]   ;;  %v390_v23 = vld [vmem:[%s550_s1 + $0xa0] ss:$8 sps:$4 sm:$0xff]   ;;  %v391_v24 = vld [vmem:[%s550_s1 + $0xb4] ss:$8 sps:$4 sm:$0xff]  }
   0x9   :  { %256 = vmatprep.mubr.bf16.mxu0 %v325_v14  ;;  %v393_v25 = vld [vmem:[%s550_s1 + $0xb0] ss:$8 sps:$4 sm:$0xff]   ;;  %v394_v26 = vld [vmem:[%s550_s1 + $0xc4] ss:$8 sps:$4 sm:$0xff]   ;;  %v396_v27 = vld [vmem:[%s550_s1 + $0xc0] ss:$8 sps:$4 sm:$0xff]  }
   0xa   :  { %v397_v28 = vld [vmem:[%s550_s1 + $0xd4] ss:$8 sps:$4 sm:$0xff]   ;;  %v399_v29 = vld [vmem:[%s550_s1 + $0xd0] ss:$8 sps:$4 sm:$0xff]   ;;  %v400_v30 = vld [vmem:[%s550_s1 + $0xe4] ss:$8 sps:$4 sm:$0xff]  }
   0xb   :  { %229 = vmatpush1.bf16.msra.mxu0 %v366_v5  ;;  %v402_v31 = vld [vmem:[%s550_s1 + $0xe0] ss:$8 sps:$4 sm:$0xff]   ;;  %v403_v32 = vld [vmem:[%s550_s1 + $0xf4] ss:$8 sps:$4 sm:$0xff]   ;;  %v405_v33 = vld [vmem:[%s550_s1 + $0xf0] ss:$8 sps:$4 sm:$0xff]  }
   0xc   :  { %230 = vmatprep.subr.bf16.mxu0 %v367_v6  ;;  %v274_v35 = vld [vmem:[%s552_s2] sm:$0xff]  ;;  %v275_v36 = vld [vmem:[%s552_s2 + $0x8] sm:$0xff] }
   0xf   :  { %231 = vmatpush1.bf16.msra.mxu0 %v369_v7 }
  0x10   :  { %232 = vmatprep.subr.bf16.mxu0 %v370_v8 }
  0x13   :  { %233 = vmatpush1.bf16.msra.mxu0 %v372_v9 }
  0x14   :  { %234 = vmatprep.subr.bf16.mxu0 %v373_v10 }
  0x17   :  { %235 = vmatpush1.bf16.msra.mxu0 %v375_v11 }
  0x18   :  { %236 = vmatprep.subr.bf16.mxu0 %v376_v12 }
  0x1b   :  { %237 = vmatpush1.bf16.msra.mxu0 %v378_v15 }
  0x1c   :  { %238 = vmatprep.subr.bf16.mxu0 %v379_v16 }
  0x1f   :  { %239 = vmatpush1.bf16.msra.mxu0 %v381_v17 }
  0x20   :  { %240 = vmatprep.subr.bf16.mxu0 %v382_v18 }
  0x23   :  { %241 = vmatpush1.bf16.msra.mxu0 %v384_v19 }
  0x24   :  { %242 = vmatprep.subr.bf16.mxu0 %v385_v20 }
  0x27   :  { %243 = vmatpush1.bf16.msra.mxu0 %v387_v21 }
  0x28   :  { %244 = vmatprep.subr.bf16.mxu0 %v388_v22 }
  0x2b   :  { %245 = vmatpush1.bf16.msra.mxu0 %v390_v23 }
  0x2c   :  { %246 = vmatprep.subr.bf16.mxu0 %v391_v24 }
  0x2f   :  { %247 = vmatpush1.bf16.msra.mxu0 %v393_v25 }
  0x30   :  { %248 = vmatprep.subr.bf16.mxu0 %v394_v26 }
  0x33   :  { %249 = vmatpush1.bf16.msra.mxu0 %v396_v27 }
  0x34   :  { %250 = vmatprep.subr.bf16.mxu0 %v397_v28 }
  0x37   :  { %251 = vmatpush1.bf16.msra.mxu0 %v399_v29 }
  0x38   :  { %252 = vmatprep.subr.bf16.mxu0 %v400_v30 }
  0x3b   :  { %253 = vmatpush1.bf16.msra.mxu0 %v402_v31 }
  0x3c   :  { %254 = vmatprep.subr.bf16.mxu0 %v403_v32 }
  0x3f   :  { %255 = vmatpush1.bf16.msra.mxu0 %v405_v33 }
  0x42   :  { %257 = vmatmul.mubr.bf16.vlgmr.msra.gmra.mrb[0].mxu0 %v324_v34 }
 0x115   :  { %v258_v37 = vpop.f32.mrb[0].mxu0 }
 0x116   :  { %v276_v38 = vadd.f32 %v274_v35, %v258_v37  ;;  %v260_v39 = vpop.f32.mrb[1].mxu0 }
 0x117   :  { %v277_v40 = vadd.f32 %v275_v36, %v260_v39  ;;  %v262_v41 = vpop.f32.mrb[2].mxu0 }
 0x118   :  { %v278_v42 = vmax.f32 %v276_v38, 0.0  ;;  %v263_v43 = vpop.f32.mrb[3].mxu0 }
 0x119   :  { %v279_v44 = vmax.f32 %v277_v40, 0.0 }
 0x11a   :  { %280 = vst [vmem:[%s553_s3] sm:$0xff] %v278_v42  ;;  %v282_v45 = vrot.slane %v278_v42, 4  ;;  %v294_v46 = vmul.f32 %v278_v42, %v278_v42 }
 0x11b   :  { %281 = vst [vmem:[%s553_s3 + $0x8] sm:$0xff] %v279_v44  ;;  %v288_v47 = vrot.slane %v279_v44, 4  ;;  %v295_v48 = vmul.f32 %v279_v44, %v279_v44 }
 0x11c   :  { %v283_v49 = vadd.f32 %v282_v45, %v278_v42  ;;  %v296_v50 = vrot.slane %v294_v46, 4 }
 0x11d   :  { %v289_v51 = vadd.f32 %v288_v47, %v279_v44  ;;  %v302_v52 = vrot.slane %v295_v48, 4 }
 0x11e   :  { %v284_v53 = vrot.slane %v283_v49, 2  ;;  %v297_v54 = vadd.f32 %v296_v50, %v294_v46 }
 0x11f   :  { %v290_v55 = vrot.slane %v289_v51, 2  ;;  %v303_v56 = vadd.f32 %v302_v52, %v295_v48 }
 0x120   :  { %v285_v57 = vadd.f32 %v284_v53, %v283_v49  ;;  %v298_v58 = vrot.slane %v297_v54, 2 }
 0x121   :  { %v291_v59 = vadd.f32 %v290_v55, %v289_v51  ;;  %v304_v60 = vrot.slane %v303_v56, 2 }
 0x122   :  { %v286_v61 = vrot.slane %v285_v57, 1  ;;  %v299_v62 = vadd.f32 %v298_v58, %v297_v54 }
 0x123   :  { %v292_v63 = vrot.slane %v291_v59, 1  ;;  %v305_v0 = vadd.f32 %v304_v60, %v303_v56 }
 0x124   :  { %v300_v1 = vrot.slane %v299_v62, 1  ;;  %v287_v3 = vadd.f32 %v286_v61, %v285_v57 }
 0x125   :  { %v306_v2 = vrot.slane %v305_v0, 1  ;;  %v293_v5 = vadd.f32 %v292_v63, %v291_v59 }
 0x126   :  { %v301_v4 = vadd.f32 %v300_v1, %v299_v62 }
 0x127   :  { %v307_v6 = vadd.f32 %v306_v2, %v305_v0 }
 0x128   :  { %v309_v7 = vsel %vm308_vm0, %v287_v3, %v301_v4 }
 0x129   :  { %v312_v8 = vsel %vm311_vm1, %v309_v7, 0.0  ;;  %v310_v9 = vsel %vm308_vm0, %v293_v5, %v307_v6 }
 0x12a   :  { %314 = vst [vmem:[%s554_s4] sm:$0xff] %v312_v8  ;;  %v313_v10 = vsel %vm311_vm1, %v310_v9, 0.0 }
 0x12b   :  { %315 = vst [vmem:[%s554_s4 + $0x8] sm:$0xff] %v313_v10 }

// kernel: deep_koalarization_norm_forward.49
= control target key start
LH: loop header
LB: loop body
LE: loop exit
PB: predicated region body
PF: predicated region fallthrough
CT: control target
= control target key end

     0   :  { %s961_s15 = smov 0   ;;  %s963_s16 = smov 0   ;;  %s1047_s0 = inlined_call_operand.vmem [shape: bf16[8,2560], index: 0, kind: input, shape index: {}]   ;;  %s1048_s1 = inlined_call_operand.vmem [shape: bf16[2560,128], index: 1, kind: input, shape index: {}]   ;;  %s1049_s2 = inlined_call_operand.vmem [shape: f32[1,128], index: 2, kind: input, shape index: {}]   ;;  %s1050_s3 = inlined_call_operand.vmem [shape: f32[8,128], index: 3, kind: output, shape index: {0}]   ;;  %s1051_s4 = inlined_call_operand.vmem [shape: f32[8,128], index: 4, kind: output, shape index: {1}]  }
   0x1   :  { %s965_s17 = smov 0  }
   0x2 LB: > { %s24_s18 = sadd.s32 1, %s929_s16  ;;  %p758_p0 = scmp.ge.s32.totalorder %s933_s17, 1  ;;  %s933_s17 = sphi %s965_s17, %s15_s17   ;;  %s929_s16 = sphi %s963_s16, %s1053_s16   ;;  %s925_s15 = sphi %s961_s15, %s1052_s15  }
   0x3   : > { %p25_p1 = scmp.ge.s32.totalorder %s24_s18, 5  ;;  %p195_p2 = scmp.lt.s32.totalorder %s933_s17, 6 }
   0x5   : > { %s1055_s18 = smov (%p25_p1, %s24_s18), 0  ;;  %p196_p3 = pnand %p758_p0, %p195_p2 }
   0x6   : > { %s759_s19 = sshll.u32 (!%p196_p3), %s925_s15, 2  ;;  %s761_s20 = sshll.u32 (!%p196_p3), %s925_s15, 6 }
   0x7   : > { %199 = sbr.rel (%p196_p3) target bundleno = 305 (0x131), region = 32  ;;  %p236_p4 = scmp.lt.s32.totalorder (!%p196_p3), %s759_s19, 19 }
   0x8   : > { %p244_p5 = scmp.lt.s32.totalorder (!%p196_p3), %s761_s20, 319  ;;  %p763_p6 = scmp.ne.s32.totalorder (!%p196_p3), %s925_s15, 0 }
   0xe   : > { %s1057_s19 = smov (!%p236_p4, %s759_s19), 19  ;;  %s1059_s20 = smov (!%p244_p5, %s761_s20), 319 }
   0xf   : > { %s760_s21 = sshll.u32 %s1057_s19, 2  ;;  %s762_s25 = sshll.u32 %s1059_s20, 2  ;;  %v935_v0 = vmov (!%p763_p6), 0.0  }
  0x10   : > { %s986_s24 = scalar_lea.vmem %s1047_s0, %s760_s21  ;;  %s991_s28 = scalar_lea.vmem %s1048_s1, %s762_s25  ;;  %262 = vst [vmem:[#allocation2] sm:$0xff] (!%p763_p6), %v935_v0 }
  0x11   : > { %261 = sbr.rel (%p763_p6) target bundleno = 24 (0x18), region = 36 }
  0x18 PF: > { %v875_v1 = vld [vmem:[%s991_s28 + $0x40] sm:$0xff]   ;;  %v879_v5 = vld [vmem:[%s991_s28 + $0x48] sm:$0xff]   ;;  %v883_v9 = vld [vmem:[%s991_s28 + $0x50] sm:$0xff]   ;;  %p800_p7 = scmp.ne.s32.totalorder %s925_s15, 4 }
  0x19   : > { %v876_v2 = vld [vmem:[%s991_s28 + $0xc0] sm:$0xff]   ;;  %806 = vmatprep.subr.bf16.mxu0 %v875_v1  ;;  %v880_v6 = vld [vmem:[%s991_s28 + $0xc8] sm:$0xff]   ;;  %v884_v10 = vld [vmem:[%s991_s28 + $0xd0] sm:$0xff]   ;;  %vm645_vm0 = vcmask (!%p800_p7), 1040384   ;;  %vm647_vm1 = vcmask (!%p800_p7), 1041408  }
  0x1a   : > { %v877_v3 = vld [vmem:[%s991_s28] sm:$0xff]   ;;  %828 = vmatprep.subr.bf16.mxu1 %v876_v2  ;;  %v881_v7 = vld [vmem:[%s991_s28 + $0x8] sm:$0xff]   ;;  %v885_v11 = vld [vmem:[%s991_s28 + $0x10] sm:$0xff]  }
  0x1b   : > { %v878_v4 = vld [vmem:[%s991_s28 + $0x80] sm:$0xff]   ;;  %807 = vmatpush3.bf16.msra.mxu0 %v877_v3  ;;  %v882_v8 = vld [vmem:[%s991_s28 + $0x88] sm:$0xff]   ;;  %v886_v12 = vld [vmem:[%s991_s28 + $0x90] sm:$0xff]  }
  0x1c   : > { %829 = vmatpush3.bf16.msra.mxu1 %v878_v4  ;;  %808 = vmatprep.subr.bf16.mxu0 %v879_v5  ;;  %v887_v13 = vld [vmem:[%s991_s28 + $0x58] sm:$0xff]   ;;  %v891_v17 = vld [vmem:[%s991_s28 + $0x60] sm:$0xff]   ;;  %v895_v21 = vld [vmem:[%s991_s28 + $0x68] sm:$0xff]  }
  0x1d   : > { %830 = vmatprep.subr.bf16.mxu1 %v880_v6  ;;  %v888_v14 = vld [vmem:[%s991_s28 + $0xd8] sm:$0xff]   ;;  %v892_v18 = vld [vmem:[%s991_s28 + $0xe0] sm:$0xff]   ;;  %v896_v22 = vld [vmem:[%s991_s28 + $0xe8] sm:$0xff]  }
  0x1e   : > { %v889_v15 = vld [vmem:[%s991_s28 + $0x18] sm:$0xff]   ;;  %v893_v19 = vld [vmem:[%s991_s28 + $0x20] sm:$0xff]   ;;  %v897_v23 = vld [vmem:[%s991_s28 + $0x28] sm:$0xff]  }
  0x1f   : > { %809 = vmatpush3.bf16.msra.mxu0 %v881_v7  ;;  %v890_v16 = vld [vmem:[%s991_s28 + $0x98] sm:$0xff]   ;;  %v894_v20 = vld [vmem:[%s991_s28 + $0xa0] sm:$0xff]   ;;  %v898_v24 = vld [vmem:[%s991_s28 + $0xa8] sm:$0xff]  }
  0x20   : > { %831 = vmatpush3.bf16.msra.mxu1 %v882_v8  ;;  %810 = vmatprep.subr.bf16.mxu0 %v883_v9  ;;  %v899_v25 = vld [vmem:[%s991_s28 + $0x70] sm:$0xff]   ;;  %v903_v29 = vld [vmem:[%s991_s28 + $0x78] sm:$0xff]   ;;  %v264_v33 = vld [vmem:[%s986_s24] sm:$0xff] }
  0x21   : > { %832 = vmatprep.subr.bf16.mxu1 %v884_v10  ;;  %v900_v26 = vld [vmem:[%s991_s28 + $0xf0] sm:$0xff]   ;;  %v904_v30 = vld [vmem:[%s991_s28 + $0xf8] sm:$0xff]   ;;  %v265_v34 = vld [vmem:[%s986_s24 + $0x8] sm:$0xff]  ;;  %v764_v35 = vcombine.low %v264_v33, %v264_v33  ;;  %v765_v36 = vcombine.high %v264_v33, %v264_v33 }
  0x22   : > { %v901_v27 = vld [vmem:[%s991_s28 + $0x30] sm:$0xff]   ;;  %v905_v31 = vld [vmem:[%s991_s28 + $0x38] sm:$0xff]   ;;  %v766_v37 = vcombine.low %v265_v34, %v265_v34  ;;  %v767_v38 = vcombine.high %v265_v34, %v265_v34  ;;  %v263_v47 = vld [vmem:[#allocation2] sm:$0xff] }
  0x23   : > { %811 = vmatpush3.bf16.msra.mxu0 %v885_v11  ;;  %v902_v28 = vld [vmem:[%s991_s28 + $0xb0] sm:$0xff]   ;;  %v906_v32 = vld [vmem:[%s991_s28 + $0xb8] sm:$0xff]   ;;  %568 = vmatprep.mubr.bf16.mxu0 %v765_v36  ;;  %v801_v53 = vld [vmem:[%s1049_s2] ss:$0 sm:$0xff] (!%p800_p7) }
  0x24   : > { %833 = vmatpush3.bf16.msra.mxu1 %v886_v12  ;;  %812 = vmatprep.subr.bf16.mxu0 %v887_v13 }
  0x25   : > { %834 = vmatprep.subr.bf16.mxu1 %v888_v14  ;;  %608 = vmatprep.mubr.bf16.mxu1 %v767_v38 }
  0x27   : > { %813 = vmatpush3.bf16.msra.mxu0 %v889_v15 }
  0x28   : > { %835 = vmatpush3.bf16.msra.mxu1 %v890_v16  ;;  %814 = vmatprep.subr.bf16.mxu0 %v891_v17 }
  0x29   : > { %836 = vmatprep.subr.bf16.mxu1 %v892_v18 }
  0x2b   : > { %815 = vmatpush3.bf16.msra.mxu0 %v893_v19 }
  0x2c   : > { %837 = vmatpush3.bf16.msra.mxu1 %v894_v20  ;;  %816 = vmatprep.subr.bf16.mxu0 %v895_v21 }
  0x2d   : > { %838 = vmatprep.subr.bf16.mxu1 %v896_v22 }
  0x2f   : > { %817 = vmatpush3.bf16.msra.mxu0 %v897_v23 }
  0x30   : > { %839 = vmatpush3.bf16.msra.mxu1 %v898_v24  ;;  %818 = vmatprep.subr.bf16.mxu0 %v899_v25 }
  0x31   : > { %840 = vmatprep.subr.bf16.mxu1 %v900_v26 }
  0x33   : > { %819 = vmatpush3.bf16.msra.mxu0 %v901_v27 }
  0x34   : > { %841 = vmatpush3.bf16.msra.mxu1 %v902_v28  ;;  %820 = vmatprep.subr.bf16.mxu0 %v903_v29 }
  0x35   : > { %842 = vmatprep.subr.bf16.mxu1 %v904_v30 }
  0x37   : > { %821 = vmatpush3.bf16.msra.mxu0 %v905_v31 }
  0x38   : > { %843 = vmatpush3.bf16.msra.mxu1 %v906_v32 }
  0x3a   : > { %569 = vmatmul.mubr.bf16.vlgmr.msra.gmra.mrb[0].mxu0 %v764_v35 }
  0x3b   : > { %609 = vmatmul.mubr.bf16.vlgmr.msra.gmra.mrb[0].mxu1 %v766_v37 }
 0x10d   : > { %v822_v39 = vpop.f32.mrb[0].mxu0 }
 0x10e   : > { %v844_v40 = vpop.f32.mrb[0].mxu1  ;;  %v823_v41 = vpop.f32.mrb[1].mxu0 }
 0x10f   : > { %v845_v42 = vpop.f32.mrb[1].mxu1  ;;  %v824_v43 = vadd.f32 %v823_v41, %v822_v39  ;;  %v825_v45 = vpop.f32.mrb[2].mxu0 }
 0x110   : > { %v846_v44 = vadd.f32 %v845_v42, %v844_v40  ;;  %v847_v46 = vpop.f32.mrb[2].mxu1  ;;  %v826_v48 = vpop.f32.mrb[3].mxu0  ;;  %621 = sbr.rel (%p800_p7) target bundleno = 305 (0x131), region = 40 }
 0x111   : > { %v848_v49 = vpop.f32.mrb[3].mxu1 }
 0x112   : > { %v611_v50 = vadd.f32 %v846_v44, %v824_v43 }
 0x114   : > { %v616_v51 = vadd.f32 %v611_v50, %v263_v47 }
 0x116   : > { %617 = vst [vmem:[#allocation2] sm:$0xff] %v616_v51 }
 0x11d   : > { %v622_v52 = vld [vmem:[#allocation2] sm:$0xff] }
 0x11e   : > { %v630_v54 = vadd.f32 %v801_v53, %v622_v52 }
 0x120   : > { %631 = vst [vmem:[%s1050_s3] sm:$0xff] %v630_v54  ;;  %v632_v55 = vrot.slane %v630_v54, 4  ;;  %v638_v56 = vmul.f32 %v630_v54, %v630_v54 }
 0x122   : > { %v633_v57 = vadd.f32 %v632_v55, %v630_v54  ;;  %v639_v58 = vrot.slane %v638_v56, 4 }
 0x124   : > { %v634_v59 = vrot.slane %v633_v57, 2  ;;  %v640_v60 = vadd.f32 %v639_v58, %v638_v56 }
 0x126   : > { %v635_v61 = vadd.f32 %v634_v59, %v633_v57  ;;  %v641_v62 = vrot.slane %v640_v60, 2 }
 0x128   : > { %v636_v63 = vrot.slane %v635_v61, 1  ;;  %v642_v0 = vadd.f32 %v641_v62, %v640_v60 }
 0x12a   : > { %v637_v1 = vadd.f32 %v636_v63, %v635_v61  ;;  %v643_v2 = vrot.slane %v642_v0, 1 }
 0x12c   : > { %v644_v3 = vadd.f32 %v643_v2, %v642_v0 }
 0x12e   : > { %v646_v4 = vsel %vm645_vm0, %v637_v1, %v644_v3 }
 0x12f   : > { %v648_v5 = vsel %vm647_vm1, %v646_v4, 0.0 }
 0x130   : > { %649 = vst [vmem:[%s1051_s4] sm:$0xff] %v648_v5 }
 0x131 PF: > { %s15_s17 = sadd.s32 1, %s933_s17   ;;  %s1052_s15 = smov %s929_s16 }
 0x132   : > { %p12_p8 = scmp.ge.s32.totalorder %s15_s17, 7   ;;  %s1053_s16 = smov %s1055_s18 }
 0x134   :  { %14 = sbr.rel (!%p12_p8) target bundleno = 2 (0x2), region = 85 }

// kernel: deep_koalarization_norm_forward.50
= control target key start
LH: loop header
LB: loop body
LE: loop exit
PB: predicated region body
PF: predicated region fallthrough
CT: control target
= control target key end

     0   :  { %s71_s0 = inlined_call_operand.vmem [shape: f32[8,128], index: 0, kind: input, shape index: {}]   ;;  %s72_s1 = inlined_call_operand.vmem [shape: f32[1,128], index: 1, kind: input, shape index: {}]   ;;  %s73_s2 = inlined_call_operand.vmem [shape: f32[1,128], index: 2, kind: input, shape index: {}]   ;;  %s74_s3 = inlined_call_operand.vmem [shape: f32[8,128], index: 3, kind: output, shape index: {}]  }
   0x1   :  { %v14_v0 = vld [vmem:[%s71_s0] sm:$0xff] }
   0x2   :  { %v37_v1 = vld [vmem:[%s72_s1] ss:$0 sm:$0xff] }
   0x3   :  { %v38_v2 = vld [vmem:[%s73_s2] ss:$0 sm:$0xff]  ;;  %v22_v3 = vmul.f32 %v37_v1, %v14_v0 }
   0x5   :  { %v30_v4 = vadd.f32 %v38_v2, %v22_v3 }
   0x7   :  { %v31_v5 = vmax.f32 %v30_v4, 0.0 }
   0x9   :  { %32 = vst [vmem:[%s74_s3] sm:$0xff] %v31_v5 }

// kernel: deep_koalarization_norm_forward.53
= control target key start
LH: loop header
LB: loop body
LE: loop exit
PB: predicated region body
PF: predicated region fallthrough
CT: control target
= control target key end

     0   :  { %vm612_vm0 = vcmask 1040384   ;;  %vm614_vm1 = vcmask 1041408   ;;  %s1009_s1 = inlined_call_operand.vmem [shape: bf16[640,128], index: 1, kind: input, shape index: {}]   ;;  %s1010_s0 = inlined_call_operand.vmem [shape: bf16[32,640], index: 0, kind: input, shape index: {}]   ;;  %s1011_s2 = inlined_call_operand.vmem [shape: f32[1,128], index: 2, kind: input, shape index: {}]   ;;  %s1012_s3 = inlined_call_operand.vmem [shape: f32[32,128], index: 3, kind: output, shape index: {0}]   ;;  %s1013_s4 = inlined_call_operand.vmem [shape: f32[8,128], index: 4, kind: output, shape index: {1}]  }
   0x1   :  { %v762_v0 = vld [vmem:[%s1009_s1 + $0x40] sm:$0xff]   ;;  %v766_v4 = vld [vmem:[%s1009_s1 + $0x48] sm:$0xff]   ;;  %v770_v8 = vld [vmem:[%s1009_s1 + $0x50] sm:$0xff]  }
   0x2   :  { %v763_v1 = vld [vmem:[%s1009_s1 + $0xc0] sm:$0xff]   ;;  %676 = vmatprep.subr.bf16.mxu0 %v762_v0  ;;  %v767_v5 = vld [vmem:[%s1009_s1 + $0xc8] sm:$0xff]   ;;  %v771_v9 = vld [vmem:[%s1009_s1 + $0xd0] sm:$0xff]  }
   0x3   :  { %v764_v2 = vld [vmem:[%s1009_s1] sm:$0xff]   ;;  %704 = vmatprep.subr.bf16.mxu1 %v763_v1  ;;  %v768_v6 = vld [vmem:[%s1009_s1 + $0x8] sm:$0xff]   ;;  %v772_v10 = vld [vmem:[%s1009_s1 + $0x10] sm:$0xff]  }
   0x4   :  { %v765_v3 = vld [vmem:[%s1009_s1 + $0x80] sm:$0xff]   ;;  %677 = vmatpush3.bf16.msra.mxu0 %v764_v2  ;;  %v769_v7 = vld [vmem:[%s1009_s1 + $0x88] sm:$0xff]   ;;  %v773_v11 = vld [vmem:[%s1009_s1 + $0x90] sm:$0xff]  }
   0x5   :  { %705 = vmatpush3.bf16.msra.mxu1 %v765_v3  ;;  %678 = vmatprep.subr.bf16.mxu0 %v766_v4  ;;  %v774_v12 = vld [vmem:[%s1009_s1 + $0x58] sm:$0xff]   ;;  %v778_v16 = vld [vmem:[%s1009_s1 + $0x60] sm:$0xff]   ;;  %v782_v20 = vld [vmem:[%s1009_s1 + $0x68] sm:$0xff]  }
   0x6   :  { %706 = vmatprep.subr.bf16.mxu1 %v767_v5  ;;  %v775_v13 = vld [vmem:[%s1009_s1 + $0xd8] sm:$0xff]   ;;  %v779_v17 = vld [vmem:[%s1009_s1 + $0xe0] sm:$0xff]   ;;  %v783_v21 = vld [vmem:[%s1009_s1 + $0xe8] sm:$0xff]  }
   0x7   :  { %v776_v14 = vld [vmem:[%s1009_s1 + $0x18] sm:$0xff]   ;;  %v780_v18 = vld [vmem:[%s1009_s1 + $0x20] sm:$0xff]   ;;  %v784_v22 = vld [vmem:[%s1009_s1 + $0x28] sm:$0xff]  }
   0x8   :  { %679 = vmatpush3.bf16.msra.mxu0 %v768_v6  ;;  %v777_v15 = vld [vmem:[%s1009_s1 + $0x98] sm:$0xff]   ;;  %v781_v19 = vld [vmem:[%s1009_s1 + $0xa0] sm:$0xff]   ;;  %v785_v23 = vld [vmem:[%s1009_s1 + $0xa8] sm:$0xff]  }
   0x9   :  { %707 = vmatpush3.bf16.msra.mxu1 %v769_v7  ;;  %680 = vmatprep.subr.bf16.mxu0 %v770_v8  ;;  %v786_v24 = vld [vmem:[%s1009_s1 + $0x70] sm:$0xff]   ;;  %v790_v28 = vld [vmem:[%s1009_s1 + $0x78] sm:$0xff]   ;;  %v799_v35 = vld [vmem:[%s1010_s0 + $0xc] ss:$20 sps:$4 sm:$0xff]  }
   0xa   :  { %708 = vmatprep.subr.bf16.mxu1 %v771_v9  ;;  %v787_v25 = vld [vmem:[%s1009_s1 + $0xf0] sm:$0xff]   ;;  %v791_v29 = vld [vmem:[%s1009_s1 + $0xf8] sm:$0xff]   ;;  %v800_v36 = vld [vmem:[%s1009_s1 + $0x100] sm:$0xff]   ;;  %494 = vmatprep.mubr.bf16.mxu1 %v799_v35 }
   0xb   :  { %v788_v26 = vld [vmem:[%s1009_s1 + $0x30] sm:$0xff]   ;;  %v792_v30 = vld [vmem:[%s1009_s1 + $0x38] sm:$0xff]   ;;  %v801_v37 = vld [vmem:[%s1009_s1 + $0x108] sm:$0xff]  }
   0xc   :  { %681 = vmatpush3.bf16.msra.mxu0 %v772_v10  ;;  %v789_v27 = vld [vmem:[%s1009_s1 + $0xb0] sm:$0xff]   ;;  %v793_v31 = vld [vmem:[%s1009_s1 + $0xb8] sm:$0xff]   ;;  %v805_v39 = vld [vmem:[%s1010_s0 + $0x2c] ss:$20 sps:$4 sm:$0xff]  }
   0xd   :  { %709 = vmatpush3.bf16.msra.mxu1 %v773_v11  ;;  %682 = vmatprep.subr.bf16.mxu0 %v774_v12  ;;  %v794_v32 = vld [vmem:[%s1010_s0] ss:$20 sps:$4 sm:$0xff]   ;;  %v796_v33 = vld [vmem:[%s1010_s0 + $0x4] ss:$20 sps:$4 sm:$0xff]   ;;  %v797_v34 = vld [vmem:[%s1010_s0 + $0x8] ss:$20 sps:$4 sm:$0xff]  }
   0xe   :  { %710 = vmatprep.subr.bf16.mxu1 %v775_v13  ;;  %445 = vmatprep.mubr.bf16.mxu0 %v796_v33  ;;  %v802_v38 = vld [vmem:[%s1009_s1 + $0x110] sm:$0xff]   ;;  %v803_v41 = vld [vmem:[%s1009_s1 + $0x118] sm:$0xff]   ;;  %v804_v45 = vld [vmem:[%s1009_s1 + $0x120] sm:$0xff]  }
   0xf   :  { %v807_v40 = vld [vmem:[%s1010_s0 + $0x34] ss:$20 sps:$4 sm:$0xff]   ;;  %v811_v43 = vld [vmem:[%s1010_s0 + $0x30] ss:$20 sps:$4 sm:$0xff]   ;;  %v813_v48 = vld [vmem:[%s1009_s1 + $0x138] sm:$0xff]  }
  0x10   :  { %683 = vmatpush3.bf16.msra.mxu0 %v776_v14  ;;  %v810_v42 = vld [vmem:[%s1010_s0 + $0x28] ss:$20 sps:$4 sm:$0xff]   ;;  %v814_v44 = vld [vmem:[%s1010_s0 + $0x10] ss:$20 sps:$4 sm:$0xff]   ;;  %v815_v49 = vld [vmem:[%s1010_s0 + $0x38] ss:$20 sps:$4 sm:$0xff]  }
  0x11   :  { %711 = vmatpush3.bf16.msra.mxu1 %v777_v15  ;;  %684 = vmatprep.subr.bf16.mxu0 %v778_v16  ;;  %v809_v46 = vld [vmem:[%s1009_s1 + $0x128] sm:$0xff]   ;;  %v812_v47 = vld [vmem:[%s1009_s1 + $0x130] sm:$0xff]   ;;  %v675_v15 = vld [vmem:[%s1011_s2] ss:$0 sm:$0xff] }
  0x12   :  { %712 = vmatprep.subr.bf16.mxu1 %v779_v17 }
  0x14   :  { %685 = vmatpush3.bf16.msra.mxu0 %v780_v18 }
  0x15   :  { %713 = vmatpush3.bf16.msra.mxu1 %v781_v19  ;;  %686 = vmatprep.subr.bf16.mxu0 %v782_v20 }
  0x16   :  { %714 = vmatprep.subr.bf16.mxu1 %v783_v21 }
  0x18   :  { %687 = vmatpush3.bf16.msra.mxu0 %v784_v22 }
  0x19   :  { %715 = vmatpush3.bf16.msra.mxu1 %v785_v23  ;;  %688 = vmatprep.subr.bf16.mxu0 %v786_v24 }
  0x1a   :  { %716 = vmatprep.subr.bf16.mxu1 %v787_v25 }
  0x1c   :  { %689 = vmatpush3.bf16.msra.mxu0 %v788_v26 }
  0x1d   :  { %717 = vmatpush3.bf16.msra.mxu1 %v789_v27  ;;  %690 = vmatprep.subr.bf16.mxu0 %v790_v28 }
  0x1e   :  { %718 = vmatprep.subr.bf16.mxu1 %v791_v29 }
  0x20   :  { %691 = vmatpush3.bf16.msra.mxu0 %v792_v30 }
  0x21   :  { %719 = vmatpush3.bf16.msra.mxu1 %v793_v31  ;;  %742 = vmatprep.subr.bf16.mxu0 %v800_v36 }
  0x23   :  { %446 = vmatmul.mubr.bf16.vlgmr.msra.gmra.mrb[0].mxu0 %v794_v32 }
  0x24   :  { %495 = vmatmul.mubr.bf16.vlgmr.msra.gmra.mrb[0].mxu1 %v797_v34  ;;  %743 = vmatpush3.bf16.msra.mxu0 %v800_v36 }
  0x25   :  { %744 = vmatprep.subr.bf16.mxu0 %v801_v37  ;;  %453 = vmatprep.mubr.bf16.mxu0 %v805_v39 }
  0x26   :  { %502 = vmatprep.mubr.bf16.mxu1 %v807_v40 }
  0x28   :  { %745 = vmatpush3.bf16.msra.mxu0 %v801_v37 }
  0x29   :  { %746 = vmatprep.subr.bf16.mxu0 %v802_v38 }
  0x2b   :  { %454 = vmatmul.mubr.bf16.gmra.mrb[4].mxu0 %v810_v42 }
  0x2c   :  { %503 = vmatmul.mubr.bf16.gmra.mrb[4].mxu1 %v811_v43  ;;  %747 = vmatpush3.bf16.msra.mxu0 %v802_v38 }
  0x2d   :  { %748 = vmatprep.subr.bf16.mxu0 %v803_v41  ;;  %758 = vmatprep.mubr.bf16.mxu0 %v814_v44 }
  0x30   :  { %749 = vmatpush3.bf16.msra.mxu0 %v803_v41 }
  0x31   :  { %750 = vmatprep.subr.bf16.mxu0 %v804_v45 }
  0x34   :  { %751 = vmatpush3.bf16.msra.mxu0 %v804_v45 }
  0x35   :  { %752 = vmatprep.subr.bf16.mxu0 %v809_v46 }
  0x38   :  { %753 = vmatpush3.bf16.msra.mxu0 %v809_v46 }
  0x39   :  { %754 = vmatprep.subr.bf16.mxu0 %v812_v47 }
  0x3c   :  { %755 = vmatpush3.bf16.msra.mxu0 %v812_v47 }
  0x3d   :  { %756 = vmatprep.subr.bf16.mxu0 %v813_v48 }
  0x40   :  { %757 = vmatpush3.bf16.msra.mxu0 %v813_v48 }
  0x43   :  { %759 = vmatmul.mubr.bf16.vlgmr.msra.gmra.mrb[8].mxu0 %v815_v49 }
  0xf6   :  { %v692_v50 = vpop.f32.mrb[0].mxu0 }
  0xf7   :  { %v720_v51 = vpop.f32.mrb[0].mxu1  ;;  %v693_v52 = vpop.f32.mrb[1].mxu0 }
  0xf8   :  { %v694_v53 = vadd.f32 %v693_v52, %v692_v50  ;;  %v721_v54 = vpop.f32.mrb[1].mxu1  ;;  %v695_v55 = vpop.f32.mrb[2].mxu0 }
  0xf9   :  { %v722_v56 = vadd.f32 %v721_v54, %v720_v51  ;;  %v723_v57 = vpop.f32.mrb[2].mxu1  ;;  %v696_v58 = vpop.f32.mrb[3].mxu0 }
  0xfa   :  { %v697_v59 = vadd.f32 %v696_v58, %v695_v55  ;;  %v724_v60 = vpop.f32.mrb[3].mxu1 }
  0xfb   :  { %v725_v61 = vadd.f32 %v724_v60, %v723_v57  ;;  %v497_v62 = vadd.f32 %v722_v56, %v694_v53 }
  0xfd   :  { %v500_v63 = vadd.f32 %v725_v61, %v697_v59 }
  0xfe   :  { %v698_v0 = vpop.f32.mrb[4].mxu0 }
  0xff   :  { %v726_v1 = vpop.f32.mrb[4].mxu1  ;;  %v699_v2 = vpop.f32.mrb[5].mxu0 }
 0x100   :  { %v700_v3 = vadd.f32 %v699_v2, %v698_v0  ;;  %v727_v4 = vpop.f32.mrb[5].mxu1  ;;  %v701_v5 = vpop.f32.mrb[6].mxu0 }
 0x101   :  { %v728_v6 = vadd.f32 %v727_v4, %v726_v1  ;;  %v729_v7 = vpop.f32.mrb[6].mxu1  ;;  %v702_v8 = vpop.f32.mrb[7].mxu0 }
 0x102   :  { %v703_v9 = vadd.f32 %v702_v8, %v701_v5  ;;  %v730_v10 = vpop.f32.mrb[7].mxu1 }
 0x103   :  { %v731_v11 = vadd.f32 %v730_v10, %v729_v7  ;;  %v505_v12 = vadd.f32 %v728_v6, %v700_v3 }
 0x105   :  { %v508_v13 = vadd.f32 %v731_v11, %v703_v9 }
 0x116   :  { %v760_v14 = vpop.f32.mrb[8].mxu0 }
 0x117   :  { %v554_v16 = vadd.f32 %v760_v14, %v505_v12  ;;  %v545_v17 = vpop.f32.mrb[9].mxu0 }
 0x118   :  { %v546_v18 = vadd.f32 %v545_v17, %v497_v62  ;;  %v761_v19 = vpop.f32.mrb[10].mxu0 }
 0x119   :  { %v584_v20 = vadd.f32 %v675_v15, %v554_v16  ;;  %v557_v21 = vadd.f32 %v761_v19, %v508_v13  ;;  %v548_v22 = vpop.f32.mrb[11].mxu0 }
 0x11a   :  { %v582_v23 = vadd.f32 %v675_v15, %v546_v18  ;;  %v549_v24 = vadd.f32 %v548_v22, %v500_v63 }
 0x11b   :  { %588 = vst [vmem:[%s1012_s3 + $0x10] sm:$0xff] %v584_v20  ;;  %v585_v25 = vadd.f32 %v675_v15, %v557_v21  ;;  %v601_v30 = vmul.f32 %v584_v20, %v584_v20 }
 0x11c   :  { %586 = vst [vmem:[%s1012_s3] sm:$0xff] %v582_v23  ;;  %v583_v26 = vadd.f32 %v675_v15, %v549_v24  ;;  %v599_v27 = vmul.f32 %v582_v23, %v582_v23 }
 0x11d   :  { %589 = vst [vmem:[%s1012_s3 + $0x18] sm:$0xff] %v585_v25  ;;  %v602_v33 = vmul.f32 %v585_v25, %v585_v25 }
 0x11e   :  { %587 = vst [vmem:[%s1012_s3 + $0x8] sm:$0xff] %v583_v26  ;;  %v590_v28 = vadd.f32 %v583_v26, %v582_v23  ;;  %v600_v29 = vmul.f32 %v583_v26, %v583_v26 }
 0x120   :  { %v591_v31 = vadd.f32 %v590_v28, %v584_v20  ;;  %v603_v32 = vadd.f32 %v600_v29, %v599_v27 }
 0x122   :  { %v592_v34 = vadd.f32 %v591_v31, %v585_v25  ;;  %v604_v35 = vadd.f32 %v603_v32, %v601_v30 }
 0x124   :  { %v593_v36 = vrot.slane %v592_v34, 4  ;;  %v605_v37 = vadd.f32 %v604_v35, %v602_v33 }
 0x126   :  { %v594_v38 = vadd.f32 %v593_v36, %v592_v34  ;;  %v606_v39 = vrot.slane %v605_v37, 4 }
 0x128   :  { %v595_v40 = vrot.slane %v594_v38, 2  ;;  %v607_v41 = vadd.f32 %v606_v39, %v605_v37 }
 0x12a   :  { %v596_v42 = vadd.f32 %v595_v40, %v594_v38  ;;  %v608_v43 = vrot.slane %v607_v41, 2 }
 0x12c   :  { %v597_v44 = vrot.slane %v596_v42, 1  ;;  %v609_v45 = vadd.f32 %v608_v43, %v607_v41 }
 0x12e   :  { %v610_v46 = vrot.slane %v609_v45, 1  ;;  %v598_v47 = vadd.f32 %v597_v44, %v596_v42 }
 0x130   :  { %v611_v48 = vadd.f32 %v610_v46, %v609_v45 }
 0x132   :  { %v613_v49 = vsel %vm612_vm0, %v598_v47, %v611_v48 }
 0x133   :  { %v615_v50 = vsel %vm614_vm1, %v613_v49, 0.0 }
 0x134   :  { %616 = vst [vmem:[%s1013_s4] sm:$0xff] %v615_v50 }

// kernel: deep_koalarization_norm_forward.57
= control target key start
LH: loop header
LB: loop body
LE: loop exit
PB: predicated region body
PF: predicated region fallthrough
CT: control target
= control target key end

     0   :  { %s1195_s1 = inlined_call_operand.vmem [shape: bf16[384,128], index: 1, kind: input, shape index: {}]   ;;  %s1196_s0 = inlined_call_operand.vmem [shape: bf16[128,384], index: 0, kind: input, shape index: {}]   ;;  %s1197_s2 = inlined_call_operand.vmem [shape: f32[1,128], index: 2, kind: input, shape index: {}]   ;;  %s1198_s3 = inlined_call_operand.vmem [shape: f32[128,128], index: 3, kind: output, shape index: {}]  }
   0x1   :  { %v868_v0 = vld [vmem:[%s1195_s1 + $0x40] sm:$0xff]   ;;  %v871_v3 = vld [vmem:[%s1195_s1 + $0x48] sm:$0xff]   ;;  %v874_v6 = vld [vmem:[%s1195_s1 + $0x50] sm:$0xff]  }
   0x2   :  { %v869_v1 = vld [vmem:[%s1195_s1] sm:$0xff]   ;;  %756 = vmatprep.subr.bf16.mxu0 %v868_v0  ;;  %v872_v4 = vld [vmem:[%s1195_s1 + $0x8] sm:$0xff]   ;;  %v875_v7 = vld [vmem:[%s1195_s1 + $0x10] sm:$0xff]  }
   0x3   :  { %v870_v2 = vld [vmem:[%s1195_s1 + $0x80] sm:$0xff]   ;;  %757 = vmatpush3.bf16.msra.mxu0 %v869_v1  ;;  %v873_v5 = vld [vmem:[%s1195_s1 + $0x88] sm:$0xff]   ;;  %v876_v8 = vld [vmem:[%s1195_s1 + $0x90] sm:$0xff]  }
   0x4   :  { %836 = vmatprep.subr.bf16.mxu1 %v870_v2  ;;  %758 = vmatprep.subr.bf16.mxu0 %v871_v3  ;;  %v877_v9 = vld [vmem:[%s1195_s1 + $0x58] sm:$0xff]   ;;  %v880_v12 = vld [vmem:[%s1195_s1 + $0x60] sm:$0xff]   ;;  %v883_v15 = vld [vmem:[%s1195_s1 + $0x68] sm:$0xff]  }
   0x5   :  { %837 = vmatpush3.bf16.msra.mxu1 %v870_v2  ;;  %v878_v10 = vld [vmem:[%s1195_s1 + $0x18] sm:$0xff]   ;;  %v882_v13 = vld [vmem:[%s1195_s1 + $0xa0] sm:$0xff]   ;;  %v885_v16 = vld [vmem:[%s1195_s1 + $0xa8] sm:$0xff]  }
   0x6   :  { %838 = vmatprep.subr.bf16.mxu1 %v873_v5  ;;  %v879_v11 = vld [vmem:[%s1195_s1 + $0x98] sm:$0xff]   ;;  %v881_v14 = vld [vmem:[%s1195_s1 + $0x20] sm:$0xff]   ;;  %v884_v17 = vld [vmem:[%s1195_s1 + $0x28] sm:$0xff]  }
   0x7   :  { %759 = vmatpush3.bf16.msra.mxu0 %v872_v4  ;;  %v886_v18 = vld [vmem:[%s1195_s1 + $0x70] sm:$0xff]   ;;  %v889_v21 = vld [vmem:[%s1195_s1 + $0x78] sm:$0xff]   ;;  %v892_v26 = vld [vmem:[%s1196_s0] ss:$12 sps:$4 sm:$0xff]  }
   0x8   :  { %760 = vmatprep.subr.bf16.mxu0 %v874_v6  ;;  %v887_v19 = vld [vmem:[%s1195_s1 + $0x30] sm:$0xff]   ;;  %v891_v22 = vld [vmem:[%s1195_s1 + $0xb8] sm:$0xff]   ;;  %v896_v28 = vld [vmem:[%s1196_s0 + $0x20] ss:$12 sps:$4 sm:$0xff]  }
   0x9   :  { %839 = vmatpush3.bf16.msra.mxu1 %v873_v5  ;;  %v888_v20 = vld [vmem:[%s1195_s1 + $0xb0] sm:$0xff]   ;;  %v890_v25 = vld [vmem:[%s1195_s1 + $0x38] sm:$0xff]   ;;  %v912_v36 = vld [vmem:[%s1196_s0 + $0x80] ss:$12 sps:$4 sm:$0xff]  }
   0xa   :  { %840 = vmatprep.subr.bf16.mxu1 %v876_v8  ;;  %v894_v23 = vld [vmem:[%s1196_s0 + $0x4] ss:$12 sps:$4 sm:$0xff]   ;;  %v895_v24 = vld [vmem:[%s1196_s0 + $0x8] ss:$12 sps:$4 sm:$0xff]   ;;  %v905_v35 = vld [vmem:[%s1196_s0 + $0x4c] ss:$12 sps:$4 sm:$0xff]  }
   0xb   :  { %761 = vmatpush3.bf16.msra.mxu0 %v875_v7  ;;  %435 = vmatprep.mubr.bf16.mxu0 %v894_v23  ;;  %v897_v27 = vld [vmem:[%s1196_s0 + $0x1c] ss:$12 sps:$4 sm:$0xff]   ;;  %v903_v29 = vld [vmem:[%s1196_s0 + $0x38] ss:$12 sps:$4 sm:$0xff]   ;;  %v900_v31 = vld [vmem:[%s1196_s0 + $0x34] ss:$12 sps:$4 sm:$0xff]  }
   0xc   :  { %762 = vmatprep.subr.bf16.mxu0 %v877_v9  ;;  %852 = vmatprep.mubr.bf16.mxu1 %v895_v24  ;;  %v899_v30 = vld [vmem:[%s1196_s0 + $0x18] ss:$12 sps:$4 sm:$0xff]   ;;  %v904_v32 = vld [vmem:[%s1196_s0 + $0x50] ss:$12 sps:$4 sm:$0xff]   ;;  %v911_v33 = vld [vmem:[%s1196_s0 + $0x68] ss:$12 sps:$4 sm:$0xff]  }
   0xd   :  { %841 = vmatpush3.bf16.msra.mxu1 %v876_v8  ;;  %v902_v34 = vld [vmem:[%s1196_s0 + $0x30] ss:$12 sps:$4 sm:$0xff]   ;;  %v919_v37 = vld [vmem:[%s1196_s0 + $0x98] ss:$12 sps:$4 sm:$0xff]   ;;  %v907_v38 = vld [vmem:[%s1196_s0 + $0x48] ss:$12 sps:$4 sm:$0xff]  }
   0xe   :  { %842 = vmatprep.subr.bf16.mxu1 %v879_v11  ;;  %v908_v39 = vld [vmem:[%s1196_s0 + $0x64] ss:$12 sps:$4 sm:$0xff]   ;;  %v910_v41 = vld [vmem:[%s1196_s0 + $0x60] ss:$12 sps:$4 sm:$0xff]   ;;  %v913_v42 = vld [vmem:[%s1196_s0 + $0x7c] ss:$12 sps:$4 sm:$0xff]  }
   0xf   :  { %763 = vmatpush3.bf16.msra.mxu0 %v878_v10  ;;  %v920_v40 = vld [vmem:[%s1196_s0 + $0xb0] ss:$12 sps:$4 sm:$0xff]   ;;  %v915_v43 = vld [vmem:[%s1196_s0 + $0x78] ss:$12 sps:$4 sm:$0xff]   ;;  %v916_v44 = vld [vmem:[%s1196_s0 + $0x94] ss:$12 sps:$4 sm:$0xff]  }
  0x10   :  { %764 = vmatprep.subr.bf16.mxu0 %v880_v12  ;;  %v918_v45 = vld [vmem:[%s1196_s0 + $0x90] ss:$12 sps:$4 sm:$0xff]   ;;  %v921_v46 = vld [vmem:[%s1196_s0 + $0xac] ss:$12 sps:$4 sm:$0xff]   ;;  %v923_v47 = vld [vmem:[%s1196_s0 + $0xa8] ss:$12 sps:$4 sm:$0xff]  }
  0x11   :  { %843 = vmatpush3.bf16.msra.mxu1 %v879_v11  ;;  %v1123_v55 = vld [vmem:[%s1197_s2] ss:$0 sm:$0xff] }
  0x12   :  { %844 = vmatprep.subr.bf16.mxu1 %v882_v13 }
  0x13   :  { %765 = vmatpush3.bf16.msra.mxu0 %v881_v14 }
  0x14   :  { %766 = vmatprep.subr.bf16.mxu0 %v883_v15 }
  0x15   :  { %845 = vmatpush3.bf16.msra.mxu1 %v882_v13 }
  0x16   :  { %846 = vmatprep.subr.bf16.mxu1 %v885_v16 }
  0x17   :  { %767 = vmatpush3.bf16.msra.mxu0 %v884_v17 }
  0x18   :  { %768 = vmatprep.subr.bf16.mxu0 %v886_v18 }
  0x19   :  { %847 = vmatpush3.bf16.msra.mxu1 %v885_v16 }
  0x1a   :  { %848 = vmatprep.subr.bf16.mxu1 %v888_v20 }
  0x1b   :  { %769 = vmatpush3.bf16.msra.mxu0 %v887_v19 }
  0x1c   :  { %770 = vmatprep.subr.bf16.mxu0 %v889_v21 }
  0x1d   :  { %849 = vmatpush3.bf16.msra.mxu1 %v888_v20 }
  0x1e   :  { %850 = vmatprep.subr.bf16.mxu1 %v891_v22 }
  0x1f   :  { %771 = vmatpush3.bf16.msra.mxu0 %v890_v25 }
  0x21   :  { %851 = vmatpush3.bf16.msra.mxu1 %v891_v22 }
  0x22   :  { %436 = vmatmul.mubr.bf16.vlgmr.msra.gmra.mrb[0].mxu0 %v892_v26 }
  0x23   :  { %443 = vmatprep.mubr.bf16.mxu0 %v897_v27 }
  0x24   :  { %853 = vmatmul.mubr.bf16.vlgmr.msra.gmra.mrb[0].mxu1 %v896_v28 }
  0x25   :  { %856 = vmatprep.mubr.bf16.mxu1 %v903_v29 }
  0x2a   :  { %444 = vmatmul.mubr.bf16.gmra.mrb[4].mxu0 %v899_v30 }
  0x2b   :  { %451 = vmatprep.mubr.bf16.mxu0 %v900_v31 }
  0x2c   :  { %857 = vmatmul.mubr.bf16.gmra.mrb[4].mxu1 %v904_v32 }
  0x2d   :  { %860 = vmatprep.mubr.bf16.mxu1 %v911_v33 }
  0x32   :  { %452 = vmatmul.mubr.bf16.gmra.mrb[8].mxu0 %v902_v34 }
  0x33   :  { %459 = vmatprep.mubr.bf16.mxu0 %v905_v35 }
  0x34   :  { %861 = vmatmul.mubr.bf16.gmra.mrb[8].mxu1 %v912_v36 }
  0x35   :  { %864 = vmatprep.mubr.bf16.mxu1 %v919_v37 }
  0x3a   :  { %460 = vmatmul.mubr.bf16.gmra.mrb[12].mxu0 %v907_v38 }
  0x3b   :  { %467 = vmatprep.mubr.bf16.mxu0 %v908_v39 }
  0x3c   :  { %865 = vmatmul.mubr.bf16.gmra.mrb[12].mxu1 %v920_v40 }
  0x42   :  { %468 = vmatmul.mubr.bf16.gmra.mrb[16].mxu0 %v910_v41 }
  0x43   :  { %475 = vmatprep.mubr.bf16.mxu0 %v913_v42 }
  0x4a   :  { %476 = vmatmul.mubr.bf16.gmra.mrb[20].mxu0 %v915_v43 }
  0x4b   :  { %483 = vmatprep.mubr.bf16.mxu0 %v916_v44 }
  0x52   :  { %484 = vmatmul.mubr.bf16.gmra.mrb[24].mxu0 %v918_v45 }
  0x53   :  { %491 = vmatprep.mubr.bf16.mxu0 %v921_v46 }
  0x5a   :  { %492 = vmatmul.mubr.bf16.gmra.mrb[28].mxu0 %v923_v47 }
  0xf5   :  { %v772_v48 = vpop.f32.mrb[0].mxu0 }
  0xf6   :  { %v773_v49 = vpop.f32.mrb[1].mxu0 }
  0xf7   :  { %v774_v50 = vadd.f32 %v773_v49, %v772_v48  ;;  %v775_v51 = vpop.f32.mrb[2].mxu0  ;;  %v854_v52 = vpop.f32.mrb[0].mxu1 }
  0xf8   :  { %v776_v53 = vpop.f32.mrb[3].mxu0  ;;  %v534_v54 = vpop.f32.mrb[1].mxu1 }
  0xf9   :  { %v777_v56 = vadd.f32 %v776_v53, %v775_v51  ;;  %v535_v57 = vadd.f32 %v774_v50, %v534_v54  ;;  %v855_v58 = vpop.f32.mrb[2].mxu1 }
  0xfa   :  { %v537_v59 = vpop.f32.mrb[3].mxu1 }
  0xfb   :  { %v655_v60 = vadd.f32 %v1123_v55, %v535_v57  ;;  %v538_v61 = vadd.f32 %v777_v56, %v537_v59 }
  0xfd   :  { %924 = vtanh.f32 %v655_v60  ;;  %v656_v62 = vadd.f32 %v1123_v55, %v538_v61  ;;  %v778_v63 = vpop.f32.mrb[4].mxu0 }
  0xfe   :  { %v779_v0 = vpop.f32.mrb[5].mxu0 }
  0xff   :  { %926 = vtanh.f32 %v656_v62  ;;  %v780_v1 = vadd.f32 %v779_v0, %v778_v63  ;;  %v781_v2 = vpop.f32.mrb[6].mxu0  ;;  %v858_v3 = vpop.f32.mrb[4].mxu1 }
 0x100   :  { %v782_v4 = vpop.f32.mrb[7].mxu0  ;;  %v550_v5 = vpop.f32.mrb[5].mxu1 }
 0x101   :  { %v543_v6 = vadd.f32 %v854_v52, %v780_v1  ;;  %v783_v7 = vadd.f32 %v782_v4, %v781_v2  ;;  %v859_v8 = vpop.f32.mrb[6].mxu1 }
 0x102   :  { %v553_v9 = vpop.f32.mrb[7].mxu1 }
 0x103   :  { %v657_v10 = vadd.f32 %v1123_v55, %v543_v6  ;;  %v546_v11 = vadd.f32 %v855_v58, %v783_v7 }
 0x105   :  { %928 = vtanh.f32 %v657_v10  ;;  %v658_v12 = vadd.f32 %v1123_v55, %v546_v11  ;;  %v784_v13 = vpop.f32.mrb[8].mxu0 }
 0x106   :  { %v785_v14 = vpop.f32.mrb[9].mxu0 }
 0x107   :  { %v925_v15 = vpop.eup %924  ;;  %930 = vtanh.f32 %v658_v12  ;;  %v786_v16 = vadd.f32 %v785_v14, %v784_v13  ;;  %v787_v17 = vpop.f32.mrb[10].mxu0 }
 0x108   :  { %v862_v18 = vpop.f32.mrb[8].mxu1  ;;  %687 = vst [vmem:[%s1198_s3] sm:$0xff] %v925_v15  ;;  %v788_v19 = vpop.f32.mrb[11].mxu0 }
 0x109   :  { %v566_v20 = vpop.f32.mrb[9].mxu1  ;;  %v927_v21 = vpop.eup %926  ;;  %v789_v22 = vadd.f32 %v788_v19, %v787_v17  ;;  %v551_v23 = vadd.f32 %v786_v16, %v550_v5 }
 0x10a   :  { %v863_v24 = vpop.f32.mrb[10].mxu1  ;;  %688 = vst [vmem:[%s1198_s3 + $0x8] sm:$0xff] %v927_v21 }
 0x10b   :  { %v569_v25 = vpop.f32.mrb[11].mxu1  ;;  %v659_v26 = vadd.f32 %v1123_v55, %v551_v23  ;;  %v554_v27 = vadd.f32 %v789_v22, %v553_v9 }
 0x10d   :  { %932 = vtanh.f32 %v659_v26  ;;  %v660_v28 = vadd.f32 %v1123_v55, %v554_v27  ;;  %v790_v29 = vpop.f32.mrb[12].mxu0 }
 0x10e   :  { %v791_v30 = vpop.f32.mrb[13].mxu0 }
 0x10f   :  { %v929_v31 = vpop.eup %928  ;;  %934 = vtanh.f32 %v660_v28  ;;  %v792_v32 = vadd.f32 %v791_v30, %v790_v29  ;;  %v793_v33 = vpop.f32.mrb[14].mxu0 }
 0x110   :  { %v1137_v34 = vpop.f32.mrb[12].mxu1  ;;  %689 = vst [vmem:[%s1198_s3 + $0x10] sm:$0xff] %v929_v31  ;;  %v794_v35 = vpop.f32.mrb[15].mxu0 }
 0x111   :  { %v582_v36 = vpop.f32.mrb[13].mxu1  ;;  %v931_v37 = vpop.eup %930  ;;  %v559_v38 = vadd.f32 %v858_v3, %v792_v32  ;;  %v795_v39 = vadd.f32 %v794_v35, %v793_v33 }
 0x112   :  { %v1142_v40 = vpop.f32.mrb[14].mxu1  ;;  %690 = vst [vmem:[%s1198_s3 + $0x18] sm:$0xff] %v931_v37 }
 0x113   :  { %v585_v41 = vpop.f32.mrb[15].mxu1  ;;  %v661_v42 = vadd.f32 %v1123_v55, %v559_v38  ;;  %v562_v43 = vadd.f32 %v859_v8, %v795_v39 }
 0x115   :  { %936 = vtanh.f32 %v661_v42  ;;  %v662_v44 = vadd.f32 %v1123_v55, %v562_v43  ;;  %v796_v45 = vpop.f32.mrb[16].mxu0 }
 0x116   :  { %v797_v46 = vpop.f32.mrb[17].mxu0 }
 0x117   :  { %v933_v47 = vpop.eup %932  ;;  %938 = vtanh.f32 %v662_v44  ;;  %v798_v48 = vadd.f32 %v797_v46, %v796_v45  ;;  %v799_v49 = vpop.f32.mrb[18].mxu0 }
 0x118   :  { %691 = vst [vmem:[%s1198_s3 + $0x20] sm:$0xff] %v933_v47  ;;  %v800_v50 = vpop.f32.mrb[19].mxu0 }
 0x119   :  { %v935_v51 = vpop.eup %934  ;;  %v801_v52 = vadd.f32 %v800_v50, %v799_v49  ;;  %v567_v53 = vadd.f32 %v798_v48, %v566_v20 }
 0x11a   :  { %692 = vst [vmem:[%s1198_s3 + $0x28] sm:$0xff] %v935_v51 }
 0x11b   :  { %v663_v54 = vadd.f32 %v1123_v55, %v567_v53  ;;  %v570_v56 = vadd.f32 %v801_v52, %v569_v25 }
 0x11d   :  { %940 = vtanh.f32 %v663_v54  ;;  %v664_v57 = vadd.f32 %v1123_v55, %v570_v56  ;;  %v802_v58 = vpop.f32.mrb[20].mxu0 }
 0x11e   :  { %v803_v59 = vpop.f32.mrb[21].mxu0 }
 0x11f   :  { %v937_v60 = vpop.eup %936  ;;  %942 = vtanh.f32 %v664_v57  ;;  %v804_v61 = vadd.f32 %v803_v59, %v802_v58  ;;  %v805_v62 = vpop.f32.mrb[22].mxu0 }
 0x120   :  { %693 = vst [vmem:[%s1198_s3 + $0x30] sm:$0xff] %v937_v60  ;;  %v806_v63 = vpop.f32.mrb[23].mxu0 }
 0x121   :  { %v939_v0 = vpop.eup %938  ;;  %v575_v1 = vadd.f32 %v862_v18, %v804_v61  ;;  %v807_v2 = vadd.f32 %v806_v63, %v805_v62 }
 0x122   :  { %694 = vst [vmem:[%s1198_s3 + $0x38] sm:$0xff] %v939_v0 }
 0x123   :  { %v665_v3 = vadd.f32 %v1123_v55, %v575_v1  ;;  %v578_v4 = vadd.f32 %v863_v24, %v807_v2 }
 0x125   :  { %944 = vtanh.f32 %v665_v3  ;;  %v666_v5 = vadd.f32 %v1123_v55, %v578_v4  ;;  %v808_v6 = vpop.f32.mrb[24].mxu0 }
 0x126   :  { %v809_v7 = vpop.f32.mrb[25].mxu0 }
 0x127   :  { %v941_v8 = vpop.eup %940  ;;  %946 = vtanh.f32 %v666_v5  ;;  %v810_v9 = vadd.f32 %v809_v7, %v808_v6  ;;  %v811_v10 = vpop.f32.mrb[26].mxu0 }
 0x128   :  { %695 = vst [vmem:[%s1198_s3 + $0x40] sm:$0xff] %v941_v8  ;;  %v812_v11 = vpop.f32.mrb[27].mxu0 }
 0x129   :  { %v943_v12 = vpop.eup %942  ;;  %v813_v13 = vadd.f32 %v812_v11, %v811_v10  ;;  %v583_v14 = vadd.f32 %v810_v9, %v582_v36 }
 0x12a   :  { %696 = vst [vmem:[%s1198_s3 + $0x48] sm:$0xff] %v943_v12 }
 0x12b   :  { %v667_v15 = vadd.f32 %v1123_v55, %v583_v14  ;;  %v586_v16 = vadd.f32 %v813_v13, %v585_v41 }
 0x12d   :  { %948 = vtanh.f32 %v667_v15  ;;  %v668_v17 = vadd.f32 %v1123_v55, %v586_v16  ;;  %v814_v18 = vpop.f32.mrb[28].mxu0 }
 0x12e   :  { %v815_v19 = vpop.f32.mrb[29].mxu0 }
 0x12f   :  { %v945_v20 = vpop.eup %944  ;;  %950 = vtanh.f32 %v668_v17  ;;  %v816_v21 = vadd.f32 %v815_v19, %v814_v18  ;;  %v817_v22 = vpop.f32.mrb[30].mxu0 }
 0x130   :  { %697 = vst [vmem:[%s1198_s3 + $0x50] sm:$0xff] %v945_v20  ;;  %v818_v23 = vpop.f32.mrb[31].mxu0 }
 0x131   :  { %v947_v24 = vpop.eup %946  ;;  %v591_v25 = vadd.f32 %v1137_v34, %v816_v21  ;;  %v819_v26 = vadd.f32 %v818_v23, %v817_v22 }
 0x132   :  { %698 = vst [vmem:[%s1198_s3 + $0x58] sm:$0xff] %v947_v24 }
 0x133   :  { %v669_v27 = vadd.f32 %v1123_v55, %v591_v25  ;;  %v594_v28 = vadd.f32 %v1142_v40, %v819_v26 }
 0x135   :  { %952 = vtanh.f32 %v669_v27  ;;  %v670_v29 = vadd.f32 %v1123_v55, %v594_v28 }
 0x137   :  { %v949_v30 = vpop.eup %948  ;;  %954 = vtanh.f32 %v670_v29 }
 0x138   :  { %699 = vst [vmem:[%s1198_s3 + $0x60] sm:$0xff] %v949_v30 }
 0x139   :  { %v951_v31 = vpop.eup %950 }
 0x13a   :  { %700 = vst [vmem:[%s1198_s3 + $0x68] sm:$0xff] %v951_v31 }
 0x13f   :  { %v953_v32 = vpop.eup %952 }
 0x140   :  { %701 = vst [vmem:[%s1198_s3 + $0x70] sm:$0xff] %v953_v32 }
 0x141   :  { %v955_v33 = vpop.eup %954 }
 0x142   :  { %702 = vst [vmem:[%s1198_s3 + $0x78] sm:$0xff] %v955_v33 }

</bundles_post_ra>
